<compile_context>
chip_gen: v6e
topology: v6e:2x2x1
jax: 0.10.0
libtpu: 0.0.40
codegen_flags: <defaults>
</compile_context>

<pallas_src>
import functools

import jax
import jax.numpy as jnp
from jax.experimental import pallas as pl
from jax.experimental.pallas import tpu as pltpu

_VMEM_LIMIT = 64 * 1024 * 1024  # fits v7x physical; raise toward ~96-128MiB on v5e/v6e


# ----------------------------- Pallas kernels -----------------------------

def _conv3x3_stats_kernel(*refs, H, W, Cin, Cout, fuse_affine_relu):
    """One image per grid step:
       [optional BN affine + ReLU on the resident input]
       -> 3x3 conv (pad=1) as a single K = 9*Cin bf16 MXU matmul (f32 acc)
       -> bf16 conv output + per-image f32 BN partial sum / sumsq."""
    if fuse_affine_relu:
        (x_ref, scale_ref, shift_ref, w_ref,
         y_ref, ps_ref, pss_ref, xpad_ref, col_ref) = refs
    else:
        x_ref, w_ref, y_ref, ps_ref, pss_ref, xpad_ref, col_ref = refs
        scale_ref = shift_ref = None

    x = x_ref[...].astype(jnp.float32)                        # (H*W, Cin)
    if fuse_affine_relu:
        # Previous stage's BatchNorm affine + ReLU applied on the resident tile.
        x = jnp.maximum(x * scale_ref[...] + shift_ref[...], 0.0)

    # Zero only the 1-pixel halo ring of the padded tile (not the full tile).
    dt = xpad_ref.dtype
    xpad_ref[0:1, :, :] = jnp.zeros((1, W + 2, Cin), dt)
    xpad_ref[H + 1:H + 2, :, :] = jnp.zeros((1, W + 2, Cin), dt)
    xpad_ref[1:H + 1, 0:1, :] = jnp.zeros((H, 1, Cin), dt)
    xpad_ref[1:H + 1, W + 1:W + 2, :] = jnp.zeros((H, 1, Cin), dt)
    xpad_ref[1:H + 1, 1:W + 1, :] = x.reshape(H, W, Cin).astype(dt)

    # Single copy pass: build the (H*W, 9*Cin) im2col tile in VMEM.
    for kh in range(3):
        for kw in range(3):
            tap = kh * 3 + kw
            col_ref[:, tap * Cin:(tap + 1) * Cin] = (
                xpad_ref[kh:kh + H, kw:kw + W, :].reshape(H * W, Cin))

    # One K-concatenated bf16 matmul on the MXU, f32 accumulation.
    acc = jnp.dot(col_ref[...], w_ref[...], preferred_element_type=jnp.float32)

    # BN partial statistics computed while the f32 accumulator is resident.
    ps_ref[...] = jnp.sum(acc, axis=0, keepdims=True)[None]
    pss_ref[...] = jnp.sum(acc * acc, axis=0, keepdims=True)[None]
    # Conv output (bias omitted - cancelled exactly by the following BatchNorm).
    y_ref[...] = acc.astype(y_ref.dtype)


def _affine_relu_kernel(y_ref, scale_ref, shift_ref, o_ref):
    y = y_ref[...].astype(jnp.float32)
    o_ref[...] = jnp.maximum(y * scale_ref[...] + shift_ref[...], 0.0)


# ----------------------------- wrappers -----------------------------------

def _conv3x3_bn_stats(x_rows, w_mat, *, N, H, W, Cin, Cout, scale=None, shift=None):
    """Fused conv3x3 (+ optional input affine+ReLU) + BN partial stats; grid over N."""
    fuse = scale is not None
    kern = functools.partial(_conv3x3_stats_kernel, H=H, W=W, Cin=Cin, Cout=Cout,
                             fuse_affine_relu=fuse)

    in_specs = [pl.BlockSpec((H * W, Cin), lambda n: (n, 0))]
    args = [x_rows]
    if fuse:
        in_specs += [pl.BlockSpec((1, Cin), lambda n: (0, 0)),
                     pl.BlockSpec((1, Cin), lambda n: (0, 0))]
        args += [scale, shift]
    in_specs.append(pl.BlockSpec((9 * Cin, Cout), lambda n: (0, 0)))
    args.append(w_mat)

    # TODO(synk): production UNet shapes (H*W >> 256, C >= 64) need a row-tile
    # grid axis (128-512 pixel rows with a 1-row halo via manual DMA), a Cout
    # tile in multiples of 128, and pl.Buffered(3) on the input once tiles
    # shrink, so resident buffers stay under v7x's 64 MiB VMEM.  At this toy
    # size one image per grid step is already a tiny tile.
    return pl.pallas_call(
        kern,
        out_shape=(
            jax.ShapeDtypeStruct((N * H * W, Cout), jnp.bfloat16),  # conv output
            jax.ShapeDtypeStruct((N, 1, Cout), jnp.float32),        # partial sum
            jax.ShapeDtypeStruct((N, 1, Cout), jnp.float32),        # partial sumsq
        ),
        grid=(N,),
        in_specs=in_specs,
        out_specs=(
            pl.BlockSpec((H * W, Cout), lambda n: (n, 0)),
            pl.BlockSpec((1, 1, Cout), lambda n: (n, 0, 0)),
            pl.BlockSpec((1, 1, Cout), lambda n: (n, 0, 0)),
        ),
        scratch_shapes=[
            pltpu.VMEM((H + 2, W + 2, Cin), jnp.bfloat16),   # zero-haloed NHWC tile
            pltpu.VMEM((H * W, 9 * Cin), jnp.bfloat16),      # im2col tile
        ],
        compiler_params=pltpu.CompilerParams(
            dimension_semantics=("parallel",),
            vmem_limit_bytes=_VMEM_LIMIT),
    )(*args)


def _largest_row_tile(R, C, itemsize=4, target_bytes=2 << 20):
    """Largest multiple-of-8 divisor of R whose (rows, C) f32 block fits the budget."""
    target = max(8, target_bytes // (itemsize * max(C, 1)))
    if R <= target:
        return R
    best = None
    d = 8
    while d <= target:
        if R % d == 0:
            best = d
        d += 8
    return best if best is not None else R


def _affine_relu(y_rows, scale, shift):
    R, C = y_rows.shape
    rows = _largest_row_tile(R, C)
    return pl.pallas_call(
        _affine_relu_kernel,
        out_shape=jax.ShapeDtypeStruct((R, C), jnp.float32),
        grid=(R // rows,),
        in_specs=[pl.BlockSpec((rows, C), lambda i: (i, 0)),
                  pl.BlockSpec((1, C), lambda i: (0, 0)),
                  pl.BlockSpec((1, C), lambda i: (0, 0))],
        out_specs=pl.BlockSpec((rows, C), lambda i: (i, 0)),
        compiler_params=pltpu.CompilerParams(
            dimension_semantics=("parallel",),
            vmem_limit_bytes=_VMEM_LIMIT),
    )(y_rows, scale, shift)


def _bn_affine_params(ps, pss, gamma, beta, count, eps=1e-5):
    """Reduce per-image partials -> per-channel BN scale/shift (tiny XLA glue)."""
    total = jnp.sum(ps[:, 0, :], axis=0)
    total_sq = jnp.sum(pss[:, 0, :], axis=0)
    mean = total / count
    # Biased variance, as PyTorch BatchNorm2d uses for train-mode normalization.
    # TODO(synk): E[x^2]-mean^2 can cancel for large/shifted activations; switch
    # to a shifted two-pass / Welford accumulation for non-toy magnitudes.
    var = total_sq / count - mean * mean
    inv_std = jax.lax.rsqrt(var + eps)
    scale = gamma * inv_std
    shift = beta - mean * scale
    return scale[None, :].astype(jnp.float32), shift[None, :].astype(jnp.float32)


@jax.jit
def unet_block_forward(x_nchw, params):
    """Pallas implementation of UNetBlock.forward (NCHW in / NCHW out)."""
    N, Cin, H, W = x_nchw.shape
    Cout = params["w1"].shape[0]
    count = N * H * W

    # NCHW -> pixel-rows (N*H*W, C).  TODO(synk): when chaining UNet blocks,
    # keep this NHWC/pixel-rows layout across blocks so the two boundary
    # transposes (one full HBM pass each) leave the hot path.
    x_rows = jnp.transpose(x_nchw, (0, 2, 3, 1)).reshape(N * H * W, Cin)
    x_rows = x_rows.astype(jnp.float32)

    # Conv weights as (9*Cin, Cout) bf16 matrices matching im2col K order (kh, kw, cin).
    w1 = jnp.transpose(params["w1"], (2, 3, 1, 0)).reshape(9 * Cin, Cout).astype(jnp.bfloat16)
    w2 = jnp.transpose(params["w2"], (2, 3, 1, 0)).reshape(9 * Cout, Cout).astype(jnp.bfloat16)

    # Stage 1: conv1 + BN1 partial stats (conv bias b1 absorbed by BN1).
    y1, ps1, pss1 = _conv3x3_bn_stats(x_rows, w1, N=N, H=H, W=W, Cin=Cin, Cout=Cout)
    scale1, shift1 = _bn_affine_params(ps1, pss1, params["g1"], params["be1"], count)

    # Stage 2: BN1 affine + ReLU fused into conv2 + BN2 partial stats
    # (bf16 y1 is read from HBM exactly once; conv bias b2 absorbed by BN2).
    y2, ps2, pss2 = _conv3x3_bn_stats(y1, w2, N=N, H=H, W=W, Cin=Cout, Cout=Cout,
                                      scale=scale1, shift=shift1)
    scale2, shift2 = _bn_affine_params(ps2, pss2, params["g2"], params["be2"], count)

    # Final BN2 affine + ReLU (f32 output).
    out_rows = _affine_relu(y2, scale2, shift2)

    return jnp.transpose(out_rows.reshape(N, H, W, Cout), (0, 3, 1, 2))


# ----------------------------- reference -----------------------------------

def _reference_forward(x, params, eps=1e-5):
    def conv(x, w, b):
        out = jax.lax.conv_general_dilated(
            x, w, window_strides=(1, 1), padding=((1, 1), (1, 1)),
            dimension_numbers=("NCHW", "OIHW", "NCHW"),
            precision=jax.lax.Precision.HIGHEST)
        return out + b[None, :, None, None]

    def bn_relu(x, g, b):
        mean = x.mean(axis=(0, 2, 3), keepdims=True)
        var = x.var(axis=(0, 2, 3), keepdims=True)   # biased variance
        xh = (x - mean) * jax.lax.rsqrt(var + eps)
        return jnp.maximum(xh * g[None, :, None, None] + b[None, :, None, None], 0.0)

    x = bn_relu(conv(x, params["w1"], params["b1"]), params["g1"], params["be1"])
    x = bn_relu(conv(x, params["w2"], params["b2"]), params["g2"], params["be2"])
    return x


# ----------------------------- main ----------------------------------------

if __name__ == "__main__":
    N, Cin, Cout, H, W = 2, 4, 8, 16, 16

    key = jax.random.PRNGKey(0)
    k_x, k_w1, k_b1, k_w2, k_b2 = jax.random.split(key, 5)

    x = jax.random.normal(k_x, (N, Cin, H, W), dtype=jnp.float32)

    params = {
        # Conv2d(in, out, 3, padding=1): weight (Cout, Cin, 3, 3), bias (Cout,)
        "w1": jax.random.normal(k_w1, (Cout, Cin, 3, 3), jnp.float32) * 0.1,
        "b1": jax.random.normal(k_b1, (Cout,), jnp.float32) * 0.1,
        "w2": jax.random.normal(k_w2, (Cout, Cout, 3, 3), jnp.float32) * 0.1,
        "b2": jax.random.normal(k_b2, (Cout,), jnp.float32) * 0.1,
        # BatchNorm2d defaults: weight = 1, bias = 0
        "g1": jnp.ones((Cout,), jnp.float32),
        "be1": jnp.zeros((Cout,), jnp.float32),
        "g2": jnp.ones((Cout,), jnp.float32),
        "be2": jnp.zeros((Cout,), jnp.float32),
    }

    out = jax.block_until_ready(unet_block_forward(x, params))
    ref = _reference_forward(x, params)

    assert out.shape == (N, Cout, H, W), out.shape
    # bf16 MXU matmuls + bf16 intermediate storage vs. a Precision.HIGHEST f32
    # reference; outputs are BN-normalized to O(1), so a few 1e-2 is expected.
    max_err = float(jnp.max(jnp.abs(out - ref)))
    assert jnp.allclose(out, ref, atol=5e-2, rtol=5e-2), max_err

    print("KERNEL_OK")
</pallas_src>

<mosaic_0001>
module attributes {stable_mosaic.version = 11 : i64} {
  func.func @_conv3x3_stats_kernel(%arg0: i32, %arg1: memref<256x4xf32, #tpu.memory_space<vmem>>, %arg2: memref<36x8xbf16, #tpu.memory_space<vmem>>, %arg3: memref<256x8xbf16, #tpu.memory_space<vmem>>, %arg4: memref<1x1x8xf32, #tpu.memory_space<vmem>>, %arg5: memref<1x1x8xf32, #tpu.memory_space<vmem>>, %arg6: memref<18x18x4xbf16, #tpu.memory_space<vmem>>, %arg7: memref<256x36xbf16, #tpu.memory_space<vmem>>) attributes {dimension_semantics = [#tpu.dimension_semantics<parallel>], iteration_bounds = array<i64: 2>, scalar_prefetch = 0 : i64, scratch_operands = 2 : i64, tpu.core_type = #tpu.core_type<tc>, window_params = [{transform_indices = @transform_0, window_bounds = array<i64: 256, 4>}, {pipeline_mode = #tpu.pipeline_mode<synchronous>, transform_indices = @transform_1, window_bounds = array<i64: 36, 8>}, {transform_indices = @transform_2, window_bounds = array<i64: 256, 8>}, {transform_indices = @transform_3, window_bounds = array<i64: 1, 1, 8>}, {transform_indices = @transform_4, window_bounds = array<i64: 1, 1, 8>}]} {
    %c0 = arith.constant 0 : index
    %c0_0 = arith.constant 0 : index
    %0 = vector.load %arg1[%c0, %c0_0] : memref<256x4xf32, #tpu.memory_space<vmem>>, vector<256x4xf32>
    %cst = arith.constant 0.000000e+00 : bf16
    %1 = vector.broadcast %cst : bf16 to vector<1x18x4xbf16>
    %c0_1 = arith.constant 0 : index
    %c0_2 = arith.constant 0 : index
    %c0_3 = arith.constant 0 : index
    %2 = vector.load %arg6[%c0_1, %c0_2, %c0_3] : memref<18x18x4xbf16, #tpu.memory_space<vmem>>, vector<1x18x4xbf16>
    tpu.vector_store %arg6[%c0_1, %c0_2, %c0_3], %1 {strides = array<i32>} : memref<18x18x4xbf16, #tpu.memory_space<vmem>>, vector<1x18x4xbf16>,
    %cst_4 = arith.constant 0.000000e+00 : bf16
    %3 = vector.broadcast %cst_4 : bf16 to vector<1x18x4xbf16>
    %c17 = arith.constant 17 : index
    %c0_5 = arith.constant 0 : index
    %c0_6 = arith.constant 0 : index
    %4 = vector.load %arg6[%c17, %c0_5, %c0_6] : memref<18x18x4xbf16, #tpu.memory_space<vmem>>, vector<1x18x4xbf16>
    tpu.vector_store %arg6[%c17, %c0_5, %c0_6], %3 {strides = array<i32>} : memref<18x18x4xbf16, #tpu.memory_space<vmem>>, vector<1x18x4xbf16>,
    %cst_7 = arith.constant 0.000000e+00 : bf16
    %5 = vector.broadcast %cst_7 : bf16 to vector<16x1x4xbf16>
    %c1 = arith.constant 1 : index
    %c0_8 = arith.constant 0 : index
    %c0_9 = arith.constant 0 : index
    %6 = vector.load %arg6[%c1, %c0_8, %c0_9] : memref<18x18x4xbf16, #tpu.memory_space<vmem>>, vector<16x1x4xbf16>
    tpu.vector_store %arg6[%c1, %c0_8, %c0_9], %5 {strides = array<i32>} : memref<18x18x4xbf16, #tpu.memory_space<vmem>>, vector<16x1x4xbf16>,
    %cst_10 = arith.constant 0.000000e+00 : bf16
    %7 = vector.broadcast %cst_10 : bf16 to vector<16x1x4xbf16>
    %c1_11 = arith.constant 1 : index
    %c17_12 = arith.constant 17 : index
    %c0_13 = arith.constant 0 : index
    %8 = vector.load %arg6[%c1_11, %c17_12, %c0_13] : memref<18x18x4xbf16, #tpu.memory_space<vmem>>, vector<16x1x4xbf16>
    tpu.vector_store %arg6[%c1_11, %c17_12, %c0_13], %7 {strides = array<i32>} : memref<18x18x4xbf16, #tpu.memory_space<vmem>>, vector<16x1x4xbf16>,
    %9 = vector.shape_cast %0 : vector<256x4xf32> to vector<16x16x4xf32>
    %10 = arith.truncf %9 : vector<16x16x4xf32> to vector<16x16x4xbf16>
    %c1_14 = arith.constant 1 : index
    %c1_15 = arith.constant 1 : index
    %c0_16 = arith.constant 0 : index
    %11 = vector.load %arg6[%c1_14, %c1_15, %c0_16] : memref<18x18x4xbf16, #tpu.memory_space<vmem>>, vector<16x16x4xbf16>
    tpu.vector_store %arg6[%c1_14, %c1_15, %c0_16], %10 {strides = array<i32>} : memref<18x18x4xbf16, #tpu.memory_space<vmem>>, vector<16x16x4xbf16>,
    %c0_17 = arith.constant 0 : index
    %c0_18 = arith.constant 0 : index
    %c0_19 = arith.constant 0 : index
    %12 = vector.load %arg6[%c0_17, %c0_18, %c0_19] : memref<18x18x4xbf16, #tpu.memory_space<vmem>>, vector<16x16x4xbf16>
    %13 = vector.shape_cast %12 : vector<16x16x4xbf16> to vector<256x4xbf16>
    %c0_20 = arith.constant 0 : index
    %c0_21 = arith.constant 0 : index
    %14 = vector.load %arg7[%c0_20, %c0_21] : memref<256x36xbf16, #tpu.memory_space<vmem>>, vector<256x4xbf16>
    tpu.vector_store %arg7[%c0_20, %c0_21], %13 {strides = array<i32>} : memref<256x36xbf16, #tpu.memory_space<vmem>>, vector<256x4xbf16>,
    %c0_22 = arith.constant 0 : index
    %c1_23 = arith.constant 1 : index
    %c0_24 = arith.constant 0 : index
    %15 = vector.load %arg6[%c0_22, %c1_23, %c0_24] : memref<18x18x4xbf16, #tpu.memory_space<vmem>>, vector<16x16x4xbf16>
    %16 = vector.shape_cast %15 : vector<16x16x4xbf16> to vector<256x4xbf16>
    %c0_25 = arith.constant 0 : index
    %c4 = arith.constant 4 : index
    %17 = vector.load %arg7[%c0_25, %c4] : memref<256x36xbf16, #tpu.memory_space<vmem>>, vector<256x4xbf16>
    tpu.vector_store %arg7[%c0_25, %c4], %16 {strides = array<i32>} : memref<256x36xbf16, #tpu.memory_space<vmem>>, vector<256x4xbf16>,
    %c0_26 = arith.constant 0 : index
    %c2 = arith.constant 2 : index
    %c0_27 = arith.constant 0 : index
    %18 = vector.load %arg6[%c0_26, %c2, %c0_27] : memref<18x18x4xbf16, #tpu.memory_space<vmem>>, vector<16x16x4xbf16>
    %19 = vector.shape_cast %18 : vector<16x16x4xbf16> to vector<256x4xbf16>
    %c0_28 = arith.constant 0 : index
    %c8 = arith.constant 8 : index
    %20 = vector.load %arg7[%c0_28, %c8] : memref<256x36xbf16, #tpu.memory_space<vmem>>, vector<256x4xbf16>
    tpu.vector_store %arg7[%c0_28, %c8], %19 {strides = array<i32>} : memref<256x36xbf16, #tpu.memory_space<vmem>>, vector<256x4xbf16>,
    %c1_29 = arith.constant 1 : index
    %c0_30 = arith.constant 0 : index
    %c0_31 = arith.constant 0 : index
    %21 = vector.load %arg6[%c1_29, %c0_30, %c0_31] : memref<18x18x4xbf16, #tpu.memory_space<vmem>>, vector<16x16x4xbf16>
    %22 = vector.shape_cast %21 : vector<16x16x4xbf16> to vector<256x4xbf16>
    %c0_32 = arith.constant 0 : index
    %c12 = arith.constant 12 : index
    %23 = vector.load %arg7[%c0_32, %c12] : memref<256x36xbf16, #tpu.memory_space<vmem>>, vector<256x4xbf16>
    tpu.vector_store %arg7[%c0_32, %c12], %22 {strides = array<i32>} : memref<256x36xbf16, #tpu.memory_space<vmem>>, vector<256x4xbf16>,
    %c1_33 = arith.constant 1 : index
    %c1_34 = arith.constant 1 : index
    %c0_35 = arith.constant 0 : index
    %24 = vector.load %arg6[%c1_33, %c1_34, %c0_35] : memref<18x18x4xbf16, #tpu.memory_space<vmem>>, vector<16x16x4xbf16>
    %25 = vector.shape_cast %24 : vector<16x16x4xbf16> to vector<256x4xbf16>
    %c0_36 = arith.constant 0 : index
    %c16 = arith.constant 16 : index
    %26 = vector.load %arg7[%c0_36, %c16] : memref<256x36xbf16, #tpu.memory_space<vmem>>, vector<256x4xbf16>
    tpu.vector_store %arg7[%c0_36, %c16], %25 {strides = array<i32>} : memref<256x36xbf16, #tpu.memory_space<vmem>>, vector<256x4xbf16>,
    %c1_37 = arith.constant 1 : index
    %c2_38 = arith.constant 2 : index
    %c0_39 = arith.constant 0 : index
    %27 = vector.load %arg6[%c1_37, %c2_38, %c0_39] : memref<18x18x4xbf16, #tpu.memory_space<vmem>>, vector<16x16x4xbf16>
    %28 = vector.shape_cast %27 : vector<16x16x4xbf16> to vector<256x4xbf16>
    %c0_40 = arith.constant 0 : index
    %c20 = arith.constant 20 : index
    %29 = vector.load %arg7[%c0_40, %c20] : memref<256x36xbf16, #tpu.memory_space<vmem>>, vector<256x4xbf16>
    tpu.vector_store %arg7[%c0_40, %c20], %28 {strides = array<i32>} : memref<256x36xbf16, #tpu.memory_space<vmem>>, vector<256x4xbf16>,
    %c2_41 = arith.constant 2 : index
    %c0_42 = arith.constant 0 : index
    %c0_43 = arith.constant 0 : index
    %30 = vector.load %arg6[%c2_41, %c0_42, %c0_43] : memref<18x18x4xbf16, #tpu.memory_space<vmem>>, vector<16x16x4xbf16>
    %31 = vector.shape_cast %30 : vector<16x16x4xbf16> to vector<256x4xbf16>
    %c0_44 = arith.constant 0 : index
    %c24 = arith.constant 24 : index
    %32 = vector.load %arg7[%c0_44, %c24] : memref<256x36xbf16, #tpu.memory_space<vmem>>, vector<256x4xbf16>
    tpu.vector_store %arg7[%c0_44, %c24], %31 {strides = array<i32>} : memref<256x36xbf16, #tpu.memory_space<vmem>>, vector<256x4xbf16>,
    %c2_45 = arith.constant 2 : index
    %c1_46 = arith.constant 1 : index
    %c0_47 = arith.constant 0 : index
    %33 = vector.load %arg6[%c2_45, %c1_46, %c0_47] : memref<18x18x4xbf16, #tpu.memory_space<vmem>>, vector<16x16x4xbf16>
    %34 = vector.shape_cast %33 : vector<16x16x4xbf16> to vector<256x4xbf16>
    %c0_48 = arith.constant 0 : index
    %c28 = arith.constant 28 : index
    %35 = vector.load %arg7[%c0_48, %c28] : memref<256x36xbf16, #tpu.memory_space<vmem>>, vector<256x4xbf16>
    tpu.vector_store %arg7[%c0_48, %c28], %34 {strides = array<i32>} : memref<256x36xbf16, #tpu.memory_space<vmem>>, vector<256x4xbf16>,
    %c2_49 = arith.constant 2 : index
    %c2_50 = arith.constant 2 : index
    %c0_51 = arith.constant 0 : index
    %36 = vector.load %arg6[%c2_49, %c2_50, %c0_51] : memref<18x18x4xbf16, #tpu.memory_space<vmem>>, vector<16x16x4xbf16>
    %37 = vector.shape_cast %36 : vector<16x16x4xbf16> to vector<256x4xbf16>
    %c0_52 = arith.constant 0 : index
    %c32 = arith.constant 32 : index
    %38 = vector.load %arg7[%c0_52, %c32] : memref<256x36xbf16, #tpu.memory_space<vmem>>, vector<256x4xbf16>
    tpu.vector_store %arg7[%c0_52, %c32], %37 {strides = array<i32>} : memref<256x36xbf16, #tpu.memory_space<vmem>>, vector<256x4xbf16>,
    %c0_53 = arith.constant 0 : index
    %c0_54 = arith.constant 0 : index
    %39 = vector.load %arg7[%c0_53, %c0_54] : memref<256x36xbf16, #tpu.memory_space<vmem>>, vector<256x36xbf16>
    %c0_55 = arith.constant 0 : index
    %c0_56 = arith.constant 0 : index
    %40 = vector.load %arg2[%c0_55, %c0_56] : memref<36x8xbf16, #tpu.memory_space<vmem>>, vector<36x8xbf16>
    %cst_57 = arith.constant dense<0.000000e+00> : vector<256x8xf32>
    %41 = tpu.matmul %39, %40, %cst_57 {dimension_numbers = #tpu.dot_dimension_numbers<[1], [0], [0], [1], [0, 0, 1, 1], [], []>} : vector<256x36xbf16>, vector<36x8xbf16>, vector<256x8xf32> -> vector<256x8xf32>
    %cst_58 = arith.constant dense<0.000000e+00> : vector<8xf32>
    %42 = vector.multi_reduction <add>, %41, %cst_58 [0] : vector<256x8xf32> to vector<8xf32>
    %43 = vector.shape_cast %42 : vector<8xf32> to vector<1x8xf32>
    %44 = vector.shape_cast %43 : vector<1x8xf32> to vector<1x1x8xf32>
    %c0_59 = arith.constant 0 : index
    %c0_60 = arith.constant 0 : index
    %c0_61 = arith.constant 0 : index
    %45 = vector.load %arg4[%c0_59, %c0_60, %c0_61] : memref<1x1x8xf32, #tpu.memory_space<vmem>>, vector<1x1x8xf32>
    tpu.vector_store %arg4[%c0_59, %c0_60, %c0_61], %44 {strides = array<i32>} : memref<1x1x8xf32, #tpu.memory_space<vmem>>, vector<1x1x8xf32>,
    %46 = arith.mulf %41, %41 : vector<256x8xf32>
    %cst_62 = arith.constant dense<0.000000e+00> : vector<8xf32>
    %47 = vector.multi_reduction <add>, %46, %cst_62 [0] : vector<256x8xf32> to vector<8xf32>
    %48 = vector.shape_cast %47 : vector<8xf32> to vector<1x8xf32>
    %49 = vector.shape_cast %48 : vector<1x8xf32> to vector<1x1x8xf32>
    %c0_63 = arith.constant 0 : index
    %c0_64 = arith.constant 0 : index
    %c0_65 = arith.constant 0 : index
    %50 = vector.load %arg5[%c0_63, %c0_64, %c0_65] : memref<1x1x8xf32, #tpu.memory_space<vmem>>, vector<1x1x8xf32>
    tpu.vector_store %arg5[%c0_63, %c0_64, %c0_65], %49 {strides = array<i32>} : memref<1x1x8xf32, #tpu.memory_space<vmem>>, vector<1x1x8xf32>,
    %51 = arith.truncf %41 : vector<256x8xf32> to vector<256x8xbf16>
    %c0_66 = arith.constant 0 : index
    %c0_67 = arith.constant 0 : index
    %52 = vector.load %arg3[%c0_66, %c0_67] : memref<256x8xbf16, #tpu.memory_space<vmem>>, vector<256x8xbf16>
    tpu.vector_store %arg3[%c0_66, %c0_67], %51 {strides = array<i32>} : memref<256x8xbf16, #tpu.memory_space<vmem>>, vector<256x8xbf16>,
    return
  }
  func.func @transform_0(%arg0: i32) -> (i32, i32) {
    %c0_i32 = arith.constant 0 : i32
    %c0_i32_0 = arith.constant 0 : i32
    return %arg0, %c0_i32 : i32, i32
  }
  func.func @transform_1(%arg0: i32) -> (i32, i32) {
    %c0_i32 = arith.constant 0 : i32
    %c0_i32_0 = arith.constant 0 : i32
    %c0_i32_1 = arith.constant 0 : i32
    return %c0_i32, %c0_i32_0 : i32, i32
  }
  func.func @transform_2(%arg0: i32) -> (i32, i32) {
    %c0_i32 = arith.constant 0 : i32
    %c0_i32_0 = arith.constant 0 : i32
    return %arg0, %c0_i32 : i32, i32
  }
  func.func @transform_3(%arg0: i32) -> (i32, i32, i32) {
    %c0_i32 = arith.constant 0 : i32
    %c0_i32_0 = arith.constant 0 : i32
    %c0_i32_1 = arith.constant 0 : i32
    return %arg0, %c0_i32, %c0_i32_0 : i32, i32, i32
  }
  func.func @transform_4(%arg0: i32) -> (i32, i32, i32) {
    %c0_i32 = arith.constant 0 : i32
    %c0_i32_0 = arith.constant 0 : i32
    %c0_i32_1 = arith.constant 0 : i32
    return %arg0, %c0_i32, %c0_i32_0 : i32, i32, i32
  }
}

module attributes {stable_mosaic.version = 11 : i64} {
  func.func @_conv3x3_stats_kernel(%arg0: i32, %arg1: memref<256x8xbf16, #tpu.memory_space<vmem>>, %arg2: memref<1x8xf32, #tpu.memory_space<vmem>>, %arg3: memref<1x8xf32, #tpu.memory_space<vmem>>, %arg4: memref<72x8xbf16, #tpu.memory_space<vmem>>, %arg5: memref<256x8xbf16, #tpu.memory_space<vmem>>, %arg6: memref<1x1x8xf32, #tpu.memory_space<vmem>>, %arg7: memref<1x1x8xf32, #tpu.memory_space<vmem>>, %arg8: memref<18x18x8xbf16, #tpu.memory_space<vmem>>, %arg9: memref<256x72xbf16, #tpu.memory_space<vmem>>) attributes {dimension_semantics = [#tpu.dimension_semantics<parallel>], iteration_bounds = array<i64: 2>, scalar_prefetch = 0 : i64, scratch_operands = 2 : i64, tpu.core_type = #tpu.core_type<tc>, window_params = [{transform_indices = @transform_0, window_bounds = array<i64: 256, 8>}, {pipeline_mode = #tpu.pipeline_mode<synchronous>, transform_indices = @transform_1, window_bounds = array<i64: 1, 8>}, {pipeline_mode = #tpu.pipeline_mode<synchronous>, transform_indices = @transform_2, window_bounds = array<i64: 1, 8>}, {pipeline_mode = #tpu.pipeline_mode<synchronous>, transform_indices = @transform_3, window_bounds = array<i64: 72, 8>}, {transform_indices = @transform_4, window_bounds = array<i64: 256, 8>}, {transform_indices = @transform_5, window_bounds = array<i64: 1, 1, 8>}, {transform_indices = @transform_6, window_bounds = array<i64: 1, 1, 8>}]} {
    %c0 = arith.constant 0 : index
    %c0_0 = arith.constant 0 : index
    %0 = vector.load %arg1[%c0, %c0_0] : memref<256x8xbf16, #tpu.memory_space<vmem>>, vector<256x8xbf16>
    %1 = arith.extf %0 : vector<256x8xbf16> to vector<256x8xf32>
    %c0_1 = arith.constant 0 : index
    %c0_2 = arith.constant 0 : index
    %2 = vector.load %arg2[%c0_1, %c0_2] : memref<1x8xf32, #tpu.memory_space<vmem>>, vector<1x8xf32>
    %3 = vector.broadcast %2 : vector<1x8xf32> to vector<256x8xf32>
    %4 = arith.mulf %1, %3 : vector<256x8xf32>
    %c0_3 = arith.constant 0 : index
    %c0_4 = arith.constant 0 : index
    %5 = vector.load %arg3[%c0_3, %c0_4] : memref<1x8xf32, #tpu.memory_space<vmem>>, vector<1x8xf32>
    %6 = vector.broadcast %5 : vector<1x8xf32> to vector<256x8xf32>
    %7 = arith.addf %4, %6 : vector<256x8xf32>
    %cst = arith.constant 0.000000e+00 : f32
    %8 = vector.broadcast %cst : f32 to vector<256x8xf32>
    %9 = arith.maximumf %7, %8 : vector<256x8xf32>
    %cst_5 = arith.constant 0.000000e+00 : bf16
    %10 = vector.broadcast %cst_5 : bf16 to vector<1x18x8xbf16>
    %c0_6 = arith.constant 0 : index
    %c0_7 = arith.constant 0 : index
    %c0_8 = arith.constant 0 : index
    %11 = vector.load %arg8[%c0_6, %c0_7, %c0_8] : memref<18x18x8xbf16, #tpu.memory_space<vmem>>, vector<1x18x8xbf16>
    tpu.vector_store %arg8[%c0_6, %c0_7, %c0_8], %10 {strides = array<i32>} : memref<18x18x8xbf16, #tpu.memory_space<vmem>>, vector<1x18x8xbf16>,
    %cst_9 = arith.constant 0.000000e+00 : bf16
    %12 = vector.broadcast %cst_9 : bf16 to vector<1x18x8xbf16>
    %c17 = arith.constant 17 : index
    %c0_10 = arith.constant 0 : index
    %c0_11 = arith.constant 0 : index
    %13 = vector.load %arg8[%c17, %c0_10, %c0_11] : memref<18x18x8xbf16, #tpu.memory_space<vmem>>, vector<1x18x8xbf16>
    tpu.vector_store %arg8[%c17, %c0_10, %c0_11], %12 {strides = array<i32>} : memref<18x18x8xbf16, #tpu.memory_space<vmem>>, vector<1x18x8xbf16>,
    %cst_12 = arith.constant 0.000000e+00 : bf16
    %14 = vector.broadcast %cst_12 : bf16 to vector<16x1x8xbf16>
    %c1 = arith.constant 1 : index
    %c0_13 = arith.constant 0 : index
    %c0_14 = arith.constant 0 : index
    %15 = vector.load %arg8[%c1, %c0_13, %c0_14] : memref<18x18x8xbf16, #tpu.memory_space<vmem>>, vector<16x1x8xbf16>
    tpu.vector_store %arg8[%c1, %c0_13, %c0_14], %14 {strides = array<i32>} : memref<18x18x8xbf16, #tpu.memory_space<vmem>>, vector<16x1x8xbf16>,
    %cst_15 = arith.constant 0.000000e+00 : bf16
    %16 = vector.broadcast %cst_15 : bf16 to vector<16x1x8xbf16>
    %c1_16 = arith.constant 1 : index
    %c17_17 = arith.constant 17 : index
    %c0_18 = arith.constant 0 : index
    %17 = vector.load %arg8[%c1_16, %c17_17, %c0_18] : memref<18x18x8xbf16, #tpu.memory_space<vmem>>, vector<16x1x8xbf16>
    tpu.vector_store %arg8[%c1_16, %c17_17, %c0_18], %16 {strides = array<i32>} : memref<18x18x8xbf16, #tpu.memory_space<vmem>>, vector<16x1x8xbf16>,
    %18 = vector.shape_cast %9 : vector<256x8xf32> to vector<16x16x8xf32>
    %19 = arith.truncf %18 : vector<16x16x8xf32> to vector<16x16x8xbf16>
    %c1_19 = arith.constant 1 : index
    %c1_20 = arith.constant 1 : index
    %c0_21 = arith.constant 0 : index
    %20 = vector.load %arg8[%c1_19, %c1_20, %c0_21] : memref<18x18x8xbf16, #tpu.memory_space<vmem>>, vector<16x16x8xbf16>
    tpu.vector_store %arg8[%c1_19, %c1_20, %c0_21], %19 {strides = array<i32>} : memref<18x18x8xbf16, #tpu.memory_space<vmem>>, vector<16x16x8xbf16>,
    %c0_22 = arith.constant 0 : index
    %c0_23 = arith.constant 0 : index
    %c0_24 = arith.constant 0 : index
    %21 = vector.load %arg8[%c0_22, %c0_23, %c0_24] : memref<18x18x8xbf16, #tpu.memory_space<vmem>>, vector<16x16x8xbf16>
    %22 = vector.shape_cast %21 : vector<16x16x8xbf16> to vector<256x8xbf16>
    %c0_25 = arith.constant 0 : index
    %c0_26 = arith.constant 0 : index
    %23 = vector.load %arg9[%c0_25, %c0_26] : memref<256x72xbf16, #tpu.memory_space<vmem>>, vector<256x8xbf16>
    tpu.vector_store %arg9[%c0_25, %c0_26], %22 {strides = array<i32>} : memref<256x72xbf16, #tpu.memory_space<vmem>>, vector<256x8xbf16>,
    %c0_27 = arith.constant 0 : index
    %c1_28 = arith.constant 1 : index
    %c0_29 = arith.constant 0 : index
    %24 = vector.load %arg8[%c0_27, %c1_28, %c0_29] : memref<18x18x8xbf16, #tpu.memory_space<vmem>>, vector<16x16x8xbf16>
    %25 = vector.shape_cast %24 : vector<16x16x8xbf16> to vector<256x8xbf16>
    %c0_30 = arith.constant 0 : index
    %c8 = arith.constant 8 : index
    %26 = vector.load %arg9[%c0_30, %c8] : memref<256x72xbf16, #tpu.memory_space<vmem>>, vector<256x8xbf16>
    tpu.vector_store %arg9[%c0_30, %c8], %25 {strides = array<i32>} : memref<256x72xbf16, #tpu.memory_space<vmem>>, vector<256x8xbf16>,
    %c0_31 = arith.constant 0 : index
    %c2 = arith.constant 2 : index
    %c0_32 = arith.constant 0 : index
    %27 = vector.load %arg8[%c0_31, %c2, %c0_32] : memref<18x18x8xbf16, #tpu.memory_space<vmem>>, vector<16x16x8xbf16>
    %28 = vector.shape_cast %27 : vector<16x16x8xbf16> to vector<256x8xbf16>
    %c0_33 = arith.constant 0 : index
    %c16 = arith.constant 16 : index
    %29 = vector.load %arg9[%c0_33, %c16] : memref<256x72xbf16, #tpu.memory_space<vmem>>, vector<256x8xbf16>
    tpu.vector_store %arg9[%c0_33, %c16], %28 {strides = array<i32>} : memref<256x72xbf16, #tpu.memory_space<vmem>>, vector<256x8xbf16>,
    %c1_34 = arith.constant 1 : index
    %c0_35 = arith.constant 0 : index
    %c0_36 = arith.constant 0 : index
    %30 = vector.load %arg8[%c1_34, %c0_35, %c0_36] : memref<18x18x8xbf16, #tpu.memory_space<vmem>>, vector<16x16x8xbf16>
    %31 = vector.shape_cast %30 : vector<16x16x8xbf16> to vector<256x8xbf16>
    %c0_37 = arith.constant 0 : index
    %c24 = arith.constant 24 : index
    %32 = vector.load %arg9[%c0_37, %c24] : memref<256x72xbf16, #tpu.memory_space<vmem>>, vector<256x8xbf16>
    tpu.vector_store %arg9[%c0_37, %c24], %31 {strides = array<i32>} : memref<256x72xbf16, #tpu.memory_space<vmem>>, vector<256x8xbf16>,
    %c1_38 = arith.constant 1 : index
    %c1_39 = arith.constant 1 : index
    %c0_40 = arith.constant 0 : index
    %33 = vector.load %arg8[%c1_38, %c1_39, %c0_40] : memref<18x18x8xbf16, #tpu.memory_space<vmem>>, vector<16x16x8xbf16>
    %34 = vector.shape_cast %33 : vector<16x16x8xbf16> to vector<256x8xbf16>
    %c0_41 = arith.constant 0 : index
    %c32 = arith.constant 32 : index
    %35 = vector.load %arg9[%c0_41, %c32] : memref<256x72xbf16, #tpu.memory_space<vmem>>, vector<256x8xbf16>
    tpu.vector_store %arg9[%c0_41, %c32], %34 {strides = array<i32>} : memref<256x72xbf16, #tpu.memory_space<vmem>>, vector<256x8xbf16>,
    %c1_42 = arith.constant 1 : index
    %c2_43 = arith.constant 2 : index
    %c0_44 = arith.constant 0 : index
    %36 = vector.load %arg8[%c1_42, %c2_43, %c0_44] : memref<18x18x8xbf16, #tpu.memory_space<vmem>>, vector<16x16x8xbf16>
    %37 = vector.shape_cast %36 : vector<16x16x8xbf16> to vector<256x8xbf16>
    %c0_45 = arith.constant 0 : index
    %c40 = arith.constant 40 : index
    %38 = vector.load %arg9[%c0_45, %c40] : memref<256x72xbf16, #tpu.memory_space<vmem>>, vector<256x8xbf16>
    tpu.vector_store %arg9[%c0_45, %c40], %37 {strides = array<i32>} : memref<256x72xbf16, #tpu.memory_space<vmem>>, vector<256x8xbf16>,
    %c2_46 = arith.constant 2 : index
    %c0_47 = arith.constant 0 : index
    %c0_48 = arith.constant 0 : index
    %39 = vector.load %arg8[%c2_46, %c0_47, %c0_48] : memref<18x18x8xbf16, #tpu.memory_space<vmem>>, vector<16x16x8xbf16>
    %40 = vector.shape_cast %39 : vector<16x16x8xbf16> to vector<256x8xbf16>
    %c0_49 = arith.constant 0 : index
    %c48 = arith.constant 48 : index
    %41 = vector.load %arg9[%c0_49, %c48] : memref<256x72xbf16, #tpu.memory_space<vmem>>, vector<256x8xbf16>
    tpu.vector_store %arg9[%c0_49, %c48], %40 {strides = array<i32>} : memref<256x72xbf16, #tpu.memory_space<vmem>>, vector<256x8xbf16>,
    %c2_50 = arith.constant 2 : index
    %c1_51 = arith.constant 1 : index
    %c0_52 = arith.constant 0 : index
    %42 = vector.load %arg8[%c2_50, %c1_51, %c0_52] : memref<18x18x8xbf16, #tpu.memory_space<vmem>>, vector<16x16x8xbf16>
    %43 = vector.shape_cast %42 : vector<16x16x8xbf16> to vector<256x8xbf16>
    %c0_53 = arith.constant 0 : index
    %c56 = arith.constant 56 : index
    %44 = vector.load %arg9[%c0_53, %c56] : memref<256x72xbf16, #tpu.memory_space<vmem>>, vector<256x8xbf16>
    tpu.vector_store %arg9[%c0_53, %c56], %43 {strides = array<i32>} : memref<256x72xbf16, #tpu.memory_space<vmem>>, vector<256x8xbf16>,
    %c2_54 = arith.constant 2 : index
    %c2_55 = arith.constant 2 : index
    %c0_56 = arith.constant 0 : index
    %45 = vector.load %arg8[%c2_54, %c2_55, %c0_56] : memref<18x18x8xbf16, #tpu.memory_space<vmem>>, vector<16x16x8xbf16>
    %46 = vector.shape_cast %45 : vector<16x16x8xbf16> to vector<256x8xbf16>
    %c0_57 = arith.constant 0 : index
    %c64 = arith.constant 64 : index
    %47 = vector.load %arg9[%c0_57, %c64] : memref<256x72xbf16, #tpu.memory_space<vmem>>, vector<256x8xbf16>
    tpu.vector_store %arg9[%c0_57, %c64], %46 {strides = array<i32>} : memref<256x72xbf16, #tpu.memory_space<vmem>>, vector<256x8xbf16>,
    %c0_58 = arith.constant 0 : index
    %c0_59 = arith.constant 0 : index
    %48 = vector.load %arg9[%c0_58, %c0_59] : memref<256x72xbf16, #tpu.memory_space<vmem>>, vector<256x72xbf16>
    %c0_60 = arith.constant 0 : index
    %c0_61 = arith.constant 0 : index
    %49 = vector.load %arg4[%c0_60, %c0_61] : memref<72x8xbf16, #tpu.memory_space<vmem>>, vector<72x8xbf16>
    %cst_62 = arith.constant dense<0.000000e+00> : vector<256x8xf32>
    %50 = tpu.matmul %48, %49, %cst_62 {dimension_numbers = #tpu.dot_dimension_numbers<[1], [0], [0], [1], [0, 0, 1, 1], [], []>} : vector<256x72xbf16>, vector<72x8xbf16>, vector<256x8xf32> -> vector<256x8xf32>
    %cst_63 = arith.constant dense<0.000000e+00> : vector<8xf32>
    %51 = vector.multi_reduction <add>, %50, %cst_63 [0] : vector<256x8xf32> to vector<8xf32>
    %52 = vector.shape_cast %51 : vector<8xf32> to vector<1x8xf32>
    %53 = vector.shape_cast %52 : vector<1x8xf32> to vector<1x1x8xf32>
    %c0_64 = arith.constant 0 : index
    %c0_65 = arith.constant 0 : index
    %c0_66 = arith.constant 0 : index
    %54 = vector.load %arg6[%c0_64, %c0_65, %c0_66] : memref<1x1x8xf32, #tpu.memory_space<vmem>>, vector<1x1x8xf32>
    tpu.vector_store %arg6[%c0_64, %c0_65, %c0_66], %53 {strides = array<i32>} : memref<1x1x8xf32, #tpu.memory_space<vmem>>, vector<1x1x8xf32>,
    %55 = arith.mulf %50, %50 : vector<256x8xf32>
    %cst_67 = arith.constant dense<0.000000e+00> : vector<8xf32>
    %56 = vector.multi_reduction <add>, %55, %cst_67 [0] : vector<256x8xf32> to vector<8xf32>
    %57 = vector.shape_cast %56 : vector<8xf32> to vector<1x8xf32>
    %58 = vector.shape_cast %57 : vector<1x8xf32> to vector<1x1x8xf32>
    %c0_68 = arith.constant 0 : index
    %c0_69 = arith.constant 0 : index
    %c0_70 = arith.constant 0 : index
    %59 = vector.load %arg7[%c0_68, %c0_69, %c0_70] : memref<1x1x8xf32, #tpu.memory_space<vmem>>, vector<1x1x8xf32>
    tpu.vector_store %arg7[%c0_68, %c0_69, %c0_70], %58 {strides = array<i32>} : memref<1x1x8xf32, #tpu.memory_space<vmem>>, vector<1x1x8xf32>,
    %60 = arith.truncf %50 : vector<256x8xf32> to vector<256x8xbf16>
    %c0_71 = arith.constant 0 : index
    %c0_72 = arith.constant 0 : index
    %61 = vector.load %arg5[%c0_71, %c0_72] : memref<256x8xbf16, #tpu.memory_space<vmem>>, vector<256x8xbf16>
    tpu.vector_store %arg5[%c0_71, %c0_72], %60 {strides = array<i32>} : memref<256x8xbf16, #tpu.memory_space<vmem>>, vector<256x8xbf16>,
    return
  }
  func.func @transform_0(%arg0: i32) -> (i32, i32) {
    %c0_i32 = arith.constant 0 : i32
    %c0_i32_0 = arith.constant 0 : i32
    return %arg0, %c0_i32 : i32, i32
  }
  func.func @transform_1(%arg0: i32) -> (i32, i32) {
    %c0_i32 = arith.constant 0 : i32
    %c0_i32_0 = arith.constant 0 : i32
    %c0_i32_1 = arith.constant 0 : i32
    return %c0_i32, %c0_i32_0 : i32, i32
  }
  func.func @transform_2(%arg0: i32) -> (i32, i32) {
    %c0_i32 = arith.constant 0 : i32
    %c0_i32_0 = arith.constant 0 : i32
    %c0_i32_1 = arith.constant 0 : i32
    return %c0_i32, %c0_i32_0 : i32, i32
  }
  func.func @transform_3(%arg0: i32) -> (i32, i32) {
    %c0_i32 = arith.constant 0 : i32
    %c0_i32_0 = arith.constant 0 : i32
    %c0_i32_1 = arith.constant 0 : i32
    return %c0_i32, %c0_i32_0 : i32, i32
  }
  func.func @transform_4(%arg0: i32) -> (i32, i32) {
    %c0_i32 = arith.constant 0 : i32
    %c0_i32_0 = arith.constant 0 : i32
    return %arg0, %c0_i32 : i32, i32
  }
  func.func @transform_5(%arg0: i32) -> (i32, i32, i32) {
    %c0_i32 = arith.constant 0 : i32
    %c0_i32_0 = arith.constant 0 : i32
    %c0_i32_1 = arith.constant 0 : i32
    return %arg0, %c0_i32, %c0_i32_0 : i32, i32, i32
  }
  func.func @transform_6(%arg0: i32) -> (i32, i32, i32) {
    %c0_i32 = arith.constant 0 : i32
    %c0_i32_0 = arith.constant 0 : i32
    %c0_i32_1 = arith.constant 0 : i32
    return %arg0, %c0_i32, %c0_i32_0 : i32, i32, i32
  }
}

module attributes {stable_mosaic.version = 11 : i64} {
  func.func @_affine_relu_kernel(%arg0: i32, %arg1: memref<512x8xbf16, #tpu.memory_space<vmem>>, %arg2: memref<1x8xf32, #tpu.memory_space<vmem>>, %arg3: memref<1x8xf32, #tpu.memory_space<vmem>>, %arg4: memref<512x8xf32, #tpu.memory_space<vmem>>) attributes {dimension_semantics = [#tpu.dimension_semantics<parallel>], iteration_bounds = array<i64: 1>, scalar_prefetch = 0 : i64, scratch_operands = 0 : i64, tpu.core_type = #tpu.core_type<tc>, window_params = [{transform_indices = @transform_0, window_bounds = array<i64: 512, 8>}, {pipeline_mode = #tpu.pipeline_mode<synchronous>, transform_indices = @transform_1, window_bounds = array<i64: 1, 8>}, {pipeline_mode = #tpu.pipeline_mode<synchronous>, transform_indices = @transform_2, window_bounds = array<i64: 1, 8>}, {transform_indices = @transform_3, window_bounds = array<i64: 512, 8>}]} {
    %c0 = arith.constant 0 : index
    %c0_0 = arith.constant 0 : index
    %0 = vector.load %arg1[%c0, %c0_0] : memref<512x8xbf16, #tpu.memory_space<vmem>>, vector<512x8xbf16>
    %1 = arith.extf %0 : vector<512x8xbf16> to vector<512x8xf32>
    %c0_1 = arith.constant 0 : index
    %c0_2 = arith.constant 0 : index
    %2 = vector.load %arg2[%c0_1, %c0_2] : memref<1x8xf32, #tpu.memory_space<vmem>>, vector<1x8xf32>
    %3 = vector.broadcast %2 : vector<1x8xf32> to vector<512x8xf32>
    %4 = arith.mulf %1, %3 : vector<512x8xf32>
    %c0_3 = arith.constant 0 : index
    %c0_4 = arith.constant 0 : index
    %5 = vector.load %arg3[%c0_3, %c0_4] : memref<1x8xf32, #tpu.memory_space<vmem>>, vector<1x8xf32>
    %6 = vector.broadcast %5 : vector<1x8xf32> to vector<512x8xf32>
    %7 = arith.addf %4, %6 : vector<512x8xf32>
    %cst = arith.constant 0.000000e+00 : f32
    %8 = vector.broadcast %cst : f32 to vector<512x8xf32>
    %9 = arith.maximumf %7, %8 : vector<512x8xf32>
    %c0_5 = arith.constant 0 : index
    %c0_6 = arith.constant 0 : index
    %10 = vector.load %arg4[%c0_5, %c0_6] : memref<512x8xf32, #tpu.memory_space<vmem>>, vector<512x8xf32>
    tpu.vector_store %arg4[%c0_5, %c0_6], %9 {strides = array<i32>} : memref<512x8xf32, #tpu.memory_space<vmem>>, vector<512x8xf32>,
    return
  }
  func.func @transform_0(%arg0: i32) -> (i32, i32) {
    %c0_i32 = arith.constant 0 : i32
    %c0_i32_0 = arith.constant 0 : i32
    return %arg0, %c0_i32 : i32, i32
  }
  func.func @transform_1(%arg0: i32) -> (i32, i32) {
    %c0_i32 = arith.constant 0 : i32
    %c0_i32_0 = arith.constant 0 : i32
    %c0_i32_1 = arith.constant 0 : i32
    return %c0_i32, %c0_i32_0 : i32, i32
  }
  func.func @transform_2(%arg0: i32) -> (i32, i32) {
    %c0_i32 = arith.constant 0 : i32
    %c0_i32_0 = arith.constant 0 : i32
    %c0_i32_1 = arith.constant 0 : i32
    return %c0_i32, %c0_i32_0 : i32, i32
  }
  func.func @transform_3(%arg0: i32) -> (i32, i32) {
    %c0_i32 = arith.constant 0 : i32
    %c0_i32_0 = arith.constant 0 : i32
    return %arg0, %c0_i32 : i32, i32
  }
}

</mosaic_0001>

<bundles_post_ra>
// kernel: unet_block_forward.5
= control target key start
LH: loop header
LB: loop body
LE: loop exit
PB: predicated region body
PF: predicated region fallthrough
CT: control target
= control target key end

     0   :  { %vm348_vm0 = vcmask 64512   ;;  %s1088_s0 = inlined_call_operand.vmem [shape: bf16[512,8], index: 0, kind: input, shape index: {}]   ;;  %s1089_s1 = inlined_call_operand.vmem [shape: f32[1,8], index: 1, kind: input, shape index: {}]   ;;  %s1090_s2 = inlined_call_operand.vmem [shape: f32[1,8], index: 2, kind: input, shape index: {}]   ;;  %s1091_s3 = inlined_call_operand.vmem [shape: f32[512,8], index: 3, kind: output, shape index: {}]  }
   0x1   :  { %v420_v0 = vld [vmem:[%s1088_s0] sm:$0xff]   ;;  %v547_v4 = vld [vmem:[%s1088_s0 + $0x8] sm:$0xff]   ;;  %v548_v5 = vld [vmem:[%s1088_s0 + $0x10] sm:$0xff]  }
   0x2   :  { %v604_v1 = vld [vmem:[%s1089_s1] ss:$0 sm:$0xff]  ;;  %v421_v2 = vunpack.c.l.bf16 %v420_v0  ;;  %v422_v3 = vunpack.c.h.bf16 %v420_v0  ;;  %v549_v6 = vld [vmem:[%s1088_s0 + $0x18] sm:$0xff]   ;;  %v425_v8 = vunpack.c.l.bf16 %v547_v4  ;;  %v426_v9 = vunpack.c.h.bf16 %v547_v4  ;;  %v551_v33 = vld [vmem:[%s1088_s0 + $0x28] sm:$0xff]  }
   0x3   :  { %v618_v7 = vld [vmem:[%s1090_s2] ss:$0 sm:$0xff]  ;;  %v429_v10 = vunpack.c.l.bf16 %v548_v5  ;;  %v430_v11 = vunpack.c.h.bf16 %v548_v5  ;;  %v433_v14 = vunpack.c.l.bf16 %v549_v6  ;;  %v434_v15 = vunpack.c.h.bf16 %v549_v6  ;;  %v552_v34 = vld [vmem:[%s1088_s0 + $0x30] sm:$0xff]   ;;  %v553_v39 = vld [vmem:[%s1088_s0 + $0x38] sm:$0xff]  }
   0x4   :  { %v149_v12 = vmul.f32 %v421_v2, %v604_v1  ;;  %v150_v13 = vmul.f32 %v422_v3, %v604_v1  ;;  %v151_v16 = vmul.f32 %v425_v8, %v604_v1  ;;  %v152_v17 = vmul.f32 %v426_v9, %v604_v1  ;;  %v550_v28 = vld [vmem:[%s1088_s0 + $0x20] sm:$0xff]   ;;  %v555_v6 = vld [vmem:[%s1088_s0 + $0x48] sm:$0xff]   ;;  %v556_v8 = vld [vmem:[%s1088_s0 + $0x50] sm:$0xff]  }
   0x5   :  { %v153_v18 = vmul.f32 %v429_v10, %v604_v1  ;;  %v154_v19 = vmul.f32 %v430_v11, %v604_v1  ;;  %v155_v22 = vmul.f32 %v433_v14, %v604_v1  ;;  %v156_v23 = vmul.f32 %v434_v15, %v604_v1  ;;  %v554_v0 = vld [vmem:[%s1088_s0 + $0x40] sm:$0xff]  }
   0x6   :  { %v220_v20 = vadd.f32 %v618_v7, %v149_v12  ;;  %v221_v21 = vadd.f32 %v618_v7, %v150_v13  ;;  %v222_v24 = vadd.f32 %v618_v7, %v151_v16  ;;  %v223_v25 = vadd.f32 %v618_v7, %v152_v17  ;;  %v557_v13 = vld [vmem:[%s1088_s0 + $0x58] sm:$0xff]  }
   0x7   :  { %v224_v26 = vadd.f32 %v618_v7, %v153_v18  ;;  %v225_v27 = vadd.f32 %v618_v7, %v154_v19  ;;  %v226_v31 = vadd.f32 %v618_v7, %v155_v22  ;;  %v227_v32 = vadd.f32 %v618_v7, %v156_v23 }
   0x8   :  { %v284_v29 = vmax.f32 %v220_v20, 0.0  ;;  %v285_v30 = vmax.f32 %v221_v21, 0.0  ;;  %v286_v35 = vmax.f32 %v222_v24, 0.0  ;;  %v287_v36 = vmax.f32 %v223_v25, 0.0 }
   0x9   :  { %v288_v37 = vmax.f32 %v224_v26, 0.0  ;;  %v289_v38 = vmax.f32 %v225_v27, 0.0  ;;  %v290_v40 = vmax.f32 %v226_v31, 0.0  ;;  %v291_v41 = vmax.f32 %v227_v32, 0.0 }
   0xa   :  { %349 = vst.msk [vmem:[%s1091_s3] sm:$0xff] %vm348_vm0, %v284_v29  ;;  %350 = vst.msk [vmem:[%s1091_s3 + $0x8] sm:$0xff] %vm348_vm0, %v285_v30  ;;  %v437_v42 = vunpack.c.l.bf16 %v550_v28  ;;  %v438_v43 = vunpack.c.h.bf16 %v550_v28  ;;  %v441_v44 = vunpack.c.l.bf16 %v551_v33  ;;  %v442_v45 = vunpack.c.h.bf16 %v551_v33 }
   0xb   :  { %351 = vst.msk [vmem:[%s1091_s3 + $0x10] sm:$0xff] %vm348_vm0, %v286_v35  ;;  %352 = vst.msk [vmem:[%s1091_s3 + $0x18] sm:$0xff] %vm348_vm0, %v287_v36  ;;  %v445_v46 = vunpack.c.l.bf16 %v552_v34  ;;  %v446_v47 = vunpack.c.h.bf16 %v552_v34  ;;  %v449_v50 = vunpack.c.l.bf16 %v553_v39  ;;  %v450_v51 = vunpack.c.h.bf16 %v553_v39 }
   0xc   :  { %353 = vst.msk [vmem:[%s1091_s3 + $0x20] sm:$0xff] %vm348_vm0, %v288_v37  ;;  %354 = vst.msk [vmem:[%s1091_s3 + $0x28] sm:$0xff] %vm348_vm0, %v289_v38  ;;  %v157_v48 = vmul.f32 %v437_v42, %v604_v1  ;;  %v158_v49 = vmul.f32 %v438_v43, %v604_v1  ;;  %v159_v52 = vmul.f32 %v441_v44, %v604_v1  ;;  %v453_v16 = vunpack.c.l.bf16 %v554_v0  ;;  %v558_v38 = vld [vmem:[%s1088_s0 + $0x60] sm:$0xff]   ;;  %v559_v43 = vld [vmem:[%s1088_s0 + $0x68] sm:$0xff]  }
   0xd   :  { %355 = vst.msk [vmem:[%s1091_s3 + $0x30] sm:$0xff] %vm348_vm0, %v290_v40  ;;  %356 = vst.msk [vmem:[%s1091_s3 + $0x38] sm:$0xff] %vm348_vm0, %v291_v41  ;;  %v160_v53 = vmul.f32 %v442_v45, %v604_v1  ;;  %v161_v54 = vmul.f32 %v445_v46, %v604_v1  ;;  %v162_v55 = vmul.f32 %v446_v47, %v604_v1  ;;  %v454_v17 = vunpack.c.h.bf16 %v554_v0  ;;  %v560_v44 = vld [vmem:[%s1088_s0 + $0x70] sm:$0xff]  }
   0xe   :  { %v228_v56 = vadd.f32 %v618_v7, %v157_v48  ;;  %v229_v57 = vadd.f32 %v618_v7, %v158_v49  ;;  %v163_v58 = vmul.f32 %v449_v50, %v604_v1  ;;  %v164_v59 = vmul.f32 %v450_v51, %v604_v1  ;;  %v561_v49 = vld [vmem:[%s1088_s0 + $0x78] sm:$0xff]  }
   0xf   :  { %v230_v60 = vadd.f32 %v618_v7, %v159_v52  ;;  %v231_v61 = vadd.f32 %v618_v7, %v160_v53  ;;  %v232_v62 = vadd.f32 %v618_v7, %v161_v54  ;;  %v233_v63 = vadd.f32 %v618_v7, %v162_v55 }
  0x10   :  { %v292_v2 = vmax.f32 %v228_v56, 0.0  ;;  %v293_v3 = vmax.f32 %v229_v57, 0.0  ;;  %v234_v4 = vadd.f32 %v618_v7, %v163_v58  ;;  %v235_v5 = vadd.f32 %v618_v7, %v164_v59 }
  0x11   :  { %v294_v9 = vmax.f32 %v230_v60, 0.0  ;;  %v295_v10 = vmax.f32 %v231_v61, 0.0  ;;  %v296_v11 = vmax.f32 %v232_v62, 0.0  ;;  %v297_v12 = vmax.f32 %v233_v63, 0.0 }
  0x12   :  { %357 = vst.msk [vmem:[%s1091_s3 + $0x40] sm:$0xff] %vm348_vm0, %v292_v2  ;;  %358 = vst.msk [vmem:[%s1091_s3 + $0x48] sm:$0xff] %vm348_vm0, %v293_v3  ;;  %v298_v14 = vmax.f32 %v234_v4, 0.0  ;;  %v299_v15 = vmax.f32 %v235_v5, 0.0  ;;  %v457_v18 = vunpack.c.l.bf16 %v555_v6  ;;  %v458_v19 = vunpack.c.h.bf16 %v555_v6 }
  0x13   :  { %359 = vst.msk [vmem:[%s1091_s3 + $0x50] sm:$0xff] %vm348_vm0, %v294_v9  ;;  %360 = vst.msk [vmem:[%s1091_s3 + $0x58] sm:$0xff] %vm348_vm0, %v295_v10  ;;  %v461_v20 = vunpack.c.l.bf16 %v556_v8  ;;  %v462_v21 = vunpack.c.h.bf16 %v556_v8  ;;  %v165_v22 = vmul.f32 %v453_v16, %v604_v1  ;;  %v166_v23 = vmul.f32 %v454_v17, %v604_v1  ;;  %v563_v17 = vld [vmem:[%s1088_s0 + $0x88] sm:$0xff]  }
  0x14   :  { %361 = vst.msk [vmem:[%s1091_s3 + $0x60] sm:$0xff] %vm348_vm0, %v296_v11  ;;  %362 = vst.msk [vmem:[%s1091_s3 + $0x68] sm:$0xff] %vm348_vm0, %v297_v12  ;;  %v465_v24 = vunpack.c.l.bf16 %v557_v13  ;;  %v466_v25 = vunpack.c.h.bf16 %v557_v13  ;;  %v167_v26 = vmul.f32 %v457_v18, %v604_v1  ;;  %v168_v27 = vmul.f32 %v458_v19, %v604_v1  ;;  %v562_v12 = vld [vmem:[%s1088_s0 + $0x80] sm:$0xff]   ;;  %v564_v18 = vld [vmem:[%s1088_s0 + $0x90] sm:$0xff]  }
  0x15   :  { %363 = vst.msk [vmem:[%s1091_s3 + $0x70] sm:$0xff] %vm348_vm0, %v298_v14  ;;  %364 = vst.msk [vmem:[%s1091_s3 + $0x78] sm:$0xff] %vm348_vm0, %v299_v15  ;;  %v169_v28 = vmul.f32 %v461_v20, %v604_v1  ;;  %v170_v29 = vmul.f32 %v462_v21, %v604_v1  ;;  %v236_v30 = vadd.f32 %v618_v7, %v165_v22  ;;  %v469_v52 = vunpack.c.l.bf16 %v558_v38 }
  0x16   :  { %v237_v31 = vadd.f32 %v618_v7, %v166_v23  ;;  %v171_v32 = vmul.f32 %v465_v24, %v604_v1  ;;  %v172_v33 = vmul.f32 %v466_v25, %v604_v1  ;;  %v238_v34 = vadd.f32 %v618_v7, %v167_v26  ;;  %v565_v23 = vld [vmem:[%s1088_s0 + $0x98] sm:$0xff]  }
  0x17   :  { %v239_v35 = vadd.f32 %v618_v7, %v168_v27  ;;  %v240_v36 = vadd.f32 %v618_v7, %v169_v28  ;;  %v241_v37 = vadd.f32 %v618_v7, %v170_v29  ;;  %v300_v39 = vmax.f32 %v236_v30, 0.0 }
  0x18   :  { %v301_v40 = vmax.f32 %v237_v31, 0.0  ;;  %v242_v41 = vadd.f32 %v618_v7, %v171_v32  ;;  %v243_v42 = vadd.f32 %v618_v7, %v172_v33  ;;  %v302_v45 = vmax.f32 %v238_v34, 0.0 }
  0x19   :  { %v303_v46 = vmax.f32 %v239_v35, 0.0  ;;  %v304_v47 = vmax.f32 %v240_v36, 0.0  ;;  %v305_v48 = vmax.f32 %v241_v37, 0.0  ;;  %365 = vst.msk [vmem:[%s1091_s3 + $0x80] sm:$0xff] %vm348_vm0, %v300_v39  ;;  %v470_v53 = vunpack.c.h.bf16 %v558_v38 }
  0x1a   :  { %366 = vst.msk [vmem:[%s1091_s3 + $0x88] sm:$0xff] %vm348_vm0, %v301_v40  ;;  %v306_v50 = vmax.f32 %v242_v41, 0.0  ;;  %v307_v51 = vmax.f32 %v243_v42, 0.0  ;;  %367 = vst.msk [vmem:[%s1091_s3 + $0x90] sm:$0xff] %vm348_vm0, %v302_v45  ;;  %v473_v54 = vunpack.c.l.bf16 %v559_v43  ;;  %v474_v55 = vunpack.c.h.bf16 %v559_v43 }
  0x1b   :  { %368 = vst.msk [vmem:[%s1091_s3 + $0x98] sm:$0xff] %vm348_vm0, %v303_v46  ;;  %369 = vst.msk [vmem:[%s1091_s3 + $0xa0] sm:$0xff] %vm348_vm0, %v304_v47  ;;  %v477_v56 = vunpack.c.l.bf16 %v560_v44  ;;  %v478_v57 = vunpack.c.h.bf16 %v560_v44  ;;  %v173_v58 = vmul.f32 %v469_v52, %v604_v1  ;;  %v174_v59 = vmul.f32 %v470_v53, %v604_v1  ;;  %v567_v53 = vld [vmem:[%s1088_s0 + $0xa8] sm:$0xff]  }
  0x1c   :  { %370 = vst.msk [vmem:[%s1091_s3 + $0xa8] sm:$0xff] %vm348_vm0, %v305_v48  ;;  %371 = vst.msk [vmem:[%s1091_s3 + $0xb0] sm:$0xff] %vm348_vm0, %v306_v50  ;;  %v481_v60 = vunpack.c.l.bf16 %v561_v49  ;;  %v482_v61 = vunpack.c.h.bf16 %v561_v49  ;;  %v175_v62 = vmul.f32 %v473_v54, %v604_v1  ;;  %v176_v63 = vmul.f32 %v474_v55, %v604_v1  ;;  %v566_v48 = vld [vmem:[%s1088_s0 + $0xa0] sm:$0xff]   ;;  %v568_v54 = vld [vmem:[%s1088_s0 + $0xb0] sm:$0xff]  }
  0x1d   :  { %372 = vst.msk [vmem:[%s1091_s3 + $0xb8] sm:$0xff] %vm348_vm0, %v307_v51  ;;  %v177_v0 = vmul.f32 %v477_v56, %v604_v1  ;;  %v178_v2 = vmul.f32 %v478_v57, %v604_v1  ;;  %v244_v3 = vadd.f32 %v618_v7, %v173_v58  ;;  %v245_v4 = vadd.f32 %v618_v7, %v174_v59  ;;  %v569_v59 = vld [vmem:[%s1088_s0 + $0xb8] sm:$0xff]  }
  0x1e   :  { %v179_v5 = vmul.f32 %v481_v60, %v604_v1  ;;  %v180_v6 = vmul.f32 %v482_v61, %v604_v1  ;;  %v246_v8 = vadd.f32 %v618_v7, %v175_v62  ;;  %v247_v9 = vadd.f32 %v618_v7, %v176_v63 }
  0x1f   :  { %v248_v10 = vadd.f32 %v618_v7, %v177_v0  ;;  %v249_v11 = vadd.f32 %v618_v7, %v178_v2  ;;  %v308_v13 = vmax.f32 %v244_v3, 0.0  ;;  %v309_v14 = vmax.f32 %v245_v4, 0.0 }
  0x20   :  { %v250_v15 = vadd.f32 %v618_v7, %v179_v5  ;;  %v251_v16 = vadd.f32 %v618_v7, %v180_v6  ;;  %v310_v19 = vmax.f32 %v246_v8, 0.0  ;;  %v311_v20 = vmax.f32 %v247_v9, 0.0 }
  0x21   :  { %v312_v21 = vmax.f32 %v248_v10, 0.0  ;;  %v313_v22 = vmax.f32 %v249_v11, 0.0  ;;  %373 = vst.msk [vmem:[%s1091_s3 + $0xc0] sm:$0xff] %vm348_vm0, %v308_v13  ;;  %374 = vst.msk [vmem:[%s1091_s3 + $0xc8] sm:$0xff] %vm348_vm0, %v309_v14  ;;  %v485_v26 = vunpack.c.l.bf16 %v562_v12  ;;  %v486_v27 = vunpack.c.h.bf16 %v562_v12 }
  0x22   :  { %v314_v24 = vmax.f32 %v250_v15, 0.0  ;;  %v315_v25 = vmax.f32 %v251_v16, 0.0  ;;  %375 = vst.msk [vmem:[%s1091_s3 + $0xd0] sm:$0xff] %vm348_vm0, %v310_v19  ;;  %376 = vst.msk [vmem:[%s1091_s3 + $0xd8] sm:$0xff] %vm348_vm0, %v311_v20  ;;  %v489_v28 = vunpack.c.l.bf16 %v563_v17  ;;  %v490_v29 = vunpack.c.h.bf16 %v563_v17 }
  0x23   :  { %377 = vst.msk [vmem:[%s1091_s3 + $0xe0] sm:$0xff] %vm348_vm0, %v312_v21  ;;  %378 = vst.msk [vmem:[%s1091_s3 + $0xe8] sm:$0xff] %vm348_vm0, %v313_v22  ;;  %v493_v30 = vunpack.c.l.bf16 %v564_v18  ;;  %v494_v31 = vunpack.c.h.bf16 %v564_v18  ;;  %v181_v32 = vmul.f32 %v485_v26, %v604_v1  ;;  %v182_v33 = vmul.f32 %v486_v27, %v604_v1  ;;  %v570_v22 = vld [vmem:[%s1088_s0 + $0xc0] sm:$0xff]   ;;  %v571_v27 = vld [vmem:[%s1088_s0 + $0xc8] sm:$0xff]  }
  0x24   :  { %379 = vst.msk [vmem:[%s1091_s3 + $0xf0] sm:$0xff] %vm348_vm0, %v314_v24  ;;  %380 = vst.msk [vmem:[%s1091_s3 + $0xf8] sm:$0xff] %vm348_vm0, %v315_v25  ;;  %v497_v34 = vunpack.c.l.bf16 %v565_v23  ;;  %v498_v35 = vunpack.c.h.bf16 %v565_v23  ;;  %v183_v36 = vmul.f32 %v489_v28, %v604_v1  ;;  %v184_v37 = vmul.f32 %v490_v29, %v604_v1  ;;  %v572_v28 = vld [vmem:[%s1088_s0 + $0xd0] sm:$0xff]  }
  0x25   :  { %v185_v38 = vmul.f32 %v493_v30, %v604_v1  ;;  %v186_v39 = vmul.f32 %v494_v31, %v604_v1  ;;  %v252_v40 = vadd.f32 %v618_v7, %v181_v32  ;;  %v253_v41 = vadd.f32 %v618_v7, %v182_v33  ;;  %v573_v33 = vld [vmem:[%s1088_s0 + $0xd8] sm:$0xff]  }
  0x26   :  { %v187_v42 = vmul.f32 %v497_v34, %v604_v1  ;;  %v188_v43 = vmul.f32 %v498_v35, %v604_v1  ;;  %v254_v44 = vadd.f32 %v618_v7, %v183_v36  ;;  %v255_v45 = vadd.f32 %v618_v7, %v184_v37 }
  0x27   :  { %v256_v46 = vadd.f32 %v618_v7, %v185_v38  ;;  %v257_v47 = vadd.f32 %v618_v7, %v186_v39  ;;  %v316_v49 = vmax.f32 %v252_v40, 0.0  ;;  %v317_v50 = vmax.f32 %v253_v41, 0.0 }
  0x28   :  { %v258_v51 = vadd.f32 %v618_v7, %v187_v42  ;;  %v259_v52 = vadd.f32 %v618_v7, %v188_v43  ;;  %v318_v55 = vmax.f32 %v254_v44, 0.0  ;;  %v319_v56 = vmax.f32 %v255_v45, 0.0 }
  0x29   :  { %v320_v57 = vmax.f32 %v256_v46, 0.0  ;;  %v321_v58 = vmax.f32 %v257_v47, 0.0  ;;  %381 = vst.msk [vmem:[%s1091_s3 + $0x100] sm:$0xff] %vm348_vm0, %v316_v49  ;;  %382 = vst.msk [vmem:[%s1091_s3 + $0x108] sm:$0xff] %vm348_vm0, %v317_v50  ;;  %v501_v62 = vunpack.c.l.bf16 %v566_v48  ;;  %v502_v63 = vunpack.c.h.bf16 %v566_v48 }
  0x2a   :  { %v322_v60 = vmax.f32 %v258_v51, 0.0  ;;  %v323_v61 = vmax.f32 %v259_v52, 0.0  ;;  %383 = vst.msk [vmem:[%s1091_s3 + $0x110] sm:$0xff] %vm348_vm0, %v318_v55  ;;  %384 = vst.msk [vmem:[%s1091_s3 + $0x118] sm:$0xff] %vm348_vm0, %v319_v56  ;;  %v505_v0 = vunpack.c.l.bf16 %v567_v53  ;;  %v506_v2 = vunpack.c.h.bf16 %v567_v53 }
  0x2b   :  { %385 = vst.msk [vmem:[%s1091_s3 + $0x120] sm:$0xff] %vm348_vm0, %v320_v57  ;;  %386 = vst.msk [vmem:[%s1091_s3 + $0x128] sm:$0xff] %vm348_vm0, %v321_v58  ;;  %v509_v3 = vunpack.c.l.bf16 %v568_v54  ;;  %v510_v4 = vunpack.c.h.bf16 %v568_v54  ;;  %v189_v5 = vmul.f32 %v501_v62, %v604_v1  ;;  %v190_v6 = vmul.f32 %v502_v63, %v604_v1  ;;  %v574_v58 = vld [vmem:[%s1088_s0 + $0xe0] sm:$0xff]   ;;  %v575_v63 = vld [vmem:[%s1088_s0 + $0xe8] sm:$0xff]  }
  0x2c   :  { %387 = vst.msk [vmem:[%s1091_s3 + $0x130] sm:$0xff] %vm348_vm0, %v322_v60  ;;  %388 = vst.msk [vmem:[%s1091_s3 + $0x138] sm:$0xff] %vm348_vm0, %v323_v61  ;;  %v513_v8 = vunpack.c.l.bf16 %v569_v59  ;;  %v514_v9 = vunpack.c.h.bf16 %v569_v59  ;;  %v191_v10 = vmul.f32 %v505_v0, %v604_v1  ;;  %v192_v11 = vmul.f32 %v506_v2, %v604_v1  ;;  %v576_v0 = vld [vmem:[%s1088_s0 + $0xf0] sm:$0xff]  }
  0x2d   :  { %v193_v12 = vmul.f32 %v509_v3, %v604_v1  ;;  %v194_v13 = vmul.f32 %v510_v4, %v604_v1  ;;  %v260_v14 = vadd.f32 %v618_v7, %v189_v5  ;;  %v261_v15 = vadd.f32 %v618_v7, %v190_v6  ;;  %v577_v6 = vld [vmem:[%s1088_s0 + $0xf8] sm:$0xff]  }
  0x2e   :  { %v195_v16 = vmul.f32 %v513_v8, %v604_v1  ;;  %v196_v17 = vmul.f32 %v514_v9, %v604_v1  ;;  %v262_v18 = vadd.f32 %v618_v7, %v191_v10  ;;  %v263_v19 = vadd.f32 %v618_v7, %v192_v11 }
  0x2f   :  { %v264_v20 = vadd.f32 %v618_v7, %v193_v12  ;;  %v265_v21 = vadd.f32 %v618_v7, %v194_v13  ;;  %v324_v23 = vmax.f32 %v260_v14, 0.0  ;;  %v325_v24 = vmax.f32 %v261_v15, 0.0 }
  0x30   :  { %v266_v25 = vadd.f32 %v618_v7, %v195_v16  ;;  %v267_v26 = vadd.f32 %v618_v7, %v196_v17  ;;  %v326_v29 = vmax.f32 %v262_v18, 0.0  ;;  %v327_v30 = vmax.f32 %v263_v19, 0.0 }
  0x31   :  { %v328_v31 = vmax.f32 %v264_v20, 0.0  ;;  %v329_v32 = vmax.f32 %v265_v21, 0.0  ;;  %389 = vst.msk [vmem:[%s1091_s3 + $0x140] sm:$0xff] %vm348_vm0, %v324_v23  ;;  %390 = vst.msk [vmem:[%s1091_s3 + $0x148] sm:$0xff] %vm348_vm0, %v325_v24  ;;  %v517_v36 = vunpack.c.l.bf16 %v570_v22  ;;  %v518_v37 = vunpack.c.h.bf16 %v570_v22 }
  0x32   :  { %v330_v34 = vmax.f32 %v266_v25, 0.0  ;;  %v331_v35 = vmax.f32 %v267_v26, 0.0  ;;  %391 = vst.msk [vmem:[%s1091_s3 + $0x150] sm:$0xff] %vm348_vm0, %v326_v29  ;;  %392 = vst.msk [vmem:[%s1091_s3 + $0x158] sm:$0xff] %vm348_vm0, %v327_v30  ;;  %v521_v38 = vunpack.c.l.bf16 %v571_v27  ;;  %v522_v39 = vunpack.c.h.bf16 %v571_v27 }
  0x33   :  { %393 = vst.msk [vmem:[%s1091_s3 + $0x160] sm:$0xff] %vm348_vm0, %v328_v31  ;;  %394 = vst.msk [vmem:[%s1091_s3 + $0x168] sm:$0xff] %vm348_vm0, %v329_v32  ;;  %v525_v40 = vunpack.c.l.bf16 %v572_v28  ;;  %v526_v41 = vunpack.c.h.bf16 %v572_v28  ;;  %v197_v42 = vmul.f32 %v517_v36, %v604_v1  ;;  %v198_v43 = vmul.f32 %v518_v37, %v604_v1 }
  0x34   :  { %395 = vst.msk [vmem:[%s1091_s3 + $0x170] sm:$0xff] %vm348_vm0, %v330_v34  ;;  %396 = vst.msk [vmem:[%s1091_s3 + $0x178] sm:$0xff] %vm348_vm0, %v331_v35  ;;  %v529_v44 = vunpack.c.l.bf16 %v573_v33  ;;  %v530_v45 = vunpack.c.h.bf16 %v573_v33  ;;  %v199_v46 = vmul.f32 %v521_v38, %v604_v1  ;;  %v200_v47 = vmul.f32 %v522_v39, %v604_v1 }
  0x35   :  { %v201_v48 = vmul.f32 %v525_v40, %v604_v1  ;;  %v202_v49 = vmul.f32 %v526_v41, %v604_v1  ;;  %v268_v50 = vadd.f32 %v618_v7, %v197_v42  ;;  %v269_v51 = vadd.f32 %v618_v7, %v198_v43 }
  0x36   :  { %v203_v52 = vmul.f32 %v529_v44, %v604_v1  ;;  %v204_v53 = vmul.f32 %v530_v45, %v604_v1  ;;  %v270_v54 = vadd.f32 %v618_v7, %v199_v46  ;;  %v271_v55 = vadd.f32 %v618_v7, %v200_v47 }
  0x37   :  { %v272_v56 = vadd.f32 %v618_v7, %v201_v48  ;;  %v273_v57 = vadd.f32 %v618_v7, %v202_v49  ;;  %v332_v59 = vmax.f32 %v268_v50, 0.0  ;;  %v333_v60 = vmax.f32 %v269_v51, 0.0 }
  0x38   :  { %v274_v61 = vadd.f32 %v618_v7, %v203_v52  ;;  %v275_v62 = vadd.f32 %v618_v7, %v204_v53  ;;  %v334_v2 = vmax.f32 %v270_v54, 0.0  ;;  %v335_v3 = vmax.f32 %v271_v55, 0.0 }
  0x39   :  { %v336_v4 = vmax.f32 %v272_v56, 0.0  ;;  %v337_v5 = vmax.f32 %v273_v57, 0.0  ;;  %397 = vst.msk [vmem:[%s1091_s3 + $0x180] sm:$0xff] %vm348_vm0, %v332_v59  ;;  %398 = vst.msk [vmem:[%s1091_s3 + $0x188] sm:$0xff] %vm348_vm0, %v333_v60  ;;  %v533_v10 = vunpack.c.l.bf16 %v574_v58  ;;  %v534_v11 = vunpack.c.h.bf16 %v574_v58 }
  0x3a   :  { %v338_v8 = vmax.f32 %v274_v61, 0.0  ;;  %v339_v9 = vmax.f32 %v275_v62, 0.0  ;;  %399 = vst.msk [vmem:[%s1091_s3 + $0x190] sm:$0xff] %vm348_vm0, %v334_v2  ;;  %400 = vst.msk [vmem:[%s1091_s3 + $0x198] sm:$0xff] %vm348_vm0, %v335_v3  ;;  %v537_v12 = vunpack.c.l.bf16 %v575_v63  ;;  %v538_v13 = vunpack.c.h.bf16 %v575_v63 }
  0x3b   :  { %401 = vst.msk [vmem:[%s1091_s3 + $0x1a0] sm:$0xff] %vm348_vm0, %v336_v4  ;;  %402 = vst.msk [vmem:[%s1091_s3 + $0x1a8] sm:$0xff] %vm348_vm0, %v337_v5  ;;  %v541_v14 = vunpack.c.l.bf16 %v576_v0  ;;  %v542_v15 = vunpack.c.h.bf16 %v576_v0  ;;  %v205_v16 = vmul.f32 %v533_v10, %v604_v1  ;;  %v206_v17 = vmul.f32 %v534_v11, %v604_v1 }
  0x3c   :  { %403 = vst.msk [vmem:[%s1091_s3 + $0x1b0] sm:$0xff] %vm348_vm0, %v338_v8  ;;  %404 = vst.msk [vmem:[%s1091_s3 + $0x1b8] sm:$0xff] %vm348_vm0, %v339_v9  ;;  %v545_v18 = vunpack.c.l.bf16 %v577_v6  ;;  %v546_v19 = vunpack.c.h.bf16 %v577_v6  ;;  %v207_v20 = vmul.f32 %v537_v12, %v604_v1  ;;  %v208_v21 = vmul.f32 %v538_v13, %v604_v1 }
  0x3d   :  { %v209_v22 = vmul.f32 %v541_v14, %v604_v1  ;;  %v210_v23 = vmul.f32 %v542_v15, %v604_v1  ;;  %v276_v24 = vadd.f32 %v618_v7, %v205_v16  ;;  %v277_v25 = vadd.f32 %v618_v7, %v206_v17 }
  0x3e   :  { %v211_v26 = vmul.f32 %v545_v18, %v604_v1  ;;  %v212_v27 = vmul.f32 %v546_v19, %v604_v1  ;;  %v278_v28 = vadd.f32 %v618_v7, %v207_v20  ;;  %v279_v29 = vadd.f32 %v618_v7, %v208_v21 }
  0x3f   :  { %v280_v30 = vadd.f32 %v618_v7, %v209_v22  ;;  %v281_v31 = vadd.f32 %v618_v7, %v210_v23  ;;  %v340_v32 = vmax.f32 %v276_v24, 0.0  ;;  %v341_v33 = vmax.f32 %v277_v25, 0.0 }
  0x40   :  { %v282_v34 = vadd.f32 %v618_v7, %v211_v26  ;;  %v283_v35 = vadd.f32 %v618_v7, %v212_v27  ;;  %v342_v36 = vmax.f32 %v278_v28, 0.0  ;;  %v343_v37 = vmax.f32 %v279_v29, 0.0 }
  0x41   :  { %v344_v38 = vmax.f32 %v280_v30, 0.0  ;;  %v345_v39 = vmax.f32 %v281_v31, 0.0  ;;  %405 = vst.msk [vmem:[%s1091_s3 + $0x1c0] sm:$0xff] %vm348_vm0, %v340_v32  ;;  %406 = vst.msk [vmem:[%s1091_s3 + $0x1c8] sm:$0xff] %vm348_vm0, %v341_v33 }
  0x42   :  { %v346_v1 = vmax.f32 %v282_v34, 0.0  ;;  %v347_v40 = vmax.f32 %v283_v35, 0.0  ;;  %407 = vst.msk [vmem:[%s1091_s3 + $0x1d0] sm:$0xff] %vm348_vm0, %v342_v36  ;;  %408 = vst.msk [vmem:[%s1091_s3 + $0x1d8] sm:$0xff] %vm348_vm0, %v343_v37 }
  0x43   :  { %409 = vst.msk [vmem:[%s1091_s3 + $0x1e0] sm:$0xff] %vm348_vm0, %v344_v38  ;;  %410 = vst.msk [vmem:[%s1091_s3 + $0x1e8] sm:$0xff] %vm348_vm0, %v345_v39 }
  0x44   :  { %411 = vst.msk [vmem:[%s1091_s3 + $0x1f0] sm:$0xff] %vm348_vm0, %v346_v1  ;;  %412 = vst.msk [vmem:[%s1091_s3 + $0x1f8] sm:$0xff] %vm348_vm0, %v347_v40 }

// kernel: unet_block_forward.3
= control target key start
LH: loop header
LB: loop body
LE: loop exit
PB: predicated region body
PF: predicated region fallthrough
CT: control target
= control target key end

     0   :  { %s5197_s15 = smov 0   ;;  %s6690_s0 = inlined_call_operand.vmem [shape: f32[512,4], index: 0, kind: input, shape index: {}]   ;;  %s6691_s1 = inlined_call_operand.vmem [shape: bf16[36,8], index: 1, kind: input, shape index: {}]   ;;  %s6692_s2 = inlined_call_operand.vmem [shape: bf16[512,8], index: 2, kind: output, shape index: {0}]   ;;  %s6693_s3 = inlined_call_operand.vmem [shape: f32[2,1,8], index: 3, kind: output, shape index: {1}]   ;;  %s6694_s4 = inlined_call_operand.vmem [shape: f32[2,1,8], index: 4, kind: output, shape index: {2}]  }
   0x1 LB: > { %s5203_s16 = sadd.s32 4294967295, %s5161_s15   ;;  %p4836_p0 = scmp.ge.s32.totalorder %s5161_s15, 1  ;;  %s5161_s15 = sphi %s5197_s15, %s15_s15  }
   0x2   : > { %p168_p1 = scmp.lt.s32.totalorder %s5161_s15, 3 }
   0x4   : > { %p169_p2 = pnand %p4836_p0, %p168_p1 }
   0x5   : > { %s4837_s17 = sshll.u32 (!%p169_p2), %s5203_s16, 5  ;;  %s5164_s22 = smov (!%p169_p2), 4  }
   0x6   : > { %172 = sbr.rel (%p169_p2) target bundleno = 960 (0x3c0), region = 28  ;;  %p201_p3 = scmp.lt.s32.totalorder (!%p169_p2), %s4837_s17, 63 }
   0x7   : > { %s5165_s23 = smov (!%p169_p2), 8   ;;  %s5166_s24 = smov (!%p169_p2), 12  }
   0x8   : > { %s5167_s25 = smov (!%p169_p2), 16   ;;  %s5168_s26 = smov (!%p169_p2), 20  }
   0x9   : > { %s5169_s27 = smov (!%p169_p2), 24   ;;  %s5170_s6 = smov (!%p169_p2), 28  }
   0xa   : > { %s5171_s9 = smov (!%p169_p2), 32   ;;  %p212_p4 = scmp.lt.s32.totalorder (!%p169_p2), %s5203_s16, 1 }
   0xb   : > { %vm251_vm0 = vcmask 27648   ;;  %v5163_v0 = vmov 0   ;;  %vm254_vm1 = vcmask 24576   ;;  %vm262_vm2 = vsmask.f32 256  ;;  %s6708_s17 = smov (!%p201_p3, %s4837_s17), 63 }
   0xc   : > { %252 = vst.msk [vmem:[#allocation2] sm:$0xf] %vm251_vm0, %v5163_v0  ;;  %253 = vst.msk [vmem:[#allocation2 + $0x4] sm:$0xf] %vm251_vm0, %v5163_v0  ;;  %vm1006_vm3 = vsmask.f32 3328 }
   0xd   : > { %257 = vst.msk [vmem:[#allocation2 + $0xcc] sm:$0xf] %vm251_vm0, %v5163_v0  ;;  %258 = vst.msk [vmem:[#allocation2 + $0xd0] sm:$0xf] %vm251_vm0, %v5163_v0  ;;  %v264_v2 = vld [vmem:[#allocation2 + $0xc] sm:$0x1] }
   0xe   : > { %vm5214_vm4 = vmand %vm254_vm1, %vm262_vm2  ;;  %vm312_vm5 = vsmask.f32 7938  ;;  %255 = vst.msk [vmem:[#allocation2 + $0x8] sm:$0x1] %vm254_vm1, %v5163_v0  ;;  %vm1007_vm6 = vsmask.f32 7440 }
   0xf   : > { %259 = vst.msk [vmem:[#allocation2 + $0xd4] sm:$0x1] %vm254_vm1, %v5163_v0  ;;  %v265_v3 = vsel %vm5214_vm4, 0, %v264_v2  ;;  %v314_v4 = vld [vmem:[#allocation2 + $0x14] sm:$0x1]  ;;  %vm5226_vm7 = vmand %vm254_vm1, %vm312_vm5  ;;  %s4838_s18 = sshll.u32 %s6708_s17, 3 }
  0x10   : > { %266 = vst [vmem:[#allocation2 + $0xc] sm:$0x1] %v265_v3  ;;  %v267_v5 = vld [vmem:[#allocation2 + $0x18] sm:$0x1]  ;;  %v317_v6 = vld [vmem:[#allocation2 + $0x20] sm:$0x1]  ;;  %s5244_s21 = scalar_lea.vmem %s6690_s0, %s4838_s18  ;;  %vm5256_vm9 = vmor %vm1006_vm3, %vm1007_vm6 }
  0x11   : > { %v268_v8 = vsel %vm5214_vm4, 0, %v267_v5  ;;  %v270_v9 = vld [vmem:[#allocation2 + $0x24] sm:$0x1]  ;;  %v320_v10 = vld [vmem:[#allocation2 + $0x2c] sm:$0x1]  ;;  %v315_v11 = vsel %vm5226_vm7, 0, %v314_v4  ;;  %vm5262_vm10 = vmand %vm251_vm0, %vm312_vm5 }
  0x12   : > { %269 = vst [vmem:[#allocation2 + $0x18] sm:$0x1] %v268_v8  ;;  %v318_v12 = vsel %vm5226_vm7, 0, %v317_v6  ;;  %v271_v13 = vsel %vm5214_vm4, 0, %v270_v9  ;;  %v321_v14 = vsel %vm5226_vm7, 0, %v320_v10  ;;  %v219_v19 = vld [vmem:[%s5244_s21] sm:$0xff] }
  0x13   : > { %vm458_vm8 = vsmask.f32 4368  ;;  %316 = vst [vmem:[#allocation2 + $0x14] sm:$0x1] %v315_v11  ;;  %319 = vst [vmem:[#allocation2 + $0x20] sm:$0x1] %v318_v12  ;;  %v4990_v27 = vpack.c.bf16 %v219_v19, %v219_v19 }
  0x14   : > { %272 = vst [vmem:[#allocation2 + $0x24] sm:$0x1] %v271_v13  ;;  %322 = vst [vmem:[#allocation2 + $0x2c] sm:$0x1] %v321_v14  ;;  %v273_v15 = vld [vmem:[#allocation2 + $0x30] sm:$0x1] }
  0x15   : > { %v323_v16 = vld [vmem:[#allocation2 + $0x38] sm:$0x1]  ;;  %v958_v17 = vld [vmem:[#allocation2] sm:$0xf]  ;;  %v959_v18 = vld [vmem:[#allocation2 + $0x4] sm:$0xf] }
  0x16   : > { %v274_v20 = vsel %vm5214_vm4, 0, %v273_v15  ;;  %v1010_v21 = vshrl.u32 %v958_v17, 16  ;;  %v1013_v22 = vshll.u32 %v958_v17, 16  ;;  %v1019_v23 = vshll.u32 %v959_v18, 16  ;;  %v220_v25 = vld [vmem:[%s5244_s21 + $0x8] sm:$0xff]  ;;  %v221_v26 = vld [vmem:[%s5244_s21 + $0x10] sm:$0xff]  ;;  %vm5268_vm11 = vmor %vm262_vm2, %vm458_vm8 }
  0x17   : > { %v1023_v24 = vshrl.u32 %v959_v18, 16  ;;  %275 = vst [vmem:[#allocation2 + $0x30] sm:$0x1] %v274_v20  ;;  %v4991_v28 = vpack.c.bf16 %v220_v25, %v220_v25  ;;  %v960_v29 = vld [vmem:[#allocation2 + $0x8] sm:$0x1]  ;;  %v222_v30 = vld [vmem:[%s5244_s21 + $0x18] sm:$0xff]  ;;  %v4992_v31 = vpack.c.bf16 %v221_v26, %v221_v26 }
  0x18   : > { %v324_v32 = vsel %vm5226_vm7, 0, %v323_v16  ;;  %v1012_v33 = vrot.slane %v1010_v21, 4  ;;  %v1015_v34 = vrot.slane %v1013_v22, 5  ;;  %v1021_v35 = vrot.slane %v1019_v23, 5  ;;  %v782_v49 = vld [vmem:[#allocation2 + $0xc] sm:$0xf] }
  0x19   : > { %v1025_v36 = vrot.slane %v1023_v24, 4  ;;  %325 = vst [vmem:[#allocation2 + $0x38] sm:$0x1] %v324_v32  ;;  %v461_v37 = vshrl.u32 %v4990_v27, 16  ;;  %v464_v38 = vshll.u32 %v4990_v27, 16  ;;  %v469_v39 = vshrl.u32 %v4991_v28, 16 }
  0x1a   : > { %v472_v40 = vshll.u32 %v4991_v28, 16  ;;  %v1016_v42 = vor.u32 %v1015_v34, %v1012_v33  ;;  %v1029_v44 = vshll.u32 %v960_v29, 16  ;;  %v4993_v45 = vpack.c.bf16 %v222_v30, %v222_v30  ;;  %v786_v56 = vld [vmem:[#allocation2 + $0x14] sm:$0x1]  ;;  %v223_v62 = vld [vmem:[%s5244_s21 + $0x20] sm:$0xff]  ;;  %v224_v4 = vld [vmem:[%s5244_s21 + $0x28] sm:$0xff] }
  0x1b   : > { %v1026_v43 = vor.u32 %v1025_v36, %v1021_v35  ;;  %v463_v46 = vrot.slane %v461_v37, 7  ;;  %v471_v47 = vrot.slane %v469_v39, 7  ;;  %v478_v50 = vshrl.u32 %v4992_v31, 16  ;;  %v225_v5 = vld [vmem:[%s5244_s21 + $0x30] sm:$0xff]  ;;  %v226_v6 = vld [vmem:[%s5244_s21 + $0x38] sm:$0xff]  ;;  %v227_v26 = vld [vmem:[%s5244_s21 + $0x40] sm:$0xff] }
  0x1c   : > { %v481_v51 = vshll.u32 %v4992_v31, 16  ;;  %v1017_v52 = vrot.slane %v1016_v42, 4  ;;  %v1031_v55 = vrot.slane %v1029_v44, 5  ;;  %v486_v57 = vshrl.u32 %v4993_v45, 16  ;;  %v789_v12 = vld [vmem:[#allocation2 + $0x18] sm:$0xf] }
  0x1d   : > { %v1027_v54 = vrot.slane %v1026_v43, 4  ;;  %v466_v58 = vor.u32 %v464_v38, %v463_v46  ;;  %v467_v59 = vrot.slane %v463_v46, 4  ;;  %v474_v60 = vor.u32 %v472_v40, %v471_v47  ;;  %v793_v13 = vld [vmem:[#allocation2 + $0x20] sm:$0x1]  ;;  %v276_v27 = vld [vmem:[#allocation2 + $0x3c] sm:$0x1] }
  0x1e   : > { %v476_v61 = vrot.slane %v471_v47, 4  ;;  %v1022_v63 = vsel %vm5256_vm9, %v1017_v52, %v1021_v35  ;;  %v480_v2 = vrot.slane %v478_v50, 7  ;;  %v488_v3 = vrot.slane %v486_v57, 7  ;;  %v228_v32 = vld [vmem:[%s5244_s21 + $0x48] sm:$0xff]  ;;  %v229_v37 = vld [vmem:[%s5244_s21 + $0x50] sm:$0xff]  ;;  %v230_v38 = vld [vmem:[%s5244_s21 + $0x58] sm:$0xff] }
  0x1f   : > { %v1032_v0 = vsel %vm5256_vm9, %v1027_v54, %v1031_v55  ;;  %1393 = vrot.lane.b32.xlu0 %v1022_v63, %s5164_s22  ;;  %v475_v8 = vsel %vm5268_vm11, %v467_v59, %v474_v60  ;;  %v783_v9 = vsel %vm5262_vm10, %v466_v58, %v782_v49  ;;  %v489_v11 = vshll.u32 %v4993_v45, 16  ;;  %v796_v46 = vld [vmem:[#allocation2 + $0x24] sm:$0xf]  ;;  %s4840_s10 = sshll.u32 %s6708_s17, 2  ;;  %s6710_s16 = smov (!%p212_p4, %s5203_s16), 1 }
  0x20   : > { %v787_v10 = vsel %vm5214_vm4, %v476_v61, %v786_v56  ;;  %784 = vst [vmem:[#allocation2 + $0xc] sm:$0xf] %v783_v9  ;;  %785 = vst.msk [vmem:[#allocation2 + $0x10] sm:$0xf] %vm251_vm0, %v475_v8  ;;  %v483_v14 = vor.u32 %v481_v51, %v480_v2  ;;  %v484_v15 = vrot.slane %v480_v2, 4  ;;  %v493_v16 = vrot.slane %v488_v3, 4  ;;  %s6489_s13 = scalar_lea.vmem %s6692_s2, %s4840_s10  ;;  %s214_s18 = scalar_lea.vmem %s6693_s3, %s6710_s16 }
  0x21   : > { %788 = vst [vmem:[#allocation2 + $0x14] sm:$0x1] %v787_v10  ;;  %v4994_v17 = vpack.c.bf16 %v223_v62, %v223_v62  ;;  %v491_v18 = vor.u32 %v489_v11, %v488_v3  ;;  %v4995_v19 = vpack.c.bf16 %v224_v4, %v224_v4  ;;  %v4996_v20 = vpack.c.bf16 %v225_v5, %v225_v5  ;;  %v800_v62 = vld [vmem:[#allocation2 + $0x2c] sm:$0x1] }
  0x22   : > { %v5288_v21 = vpack.c.bf16 %v226_v6, %v226_v6  ;;  %v790_v22 = vsel %vm5262_vm10, %v483_v14, %v789_v12  ;;  %v794_v23 = vsel %vm5214_vm4, %v493_v16, %v793_v13  ;;  %v277_v42 = vsel %vm5214_vm4, 0, %v276_v27 }
  0x23   : > { %v495_v24 = vshrl.u32 %v4994_v17, 16  ;;  %v498_v25 = vshll.u32 %v4994_v17, 16  ;;  %1395 = vrot.lane.b32.xlu0 %v1032_v0, %s5164_s22  ;;  %v492_v28 = vsel %vm5268_vm11, %v484_v15, %v491_v18  ;;  %791 = vst [vmem:[#allocation2 + $0x18] sm:$0xf] %v790_v22  ;;  %795 = vst [vmem:[#allocation2 + $0x20] sm:$0x1] %v794_v23  ;;  %v5308_v43 = vpack.c.bf16 %v227_v26, %v227_v26 }
  0x24   : > { %v503_v29 = vshrl.u32 %v4995_v19, 16  ;;  %v506_v30 = vshll.u32 %v4995_v19, 16  ;;  %v512_v31 = vshrl.u32 %v4996_v20, 16  ;;  %792 = vst.msk [vmem:[#allocation2 + $0x1c] sm:$0xf] %vm251_vm0, %v492_v28  ;;  %v515_v34 = vshll.u32 %v4996_v20, 16 }
  0x25   : > { %v497_v33 = vrot.slane %v495_v24, 7  ;;  %v520_v35 = vshrl.u32 %v5288_v21, 16  ;;  %v523_v36 = vshll.u32 %v5288_v21, 16  ;;  %278 = vst [vmem:[#allocation2 + $0x3c] sm:$0x1] %v277_v42  ;;  %v5312_v49 = vpack.c.bf16 %v228_v32, %v228_v32 }
  0x26   : > { %v505_v39 = vrot.slane %v503_v29, 7  ;;  %v5304_v40 = vrot.slane %v512_v31, 7  ;;  %v5315_v56 = vpack.c.bf16 %v229_v37, %v229_v37  ;;  %v5317_v57 = vpack.c.bf16 %v230_v38, %v230_v38  ;;  %v803_v20 = vld [vmem:[#allocation2 + $0x30] sm:$0xf]  ;;  %v231_v29 = vld [vmem:[%s5244_s21 + $0x60] sm:$0xff] }
  0x27   : > { %v500_v44 = vor.u32 %v498_v25, %v497_v33  ;;  %v501_v45 = vrot.slane %v497_v33, 4  ;;  %v5310_v47 = vrot.slane %v520_v35, 7  ;;  %v961_v50 = vld [vmem:[#allocation2 + $0xc] sm:$0xf]  ;;  %v962_v51 = vld [vmem:[#allocation2 + $0x10] sm:$0xf] }
  0x28   : > { %v963_v52 = vld [vmem:[#allocation2 + $0x14] sm:$0x1]  ;;  %v508_v54 = vor.u32 %v506_v30, %v505_v39  ;;  %v517_v55 = vor.u32 %v515_v34, %v5304_v40  ;;  %v1034_v58 = vshrl.u32 %v961_v50, 16  ;;  %v1037_v59 = vshll.u32 %v961_v50, 16 }
  0x29   : > { %v1043_v60 = vshll.u32 %v962_v51, 16  ;;  %v1047_v61 = vshrl.u32 %v962_v51, 16  ;;  %v1053_v63 = vshll.u32 %v963_v52, 16  ;;  %v797_v2 = vsel %vm5262_vm10, %v500_v44, %v796_v46 }
  0x2a   : > { %v509_v0 = vsel %vm5268_vm11, %v501_v45, %v508_v54  ;;  %v510_v3 = vrot.slane %v505_v39, 4  ;;  %v1036_v4 = vrot.slane %v1034_v58, 4  ;;  %v1039_v5 = vrot.slane %v1037_v59, 5  ;;  %v964_v9 = vld [vmem:[#allocation2 + $0x18] sm:$0xf] }
  0x2b   : > { %v1045_v6 = vrot.slane %v1043_v60, 5  ;;  %v1049_v8 = vrot.slane %v1047_v61, 4  ;;  %798 = vst [vmem:[#allocation2 + $0x24] sm:$0xf] %v797_v2  ;;  %799 = vst.msk [vmem:[#allocation2 + $0x28] sm:$0xf] %vm251_vm0, %v509_v0  ;;  %v525_v32 = vor.u32 %v523_v36, %v5310_v47  ;;  %v804_v33 = vsel %vm5262_vm10, %v517_v55, %v803_v20 }
  0x2c   : > { %v1055_v10 = vrot.slane %v1053_v63, 5  ;;  %v965_v11 = vld [vmem:[#allocation2 + $0x1c] sm:$0xf]  ;;  %v1058_v12 = vshrl.u32 %v964_v9, 16  ;;  %v1061_v13 = vshll.u32 %v964_v9, 16  ;;  %v801_v14 = vsel %vm5214_vm4, %v510_v3, %v800_v62 }
  0x2d   : > { %v1040_v15 = vor.u32 %v1039_v5, %v1036_v4  ;;  %v1050_v16 = vor.u32 %v1049_v8, %v1045_v6  ;;  %v1067_v17 = vshll.u32 %v965_v11, 16  ;;  %v1071_v18 = vshrl.u32 %v965_v11, 16  ;;  %v966_v19 = vld [vmem:[#allocation2 + $0x20] sm:$0x1]  ;;  %802 = vst [vmem:[#allocation2 + $0x2c] sm:$0x1] %v801_v14 }
  0x2e   : > { %v1060_v21 = vrot.slane %v1058_v12, 4  ;;  %v1063_v22 = vrot.slane %v1061_v13, 5  ;;  %v1077_v23 = vshll.u32 %v966_v19, 16  ;;  %v518_v24 = vrot.slane %v5304_v40, 4  ;;  %805 = vst [vmem:[#allocation2 + $0x30] sm:$0xf] %v804_v33 }
  0x2f   : > { %v1041_v25 = vrot.slane %v1040_v15, 4  ;;  %v1051_v26 = vrot.slane %v1050_v16, 4  ;;  %v1069_v27 = vrot.slane %v1067_v17, 5  ;;  %v1073_v28 = vrot.slane %v1071_v18, 4  ;;  %v807_v39 = vld [vmem:[#allocation2 + $0x38] sm:$0x1] }
  0x30   : > { %v1064_v30 = vor.u32 %v1063_v22, %v1060_v21  ;;  %v1079_v31 = vrot.slane %v1077_v23, 5  ;;  %v527_v38 = vrot.slane %v5310_v47, 4  ;;  %v526_v36 = vsel %vm5268_vm11, %v518_v24, %v525_v32  ;;  %v326_v61 = vld [vmem:[#allocation2 + $0x44] sm:$0x1]  ;;  %v279_v3 = vld [vmem:[#allocation2 + $0x48] sm:$0x1] }
  0x31   : > { %v1046_v34 = vsel %vm5256_vm9, %v1041_v25, %v1045_v6  ;;  %v1056_v35 = vsel %vm5256_vm9, %v1051_v26, %v1055_v10  ;;  %v1074_v37 = vor.u32 %v1073_v28, %v1069_v27  ;;  %v529_v45 = vshrl.u32 %v5308_v43, 16  ;;  %806 = vst.msk [vmem:[#allocation2 + $0x34] sm:$0xf] %vm251_vm0, %v526_v36  ;;  %v810_v12 = vld [vmem:[#allocation2 + $0x3c] sm:$0xf] }
  0x32   : > { %1397 = vrot.lane.b32.xlu1 %v1046_v34, %s5164_s22  ;;  %v1065_v40 = vrot.slane %v1064_v30, 4  ;;  %v967_v42 = vld [vmem:[#allocation2 + $0x24] sm:$0xf]  ;;  %v968_v44 = vld [vmem:[#allocation2 + $0x28] sm:$0xf]  ;;  %v5340_v46 = vpack.c.bf16 %v231_v29, %v231_v29  ;;  %v808_v59 = vsel %vm5214_vm4, %v527_v38, %v807_v39  ;;  %v532_v6 = vshll.u32 %v5308_v43, 16 }
  0x33   : > { %v1075_v50 = vrot.slane %v1074_v37, 4  ;;  %v1082_v51 = vshrl.u32 %v967_v42, 16  ;;  %v1085_v52 = vshll.u32 %v967_v42, 16  ;;  %v1091_v54 = vshll.u32 %v968_v44, 16  ;;  %809 = vst [vmem:[#allocation2 + $0x38] sm:$0x1] %v808_v59 }
  0x34   : > { %v1070_v47 = vsel %vm5256_vm9, %v1065_v40, %v1069_v27  ;;  %v1095_v55 = vshrl.u32 %v968_v44, 16  ;;  %v969_v58 = vld [vmem:[#allocation2 + $0x2c] sm:$0x1]  ;;  %v531_v60 = vrot.slane %v529_v45, 7  ;;  %v537_v10 = vshrl.u32 %v5312_v49, 16 }
  0x35   : > { %1401 = vrot.lane.b32.xlu0 %v1070_v47, %s5164_s22  ;;  %v1080_v62 = vsel %vm5256_vm9, %v1075_v50, %v1079_v31  ;;  %v1084_v63 = vrot.slane %v1082_v51, 4  ;;  %v1087_v0 = vrot.slane %v1085_v52, 5  ;;  %v1093_v2 = vrot.slane %v1091_v54, 5  ;;  %v970_v16 = vld [vmem:[#allocation2 + $0x30] sm:$0xf]  ;;  %v232_v45 = vld [vmem:[%s5244_s21 + $0x68] sm:$0xff] }
  0x36   : > { %1399 = vrot.lane.b32.xlu1 %v1056_v35, %s5164_s22  ;;  %v1097_v4 = vrot.slane %v1095_v55, 4  ;;  %v1101_v5 = vshll.u32 %v969_v58, 16  ;;  %v535_v8 = vrot.slane %v531_v60, 4  ;;  %v540_v11 = vshll.u32 %v5312_v49, 16  ;;  %v329_v39 = vld [vmem:[#allocation2 + $0x50] sm:$0x1] }
  0x37   : > { %v1088_v9 = vor.u32 %v1087_v0, %v1084_v63  ;;  %v327_v13 = vsel %vm5226_vm7, 0, %v326_v61  ;;  %v534_v17 = vor.u32 %v532_v6, %v531_v60  ;;  %v280_v18 = vsel %vm5214_vm4, 0, %v279_v3  ;;  %v282_v50 = vld [vmem:[#allocation2 + $0x54] sm:$0x1]  ;;  %v332_v3 = vld [vmem:[#allocation2 + $0x5c] sm:$0x1] }
  0x38   : > { %v1098_v14 = vor.u32 %v1097_v4, %v1093_v2  ;;  %v1103_v15 = vrot.slane %v1101_v5, 5  ;;  %328 = vst [vmem:[#allocation2 + $0x44] sm:$0x1] %v327_v13  ;;  %v1106_v43 = vshrl.u32 %v970_v16, 16  ;;  %v1109_v20 = vshll.u32 %v970_v16, 16 }
  0x39   : > { %v1089_v19 = vrot.slane %v1088_v9, 4  ;;  %v539_v21 = vrot.slane %v537_v10, 7  ;;  %281 = vst [vmem:[#allocation2 + $0x48] sm:$0x1] %v280_v18  ;;  %v971_v22 = vld [vmem:[#allocation2 + $0x34] sm:$0xf]  ;;  %v811_v23 = vsel %vm5262_vm10, %v534_v17, %v810_v12 }
  0x3a   : > { %1403 = vrot.lane.b32.xlu1 %v1080_v62, %s5164_s22  ;;  %v1099_v49 = vrot.slane %v1098_v14, 4  ;;  %v546_v24 = vshrl.u32 %v5315_v56, 16  ;;  %v549_v25 = vshll.u32 %v5315_v56, 16  ;;  %v1108_v27 = vrot.slane %v1106_v43, 4  ;;  %812 = vst [vmem:[#allocation2 + $0x3c] sm:$0xf] %v811_v23 }
  0x3b   : > { %v1094_v26 = vsel %vm5256_vm9, %v1089_v19, %v1093_v2  ;;  %v1111_v28 = vrot.slane %v1109_v20, 5  ;;  %v1115_v29 = vshll.u32 %v971_v22, 16  ;;  %v1119_v31 = vshrl.u32 %v971_v22, 16  ;;  %v972_v32 = vld [vmem:[#allocation2 + $0x38] sm:$0x1]  ;;  %v233_v10 = vld [vmem:[%s5244_s21 + $0x70] sm:$0xff] }
  0x3c   : > { %1405 = vrot.lane.b32.xlu0 %v1094_v26, %s5164_s22  ;;  %v1104_v30 = vsel %vm5256_vm9, %v1099_v49, %v1103_v15  ;;  %v542_v33 = vor.u32 %v540_v11, %v539_v21  ;;  %v544_v34 = vrot.slane %v539_v21, 4  ;;  %v1125_v56 = vshll.u32 %v972_v32, 16  ;;  %v285_v15 = vld [vmem:[#allocation2 + $0x60] sm:$0x1]  ;;  %v234_v49 = vld [vmem:[%s5244_s21 + $0x78] sm:$0xff] }
  0x3d   : > { %v1112_v35 = vor.u32 %v1111_v28, %v1108_v27  ;;  %v1117_v37 = vrot.slane %v1115_v29, 5  ;;  %v548_v38 = vrot.slane %v546_v24, 7  ;;  %v1121_v40 = vrot.slane %v1119_v31, 4  ;;  %v235_v22 = vld [vmem:[%s5244_s21 + $0x80] sm:$0xff] }
  0x3e   : > { %1407 = vrot.lane.b32.xlu1 %v1104_v30, %s5164_s22  ;;  %v543_v42 = vsel %vm5268_vm11, %v535_v8, %v542_v33  ;;  %v554_v44 = vshrl.u32 %v5317_v57, 16  ;;  %v557_v36 = vshll.u32 %v5317_v57, 16  ;;  %v1127_v52 = vrot.slane %v1125_v56, 5 }
  0x3f   : > { %v1113_v51 = vrot.slane %v1112_v35, 4  ;;  %813 = vst.msk [vmem:[#allocation2 + $0x40] sm:$0xf] %vm251_vm0, %v543_v42  ;;  %v814_v54 = vld [vmem:[#allocation2 + $0x44] sm:$0x1]  ;;  %v551_v47 = vor.u32 %v549_v25, %v548_v38  ;;  %v552_v55 = vrot.slane %v548_v38, 4  ;;  %v1122_v58 = vor.u32 %v1121_v40, %v1117_v37 }
  0x40   : > { %v815_v59 = vsel %vm5214_vm4, %v544_v34, %v814_v54  ;;  %v556_v60 = vrot.slane %v554_v44, 7  ;;  %v817_v61 = vld [vmem:[#allocation2 + $0x48] sm:$0xf]  ;;  %v330_v62 = vsel %vm5226_vm7, 0, %v329_v39  ;;  %v283_v0 = vsel %vm5214_vm4, 0, %v282_v50 }
  0x41   : > { %v1118_v57 = vsel %vm5256_vm9, %v1113_v51, %v1117_v37  ;;  %816 = vst [vmem:[#allocation2 + $0x44] sm:$0x1] %v815_v59  ;;  %v818_v63 = vsel %vm5262_vm10, %v551_v47, %v817_v61  ;;  %331 = vst [vmem:[#allocation2 + $0x50] sm:$0x1] %v330_v62  ;;  %v5003_v2 = vpack.c.bf16 %v232_v45, %v232_v45  ;;  %v1123_v4 = vrot.slane %v1122_v58, 4 }
  0x42   : > { %1409 = vrot.lane.b32.xlu0 %v1118_v57, %s5164_s22  ;;  %v973_v5 = vld [vmem:[#allocation2 + $0x3c] sm:$0xf]  ;;  %v559_v6 = vor.u32 %v557_v36, %v556_v60  ;;  %819 = vst [vmem:[#allocation2 + $0x48] sm:$0xf] %v818_v63  ;;  %v561_v8 = vrot.slane %v556_v60, 4  ;;  %v563_v9 = vshrl.u32 %v5340_v46, 16  ;;  %v5004_v27 = vpack.c.bf16 %v233_v10, %v233_v10 }
  0x43   : > { %284 = vst [vmem:[#allocation2 + $0x54] sm:$0x1] %v283_v0  ;;  %v1130_v11 = vshrl.u32 %v973_v5, 16  ;;  %v1133_v12 = vshll.u32 %v973_v5, 16  ;;  %v566_v13 = vshll.u32 %v5340_v46, 16  ;;  %v571_v14 = vshrl.u32 %v5003_v2, 16 }
  0x44   : > { %v1128_v16 = vsel %vm5256_vm9, %v1123_v4, %v1127_v52  ;;  %v560_v17 = vsel %vm5268_vm11, %v552_v55, %v559_v6  ;;  %v565_v18 = vrot.slane %v563_v9, 7  ;;  %v574_v19 = vshll.u32 %v5003_v2, 16  ;;  %v335_v59 = vld [vmem:[#allocation2 + $0x68] sm:$0x1] }
  0x45   : > { %1411 = vrot.lane.b32.xlu1 %v1128_v16, %s5164_s22  ;;  %v1132_v43 = vrot.slane %v1130_v11, 4  ;;  %v1135_v20 = vrot.slane %v1133_v12, 5  ;;  %820 = vst.msk [vmem:[#allocation2 + $0x4c] sm:$0xf] %vm251_vm0, %v560_v17  ;;  %v573_v21 = vrot.slane %v571_v14, 7  ;;  %v333_v46 = vsel %vm5226_vm7, 0, %v332_v3 }
  0x46   : > { %v974_v23 = vld [vmem:[#allocation2 + $0x40] sm:$0xf]  ;;  %v568_v24 = vor.u32 %v566_v13, %v565_v18  ;;  %v569_v25 = vrot.slane %v565_v18, 4  ;;  %334 = vst [vmem:[#allocation2 + $0x5c] sm:$0x1] %v333_v46  ;;  %v286_v26 = vsel %vm5214_vm4, 0, %v285_v15  ;;  %v5005_v35 = vpack.c.bf16 %v234_v49, %v234_v49 }
  0x47   : > { %v1136_v28 = vor.u32 %v1135_v20, %v1132_v43  ;;  %v1139_v29 = vshll.u32 %v974_v23, 16  ;;  %v1143_v30 = vshrl.u32 %v974_v23, 16  ;;  %v576_v31 = vor.u32 %v574_v19, %v573_v21  ;;  %287 = vst [vmem:[#allocation2 + $0x60] sm:$0x1] %v286_v26  ;;  %v236_v12 = vld [vmem:[%s5244_s21 + $0x88] sm:$0xff] }
  0x48   : > { %v975_v32 = vld [vmem:[#allocation2 + $0x44] sm:$0x1]  ;;  %v821_v33 = vld [vmem:[#allocation2 + $0x50] sm:$0x1]  ;;  %v578_v34 = vrot.slane %v573_v21, 4  ;;  %v580_v37 = vshrl.u32 %v5004_v27, 16  ;;  %v5401_v56 = vpack.c.bf16 %v235_v22, %v235_v22  ;;  %v5007_v22 = vpack.c.bf16 %v236_v12, %v236_v12 }
  0x49   : > { %v1137_v38 = vrot.slane %v1136_v28, 4  ;;  %v1141_v39 = vrot.slane %v1139_v29, 5  ;;  %v1145_v40 = vrot.slane %v1143_v30, 4  ;;  %v1149_v42 = vshll.u32 %v975_v32, 16  ;;  %v976_v44 = vld [vmem:[#allocation2 + $0x48] sm:$0xf] }
  0x4a   : > { %v1154_v36 = vshrl.u32 %v976_v44, 16  ;;  %v1157_v45 = vshll.u32 %v976_v44, 16  ;;  %v822_v50 = vsel %vm5214_vm4, %v561_v8, %v821_v33  ;;  %v577_v51 = vsel %vm5268_vm11, %v569_v25, %v576_v31  ;;  %v824_v52 = vld [vmem:[#allocation2 + $0x54] sm:$0xf]  ;;  %v288_v13 = vld [vmem:[#allocation2 + $0x6c] sm:$0x1] }
  0x4b   : > { %v1142_v54 = vsel %vm5256_vm9, %v1137_v38, %v1141_v39  ;;  %v1146_v47 = vor.u32 %v1145_v40, %v1141_v39  ;;  %v1151_v55 = vrot.slane %v1149_v42, 5  ;;  %823 = vst [vmem:[#allocation2 + $0x50] sm:$0x1] %v822_v50  ;;  %v825_v58 = vsel %vm5262_vm10, %v568_v24, %v824_v52  ;;  %827 = vst.msk [vmem:[#allocation2 + $0x58] sm:$0xf] %vm251_vm0, %v577_v51 }
  0x4c   : > { %1413 = vrot.lane.b32.xlu0 %v1142_v54, %s5164_s22  ;;  %v977_v60 = vld [vmem:[#allocation2 + $0x4c] sm:$0xf]  ;;  %v1156_v61 = vrot.slane %v1154_v36, 4  ;;  %v1159_v62 = vrot.slane %v1157_v45, 5  ;;  %826 = vst [vmem:[#allocation2 + $0x54] sm:$0xf] %v825_v58 }
  0x4d   : > { %v582_v57 = vrot.slane %v580_v37, 7  ;;  %v583_v63 = vshll.u32 %v5004_v27, 16  ;;  %v1147_v0 = vrot.slane %v1146_v47, 4  ;;  %v1163_v2 = vshll.u32 %v977_v60, 16  ;;  %v828_v4 = vld [vmem:[#allocation2 + $0x5c] sm:$0x1] }
  0x4e   : > { %v1167_v3 = vshrl.u32 %v977_v60, 16  ;;  %v588_v5 = vshrl.u32 %v5005_v35, 16  ;;  %v1160_v6 = vor.u32 %v1159_v62, %v1156_v61  ;;  %v829_v8 = vsel %vm5214_vm4, %v578_v34, %v828_v4  ;;  %v831_v11 = vld [vmem:[#allocation2 + $0x60] sm:$0xf]  ;;  %v338_v39 = vld [vmem:[#allocation2 + $0x74] sm:$0x1] }
  0x4f   : > { %v585_v9 = vor.u32 %v583_v63, %v582_v57  ;;  %v586_v10 = vrot.slane %v582_v57, 4  ;;  %v1152_v14 = vsel %vm5256_vm9, %v1147_v0, %v1151_v55  ;;  %v1165_v15 = vrot.slane %v1163_v2, 5  ;;  %830 = vst [vmem:[#allocation2 + $0x5c] sm:$0x1] %v829_v8  ;;  %v237_v36 = vld [vmem:[%s5244_s21 + $0x90] sm:$0xff]  ;;  %v238_v60 = vld [vmem:[%s5244_s21 + $0x98] sm:$0xff] }
  0x50   : > { %v1169_v16 = vrot.slane %v1167_v3, 4  ;;  %v5418_v17 = vrot.slane %v588_v5, 7  ;;  %1415 = vrot.lane.b32.xlu1 %v1152_v14, %s5164_s22  ;;  %v1161_v18 = vrot.slane %v1160_v6, 4  ;;  %v591_v19 = vshll.u32 %v5005_v35, 16  ;;  %v291_v61 = vld [vmem:[#allocation2 + $0x78] sm:$0x1] }
  0x51   : > { %v832_v43 = vsel %vm5262_vm10, %v585_v9, %v831_v11  ;;  %v336_v20 = vsel %vm5226_vm7, 0, %v335_v59  ;;  %v289_v49 = vsel %vm5214_vm4, 0, %v288_v13  ;;  %v597_v27 = vshrl.u32 %v5401_v56, 16  ;;  %v341_v14 = vld [vmem:[#allocation2 + $0x80] sm:$0x1] }
  0x52   : > { %v1170_v21 = vor.u32 %v1169_v16, %v1165_v15  ;;  %833 = vst [vmem:[#allocation2 + $0x60] sm:$0xf] %v832_v43  ;;  %337 = vst [vmem:[#allocation2 + $0x68] sm:$0x1] %v336_v20  ;;  %v595_v46 = vrot.slane %v5418_v17, 4  ;;  %v1166_v23 = vsel %vm5256_vm9, %v1161_v18, %v1165_v15  ;;  %v593_v26 = vor.u32 %v591_v19, %v5418_v17  ;;  %v239_v43 = vld [vmem:[%s5244_s21 + $0xa0] sm:$0xff] }
  0x53   : > { %v978_v24 = vld [vmem:[#allocation2 + $0x50] sm:$0x1]  ;;  %v980_v25 = vld [vmem:[#allocation2 + $0x58] sm:$0xf]  ;;  %290 = vst [vmem:[#allocation2 + $0x6c] sm:$0x1] %v289_v49  ;;  %1417 = vrot.lane.b32.xlu0 %v1166_v23, %s5164_s22  ;;  %v5446_v3 = vpack.c.bf16 %v237_v36, %v237_v36  ;;  %v5009_v23 = vpack.c.bf16 %v238_v60, %v238_v60 }
  0x54   : > { %v600_v28 = vshll.u32 %v5401_v56, 16  ;;  %v1171_v29 = vrot.slane %v1170_v21, 4  ;;  %v1173_v30 = vshll.u32 %v978_v24, 16  ;;  %v979_v31 = vld [vmem:[#allocation2 + $0x54] sm:$0xf]  ;;  %v1187_v32 = vshll.u32 %v980_v25, 16 }
  0x55   : > { %v1191_v33 = vshrl.u32 %v980_v25, 16  ;;  %v1178_v34 = vshrl.u32 %v979_v31, 16  ;;  %v1181_v35 = vshll.u32 %v979_v31, 16  ;;  %v594_v37 = vsel %vm5268_vm11, %v586_v10, %v593_v26  ;;  %v894_v15 = vld [vmem:[#allocation2] sm:$0xf]  ;;  %v240_v24 = vld [vmem:[%s5244_s21 + $0xa8] sm:$0xff] }
  0x56   : > { %v599_v38 = vrot.slane %v597_v27, 7  ;;  %v1175_v40 = vrot.slane %v1173_v30, 5  ;;  %v1189_v42 = vrot.slane %v1187_v32, 5  ;;  %834 = vst.msk [vmem:[#allocation2 + $0x64] sm:$0xf] %vm251_vm0, %v594_v37  ;;  %v605_v56 = vshrl.u32 %v5007_v22, 16 }
  0x57   : > { %v1193_v44 = vrot.slane %v1191_v33, 4  ;;  %v1180_v45 = vrot.slane %v1178_v34, 4  ;;  %v1183_v50 = vrot.slane %v1181_v35, 5  ;;  %v981_v51 = vld [vmem:[#allocation2 + $0x5c] sm:$0x1]  ;;  %v608_v0 = vshll.u32 %v5007_v22, 16 }
  0x58   : > { %v602_v52 = vor.u32 %v600_v28, %v599_v38  ;;  %v603_v54 = vrot.slane %v599_v38, 4  ;;  %v1176_v47 = vsel %vm5256_vm9, %v1171_v29, %v1175_v40  ;;  %v1197_v58 = vshll.u32 %v981_v51, 16  ;;  %926 = vst.msk [vmem:[#allocation3] sm:$0xf] %vm251_vm0, %v894_v15  ;;  %v896_v20 = vld [vmem:[#allocation2 + $0xc] sm:$0xf] }
  0x59   : > { %v1194_v55 = vor.u32 %v1193_v44, %v1189_v42  ;;  %v5440_v59 = vrot.slane %v605_v56, 7  ;;  %1419 = vrot.lane.b32.xlu1 %v1176_v47, %s5164_s22  ;;  %v1184_v62 = vor.u32 %v1183_v50, %v1180_v45  ;;  %v982_v57 = vld [vmem:[#allocation2 + $0x60] sm:$0xf]  ;;  %v835_v63 = vld [vmem:[#allocation2 + $0x68] sm:$0x1]  ;;  %v339_v2 = vsel %vm5226_vm7, 0, %v338_v39 }
  0x5a   : > { %v1199_v5 = vrot.slane %v1197_v58, 5  ;;  %v1202_v6 = vshrl.u32 %v982_v57, 16  ;;  %v1205_v8 = vshll.u32 %v982_v57, 16  ;;  %v838_v9 = vld [vmem:[#allocation2 + $0x6c] sm:$0xf]  ;;  %v836_v11 = vsel %vm5214_vm4, %v595_v46, %v835_v63  ;;  %v241_v30 = vld [vmem:[%s5244_s21 + $0xb0] sm:$0xff] }
  0x5b   : > { %v1195_v4 = vrot.slane %v1194_v55, 4  ;;  %340 = vst [vmem:[#allocation2 + $0x74] sm:$0x1] %v339_v2  ;;  %v1185_v10 = vrot.slane %v1184_v62, 4  ;;  %v610_v12 = vor.u32 %v608_v0, %v5440_v59  ;;  %v839_v13 = vsel %vm5262_vm10, %v602_v52, %v838_v9  ;;  %837 = vst [vmem:[#allocation2 + $0x68] sm:$0x1] %v836_v11 }
  0x5c   : > { %v1204_v17 = vrot.slane %v1202_v6, 4  ;;  %v1207_v18 = vrot.slane %v1205_v8, 5  ;;  %840 = vst [vmem:[#allocation2 + $0x6c] sm:$0xf] %v839_v13  ;;  %v612_v19 = vrot.slane %v5440_v59, 4  ;;  %v292_v22 = vsel %vm5214_vm4, 0, %v291_v61 }
  0x5d   : > { %v1200_v16 = vsel %vm5256_vm9, %v1195_v4, %v1199_v5  ;;  %v1190_v21 = vsel %vm5256_vm9, %v1185_v10, %v1189_v42  ;;  %v983_v46 = vld [vmem:[#allocation2 + $0x64] sm:$0xf]  ;;  %v611_v49 = vsel %vm5268_vm11, %v603_v54, %v610_v12  ;;  %928 = vst.msk [vmem:[#allocation3 + $0x8] sm:$0xf] %vm251_vm0, %v896_v20  ;;  %293 = vst [vmem:[#allocation2 + $0x78] sm:$0x1] %v292_v22 }
  0x5e   : > { %1423 = vrot.lane.b32.xlu1 %v1200_v16, %s5164_s22  ;;  %v294_v25 = vld [vmem:[#allocation2 + $0x84] sm:$0x1]  ;;  %1421 = vrot.lane.b32.xlu0 %v1190_v21, %s5164_s22  ;;  %v1208_v26 = vor.u32 %v1207_v18, %v1204_v17  ;;  %v1211_v27 = vshll.u32 %v983_v46, 16  ;;  %v1215_v28 = vshrl.u32 %v983_v46, 16  ;;  %841 = vst.msk [vmem:[#allocation2 + $0x70] sm:$0xf] %vm251_vm0, %v611_v49  ;;  %v5010_v50 = vpack.c.bf16 %v239_v43, %v239_v43 }
  0x5f   : > { %v614_v29 = vshrl.u32 %v5446_v3, 16  ;;  %v895_v31 = vld [vmem:[#allocation2 + $0x4] sm:$0xf]  ;;  %v617_v32 = vshll.u32 %v5446_v3, 16  ;;  %v622_v33 = vshrl.u32 %v5009_v23, 16  ;;  %v625_v34 = vshll.u32 %v5009_v23, 16 }
  0x60   : > { %v342_v35 = vsel %vm5226_vm7, 0, %v341_v14  ;;  %927 = vst.msk [vmem:[#allocation3 + $0x4] sm:$0xf] %vm251_vm0, %v895_v31  ;;  %v897_v37 = vld [vmem:[#allocation2 + $0x10] sm:$0xf]  ;;  %v1209_v38 = vrot.slane %v1208_v26, 4  ;;  %v5478_v51 = vpack.c.bf16 %v240_v24, %v240_v24  ;;  %v5488_v3 = vpack.c.bf16 %v241_v30, %v241_v30 }
  0x61   : > { %v1213_v39 = vrot.slane %v1211_v27, 5  ;;  %v1217_v40 = vrot.slane %v1215_v28, 4  ;;  %v616_v42 = vrot.slane %v614_v29, 7  ;;  %343 = vst [vmem:[#allocation2 + $0x80] sm:$0x1] %v342_v35  ;;  %v624_v36 = vrot.slane %v622_v33, 7 }
  0x62   : > { %929 = vst.msk [vmem:[#allocation3 + $0xc] sm:$0xf] %vm251_vm0, %v897_v37  ;;  %v898_v44 = vld [vmem:[#allocation2 + $0x18] sm:$0xf]  ;;  %v842_v56 = vld [vmem:[#allocation2 + $0x74] sm:$0x1] }
  0x63   : > { %v295_v45 = vsel %vm5214_vm4, 0, %v294_v25  ;;  %930 = vst.msk [vmem:[#allocation3 + $0x10] sm:$0xf] %vm251_vm0, %v898_v44  ;;  %v899_v52 = vld [vmem:[#allocation2 + $0x1c] sm:$0xf]  ;;  %v1214_v54 = vsel %vm5256_vm9, %v1209_v38, %v1213_v39  ;;  %v1218_v47 = vor.u32 %v1217_v40, %v1213_v39  ;;  %v843_v55 = vsel %vm5214_vm4, %v612_v19, %v842_v56 }
  0x64   : > { %v619_v58 = vor.u32 %v617_v32, %v616_v42  ;;  %296 = vst [vmem:[#allocation2 + $0x84] sm:$0x1] %v295_v45  ;;  %v242_v59 = vld [vmem:[%s5244_s21 + $0xb8] sm:$0xff]  ;;  %931 = vst.msk [vmem:[#allocation3 + $0x14] sm:$0xf] %vm251_vm0, %v899_v52  ;;  %1425 = vrot.lane.b32.xlu0 %v1214_v54, %s5164_s22  ;;  %v620_v63 = vrot.slane %v616_v42, 4  ;;  %v627_v0 = vor.u32 %v625_v34, %v624_v36 }
  0x65   : > { %v900_v60 = vld [vmem:[#allocation2 + $0x24] sm:$0xf]  ;;  %v901_v61 = vld [vmem:[#allocation2 + $0x28] sm:$0xf]  ;;  %v985_v57 = vld [vmem:[#allocation2 + $0x6c] sm:$0xf]  ;;  %v5494_v15 = vpack.c.bf16 %v242_v59, %v242_v59 }
  0x66   : > { %v984_v62 = vld [vmem:[#allocation2 + $0x68] sm:$0x1]  ;;  %844 = vst [vmem:[#allocation2 + $0x74] sm:$0x1] %v843_v55  ;;  %v629_v2 = vrot.slane %v624_v36, 4  ;;  %v1219_v4 = vrot.slane %v1218_v47, 4  ;;  %v628_v10 = vsel %vm5268_vm11, %v620_v63, %v627_v0 }
  0x67   : > { %932 = vst.msk [vmem:[#allocation3 + $0x18] sm:$0xf] %vm251_vm0, %v900_v60  ;;  %933 = vst.msk [vmem:[#allocation3 + $0x1c] sm:$0xf] %vm251_vm0, %v901_v61  ;;  %v1221_v5 = vshll.u32 %v984_v62, 16  ;;  %v1226_v6 = vshrl.u32 %v985_v57, 16 }
  0x68   : > { %v1229_v8 = vshll.u32 %v985_v57, 16  ;;  %v986_v9 = vld [vmem:[#allocation2 + $0x70] sm:$0xf]  ;;  %v845_v11 = vld [vmem:[#allocation2 + $0x78] sm:$0xf]  ;;  %v631_v12 = vshrl.u32 %v5010_v50, 16 }
  0x69   : > { %v634_v13 = vshll.u32 %v5010_v50, 16  ;;  %v344_v14 = vld [vmem:[#allocation2 + $0x8c] sm:$0x1]  ;;  %v1223_v16 = vrot.slane %v1221_v5, 5  ;;  %v1228_v17 = vrot.slane %v1226_v6, 4  ;;  %v1235_v19 = vshll.u32 %v986_v9, 16 }
  0x6a   : > { %v1231_v18 = vrot.slane %v1229_v8, 5  ;;  %848 = vst.msk [vmem:[#allocation2 + $0x7c] sm:$0xf] %vm251_vm0, %v628_v10  ;;  %v297_v43 = vld [vmem:[#allocation2 + $0x90] sm:$0x1]  ;;  %v1239_v20 = vshrl.u32 %v986_v9, 16  ;;  %v846_v21 = vsel %vm5262_vm10, %v619_v58, %v845_v11 }
  0x6b   : > { %v849_v46 = vld [vmem:[#allocation2 + $0x80] sm:$0x1]  ;;  %v633_v49 = vrot.slane %v631_v12, 7  ;;  %v639_v22 = vshrl.u32 %v5478_v51, 16  ;;  %v1224_v23 = vsel %vm5256_vm9, %v1219_v4, %v1223_v16  ;;  %v1237_v25 = vrot.slane %v1235_v19, 5 }
  0x6c   : > { %v1232_v24 = vor.u32 %v1231_v18, %v1228_v17  ;;  %847 = vst [vmem:[#allocation2 + $0x78] sm:$0xf] %v846_v21  ;;  %v850_v26 = vsel %vm5214_vm4, %v629_v2, %v849_v46  ;;  %1427 = vrot.lane.b32.xlu1 %v1224_v23, %s5164_s22  ;;  %v1241_v27 = vrot.slane %v1239_v20, 4  ;;  %v852_v31 = vld [vmem:[#allocation2 + $0x84] sm:$0xf]  ;;  %v642_v34 = vshll.u32 %v5478_v51, 16 }
  0x6d   : > { %851 = vst [vmem:[#allocation2 + $0x80] sm:$0x1] %v850_v26  ;;  %v636_v28 = vor.u32 %v634_v13, %v633_v49  ;;  %v637_v29 = vrot.slane %v633_v49, 4  ;;  %v5505_v30 = vrot.slane %v639_v22, 7  ;;  %v987_v33 = vld [vmem:[#allocation2 + $0x74] sm:$0x1] }
  0x6e   : > { %v1233_v32 = vrot.slane %v1232_v24, 4  ;;  %v345_v35 = vsel %vm5226_vm7, 0, %v344_v14  ;;  %v298_v37 = vsel %vm5214_vm4, 0, %v297_v43  ;;  %v1242_v38 = vor.u32 %v1241_v27, %v1237_v25  ;;  %v347_v44 = vld [vmem:[#allocation2 + $0x98] sm:$0x1]  ;;  %v243_v5 = vld [vmem:[%s5244_s21 + $0xc0] sm:$0xff] }
  0x6f   : > { %v1245_v39 = vshll.u32 %v987_v33, 16  ;;  %v853_v40 = vsel %vm5262_vm10, %v636_v28, %v852_v31  ;;  %346 = vst [vmem:[#allocation2 + $0x8c] sm:$0x1] %v345_v35  ;;  %v646_v42 = vrot.slane %v5505_v30, 4  ;;  %299 = vst [vmem:[#allocation2 + $0x90] sm:$0x1] %v298_v37  ;;  %v644_v45 = vor.u32 %v642_v34, %v5505_v30 }
  0x70   : > { %v902_v56 = vld [vmem:[#allocation2 + $0x30] sm:$0xf]  ;;  %v1238_v36 = vsel %vm5256_vm9, %v1233_v32, %v1237_v25  ;;  %854 = vst [vmem:[#allocation2 + $0x84] sm:$0xf] %v853_v40  ;;  %v648_v50 = vshrl.u32 %v5488_v3, 16  ;;  %v651_v51 = vshll.u32 %v5488_v3, 16  ;;  %v5014_v46 = vpack.c.bf16 %v243_v5, %v243_v5 }
  0x71   : > { %v300_v52 = vld [vmem:[#allocation2 + $0x9c] sm:$0x1]  ;;  %934 = vst.msk [vmem:[#allocation3 + $0x20] sm:$0xf] %vm251_vm0, %v902_v56  ;;  %v903_v54 = vld [vmem:[#allocation2 + $0x34] sm:$0xf]  ;;  %1429 = vrot.lane.b32.xlu0 %v1238_v36, %s5164_s22  ;;  %v645_v57 = vsel %vm5268_vm11, %v637_v29, %v644_v45 }
  0x72   : > { %v1243_v47 = vrot.slane %v1242_v38, 4  ;;  %v1247_v55 = vrot.slane %v1245_v39, 5  ;;  %v989_v58 = vld [vmem:[#allocation2 + $0x7c] sm:$0xf]  ;;  %v656_v59 = vshrl.u32 %v5494_v15, 16  ;;  %v659_v60 = vshll.u32 %v5494_v15, 16 }
  0x73   : > { %935 = vst.msk [vmem:[#allocation3 + $0x24] sm:$0xf] %vm251_vm0, %v903_v54  ;;  %v1259_v61 = vshll.u32 %v989_v58, 16  ;;  %v1263_v62 = vshrl.u32 %v989_v58, 16  ;;  %v650_v63 = vrot.slane %v648_v50, 7  ;;  %v348_v4 = vsel %vm5226_vm7, 0, %v347_v44 }
  0x74   : > { %v1248_v0 = vsel %vm5256_vm9, %v1243_v47, %v1247_v55  ;;  %v988_v2 = vld [vmem:[#allocation2 + $0x78] sm:$0xf]  ;;  %855 = vst.msk [vmem:[#allocation2 + $0x88] sm:$0xf] %vm251_vm0, %v645_v57  ;;  %v658_v3 = vrot.slane %v656_v59, 7  ;;  %v301_v6 = vsel %vm5214_vm4, 0, %v300_v52 }
  0x75   : > { %1431 = vrot.lane.b32.xlu1 %v1248_v0, %s5164_s22  ;;  %v1250_v8 = vshrl.u32 %v988_v2, 16  ;;  %v1253_v9 = vshll.u32 %v988_v2, 16  ;;  %v1261_v10 = vrot.slane %v1259_v61, 5  ;;  %v990_v11 = vld [vmem:[#allocation2 + $0x80] sm:$0x1]  ;;  %v1265_v12 = vrot.slane %v1263_v62, 4 }
  0x76   : > { %349 = vst [vmem:[#allocation2 + $0x98] sm:$0x1] %v348_v4  ;;  %302 = vst [vmem:[#allocation2 + $0x9c] sm:$0x1] %v301_v6  ;;  %v1269_v13 = vshll.u32 %v990_v11, 16  ;;  %v653_v14 = vor.u32 %v651_v51, %v650_v63  ;;  %v654_v15 = vrot.slane %v650_v63, 4  ;;  %v661_v16 = vor.u32 %v659_v60, %v658_v3 }
  0x77   : > { %v244_v17 = vld [vmem:[%s5244_s21 + $0xc8] sm:$0xff]  ;;  %v1252_v18 = vrot.slane %v1250_v8, 4  ;;  %v1255_v19 = vrot.slane %v1253_v9, 5  ;;  %v1266_v43 = vor.u32 %v1265_v12, %v1261_v10  ;;  %v859_v21 = vld [vmem:[#allocation2 + $0x90] sm:$0xf]  ;;  %v663_v30 = vrot.slane %v658_v3, 4 }
  0x78   : > { %v856_v20 = vld [vmem:[#allocation2 + $0x8c] sm:$0x1]  ;;  %v1271_v49 = vrot.slane %v1269_v13, 5  ;;  %v991_v22 = vld [vmem:[#allocation2 + $0x84] sm:$0xf]  ;;  %v662_v24 = vsel %vm5268_vm11, %v654_v15, %v661_v16  ;;  %v860_v25 = vsel %vm5262_vm10, %v653_v14, %v859_v21  ;;  %v5015_v31 = vpack.c.bf16 %v244_v17, %v244_v17  ;;  %v245_v59 = vld [vmem:[%s5244_s21 + $0xd0] sm:$0xff] }
  0x79   : > { %v857_v23 = vsel %vm5214_vm4, %v646_v42, %v856_v20  ;;  %v1256_v26 = vor.u32 %v1255_v19, %v1252_v18  ;;  %v1267_v27 = vrot.slane %v1266_v43, 4  ;;  %v1274_v28 = vshrl.u32 %v991_v22, 16  ;;  %861 = vst [vmem:[#allocation2 + $0x90] sm:$0xf] %v860_v25  ;;  %862 = vst.msk [vmem:[#allocation2 + $0x94] sm:$0xf] %vm251_vm0, %v662_v24 }
  0x7a   : > { %v1277_v29 = vshll.u32 %v991_v22, 16  ;;  %858 = vst [vmem:[#allocation2 + $0x8c] sm:$0x1] %v857_v23  ;;  %v665_v32 = vshrl.u32 %v5014_v46, 16  ;;  %v668_v33 = vshll.u32 %v5014_v46, 16  ;;  %v673_v51 = vshrl.u32 %v5015_v31, 16 }
  0x7b   : > { %v350_v34 = vld [vmem:[#allocation2 + $0xa4] sm:$0x1]  ;;  %v303_v35 = vld [vmem:[#allocation2 + $0xa8] sm:$0x1]  ;;  %v904_v37 = vld [vmem:[#allocation2 + $0x3c] sm:$0xf]  ;;  %v1272_v39 = vsel %vm5256_vm9, %v1267_v27, %v1271_v49  ;;  %v5016_v12 = vpack.c.bf16 %v245_v59, %v245_v59 }
  0x7c   : > { %v1257_v38 = vrot.slane %v1256_v26, 4  ;;  %v992_v40 = vld [vmem:[#allocation2 + $0x88] sm:$0xf]  ;;  %v1276_v42 = vrot.slane %v1274_v28, 4  ;;  %v1279_v44 = vrot.slane %v1277_v29, 5  ;;  %1435 = vrot.lane.b32.xlu1 %v1272_v39, %s5164_s22  ;;  %v667_v50 = vrot.slane %v665_v32, 7 }
  0x7d   : > { %936 = vst.msk [vmem:[#allocation3 + $0x28] sm:$0xf] %vm251_vm0, %v904_v37  ;;  %v1283_v56 = vshll.u32 %v992_v40, 16  ;;  %v1287_v36 = vshrl.u32 %v992_v40, 16  ;;  %v863_v45 = vld [vmem:[#allocation2 + $0x98] sm:$0x1] }
  0x7e   : > { %v1262_v52 = vsel %vm5256_vm9, %v1257_v38, %v1261_v10  ;;  %v1280_v54 = vor.u32 %v1279_v44, %v1276_v42  ;;  %v864_v47 = vsel %vm5214_vm4, %v663_v30, %v863_v45  ;;  %v676_v55 = vshll.u32 %v5015_v31, 16  ;;  %v866_v58 = vld [vmem:[#allocation2 + $0x9c] sm:$0xf]  ;;  %v905_v0 = vld [vmem:[#allocation2 + $0x40] sm:$0xf]  ;;  %v248_v28 = vld [vmem:[%s5244_s21 + $0xe8] sm:$0xff] }
  0x7f   : > { %v246_v60 = vld [vmem:[%s5244_s21 + $0xd8] sm:$0xff]  ;;  %1433 = vrot.lane.b32.xlu0 %v1262_v52, %s5164_s22  ;;  %v1285_v61 = vrot.slane %v1283_v56, 5  ;;  %v1289_v62 = vrot.slane %v1287_v36, 4  ;;  %865 = vst [vmem:[#allocation2 + $0x98] sm:$0x1] %v864_v47  ;;  %v670_v57 = vor.u32 %v668_v33, %v667_v50  ;;  %v671_v63 = vrot.slane %v667_v50, 4 }
  0x80   : > { %v1281_v2 = vrot.slane %v1280_v54, 4  ;;  %v675_v3 = vrot.slane %v673_v51, 7  ;;  %v351_v4 = vsel %vm5226_vm7, 0, %v350_v34  ;;  %v304_v5 = vsel %vm5214_vm4, 0, %v303_v35  ;;  %937 = vst.msk [vmem:[#allocation3 + $0x2c] sm:$0xf] %vm251_vm0, %v905_v0 }
  0x81   : > { %v993_v6 = vld [vmem:[#allocation2 + $0x8c] sm:$0x1]  ;;  %v1290_v8 = vor.u32 %v1289_v62, %v1285_v61  ;;  %v994_v9 = vld [vmem:[#allocation2 + $0x90] sm:$0xf]  ;;  %v995_v10 = vld [vmem:[#allocation2 + $0x94] sm:$0xf]  ;;  %v867_v11 = vsel %vm5262_vm10, %v670_v57, %v866_v58  ;;  %v5017_v13 = vpack.c.bf16 %v246_v60, %v246_v60  ;;  %v5019_v50 = vpack.c.bf16 %v248_v28, %v248_v28 }
  0x82   : > { %352 = vst [vmem:[#allocation2 + $0xa4] sm:$0x1] %v351_v4  ;;  %305 = vst [vmem:[#allocation2 + $0xa8] sm:$0x1] %v304_v5  ;;  %v1286_v14 = vsel %vm5256_vm9, %v1281_v2, %v1285_v61  ;;  %v1293_v15 = vshll.u32 %v993_v6, 16  ;;  %v1298_v16 = vshrl.u32 %v994_v9, 16  ;;  %v678_v20 = vor.u32 %v676_v55, %v675_v3 }
  0x83   : > { %v1301_v17 = vshll.u32 %v994_v9, 16  ;;  %868 = vst [vmem:[#allocation2 + $0x9c] sm:$0xf] %v867_v11  ;;  %1437 = vrot.lane.b32.xlu0 %v1286_v14, %s5164_s22  ;;  %v1291_v18 = vrot.slane %v1290_v8, 4  ;;  %v1307_v19 = vshll.u32 %v995_v10, 16  ;;  %v1311_v43 = vshrl.u32 %v995_v10, 16 }
  0x84   : > { %v1295_v21 = vrot.slane %v1293_v15, 5  ;;  %v1300_v46 = vrot.slane %v1298_v16, 4  ;;  %v680_v22 = vrot.slane %v675_v3, 4  ;;  %v679_v25 = vsel %vm5268_vm11, %v671_v63, %v678_v20  ;;  %v247_v27 = vld [vmem:[%s5244_s21 + $0xe0] sm:$0xff]  ;;  %v353_v34 = vld [vmem:[#allocation2 + $0xb0] sm:$0x1] }
  0x85   : > { %v1303_v49 = vrot.slane %v1301_v17, 5  ;;  %v1309_v23 = vrot.slane %v1307_v19, 5  ;;  %v1313_v24 = vrot.slane %v1311_v43, 4  ;;  %v682_v26 = vshrl.u32 %v5016_v12, 16  ;;  %869 = vst.msk [vmem:[#allocation2 + $0xa0] sm:$0xf] %vm251_vm0, %v679_v25 }
  0x86   : > { %v1296_v29 = vsel %vm5256_vm9, %v1291_v18, %v1295_v21  ;;  %v996_v31 = vld [vmem:[#allocation2 + $0x98] sm:$0x1]  ;;  %v685_v32 = vshll.u32 %v5016_v12, 16  ;;  %v690_v33 = vshrl.u32 %v5017_v13, 16  ;;  %v693_v39 = vshll.u32 %v5017_v13, 16 }
  0x87   : > { %v1304_v30 = vor.u32 %v1303_v49, %v1300_v46  ;;  %1439 = vrot.lane.b32.xlu1 %v1296_v29, %s5164_s22  ;;  %v1314_v35 = vor.u32 %v1313_v24, %v1309_v23  ;;  %v1317_v37 = vshll.u32 %v996_v31, 16  ;;  %v684_v38 = vrot.slane %v682_v26, 7  ;;  %v906_v40 = vld [vmem:[#allocation2 + $0x48] sm:$0xf]  ;;  %v306_v58 = vld [vmem:[#allocation2 + $0xb4] sm:$0x1] }
  0x88   : > { %v5573_v56 = vrot.slane %v690_v33, 7  ;;  %v5018_v45 = vpack.c.bf16 %v247_v27, %v247_v27  ;;  %938 = vst.msk [vmem:[#allocation3 + $0x30] sm:$0xf] %vm251_vm0, %v906_v40  ;;  %v907_v57 = vld [vmem:[#allocation2 + $0x4c] sm:$0xf]  ;;  %v354_v3 = vsel %vm5226_vm7, 0, %v353_v34 }
  0x89   : > { %v1305_v42 = vrot.slane %v1304_v30, 4  ;;  %v870_v44 = vld [vmem:[#allocation2 + $0xa4] sm:$0x1]  ;;  %v873_v36 = vld [vmem:[#allocation2 + $0xa8] sm:$0xf]  ;;  %v1315_v51 = vrot.slane %v1314_v35, 4  ;;  %v687_v55 = vor.u32 %v685_v32, %v684_v38 }
  0x8a   : > { %v1319_v52 = vrot.slane %v1317_v37, 5  ;;  %v997_v54 = vld [vmem:[#allocation2 + $0x9c] sm:$0xf]  ;;  %v871_v47 = vsel %vm5214_vm4, %v680_v22, %v870_v44  ;;  %v688_v62 = vrot.slane %v684_v38, 4  ;;  %v695_v0 = vor.u32 %v693_v39, %v5573_v56  ;;  %939 = vst.msk [vmem:[#allocation3 + $0x34] sm:$0xf] %vm251_vm0, %v907_v57 }
  0x8b   : > { %v1310_v59 = vsel %vm5256_vm9, %v1305_v42, %v1309_v23  ;;  %v1322_v60 = vshrl.u32 %v997_v54, 16  ;;  %v1325_v61 = vshll.u32 %v997_v54, 16  ;;  %872 = vst [vmem:[#allocation2 + $0xa4] sm:$0x1] %v871_v47  ;;  %v874_v2 = vsel %vm5262_vm10, %v687_v55, %v873_v36  ;;  %v356_v4 = vld [vmem:[#allocation2 + $0xbc] sm:$0x1] }
  0x8c   : > { %1441 = vrot.lane.b32.xlu0 %v1310_v59, %s5164_s22  ;;  %v1320_v63 = vsel %vm5256_vm9, %v1315_v51, %v1319_v52  ;;  %875 = vst [vmem:[#allocation2 + $0xa8] sm:$0xf] %v874_v2  ;;  %355 = vst [vmem:[#allocation2 + $0xb0] sm:$0x1] %v354_v3  ;;  %v307_v8 = vsel %vm5214_vm4, 0, %v306_v58  ;;  %v696_v11 = vsel %vm5268_vm11, %v688_v62, %v695_v0  ;;  %v699_v12 = vshrl.u32 %v5018_v45, 16 }
  0x8d   : > { %1443 = vrot.lane.b32.xlu1 %v1320_v63, %s5164_s22  ;;  %v1324_v5 = vrot.slane %v1322_v60, 4  ;;  %v1327_v6 = vrot.slane %v1325_v61, 5  ;;  %v908_v9 = vld [vmem:[#allocation2 + $0x54] sm:$0xf]  ;;  %v998_v10 = vld [vmem:[#allocation2 + $0xa0] sm:$0xf] }
  0x8e   : > { %308 = vst [vmem:[#allocation2 + $0xb4] sm:$0x1] %v307_v8  ;;  %v702_v13 = vshll.u32 %v5018_v45, 16  ;;  %v707_v14 = vshrl.u32 %v5019_v50, 16  ;;  %940 = vst.msk [vmem:[#allocation3 + $0x38] sm:$0xf] %vm251_vm0, %v908_v9 }
  0x8f   : > { %v1328_v15 = vor.u32 %v1327_v6, %v1324_v5  ;;  %v1331_v16 = vshll.u32 %v998_v10, 16  ;;  %v1335_v17 = vshrl.u32 %v998_v10, 16  ;;  %876 = vst.msk [vmem:[#allocation2 + $0xac] sm:$0xf] %vm251_vm0, %v696_v11  ;;  %v710_v18 = vshll.u32 %v5019_v50, 16 }
  0x90   : > { %v701_v19 = vrot.slane %v699_v12, 7  ;;  %v709_v43 = vrot.slane %v707_v14, 7  ;;  %v357_v20 = vsel %vm5226_vm7, 0, %v356_v4  ;;  %v909_v21 = vld [vmem:[#allocation2 + $0x58] sm:$0xf]  ;;  %v697_v24 = vrot.slane %v5573_v56, 4 }
  0x91   : > { %v1329_v46 = vrot.slane %v1328_v15, 4  ;;  %v1333_v49 = vrot.slane %v1331_v16, 5  ;;  %v1337_v22 = vrot.slane %v1335_v17, 4  ;;  %358 = vst [vmem:[#allocation2 + $0xbc] sm:$0x1] %v357_v20  ;;  %vm1618_vm12 = vcmask 1042432  }
  0x92   : > { %941 = vst.msk [vmem:[#allocation3 + $0x3c] sm:$0xf] %vm251_vm0, %v909_v21  ;;  %v999_v23 = vld [vmem:[#allocation2 + $0xa4] sm:$0x1]  ;;  %v704_v25 = vor.u32 %v702_v13, %v701_v19  ;;  %v705_v26 = vrot.slane %v701_v19, 4  ;;  %v712_v27 = vor.u32 %v710_v18, %v709_v43  ;;  %v714_v35 = vrot.slane %v709_v43, 4 }
  0x93   : > { %v1334_v28 = vsel %vm5256_vm9, %v1329_v46, %v1333_v49  ;;  %v1338_v29 = vor.u32 %v1337_v22, %v1333_v49  ;;  %v1341_v30 = vshll.u32 %v999_v23, 16  ;;  %v910_v31 = vld [vmem:[#allocation2 + $0x60] sm:$0xf]  ;;  %v1000_v32 = vld [vmem:[#allocation2 + $0xa8] sm:$0xf]  ;;  %vm1619_vm13 = vcmask 1046532  }
  0x94   : > { %1445 = vrot.lane.b32.xlu0 %v1334_v28, %s5164_s22  ;;  %v877_v33 = vld [vmem:[#allocation2 + $0xb0] sm:$0x1]  ;;  %v713_v34 = vsel %vm5268_vm11, %v705_v26, %v712_v27  ;;  %942 = vst.msk [vmem:[#allocation3 + $0x40] sm:$0xf] %vm251_vm0, %v910_v31  ;;  %v1346_v39 = vshrl.u32 %v1000_v32, 16  ;;  %v1349_v40 = vshll.u32 %v1000_v32, 16  ;;  %vm5631_vm14 = vmor %vm1618_vm12, %vm1619_vm13 }
  0x95   : > { %v1339_v37 = vrot.slane %v1338_v29, 4  ;;  %v1343_v38 = vrot.slane %v1341_v30, 5  ;;  %v880_v42 = vld [vmem:[#allocation2 + $0xb4] sm:$0xf]  ;;  %883 = vst.msk [vmem:[#allocation2 + $0xb8] sm:$0xf] %vm251_vm0, %v713_v34  ;;  %v878_v56 = vsel %vm5214_vm4, %v697_v24, %v877_v33 }
  0x96   : > { %v1001_v44 = vld [vmem:[#allocation2 + $0xac] sm:$0xf]  ;;  %v881_v36 = vsel %vm5262_vm10, %v704_v25, %v880_v42  ;;  %v1348_v50 = vrot.slane %v1346_v39, 4  ;;  %v1351_v51 = vrot.slane %v1349_v40, 5  ;;  %879 = vst [vmem:[#allocation2 + $0xb0] sm:$0x1] %v878_v56  ;;  %v5624_v25 = vpop.permute.xlu0 %1393 }
  0x97   : > { %v1344_v45 = vsel %vm5256_vm9, %v1339_v37, %v1343_v38  ;;  %v1355_v52 = vshll.u32 %v1001_v44, 16  ;;  %882 = vst [vmem:[#allocation2 + $0xb4] sm:$0xf] %v881_v36  ;;  %v1359_v54 = vshrl.u32 %v1001_v44, 16  ;;  %v911_v60 = vld [vmem:[#allocation2 + $0x64] sm:$0xf] }
  0x98   : > { %1447 = vrot.lane.b32.xlu1 %v1344_v45, %s5164_s22  ;;  %v884_v47 = vld [vmem:[#allocation2 + $0xbc] sm:$0x1]  ;;  %v1352_v55 = vor.u32 %v1351_v51, %v1348_v50  ;;  %943 = vst.msk [vmem:[#allocation3 + $0x44] sm:$0xf] %vm251_vm0, %v911_v60  ;;  %v912_v57 = vld [vmem:[#allocation2 + $0x6c] sm:$0xf] }
  0x99   : > { %v1357_v58 = vrot.slane %v1355_v52, 5  ;;  %v885_v59 = vsel %vm5214_vm4, %v714_v35, %v884_v47  ;;  %v1361_v61 = vrot.slane %v1359_v54, 4  ;;  %944 = vst.msk [vmem:[#allocation3 + $0x48] sm:$0xf] %vm251_vm0, %v912_v57  ;;  %v1523_v5 = vld [vmem:[#allocation2 + $0x4] sm:$0xf] }
  0x9a   : > { %886 = vst [vmem:[#allocation2 + $0xbc] sm:$0x1] %v885_v59  ;;  %v1353_v62 = vrot.slane %v1352_v55, 4  ;;  %v913_v6 = vld [vmem:[#allocation2 + $0x70] sm:$0xf]  ;;  %v1623_v21 = vrot.slane %v1523_v5, 5 }
  0x9b   : > { %v1362_v63 = vor.u32 %v1361_v61, %v1357_v58  ;;  %945 = vst.msk [vmem:[#allocation3 + $0x4c] sm:$0xf] %vm251_vm0, %v913_v6  ;;  %v1522_v16 = vld [vmem:[#allocation2] sm:$0xe]  ;;  %v1524_v17 = vld [vmem:[#allocation2 + $0x8] sm:$0x1] }
  0x9c   : > { %v1004_v0 = vld [vmem:[#allocation2 + $0xb8] sm:$0xf]  ;;  %v1358_v2 = vsel %vm5256_vm9, %v1353_v62, %v1357_v58  ;;  %v1526_v22 = vld [vmem:[#allocation2 + $0x10] sm:$0xf]  ;;  %v915_v27 = vld [vmem:[#allocation2 + $0x7c] sm:$0xf]  ;;  %v1396_v58 = vpop.permute.xlu0 %1395 }
  0x9d   : > { %v1379_v3 = vshll.u32 %v1004_v0, 16  ;;  %v1383_v4 = vshrl.u32 %v1004_v0, 16  ;;  %1449 = vrot.lane.b32.xlu0 %v1358_v2, %s5164_s22  ;;  %v1002_v8 = vld [vmem:[#allocation2 + $0xb0] sm:$0x1]  ;;  %v1363_v9 = vrot.slane %v1362_v63, 4  ;;  %v4873_v30 = vrot.slane %v1522_v16, 9 }
  0x9e   : > { %v1003_v10 = vld [vmem:[#allocation2 + $0xb4] sm:$0xf]  ;;  %v1365_v11 = vshll.u32 %v1002_v8, 16  ;;  %v914_v26 = vld [vmem:[#allocation2 + $0x78] sm:$0xf]  ;;  %v1625_v34 = vrot.slane %v1623_v21, 4 }
  0x9f   : > { %v1370_v12 = vshrl.u32 %v1003_v10, 16  ;;  %v1373_v13 = vshll.u32 %v1003_v10, 16  ;;  %v1381_v14 = vrot.slane %v1379_v3, 5  ;;  %v1385_v15 = vrot.slane %v1383_v4, 4  ;;  %v1525_v31 = vld [vmem:[#allocation2 + $0xc] sm:$0xe] }
  0xa0   : > { %v1367_v18 = vrot.slane %v1365_v11, 5  ;;  %946 = vst.msk [vmem:[#allocation3 + $0x50] sm:$0xf] %vm251_vm0, %v914_v26  ;;  %947 = vst.msk [vmem:[#allocation3 + $0x54] sm:$0xf] %vm251_vm0, %v915_v27  ;;  %v1626_v35 = vrot.slane %v1524_v17, 5  ;;  %v1624_v36 = vsel %vm5631_vm14, %v4873_v30, %v1623_v21 }
  0xa1   : > { %v1372_v19 = vrot.slane %v1370_v12, 4  ;;  %v1375_v43 = vrot.slane %v1373_v13, 5  ;;  %v1005_v20 = vld [vmem:[#allocation2 + $0xbc] sm:$0x1]  ;;  %v1386_v46 = vor.u32 %v1385_v15, %v1381_v14  ;;  %v1630_v37 = vrot.slane %v1526_v22, 5 }
  0xa2   : > { %v1389_v49 = vshll.u32 %v1005_v20, 16  ;;  %v1368_v23 = vsel %vm5256_vm9, %v1363_v9, %v1367_v18  ;;  %v1527_v38 = vld [vmem:[#allocation2 + $0x14] sm:$0x1]  ;;  %v1529_v40 = vld [vmem:[#allocation2 + $0x1c] sm:$0xf]  ;;  %v4874_v45 = vrot.slane %v1525_v31, 9  ;;  %v1627_v52 = vsel %vm5631_vm14, %v1625_v34, %v1626_v35 }
  0xa3   : > { %v1376_v24 = vor.u32 %v1375_v43, %v1372_v19  ;;  %1451 = vrot.lane.b32.xlu1 %v1368_v23, %s5164_s22  ;;  %v1387_v28 = vrot.slane %v1386_v46, 4  ;;  %v916_v42 = vld [vmem:[#allocation2 + $0x84] sm:$0xf]  ;;  %v917_v44 = vld [vmem:[#allocation2 + $0x88] sm:$0xf]  ;;  %v1632_v54 = vrot.slane %v1630_v37, 4 }
  0xa4   : > { %v1391_v29 = vrot.slane %v1389_v49, 5  ;;  %948 = vst.msk [vmem:[#allocation3 + $0x58] sm:$0xf] %vm251_vm0, %v916_v42  ;;  %949 = vst.msk [vmem:[#allocation3 + $0x5c] sm:$0xf] %vm251_vm0, %v917_v44  ;;  %v1633_v47 = vrot.slane %v1527_v38, 5  ;;  %v1631_v57 = vsel %vm5631_vm14, %v4874_v45, %v1630_v37  ;;  %v1398_v2 = vpop.permute.xlu1 %1397 }
  0xa5   : > { %v1377_v32 = vrot.slane %v1376_v24, 4  ;;  %v1528_v50 = vld [vmem:[#allocation2 + $0x18] sm:$0xe]  ;;  %v918_v51 = vld [vmem:[#allocation2 + $0x90] sm:$0xf]  ;;  %v1637_v55 = vrot.slane %v1529_v40, 5 }
  0xa6   : > { %v1392_v39 = vsel %vm5256_vm9, %v1387_v28, %v1391_v29  ;;  %950 = vst.msk [vmem:[#allocation3 + $0x60] sm:$0xf] %vm251_vm0, %v918_v51  ;;  %v919_v59 = vld [vmem:[#allocation2 + $0x94] sm:$0xf]  ;;  %v1530_v60 = vld [vmem:[#allocation2 + $0x20] sm:$0x1]  ;;  %v1634_v4 = vsel %vm5631_vm14, %v1632_v54, %v1633_v47 }
  0xa7   : > { %v1382_v56 = vsel %vm5256_vm9, %v1377_v32, %v1381_v14  ;;  %1455 = vrot.lane.b32.xlu1 %v1392_v39, %s5164_s22  ;;  %v1532_v61 = vld [vmem:[#allocation2 + $0x28] sm:$0xf]  ;;  %951 = vst.msk [vmem:[#allocation3 + $0x64] sm:$0xf] %vm251_vm0, %v919_v59  ;;  %v1531_v62 = vld [vmem:[#allocation2 + $0x24] sm:$0xe]  ;;  %v1402_v11 = vpop.permute.xlu0 %1401 }
  0xa8   : > { %1453 = vrot.lane.b32.xlu0 %v1382_v56, %s5164_s22  ;;  %v4875_v63 = vrot.slane %v1528_v50, 9  ;;  %v1533_v0 = vld [vmem:[#allocation2 + $0x2c] sm:$0x1]  ;;  %v920_v3 = vld [vmem:[#allocation2 + $0x9c] sm:$0xf]  ;;  %v1639_v5 = vrot.slane %v1637_v55, 4  ;;  %v1400_v14 = vpop.permute.xlu1 %1399 }
  0xa9   : > { %v1640_v6 = vrot.slane %v1530_v60, 5  ;;  %v1644_v8 = vrot.slane %v1532_v61, 5  ;;  %952 = vst.msk [vmem:[#allocation3 + $0x68] sm:$0xf] %vm251_vm0, %v920_v3  ;;  %v921_v9 = vld [vmem:[#allocation2 + $0xa0] sm:$0xf] }
  0xaa   : > { %v1535_v10 = vld [vmem:[#allocation2 + $0x34] sm:$0xf]  ;;  %953 = vst.msk [vmem:[#allocation3 + $0x6c] sm:$0xf] %vm251_vm0, %v921_v9  ;;  %v4876_v12 = vrot.slane %v1531_v62, 9  ;;  %v1647_v13 = vrot.slane %v1533_v0, 5  ;;  %v1638_v16 = vsel %vm5631_vm14, %v4875_v63, %v1637_v55 }
  0xab   : > { %1735 = vrot.lane.b32.xlu1 %v1627_v52, %s5165_s23  ;;  %vm1489_vm15 = vcmask 60448   ;;  %v922_v15 = vld [vmem:[#allocation2 + $0xa8] sm:$0xf]  ;;  %v1641_v17 = vsel %vm5631_vm14, %v1639_v5, %v1640_v6  ;;  %v1646_v18 = vrot.slane %v1644_v8, 4  ;;  %v1534_v19 = vld [vmem:[#allocation2 + $0x30] sm:$0xe] }
  0xac   : > { %1733 = vrot.lane.b32.xlu0 %v1624_v36, %s5165_s23  ;;  %v1651_v43 = vrot.slane %v1535_v10, 5  ;;  %1490 = vst.msk [vmem:[#allocation3] sm:$0xf] %vm1489_vm15, %v5624_v25  ;;  %1492 = vst.msk [vmem:[#allocation3 + $0x8] sm:$0xf] %vm1489_vm15, %v1398_v2  ;;  %v1645_v22 = vsel %vm5631_vm14, %v4876_v12, %v1644_v8  ;;  %v4877_v23 = vrot.slane %v1534_v19, 9  ;;  %v1404_v24 = vpop.permute.xlu1 %1403 }
  0xad   : > { %1491 = vst.msk [vmem:[#allocation3 + $0x4] sm:$0xf] %vm1489_vm15, %v1396_v58  ;;  %1493 = vst.msk [vmem:[#allocation3 + $0xc] sm:$0xf] %vm1489_vm15, %v1400_v14  ;;  %v923_v20 = vld [vmem:[#allocation2 + $0xac] sm:$0xf]  ;;  %v1648_v26 = vsel %vm5631_vm14, %v1646_v18, %v1647_v13 }
  0xae   : > { %1494 = vst.msk [vmem:[#allocation3 + $0x10] sm:$0xf] %vm1489_vm15, %v1402_v11  ;;  %v1536_v21 = vld [vmem:[#allocation2 + $0x38] sm:$0x1]  ;;  %v1538_v46 = vld [vmem:[#allocation2 + $0x40] sm:$0xf]  ;;  %v1406_v34 = vpop.permute.xlu0 %1405  ;;  %v1652_v35 = vsel %vm5631_vm14, %v4877_v23, %v1651_v43 }
  0xaf   : > { %1739 = vrot.lane.b32.xlu1 %v1634_v4, %s5165_s23  ;;  %954 = vst.msk [vmem:[#allocation3 + $0x70] sm:$0xf] %vm251_vm0, %v922_v15  ;;  %955 = vst.msk [vmem:[#allocation3 + $0x74] sm:$0xf] %vm251_vm0, %v923_v20  ;;  %v924_v49 = vld [vmem:[#allocation2 + $0xb4] sm:$0xf] }
  0xb0   : > { %1737 = vrot.lane.b32.xlu0 %v1631_v57, %s5165_s23  ;;  %956 = vst.msk [vmem:[#allocation3 + $0x78] sm:$0xf] %vm251_vm0, %v924_v49  ;;  %v925_v25 = vld [vmem:[#allocation2 + $0xb8] sm:$0xf]  ;;  %v1653_v27 = vrot.slane %v1651_v43, 4  ;;  %v1654_v28 = vrot.slane %v1536_v21, 5  ;;  %v1408_v38 = vpop.permute.xlu1 %1407 }
  0xb1   : > { %v1537_v29 = vld [vmem:[#allocation2 + $0x3c] sm:$0xe]  ;;  %v1658_v30 = vrot.slane %v1538_v46, 5  ;;  %1495 = vst.msk [vmem:[#allocation3 + $0x14] sm:$0xf] %vm1489_vm15, %v1404_v24  ;;  %vm1829_vm1 = vcmask 93248  }
  0xb2   : > { %957 = vst.msk [vmem:[#allocation3 + $0x7c] sm:$0xf] %vm251_vm0, %v925_v25  ;;  %v1539_v31 = vld [vmem:[#allocation2 + $0x44] sm:$0x1]  ;;  %v1541_v32 = vld [vmem:[#allocation2 + $0x4c] sm:$0xf]  ;;  %v1655_v39 = vsel %vm5631_vm14, %v1653_v27, %v1654_v28 }
  0xb3   : > { %1743 = vrot.lane.b32.xlu1 %v1641_v17, %s5165_s23  ;;  %1496 = vst.msk [vmem:[#allocation3 + $0x18] sm:$0xf] %vm1489_vm15, %v1406_v34  ;;  %v4878_v37 = vrot.slane %v1537_v29, 9  ;;  %v1660_v40 = vrot.slane %v1658_v30, 4  ;;  %v1661_v42 = vrot.slane %v1539_v31, 5  ;;  %v1665_v56 = vrot.slane %v1541_v32, 5 }
  0xb4   : > { %1741 = vrot.lane.b32.xlu0 %v1638_v16, %s5165_s23  ;;  %v1540_v44 = vld [vmem:[#allocation2 + $0x48] sm:$0xe]  ;;  %1497 = vst.msk [vmem:[#allocation3 + $0x1c] sm:$0xf] %vm1489_vm15, %v1408_v38  ;;  %v1542_v36 = vld [vmem:[#allocation2 + $0x50] sm:$0x1]  ;;  %v1410_v52 = vpop.permute.xlu0 %1409 }
  0xb5   : > { %v1544_v45 = vld [vmem:[#allocation2 + $0x58] sm:$0xf]  ;;  %v1659_v50 = vsel %vm5631_vm14, %v4878_v37, %v1658_v30  ;;  %v4879_v51 = vrot.slane %v1540_v44, 9  ;;  %v1662_v54 = vsel %vm5631_vm14, %v1660_v40, %v1661_v42  ;;  %v1667_v47 = vrot.slane %v1665_v56, 4  ;;  %v1543_v58 = vld [vmem:[#allocation2 + $0x54] sm:$0xe] }
  0xb6   : > { %v1668_v55 = vrot.slane %v1542_v36, 5  ;;  %v1672_v59 = vrot.slane %v1544_v45, 5  ;;  %1498 = vst.msk [vmem:[#allocation3 + $0x20] sm:$0xf] %vm1489_vm15, %v1410_v52  ;;  %v1545_v60 = vld [vmem:[#allocation2 + $0x5c] sm:$0x1] }
  0xb7   : > { %1747 = vrot.lane.b32.xlu1 %v1648_v26, %s5165_s23  ;;  %v1547_v61 = vld [vmem:[#allocation2 + $0x64] sm:$0xf]  ;;  %v1412_v62 = vpop.permute.xlu1 %1411  ;;  %v1666_v57 = vsel %vm5631_vm14, %v4879_v51, %v1665_v56  ;;  %v4880_v63 = vrot.slane %v1543_v58, 9  ;;  %v1675_v3 = vrot.slane %v1545_v60, 5  ;;  %v1546_v4 = vld [vmem:[#allocation2 + $0x60] sm:$0xe] }
  0xb8   : > { %1745 = vrot.lane.b32.xlu0 %v1645_v22, %s5165_s23  ;;  %1499 = vst.msk [vmem:[#allocation3 + $0x24] sm:$0xf] %vm1489_vm15, %v1412_v62  ;;  %v1669_v0 = vsel %vm5631_vm14, %v1667_v47, %v1668_v55  ;;  %v1674_v2 = vrot.slane %v1672_v59, 4  ;;  %v1679_v5 = vrot.slane %v1547_v61, 5  ;;  %v1548_v6 = vld [vmem:[#allocation2 + $0x68] sm:$0x1] }
  0xb9   : > { %v1550_v8 = vld [vmem:[#allocation2 + $0x70] sm:$0xf]  ;;  %v1673_v9 = vsel %vm5631_vm14, %v4880_v63, %v1672_v59  ;;  %v4881_v10 = vrot.slane %v1546_v4, 9  ;;  %v1682_v13 = vrot.slane %v1548_v6, 5  ;;  %v1549_v14 = vld [vmem:[#allocation2 + $0x6c] sm:$0xe] }
  0xba   : > { %v1676_v11 = vsel %vm5631_vm14, %v1674_v2, %v1675_v3  ;;  %v1681_v12 = vrot.slane %v1679_v5, 4  ;;  %v1686_v15 = vrot.slane %v1550_v8, 5  ;;  %v1551_v16 = vld [vmem:[#allocation2 + $0x74] sm:$0x1]  ;;  %v1553_v17 = vld [vmem:[#allocation2 + $0x7c] sm:$0xf] }
  0xbb   : > { %1751 = vrot.lane.b32.xlu1 %v1655_v39, %s5165_s23  ;;  %v1680_v19 = vsel %vm5631_vm14, %v4881_v10, %v1679_v5  ;;  %v4882_v43 = vrot.slane %v1549_v14, 9  ;;  %v1689_v46 = vrot.slane %v1551_v16, 5  ;;  %v1552_v49 = vld [vmem:[#allocation2 + $0x78] sm:$0xe]  ;;  %v1693_v22 = vrot.slane %v1553_v17, 5 }
  0xbc   : > { %1749 = vrot.lane.b32.xlu0 %v1652_v35, %s5165_s23  ;;  %v1683_v20 = vsel %vm5631_vm14, %v1681_v12, %v1682_v13  ;;  %v1688_v21 = vrot.slane %v1686_v15, 4  ;;  %v1554_v23 = vld [vmem:[#allocation2 + $0x80] sm:$0x1]  ;;  %v1556_v24 = vld [vmem:[#allocation2 + $0x88] sm:$0xf]  ;;  %v4883_v27 = vrot.slane %v1552_v49, 9 }
  0xbd   : > { %v1687_v26 = vsel %vm5631_vm14, %v4882_v43, %v1686_v15  ;;  %v1695_v29 = vrot.slane %v1693_v22, 4  ;;  %v1696_v30 = vrot.slane %v1554_v23, 5  ;;  %v1555_v31 = vld [vmem:[#allocation2 + $0x84] sm:$0xe]  ;;  %v1700_v32 = vrot.slane %v1556_v24, 5 }
  0xbe   : > { %v1414_v18 = vpop.permute.xlu0 %1413  ;;  %v1690_v28 = vsel %vm5631_vm14, %v1688_v21, %v1689_v46  ;;  %v1557_v35 = vld [vmem:[#allocation2 + $0x8c] sm:$0x1]  ;;  %v1559_v37 = vld [vmem:[#allocation2 + $0x94] sm:$0xf]  ;;  %v1694_v38 = vsel %vm5631_vm14, %v4883_v27, %v1693_v22  ;;  %v4884_v39 = vrot.slane %v1555_v31, 9  ;;  %vm4226_vm2 = vcmask 1041408  }
  0xbf   : > { %1755 = vrot.lane.b32.xlu1 %v1662_v54, %s5165_s23  ;;  %1500 = vst.msk [vmem:[#allocation3 + $0x28] sm:$0xf] %vm1489_vm15, %v1414_v18  ;;  %v1697_v40 = vsel %vm5631_vm14, %v1695_v29, %v1696_v30  ;;  %v1702_v42 = vrot.slane %v1700_v32, 4  ;;  %v1703_v44 = vrot.slane %v1557_v35, 5  ;;  %v1558_v56 = vld [vmem:[#allocation2 + $0x90] sm:$0xe] }
  0xc0   : > { %1753 = vrot.lane.b32.xlu0 %v1659_v50, %s5165_s23  ;;  %v1707_v36 = vrot.slane %v1559_v37, 5  ;;  %v1560_v45 = vld [vmem:[#allocation2 + $0x98] sm:$0x1]  ;;  %v1562_v50 = vld [vmem:[#allocation2 + $0xa0] sm:$0xf]  ;;  %v1701_v52 = vsel %vm5631_vm14, %v4884_v39, %v1700_v32  ;;  %v4885_v54 = vrot.slane %v1558_v56, 9 }
  0xc1   : > { %v1704_v47 = vsel %vm5631_vm14, %v1702_v42, %v1703_v44  ;;  %v1710_v58 = vrot.slane %v1560_v45, 5  ;;  %v1561_v59 = vld [vmem:[#allocation2 + $0x9c] sm:$0xe]  ;;  %v1714_v60 = vrot.slane %v1562_v50, 5  ;;  %v1563_v61 = vld [vmem:[#allocation2 + $0xa4] sm:$0x1] }
  0xc2   : > { %v1416_v25 = vpop.permute.xlu1 %1415  ;;  %v1709_v55 = vrot.slane %v1707_v36, 4  ;;  %v1565_v62 = vld [vmem:[#allocation2 + $0xac] sm:$0xf]  ;;  %v4886_v2 = vrot.slane %v1561_v59, 9  ;;  %v1564_v3 = vld [vmem:[#allocation2 + $0xa8] sm:$0xe] }
  0xc3   : > { %1759 = vrot.lane.b32.xlu1 %v1669_v0, %s5165_s23  ;;  %1501 = vst.msk [vmem:[#allocation3 + $0x2c] sm:$0xf] %vm1489_vm15, %v1416_v25  ;;  %v1708_v0 = vsel %vm5631_vm14, %v4885_v54, %v1707_v36  ;;  %v1716_v5 = vrot.slane %v1714_v60, 4  ;;  %v1717_v6 = vrot.slane %v1563_v61, 5  ;;  %v1721_v8 = vrot.slane %v1565_v62, 5 }
  0xc4   : > { %1757 = vrot.lane.b32.xlu0 %v1666_v57, %s5165_s23  ;;  %v1711_v4 = vsel %vm5631_vm14, %v1709_v55, %v1710_v58  ;;  %v1568_v10 = vld [vmem:[#allocation2 + $0xb8] sm:$0xf]  ;;  %v1715_v14 = vsel %vm5631_vm14, %v4886_v2, %v1714_v60  ;;  %v1567_v17 = vld [vmem:[#allocation2 + $0xb4] sm:$0xe]  ;;  %v1863_v27 = vld [vmem:[#allocation2 + $0x10] sm:$0xf] }
  0xc5   : > { %v1418_v34 = vpop.permute.xlu0 %1417  ;;  %v1718_v15 = vsel %vm5631_vm14, %v1716_v5, %v1717_v6  ;;  %v1723_v16 = vrot.slane %v1721_v8, 4  ;;  %v1728_v18 = vrot.slane %v1568_v10, 5  ;;  %v4888_v43 = vrot.slane %v1567_v17, 9  ;;  %v1864_v29 = vld [vmem:[#allocation2 + $0x18] sm:$0xf] }
  0xc6   : > { %1502 = vst.msk [vmem:[#allocation3 + $0x30] sm:$0xf] %vm1489_vm15, %v1418_v34  ;;  %v1865_v30 = vld [vmem:[#allocation2 + $0x1c] sm:$0xf]  ;;  %v1866_v32 = vld [vmem:[#allocation2 + $0x24] sm:$0xf] }
  0xc7   : > { %1763 = vrot.lane.b32.xlu1 %v1676_v11, %s5165_s23  ;;  %v4887_v11 = vrot.slane %v1564_v3, 9  ;;  %v1730_v46 = vrot.slane %v1728_v18, 4  ;;  %v1729_v23 = vsel %vm5631_vm14, %v4888_v43, %v1728_v18  ;;  %v1867_v34 = vld [vmem:[#allocation2 + $0x28] sm:$0xf]  ;;  %v1868_v37 = vld [vmem:[#allocation2 + $0x30] sm:$0xf] }
  0xc8   : > { %1761 = vrot.lane.b32.xlu0 %v1673_v9, %s5165_s23  ;;  %v1566_v9 = vld [vmem:[#allocation2 + $0xb0] sm:$0x1]  ;;  %v1871_v42 = vld [vmem:[#allocation2 + $0x40] sm:$0xf]  ;;  %v2055_v44 = vld [vmem:[#allocation2 + $0xc] sm:$0xf] }
  0xc9   : > { %v1724_v12 = vrot.slane %v1566_v9, 5  ;;  %v2056_v56 = vld [vmem:[#allocation2 + $0x10] sm:$0xf]  ;;  %v2104_v45 = vshrl.u32 %v2055_v44, 16  ;;  %v2107_v50 = vshll.u32 %v2055_v44, 16  ;;  %vm2022_vm3 = vcmask 126048  }
  0xca   : > { %v1872_v54 = vld [vmem:[#allocation2 + $0x48] sm:$0xf]  ;;  %v2058_v58 = vld [vmem:[#allocation2 + $0x18] sm:$0xf]  ;;  %v2059_v59 = vld [vmem:[#allocation2 + $0x1c] sm:$0xf] }
  0xcb   : > { %1767 = vrot.lane.b32.xlu1 %v1683_v20, %s5165_s23  ;;  %v1420_v51 = vpop.permute.xlu1 %1419  ;;  %v1722_v20 = vsel %vm5631_vm14, %v4887_v11, %v1721_v8  ;;  %v1725_v21 = vsel %vm5631_vm14, %v1723_v16, %v1724_v12  ;;  %v1874_v60 = vld [vmem:[#allocation2 + $0x54] sm:$0xf]  ;;  %v1875_v62 = vld [vmem:[#allocation2 + $0x58] sm:$0xf]  ;;  %v2131_v5 = vshll.u32 %v2058_v58, 16  ;;  %v2137_v6 = vshll.u32 %v2059_v59, 16 }
  0xcc   : > { %1765 = vrot.lane.b32.xlu0 %v1680_v19, %s5165_s23  ;;  %1503 = vst.msk [vmem:[#allocation3 + $0x34] sm:$0xf] %vm1489_vm15, %v1420_v51  ;;  %v1569_v19 = vld [vmem:[#allocation2 + $0xbc] sm:$0x1]  ;;  %v2113_v51 = vshll.u32 %v2056_v56, 16  ;;  %v2141_v8 = vshrl.u32 %v2059_v59, 16 }
  0xcd   : > { %v1731_v49 = vrot.slane %v1569_v19, 5  ;;  %v2057_v3 = vld [vmem:[#allocation2 + $0x14] sm:$0x1]  ;;  %v1876_v9 = vld [vmem:[#allocation2 + $0x60] sm:$0xf]  ;;  %v2139_v16 = vrot.slane %v2137_v6, 5 }
  0xce   : > { %v1877_v10 = vld [vmem:[#allocation2 + $0x64] sm:$0xf]  ;;  %v2060_v17 = vld [vmem:[#allocation2 + $0x20] sm:$0x1]  ;;  %v2143_v18 = vrot.slane %v2141_v8, 4  ;;  %vm2583_vm5 = vcmask 158848  }
  0xcf   : > { %1771 = vrot.lane.b32.xlu1 %v1690_v28, %s5165_s23  ;;  %v1732_v24 = vsel %vm5631_vm14, %v1730_v46, %v1731_v49  ;;  %v1878_v43 = vld [vmem:[#allocation2 + $0x6c] sm:$0xf]  ;;  %v1879_v46 = vld [vmem:[#allocation2 + $0x70] sm:$0xf]  ;;  %v2619_v44 = vld [vmem:[#allocation2 + $0x18] sm:$0xe] }
  0xd0   : > { %1769 = vrot.lane.b32.xlu0 %v1687_v26, %s5165_s23  ;;  %v1424_v57 = vpop.permute.xlu1 %1423  ;;  %v1422_v63 = vpop.permute.xlu0 %1421  ;;  %v1862_v26 = vld [vmem:[#allocation2 + $0xc] sm:$0xf]  ;;  %vm2920_vm6 = vcmask 191648   ;;  %vm3114_vm8 = vcmask 224448   ;;  %vm3675_vm12 = vcmask 257248   ;;  %vm4012_vm13 = vcmask 290048  }
  0xd1   : > { %1505 = vst.msk [vmem:[#allocation3 + $0x3c] sm:$0xf] %vm1489_vm15, %v1424_v57  ;;  %1504 = vst.msk [vmem:[#allocation3 + $0x38] sm:$0xf] %vm1489_vm15, %v1422_v63  ;;  %v2106_v57 = vrot.slane %v2104_v45, 4  ;;  %v2109_v63 = vrot.slane %v2107_v50, 5 }
  0xd2   : > { %v2621_v50 = vld [vmem:[#allocation2 + $0x20] sm:$0x1]  ;;  %v2972_v1 = vld [vmem:[#allocation2 + $0x84] sm:$0xf] }
  0xd3   : > { %1775 = vrot.lane.b32.xlu1 %v1697_v40, %s5165_s23  ;;  %v1870_v40 = vld [vmem:[#allocation2 + $0x3c] sm:$0xf]  ;;  %v2110_v11 = vor.u32 %v2109_v63, %v2106_v57 }
  0xd4   : > { %1773 = vrot.lane.b32.xlu0 %v1694_v38, %s5165_s23  ;;  %v1869_v38 = vld [vmem:[#allocation2 + $0x34] sm:$0xf] }
  0xd5   : > { %v2111_v49 = vrot.slane %v2110_v11, 4 }
  0xd6   : > { %v1426_v13 = vpop.permute.xlu0 %1425 }
  0xd7   : > { %1779 = vrot.lane.b32.xlu1 %v1704_v47, %s5165_s23  ;;  %1506 = vst.msk [vmem:[#allocation3 + $0x40] sm:$0xf] %vm1489_vm15, %v1426_v13  ;;  %v1873_v47 = vld [vmem:[#allocation2 + $0x4c] sm:$0xf]  ;;  %v2123_v13 = vshll.u32 %v2057_v3, 16 }
  0xd8   : > { %1777 = vrot.lane.b32.xlu0 %v1701_v52, %s5165_s23  ;;  %v2117_v52 = vshrl.u32 %v2056_v56, 16 }
  0xda   : > { %v2119_v2 = vrot.slane %v2117_v52, 4  ;;  %v3148_v52 = vld [vmem:[#allocation2 + $0x1c] sm:$0xf] }
  0xdb   : > { %1783 = vrot.lane.b32.xlu1 %v1711_v4, %s5165_s23  ;;  %v2128_v4 = vshrl.u32 %v2058_v58, 16  ;;  %v2724_v58 = vrot.slane %v2621_v50, 5  ;;  %v3205_v57 = vshll.u32 %v3148_v52, 16  ;;  %v3209_v63 = vshrl.u32 %v3148_v52, 16  ;;  %v3710_v50 = vld [vmem:[#allocation2 + $0x20] sm:$0x1] }
  0xdc   : > { %1781 = vrot.lane.b32.xlu0 %v1708_v0, %s5165_s23  ;;  %v2115_v0 = vrot.slane %v2113_v51, 5  ;;  %v3147_v51 = vld [vmem:[#allocation2 + $0x18] sm:$0xf] }
  0xdd   : > { %v3196_v59 = vshrl.u32 %v3147_v51, 16 }
  0xde   : > { %v1428_v22 = vpop.permute.xlu1 %1427  ;;  %v2120_v12 = vor.u32 %v2119_v2, %v2115_v0 }
  0xdf   : > { %1787 = vrot.lane.b32.xlu1 %v1718_v15, %s5165_s23  ;;  %1507 = vst.msk [vmem:[#allocation3 + $0x44] sm:$0xf] %vm1489_vm15, %v1428_v22  ;;  %v2133_v15 = vrot.slane %v2131_v5, 5  ;;  %v3198_v6 = vrot.slane %v3196_v59, 4 }
  0xe0   : > { %1785 = vrot.lane.b32.xlu0 %v1715_v14, %s5165_s23  ;;  %v2130_v14 = vrot.slane %v2128_v4, 4  ;;  %v2121_v22 = vrot.slane %v2120_v12, 4  ;;  %v5818_v12 = vrot.slane %v3205_v57, 5 }
  0xe3   : > { %1791 = vrot.lane.b32.xlu1 %v1725_v21, %s5165_s23  ;;  %v1430_v25 = vpop.permute.xlu0 %1429  ;;  %v2147_v21 = vshll.u32 %v2060_v17, 16 }
  0xe4   : > { %1789 = vrot.lane.b32.xlu0 %v1722_v20, %s5165_s23  ;;  %1508 = vst.msk [vmem:[#allocation3 + $0x48] sm:$0xf] %vm1489_vm15, %v1430_v25  ;;  %v2125_v20 = vrot.slane %v2123_v13, 5  ;;  %v2617_v25 = vld [vmem:[#allocation2 + $0x10] sm:$0xf]  ;;  %v3211_v13 = vrot.slane %v3209_v63, 4 }
  0xe7   : > { %1795 = vrot.lane.b32.xlu1 %v1732_v24, %s5165_s23  ;;  %v1432_v28 = vpop.permute.xlu1 %1431  ;;  %v2144_v24 = vor.u32 %v2143_v18, %v2139_v16 }
  0xe8   : > { %1793 = vrot.lane.b32.xlu0 %v1729_v23, %s5165_s23  ;;  %1509 = vst.msk [vmem:[#allocation3 + $0x4c] sm:$0xf] %vm1489_vm15, %v1432_v28  ;;  %v2134_v23 = vor.u32 %v2133_v15, %v2130_v14  ;;  %v2714_v28 = vrot.slane %v2617_v25, 5 }
  0xeb   : > { %1928 = vrot.lane.b32.xlu1 %v1863_v27, %s5166_s24  ;;  %v2149_v27 = vrot.slane %v2147_v21, 5  ;;  %v2954_v21 = vld [vmem:[#allocation2 + $0x18] sm:$0xf] }
  0xec   : > { %1926 = vrot.lane.b32.xlu0 %v1862_v26, %s5166_s24 }
  0xee   : > { %v1436_v31 = vpop.permute.xlu1 %1435 }
  0xef   : > { %1932 = vrot.lane.b32.xlu1 %v1865_v30, %s5166_s24  ;;  %1511 = vst.msk [vmem:[#allocation3 + $0x54] sm:$0xf] %vm1489_vm15, %v1436_v31  ;;  %v2126_v30 = vsel %vm5256_vm9, %v2121_v22, %v2125_v20  ;;  %v2135_v31 = vrot.slane %v2134_v23, 4  ;;  %v3212_v22 = vor.u32 %v3211_v13, %v5818_v12 }
  0xf0   : > { %1930 = vrot.lane.b32.xlu0 %v1864_v29, %s5166_s24  ;;  %v2116_v29 = vsel %vm5256_vm9, %v2111_v49, %v2115_v0  ;;  %v3151_v0 = vld [vmem:[#allocation2 + $0x28] sm:$0xf] }
  0xf1   : > { %v1434_v35 = vpop.permute.xlu0 %1433  ;;  %v2140_v56 = vsel %vm5256_vm9, %v2135_v31, %v2139_v16  ;;  %v3229_v8 = vshll.u32 %v3151_v0, 16  ;;  %v3149_v16 = vld [vmem:[#allocation2 + $0x20] sm:$0x1]  ;;  %v5832_v31 = vld [vmem:[#allocation2 + $0x1c] sm:$0xf] }
  0xf2   : > { %1510 = vst.msk [vmem:[#allocation3 + $0x50] sm:$0xf] %vm1489_vm15, %v1434_v35  ;;  %v2618_v35 = vld [vmem:[#allocation2 + $0x14] sm:$0x1]  ;;  %v3215_v23 = vshll.u32 %v3149_v16, 16 }
  0xf3   : > { %1936 = vrot.lane.b32.xlu1 %v1867_v34, %s5166_s24  ;;  %v2616_v34 = vld [vmem:[#allocation2 + $0xc] sm:$0xe]  ;;  %v2063_v16 = vld [vmem:[#allocation2 + $0x2c] sm:$0x1] }
  0xf4   : > { %1934 = vrot.lane.b32.xlu0 %v1866_v32, %s5166_s24  ;;  %v2145_v32 = vrot.slane %v2144_v24, 4 }
  0xf5   : > { %v1438_v39 = vpop.permute.xlu0 %1437 }
  0xf6   : > { %1512 = vst.msk [vmem:[#allocation3 + $0x58] sm:$0xf] %vm1489_vm15, %v1438_v39  ;;  %v4889_v39 = vrot.slane %v2616_v34, 9 }
  0xf7   : > { %1940 = vrot.lane.b32.xlu1 %v1869_v38, %s5166_s24 }
  0xf8   : > { %1938 = vrot.lane.b32.xlu0 %v1868_v37, %s5166_s24  ;;  %v2620_v37 = vld [vmem:[#allocation2 + $0x1c] sm:$0xf] }
  0xf9   : > { %v1440_v36 = vpop.permute.xlu1 %1439  ;;  %v2721_v45 = vrot.slane %v2620_v37, 5  ;;  %v3217_v37 = vrot.slane %v3215_v23, 5 }
  0xfa   : > { %1513 = vst.msk [vmem:[#allocation3 + $0x5c] sm:$0xf] %vm1489_vm15, %v1440_v36  ;;  %v2150_v36 = vsel %vm5256_vm9, %v2145_v32, %v2149_v27  ;;  %v2956_v27 = vld [vmem:[#allocation2 + $0x24] sm:$0xf] }
  0xfb   : > { %1944 = vrot.lane.b32.xlu1 %v1871_v42, %s5166_s24  ;;  %v2717_v42 = vrot.slane %v2618_v35, 5  ;;  %v2061_v32 = vld [vmem:[#allocation2 + $0x24] sm:$0xf]  ;;  %v3213_v35 = vrot.slane %v3212_v22, 4 }
  0xfc   : > { %1942 = vrot.lane.b32.xlu0 %v1870_v40, %s5166_s24  ;;  %v2716_v40 = vrot.slane %v2714_v28, 4 }
  0xfe   : > { %v1442_v55 = vpop.permute.xlu0 %1441 }
  0xff   : > { %1514 = vst.msk [vmem:[#allocation3 + $0x60] sm:$0xf] %vm1489_vm15, %v1442_v55  ;;  %v1444_v61 = vpop.permute.xlu1 %1443  ;;  %1948 = vrot.lane.b32.xlu1 %v1873_v47, %s5166_s24  ;;  %v2715_v47 = vsel %vm5631_vm14, %v4889_v39, %v2714_v28  ;;  %v2718_v55 = vsel %vm5631_vm14, %v2716_v40, %v2717_v42 }
 0x100   : > { %1946 = vrot.lane.b32.xlu0 %v1872_v54, %s5166_s24  ;;  %1515 = vst.msk [vmem:[#allocation3 + $0x64] sm:$0xf] %vm1489_vm15, %v1444_v61  ;;  %v4890_v54 = vrot.slane %v2619_v44, 9  ;;  %v2723_v61 = vrot.slane %v2721_v45, 4  ;;  %v3708_v44 = vld [vmem:[#allocation2 + $0x18] sm:$0xe] }
 0x102   : > { %v2722_v5 = vsel %vm5631_vm14, %v4890_v54, %v2721_v45  ;;  %v3806_v45 = vrot.slane %v5832_v31, 5  ;;  %v5844_v54 = vld [vmem:[#allocation2 + $0x28] sm:$0xf] }
 0x103   : > { %1952 = vrot.lane.b32.xlu1 %v1875_v62, %s5166_s24  ;;  %v3199_v62 = vshll.u32 %v3147_v51, 16  ;;  %v2152_v51 = vshrl.u32 %v2061_v32, 16 }
 0x104   : > { %1950 = vrot.lane.b32.xlu0 %v1874_v60, %s5166_s24  ;;  %v3150_v60 = vld [vmem:[#allocation2 + $0x24] sm:$0xf] }
 0x105   : > { %v3220_v3 = vshrl.u32 %v3150_v60, 16  ;;  %v3223_v4 = vshll.u32 %v3150_v60, 16  ;;  %v3201_v11 = vrot.slane %v3199_v62, 5  ;;  %v3218_v60 = vsel %vm5256_vm9, %v3213_v35, %v3217_v37  ;;  %v2064_v62 = vld [vmem:[#allocation2 + $0x30] sm:$0xf] }
 0x106   : > { %v1446_v19 = vpop.permute.xlu0 %1445 }
 0x107   : > { %1516 = vst.msk [vmem:[#allocation3 + $0x68] sm:$0xf] %vm1489_vm15, %v1446_v19  ;;  %1956 = vrot.lane.b32.xlu1 %v1877_v10, %s5166_s24  ;;  %v2725_v10 = vsel %vm5631_vm14, %v2723_v61, %v2724_v58  ;;  %v3222_v17 = vrot.slane %v3220_v3, 4  ;;  %v3225_v18 = vrot.slane %v3223_v4, 5  ;;  %v3152_v19 = vld [vmem:[#allocation2 + $0x2c] sm:$0x1]  ;;  %v3202_v49 = vor.u32 %v3201_v11, %v3198_v6 }
 0x108   : > { %1954 = vrot.lane.b32.xlu0 %v1876_v9, %s5166_s24  ;;  %v3233_v9 = vshrl.u32 %v3151_v0, 16  ;;  %v4905_v0 = vrot.slane %v3708_v44, 9  ;;  %v2065_v3 = vld [vmem:[#allocation2 + $0x34] sm:$0xf]  ;;  %v5137_v4 = vld [vmem:[%s6691_s1 + $0x8] sm:$0xff]   ;;  %v3808_v6 = vrot.slane %v3806_v45, 4 }
 0x109   : > { %v3226_v28 = vor.u32 %v3225_v18, %v3222_v17  ;;  %v3203_v34 = vrot.slane %v3202_v49, 4  ;;  %v2179_v18 = vshll.u32 %v2064_v62, 16 }
 0x10a   : > { %v1448_v26 = vpop.permute.xlu1 %1447  ;;  %v3235_v20 = vrot.slane %v3233_v9, 4  ;;  %v3813_v9 = vrot.slane %v5844_v54, 5  ;;  %v3807_v49 = vsel %vm5631_vm14, %v4905_v0, %v3806_v45  ;;  %v2626_v0 = vld [vmem:[#allocation2 + $0x34] sm:$0xf] }
 0x10b   : > { %1517 = vst.msk [vmem:[#allocation3 + $0x6c] sm:$0xf] %vm1489_vm15, %v1448_v26  ;;  %1960 = vrot.lane.b32.xlu1 %v1879_v46, %s5166_s24  ;;  %v2955_v46 = vld [vmem:[#allocation2 + $0x1c] sm:$0xf]  ;;  %v3239_v26 = vshll.u32 %v3152_v19, 16  ;;  %v3208_v59 = vsel %vm5256_vm9, %v3203_v34, %v5818_v12  ;;  %v2185_v19 = vshll.u32 %v2065_v3, 16 }
 0x10c   : > { %1958 = vrot.lane.b32.xlu0 %v1878_v43, %s5166_s24  ;;  %v5824_v43 = vrot.slane %v3229_v8, 5  ;;  %v3711_v8 = vld [vmem:[#allocation2 + $0x24] sm:$0xe]  ;;  %v3713_v12 = vld [vmem:[#allocation2 + $0x2c] sm:$0x1] }
 0x10d   : > { %v5834_v42 = vrot.slane %v3239_v26, 5  ;;  %v4906_v23 = vrot.slane %v3711_v8, 9  ;;  %v2187_v31 = vrot.slane %v2185_v19, 5 }
 0x10f   : > { %2489 = vrot.lane.b32.xlu1 %v2126_v30, %s5167_s25  ;;  %v1450_v38 = vpop.permute.xlu0 %1449  ;;  %v3236_v30 = vor.u32 %v3235_v20, %v5824_v43 }
 0x110   : > { %2487 = vrot.lane.b32.xlu0 %v2116_v29, %s5167_s25  ;;  %1518 = vst.msk [vmem:[#allocation3 + $0x70] sm:$0xf] %vm1489_vm15, %v1450_v38  ;;  %v2957_v29 = vld [vmem:[#allocation2 + $0x28] sm:$0xf] }
 0x111   : > { %v2062_v38 = vld [vmem:[#allocation2 + $0x28] sm:$0xf]  ;;  %v3237_v52 = vrot.slane %v3236_v30, 4  ;;  %v2181_v30 = vrot.slane %v2179_v18, 5 }
 0x112   : > { %v2165_v61 = vshrl.u32 %v2062_v38, 16 }
 0x113   : > { %2493 = vrot.lane.b32.xlu1 %v2150_v36, %s5167_s25  ;;  %v3227_v36 = vrot.slane %v3226_v28, 4  ;;  %v3242_v11 = vsel %vm5256_vm9, %v3237_v52, %v5834_v42 }
 0x114   : > { %2491 = vrot.lane.b32.xlu0 %v2140_v56, %s5167_s25  ;;  %v5136_v56 = vld [vmem:[%s6691_s1 + $0x10] ss:$0 sps:$4 sm:$0x33]   ;;  %v2167_v17 = vrot.slane %v2165_v61, 4  ;;  %v2622_v61 = vld [vmem:[#allocation2 + $0x24] sm:$0xe] }
 0x115   : > { %v1452_v2 = vpop.permute.xlu1 %1451  ;;  %v4228_v58 = vsel %vm4226_vm2, %v5136_v56, 0  ;;  %5117 = vmatprep.subr.msk.bf16.mxu0 %vm4226_vm2, %v5136_v56  ;;  %5118 = vmatprep.subr.msk.bf16.mxu1 %vm4226_vm2, %v5136_v56 }
 0x116   : > { %1519 = vst.msk [vmem:[#allocation3 + $0x74] sm:$0xf] %vm1489_vm15, %v1452_v2  ;;  %v3809_v2 = vrot.slane %v3710_v50, 5  ;;  %5074 = vmatpush3.bf16.msra.mxu0 %v4228_v58  ;;  %5114 = vmatpush3.bf16.msra.mxu1 %v4228_v58  ;;  %v2623_v50 = vld [vmem:[#allocation2 + $0x28] sm:$0xf] }
 0x117   : > { %2826 = vrot.lane.b32.xlu1 %v2718_v55, %s5168_s26  ;;  %v2161_v55 = vshll.u32 %v2062_v38, 16  ;;  %5075 = vmatprep.subr.bf16.mxu0 %v5137_v4  ;;  %v3814_v38 = vsel %vm5631_vm14, %v4906_v23, %v3813_v9 }
 0x118   : > { %2824 = vrot.lane.b32.xlu0 %v2715_v47, %s5168_s26  ;;  %v2155_v47 = vshll.u32 %v2061_v32, 16  ;;  %5112 = vmatprep.subr.bf16.mxu1 %v5137_v4  ;;  %v3810_v22 = vsel %vm5631_vm14, %v3808_v6, %v3809_v2  ;;  %v2066_v32 = vld [vmem:[#allocation2 + $0x38] sm:$0x1]  ;;  %v4891_v2 = vrot.slane %v2622_v61, 9 }
 0x119   : > { %v1456_v15 = vpop.permute.xlu1 %1455  ;;  %v2195_v42 = vshll.u32 %v2066_v32, 16 }
 0x11a   : > { %v1454_v14 = vpop.permute.xlu0 %1453  ;;  %1521 = vst.msk [vmem:[#allocation3 + $0x7c] sm:$0xf] %vm1489_vm15, %v1456_v15  ;;  %v2157_v13 = vrot.slane %v2155_v47, 5  ;;  %v2176_v15 = vshrl.u32 %v2064_v62, 16  ;;  %5076 = vmatpush3.bf16.msra.mxu0 %v5137_v4  ;;  %5115 = vmatpush3.bf16.msra.mxu1 %v5137_v4  ;;  %v2728_v47 = vrot.slane %v2623_v50, 5 }
 0x11b   : > { %1520 = vst.msk [vmem:[#allocation3 + $0x78] sm:$0xf] %vm1489_vm15, %v1454_v14  ;;  %2830 = vrot.lane.b32.xlu1 %v2725_v10, %s5168_s26  ;;  %v2154_v10 = vrot.slane %v2152_v51, 4  ;;  %v5865_v14 = vrot.slane %v2161_v55, 5  ;;  %v2197_v54 = vrot.slane %v2195_v42, 5  ;;  %vm4177_vm15 = vcmask 293888  }
 0x11c   : > { %2828 = vrot.lane.b32.xlu0 %v2722_v5, %s5168_s26  ;;  %v3232_v5 = vsel %vm5256_vm9, %v3227_v36, %v5824_v43  ;;  %v2189_v43 = vshrl.u32 %v2065_v3, 16  ;;  %v2178_v28 = vrot.slane %v2176_v15, 4  ;;  %v2624_v62 = vld [vmem:[#allocation2 + $0x2c] sm:$0x1]  ;;  %v2730_v3 = vrot.slane %v2728_v47, 4 }
 0x11d   : > { %v1736_v25 = vpop.permute.xlu1 %1735  ;;  %v2158_v26 = vor.u32 %v2157_v13, %v2154_v10  ;;  %v2731_v4 = vrot.slane %v2624_v62, 5  ;;  %v2627_v10 = vld [vmem:[#allocation2 + $0x38] sm:$0x1]  ;;  %v2958_v50 = vld [vmem:[#allocation2 + $0x30] sm:$0xf] }
 0x11e   : > { %v1734_v24 = vpop.permute.xlu0 %1733  ;;  %1831 = vst.msk [vmem:[#allocation3 + $0x4] sm:$0xf] %vm1829_vm1, %v1736_v25  ;;  %v3815_v25 = vrot.slane %v3813_v9, 4  ;;  %v2191_v34 = vrot.slane %v2189_v43, 4  ;;  %v2182_v36 = vor.u32 %v2181_v30, %v2178_v28  ;;  %v2735_v9 = vrot.slane %v2626_v0, 5 }
 0x11f   : > { %1830 = vst.msk [vmem:[#allocation3] sm:$0xf] %vm1829_vm1, %v1734_v24  ;;  %3020 = vrot.lane.b32.xlu1 %v2955_v46, %s5169_s27  ;;  %v5138_v46 = vld [vmem:[%s6691_s1] sm:$0xff]   ;;  %v3816_v24 = vrot.slane %v3713_v12, 5  ;;  %v2159_v44 = vrot.slane %v2158_v26, 4  ;;  %v2738_v18 = vrot.slane %v2627_v10, 5 }
 0x120   : > { %3018 = vrot.lane.b32.xlu0 %v2954_v21, %s5169_s27  ;;  %5077 = vmatprep.subr.bf16.mxu0 %v5138_v46  ;;  %v2192_v45 = vor.u32 %v2191_v34, %v2187_v31  ;;  %v3156_v43 = vld [vmem:[#allocation2 + $0x3c] sm:$0xf]  ;;  %v2961_v62 = vld [vmem:[#allocation2 + $0x40] sm:$0xf] }
 0x121   : > { %v1740_v40 = vpop.permute.xlu1 %1739  ;;  %5113 = vmatprep.subr.bf16.mxu1 %v5138_v46  ;;  %5078 = vmatpush3.bf16.msra.mxu0 %v5138_v46  ;;  %v2164_v55 = vsel %vm5256_vm9, %v2159_v44, %v5865_v14  ;;  %v3271_v26 = vshll.u32 %v3156_v43, 16 }
 0x122   : > { %v1738_v39 = vpop.permute.xlu0 %1737  ;;  %1833 = vst.msk [vmem:[#allocation3 + $0xc] sm:$0xf] %vm1829_vm1, %v1740_v40  ;;  %5116 = vmatpush3.bf16.msra.mxu1 %v5138_v46 }
 0x123   : > { %1832 = vst.msk [vmem:[#allocation3 + $0x8] sm:$0xf] %vm1829_vm1, %v1738_v39  ;;  %3024 = vrot.lane.b32.xlu1 %v2957_v29, %s5169_s27  ;;  %v2168_v29 = vor.u32 %v2167_v17, %v5865_v14  ;;  %v3817_v39 = vsel %vm5631_vm14, %v3815_v25, %v3816_v24  ;;  %v3154_v14 = vld [vmem:[#allocation2 + $0x34] sm:$0xf]  ;;  %v2732_v17 = vsel %vm5631_vm14, %v2730_v3, %v2731_v4  ;;  %v3268_v25 = vshrl.u32 %v3156_v43, 16 }
 0x124   : > { %3022 = vrot.lane.b32.xlu0 %v2956_v27, %s5169_s27  ;;  %v2171_v27 = vshll.u32 %v2063_v16, 16  ;;  %v2729_v16 = vsel %vm5631_vm14, %v4891_v2, %v2728_v47  ;;  %v3273_v42 = vrot.slane %v3271_v26, 5  ;;  %v2067_v3 = vld [vmem:[#allocation2 + $0x3c] sm:$0xf]  ;;  %v2068_v4 = vld [vmem:[#allocation2 + $0x40] sm:$0xf] }
 0x125   : > { %v1744_v63 = vpop.permute.xlu1 %1743  ;;  %v2169_v56 = vrot.slane %v2168_v29, 4  ;;  %v2213_v43 = vshrl.u32 %v2068_v4, 16 }
 0x126   : > { %v1742_v57 = vpop.permute.xlu0 %1741  ;;  %1835 = vst.msk [vmem:[#allocation3 + $0x14] sm:$0xf] %vm1829_vm1, %v1744_v63  ;;  %v2173_v40 = vrot.slane %v2171_v27, 5 }
 0x127   : > { %1834 = vst.msk [vmem:[#allocation3 + $0x10] sm:$0xf] %vm1829_vm1, %v1742_v57  ;;  %3581 = vrot.lane.b32.xlu1 %v3218_v60, %s5170_s6  ;;  %v2193_v60 = vrot.slane %v2192_v45, 4  ;;  %v3158_v45 = vld [vmem:[#allocation2 + $0x44] sm:$0x1] }
 0x128   : > { %3579 = vrot.lane.b32.xlu0 %v3208_v59, %s5170_s6  ;;  %v2174_v58 = vsel %vm5256_vm9, %v2169_v56, %v2173_v40  ;;  %v2183_v59 = vrot.slane %v2182_v36, 4  ;;  %v3270_v40 = vrot.slane %v3268_v25, 4  ;;  %v3287_v61 = vshll.u32 %v3158_v45, 16 }
 0x129   : > { %v1748_v21 = vpop.permute.xlu1 %1747  ;;  %v2198_v8 = vsel %vm5256_vm9, %v2193_v60, %v2197_v54 }
 0x12a   : > { %v1746_v20 = vpop.permute.xlu0 %1745  ;;  %1837 = vst.msk [vmem:[#allocation3 + $0x1c] sm:$0xf] %vm1829_vm1, %v1748_v21  ;;  %v2188_v6 = vsel %vm5256_vm9, %v2183_v59, %v2187_v31  ;;  %v2737_v21 = vrot.slane %v2735_v9, 4  ;;  %v3274_v59 = vor.u32 %v3273_v42, %v3270_v40 }
 0x12b   : > { %1836 = vst.msk [vmem:[#allocation3 + $0x18] sm:$0xf] %vm1829_vm1, %v1746_v20  ;;  %3585 = vrot.lane.b32.xlu1 %v3242_v11, %s5170_s6  ;;  %v3153_v11 = vld [vmem:[#allocation2 + $0x30] sm:$0xf]  ;;  %v3157_v20 = vld [vmem:[#allocation2 + $0x40] sm:$0xf] }
 0x12c   : > { %3583 = vrot.lane.b32.xlu0 %v3232_v5, %s5170_s6  ;;  %v2625_v5 = vld [vmem:[#allocation2 + $0x30] sm:$0xe]  ;;  %v3244_v19 = vshrl.u32 %v3153_v11, 16  ;;  %v3247_v46 = vshll.u32 %v3153_v11, 16  ;;  %v3277_v27 = vshll.u32 %v3157_v20, 16  ;;  %v3281_v28 = vshrl.u32 %v3157_v20, 16 }
 0x12d   : > { %v1752_v37 = vpop.permute.xlu1 %1751  ;;  %v4892_v15 = vrot.slane %v2625_v5, 9  ;;  %v2739_v31 = vsel %vm5631_vm14, %v2737_v21, %v2738_v18  ;;  %v3289_v11 = vrot.slane %v3287_v61, 5  ;;  %v2070_v20 = vld [vmem:[#allocation2 + $0x48] sm:$0xf] }
 0x12e   : > { %v1750_v35 = vpop.permute.xlu0 %1749  ;;  %1839 = vst.msk [vmem:[#allocation3 + $0x24] sm:$0xf] %vm1829_vm1, %v1752_v37  ;;  %v3246_v30 = vrot.slane %v3244_v19, 4  ;;  %v3249_v32 = vrot.slane %v3247_v46, 5  ;;  %v5924_v44 = vrot.slane %v3277_v27, 5  ;;  %v3283_v56 = vrot.slane %v3281_v28, 4 }
 0x12f   : > { %1838 = vst.msk [vmem:[#allocation3 + $0x20] sm:$0xf] %vm1829_vm1, %v1750_v35  ;;  %3918 = vrot.lane.b32.xlu1 %v3810_v22, %s5171_s9  ;;  %v3257_v22 = vshrl.u32 %v3154_v14, 16  ;;  %v2736_v29 = vsel %vm5631_vm14, %v4892_v15, %v2735_v9  ;;  %v3155_v35 = vld [vmem:[#allocation2 + $0x38] sm:$0x1]  ;;  %v3275_v9 = vrot.slane %v3274_v59, 4 }
 0x130   : > { %3916 = vrot.lane.b32.xlu0 %v3807_v49, %s5171_s9  ;;  %v3253_v49 = vshll.u32 %v3154_v14, 16  ;;  %v3263_v36 = vshll.u32 %v3155_v35, 16  ;;  %v3284_v60 = vor.u32 %v3283_v56, %v5924_v44  ;;  %v3718_v14 = vld [vmem:[#allocation2 + $0x40] sm:$0xf]  ;;  %v2200_v15 = vshrl.u32 %v2067_v3, 16 }
 0x131   : > { %v1756_v52 = vpop.permute.xlu1 %1755  ;;  %v3259_v37 = vrot.slane %v3257_v22, 4  ;;  %v3717_v27 = vld [vmem:[#allocation2 + $0x3c] sm:$0xe]  ;;  %v3827_v28 = vrot.slane %v3718_v14, 5  ;;  %v2069_v35 = vld [vmem:[#allocation2 + $0x44] sm:$0x1] }
 0x132   : > { %v1754_v51 = vpop.permute.xlu0 %1753  ;;  %1841 = vst.msk [vmem:[#allocation3 + $0x2c] sm:$0xf] %vm1829_vm1, %v1756_v52  ;;  %v5920_v34 = vrot.slane %v3253_v49, 5  ;;  %v3250_v52 = vor.u32 %v3249_v32, %v3246_v30  ;;  %v3285_v10 = vrot.slane %v3284_v60, 4  ;;  %v2202_v30 = vrot.slane %v2200_v15, 4 }
 0x133   : > { %1840 = vst.msk [vmem:[#allocation3 + $0x28] sm:$0xf] %vm1829_vm1, %v1754_v51  ;;  %3922 = vrot.lane.b32.xlu1 %v3817_v39, %s5171_s9  ;;  %v2959_v51 = vld [vmem:[#allocation2 + $0x34] sm:$0xf]  ;;  %v4908_v45 = vrot.slane %v3717_v27, 9 }
 0x134   : > { %3920 = vrot.lane.b32.xlu0 %v3814_v38, %s5171_s9  ;;  %v3260_v54 = vor.u32 %v3259_v37, %v5920_v34  ;;  %v3251_v0 = vrot.slane %v3250_v52, 4  ;;  %v3290_v25 = vsel %vm5256_vm9, %v3285_v10, %v3289_v11  ;;  %v2215_v37 = vrot.slane %v2213_v43, 4  ;;  %v2072_v60 = vld [vmem:[#allocation2 + $0x50] sm:$0x1]  ;;  %v2632_v43 = vld [vmem:[#allocation2 + $0x4c] sm:$0xf] }
 0x135   : > { %v1760_v63 = vpop.permute.xlu1 %1759  ;;  %v2633_v27 = vld [vmem:[#allocation2 + $0x50] sm:$0x1] }
 0x136   : > { %v1758_v57 = vpop.permute.xlu0 %1757  ;;  %1843 = vst.msk [vmem:[#allocation3 + $0x34] sm:$0xf] %vm1829_vm1, %v1760_v63  ;;  %v3715_v63 = vld [vmem:[#allocation2 + $0x34] sm:$0xf]  ;;  %v3261_v2 = vrot.slane %v3260_v54, 4  ;;  %v3256_v18 = vsel %vm5256_vm9, %v3251_v0, %v5920_v34  ;;  %v2224_v34 = vshrl.u32 %v2070_v20, 16 }
 0x137   : > { %1842 = vst.msk [vmem:[#allocation3 + $0x30] sm:$0xf] %vm1829_vm1, %v1758_v57  ;;  %2497 = vrot.lane.b32.xlu1 %v2174_v58, %s5167_s25  ;;  %v2960_v58 = vld [vmem:[#allocation2 + $0x3c] sm:$0xf]  ;;  %v3265_v57 = vrot.slane %v3263_v36, 5  ;;  %v2219_v54 = vshll.u32 %v2069_v35, 16 }
 0x138   : > { %2495 = vrot.lane.b32.xlu0 %v2164_v55, %s5167_s25 }
 0x139   : > { %v1764_v13 = vpop.permute.xlu1 %1763  ;;  %v3266_v19 = vsel %vm5256_vm9, %v3261_v2, %v3265_v57  ;;  %v2221_v2 = vrot.slane %v2219_v54, 5 }
 0x13a   : > { %v1762_v12 = vpop.permute.xlu0 %1761  ;;  %1845 = vst.msk [vmem:[#allocation3 + $0x3c] sm:$0xf] %vm1829_vm1, %v1764_v13  ;;  %v3716_v13 = vld [vmem:[#allocation2 + $0x38] sm:$0x1] }
 0x13b   : > { %1844 = vst.msk [vmem:[#allocation3 + $0x38] sm:$0xf] %vm1829_vm1, %v1762_v12  ;;  %2501 = vrot.lane.b32.xlu1 %v2198_v8, %s5167_s25  ;;  %v3714_v8 = vld [vmem:[#allocation2 + $0x30] sm:$0xe]  ;;  %v3820_v12 = vrot.slane %v3715_v63, 5  ;;  %v3823_v22 = vrot.slane %v3716_v13, 5  ;;  %v3828_v63 = vsel %vm5631_vm14, %v4908_v45, %v3827_v28 }
 0x13c   : > { %2499 = vrot.lane.b32.xlu0 %v2188_v6, %s5167_s25  ;;  %v4907_v49 = vrot.slane %v3714_v8, 9  ;;  %v2628_v13 = vld [vmem:[#allocation2 + $0x3c] sm:$0xe] }
 0x13d   : > { %v1768_v24 = vpop.permute.xlu1 %1767  ;;  %v3822_v26 = vrot.slane %v3820_v12, 4 }
 0x13e   : > { %v1766_v23 = vpop.permute.xlu0 %1765  ;;  %1847 = vst.msk [vmem:[#allocation3 + $0x44] sm:$0xf] %vm1829_vm1, %v1768_v24  ;;  %v3280_v24 = vsel %vm5256_vm9, %v3275_v9, %v5924_v44  ;;  %v3821_v56 = vsel %vm5631_vm14, %v4907_v49, %v3820_v12  ;;  %v2629_v9 = vld [vmem:[#allocation2 + $0x40] sm:$0xf] }
 0x13f   : > { %1846 = vst.msk [vmem:[#allocation3 + $0x40] sm:$0xf] %vm1829_vm1, %v1766_v23  ;;  %2834 = vrot.lane.b32.xlu1 %v2732_v17, %s5168_s26  ;;  %v2209_v17 = vshll.u32 %v2068_v4, 16  ;;  %v2071_v23 = vld [vmem:[#allocation2 + $0x4c] sm:$0xf]  ;;  %v3824_v36 = vsel %vm5631_vm14, %v3822_v26, %v3823_v22  ;;  %v2742_v14 = vrot.slane %v2629_v9, 5 }
 0x140   : > { %2832 = vrot.lane.b32.xlu0 %v2729_v16, %s5168_s26  ;;  %v2203_v16 = vshll.u32 %v2067_v3, 16  ;;  %v2237_v40 = vshrl.u32 %v2071_v23, 16  ;;  %v2243_v3 = vshll.u32 %v2072_v60, 16  ;;  %v2963_v9 = vld [vmem:[#allocation2 + $0x4c] sm:$0xf] }
 0x141   : > { %v1772_v39 = vpop.permute.xlu1 %1771  ;;  %v2211_v32 = vrot.slane %v2209_v17, 5  ;;  %v2744_v49 = vrot.slane %v2742_v14, 4 }
 0x142   : > { %v1770_v38 = vpop.permute.xlu0 %1769  ;;  %1849 = vst.msk [vmem:[#allocation3 + $0x4c] sm:$0xf] %vm1829_vm1, %v1772_v39  ;;  %v2233_v39 = vshll.u32 %v2071_v23, 16  ;;  %v2239_v61 = vrot.slane %v2237_v40, 4  ;;  %v2245_v12 = vrot.slane %v2243_v3, 5 }
 0x143   : > { %1848 = vst.msk [vmem:[#allocation3 + $0x48] sm:$0xf] %vm1829_vm1, %v1770_v38  ;;  %2838 = vrot.lane.b32.xlu1 %v2739_v31, %s5168_s26  ;;  %v2205_v31 = vrot.slane %v2203_v16, 5  ;;  %v2227_v38 = vshll.u32 %v2070_v20, 16  ;;  %v2631_v23 = vld [vmem:[#allocation2 + $0x48] sm:$0xe] }
 0x144   : > { %2836 = vrot.lane.b32.xlu0 %v2736_v29, %s5168_s26  ;;  %v3719_v29 = vld [vmem:[#allocation2 + $0x44] sm:$0x1]  ;;  %v2235_v59 = vrot.slane %v2233_v39, 5  ;;  %v2752_v39 = vrot.slane %v2633_v27, 5  ;;  %v3163_v40 = vld [vmem:[#allocation2 + $0x58] sm:$0xf] }
 0x145   : > { %v1776_v55 = vpop.permute.xlu1 %1775  ;;  %v2206_v52 = vor.u32 %v2205_v31, %v2202_v30  ;;  %v3159_v30 = vld [vmem:[#allocation2 + $0x48] sm:$0xf]  ;;  %v3160_v31 = vld [vmem:[#allocation2 + $0x4c] sm:$0xf]  ;;  %v3325_v54 = vshll.u32 %v3163_v40, 16 }
 0x146   : > { %v1774_v47 = vpop.permute.xlu0 %1773  ;;  %1851 = vst.msk [vmem:[#allocation3 + $0x54] sm:$0xf] %vm1829_vm1, %v1776_v55  ;;  %v2216_v55 = vor.u32 %v2215_v37, %v2211_v32  ;;  %v2240_v8 = vor.u32 %v2239_v61, %v2235_v59 }
 0x147   : > { %1850 = vst.msk [vmem:[#allocation3 + $0x50] sm:$0xf] %vm1829_vm1, %v1774_v47  ;;  %3028 = vrot.lane.b32.xlu1 %v2959_v51, %s5169_s27  ;;  %v3829_v51 = vrot.slane %v3827_v28, 4  ;;  %v2226_v47 = vrot.slane %v2224_v34, 4  ;;  %v2207_v4 = vrot.slane %v2206_v52, 4 }
 0x148   : > { %3026 = vrot.lane.b32.xlu0 %v2958_v50, %s5169_s27  ;;  %v3830_v50 = vrot.slane %v3719_v29, 5  ;;  %v3162_v34 = vld [vmem:[#allocation2 + $0x54] sm:$0xf] }
 0x149   : > { %v1780_v6 = vpop.permute.xlu1 %1779  ;;  %v2212_v15 = vsel %vm5256_vm9, %v2207_v4, %v2211_v32  ;;  %v4894_v32 = vrot.slane %v2631_v23, 9  ;;  %v3319_v52 = vshll.u32 %v3162_v34, 16  ;;  %v6004_v4 = vrot.slane %v3325_v54, 5 }
 0x14a   : > { %v1778_v5 = vpop.permute.xlu0 %1777  ;;  %1853 = vst.msk [vmem:[#allocation3 + $0x5c] sm:$0xf] %vm1829_vm1, %v1780_v6  ;;  %v3831_v0 = vsel %vm5631_vm14, %v3829_v51, %v3830_v50  ;;  %v3316_v51 = vshrl.u32 %v3162_v34, 16 }
 0x14b   : > { %1852 = vst.msk [vmem:[#allocation3 + $0x58] sm:$0xf] %vm1829_vm1, %v1778_v5  ;;  %3032 = vrot.lane.b32.xlu1 %v2961_v62, %s5169_s27  ;;  %v2217_v5 = vrot.slane %v2216_v55, 4  ;;  %v3321_v3 = vrot.slane %v3319_v52, 5 }
 0x14c   : > { %3030 = vrot.lane.b32.xlu0 %v2960_v58, %s5169_s27  ;;  %v2229_v58 = vrot.slane %v2227_v38, 5 }
 0x14d   : > { %v1784_v46 = vpop.permute.xlu1 %1783  ;;  %v2222_v16 = vsel %vm5256_vm9, %v2217_v5, %v2221_v2  ;;  %v3318_v2 = vrot.slane %v3316_v51, 4 }
 0x14e   : > { %v1782_v21 = vpop.permute.xlu0 %1781  ;;  %1855 = vst.msk [vmem:[#allocation3 + $0x64] sm:$0xf] %vm1829_vm1, %v1784_v46  ;;  %v2230_v6 = vor.u32 %v2229_v58, %v2226_v47  ;;  %v4893_v46 = vrot.slane %v2628_v13, 9  ;;  %v3329_v47 = vshrl.u32 %v3163_v40, 16  ;;  %v2076_v40 = vld [vmem:[#allocation2 + $0x60] sm:$0xf] }
 0x14f   : > { %1854 = vst.msk [vmem:[#allocation3 + $0x60] sm:$0xf] %vm1829_vm1, %v1782_v21  ;;  %3589 = vrot.lane.b32.xlu1 %v3266_v19, %s5170_s6  ;;  %v2630_v19 = vld [vmem:[#allocation2 + $0x44] sm:$0x1] }
 0x150   : > { %3587 = vrot.lane.b32.xlu0 %v3256_v18, %s5170_s6  ;;  %v2231_v17 = vrot.slane %v2230_v6, 4  ;;  %v2241_v18 = vrot.slane %v2240_v8, 4  ;;  %v2745_v22 = vrot.slane %v2630_v19, 5  ;;  %v2743_v35 = vsel %vm5631_vm14, %v4893_v46, %v2742_v14  ;;  %v3164_v6 = vld [vmem:[#allocation2 + $0x5c] sm:$0x1] }
 0x151   : > { %v1788_v44 = vpop.permute.xlu1 %1787  ;;  %v3331_v5 = vrot.slane %v3329_v47, 4  ;;  %v2962_v8 = vld [vmem:[#allocation2 + $0x48] sm:$0xf]  ;;  %v2965_v19 = vld [vmem:[#allocation2 + $0x58] sm:$0xf] }
 0x152   : > { %v1786_v42 = vpop.permute.xlu0 %1785  ;;  %1857 = vst.msk [vmem:[#allocation3 + $0x6c] sm:$0xf] %vm1829_vm1, %v1788_v44  ;;  %v2246_v26 = vsel %vm5256_vm9, %v2241_v18, %v2245_v12  ;;  %v2746_v37 = vsel %vm5631_vm14, %v2744_v49, %v2745_v22  ;;  %v3295_v44 = vshll.u32 %v3159_v30, 16  ;;  %v2964_v18 = vld [vmem:[#allocation2 + $0x54] sm:$0xf] }
 0x153   : > { %1856 = vst.msk [vmem:[#allocation3 + $0x68] sm:$0xf] %vm1829_vm1, %v1786_v42  ;;  %3593 = vrot.lane.b32.xlu1 %v3290_v25, %s5170_s6  ;;  %v2236_v25 = vsel %vm5256_vm9, %v2231_v17, %v2235_v59  ;;  %v3292_v42 = vshrl.u32 %v3159_v30, 16  ;;  %v3335_v17 = vshll.u32 %v3164_v6, 16  ;;  %v2073_v49 = vld [vmem:[#allocation2 + $0x54] sm:$0xf] }
 0x154   : > { %3591 = vrot.lane.b32.xlu0 %v3280_v24, %s5170_s6  ;;  %v2749_v24 = vrot.slane %v2632_v43, 5  ;;  %v3297_v60 = vrot.slane %v3295_v44, 5  ;;  %v3721_v43 = vld [vmem:[#allocation2 + $0x4c] sm:$0xf]  ;;  %v3722_v30 = vld [vmem:[#allocation2 + $0x50] sm:$0x1] }
 0x155   : > { %v1792_v57 = vpop.permute.xlu1 %1791  ;;  %v3294_v59 = vrot.slane %v3292_v42, 4  ;;  %v3337_v27 = vrot.slane %v3335_v17, 5  ;;  %v2251_v34 = vshll.u32 %v2073_v49, 16  ;;  %v3837_v52 = vrot.slane %v3722_v30, 5  ;;  %v3723_v47 = vld [vmem:[#allocation2 + $0x54] sm:$0xe] }
 0x156   : > { %v1790_v62 = vpop.permute.xlu0 %1789  ;;  %1859 = vst.msk [vmem:[#allocation3 + $0x74] sm:$0xf] %vm1829_vm1, %v1792_v57  ;;  %v2751_v38 = vrot.slane %v2749_v24, 4  ;;  %v2750_v55 = vsel %vm5631_vm14, %v4894_v32, %v2749_v24  ;;  %v2248_v32 = vshrl.u32 %v2073_v49, 16 }
 0x157   : > { %1858 = vst.msk [vmem:[#allocation3 + $0x70] sm:$0xf] %vm1829_vm1, %v1790_v62  ;;  %3926 = vrot.lane.b32.xlu1 %v3824_v36, %s5171_s9  ;;  %v3305_v36 = vshrl.u32 %v3160_v31, 16 }
 0x158   : > { %3924 = vrot.lane.b32.xlu0 %v3821_v56, %s5171_s9  ;;  %v3301_v56 = vshll.u32 %v3160_v31, 16  ;;  %v2753_v58 = vsel %vm5631_vm14, %v2751_v38, %v2752_v39  ;;  %v3724_v31 = vld [vmem:[#allocation2 + $0x58] sm:$0xf] }
 0x159   : > { %v1796_v11 = vpop.permute.xlu1 %1795  ;;  %v3307_v62 = vrot.slane %v3305_v36, 4  ;;  %v3841_v54 = vrot.slane %v3724_v31, 5  ;;  %v2638_v31 = vld [vmem:[#allocation2 + $0x64] sm:$0xf] }
 0x15a   : > { %v1794_v10 = vpop.permute.xlu0 %1793  ;;  %1861 = vst.msk [vmem:[#allocation3 + $0x7c] sm:$0xf] %vm1829_vm1, %v1796_v11  ;;  %v6000_v61 = vrot.slane %v3301_v56, 5 }
 0x15b   : > { %1860 = vst.msk [vmem:[#allocation3 + $0x78] sm:$0xf] %vm1829_vm1, %v1794_v10  ;;  %3930 = vrot.lane.b32.xlu1 %v3831_v0, %s5171_s9  ;;  %v3161_v0 = vld [vmem:[#allocation2 + $0x50] sm:$0x1]  ;;  %v3298_v10 = vor.u32 %v3297_v60, %v3294_v59  ;;  %v2272_v59 = vshrl.u32 %v2076_v40, 16  ;;  %v2275_v60 = vshll.u32 %v2076_v40, 16 }
 0x15c   : > { %3928 = vrot.lane.b32.xlu0 %v3828_v63, %s5171_s9  ;;  %v3308_v11 = vor.u32 %v3307_v62, %v6000_v61  ;;  %v3311_v12 = vshll.u32 %v3161_v0, 16  ;;  %v2634_v40 = vld [vmem:[#allocation2 + $0x54] sm:$0xe] }
 0x15d   : > { %v1929_v21 = vpop.permute.xlu1 %1928 }
 0x15e   : > { %v1927_v20 = vpop.permute.xlu0 %1926  ;;  %2024 = vst.msk [vmem:[#allocation3 + $0x4] sm:$0xf] %vm2022_vm3, %v1929_v21  ;;  %v3309_v21 = vrot.slane %v3308_v11, 4  ;;  %v3313_v46 = vrot.slane %v3311_v12, 5  ;;  %v2274_v12 = vrot.slane %v2272_v59, 4 }
 0x15f   : > { %2023 = vst.msk [vmem:[#allocation3] sm:$0xf] %vm2022_vm3, %v1927_v20  ;;  %2505 = vrot.lane.b32.xlu1 %v2222_v16, %s5167_s25  ;;  %v3332_v16 = vor.u32 %v3331_v5, %v6004_v4  ;;  %v3299_v20 = vrot.slane %v3298_v10, 4  ;;  %v3166_v59 = vld [vmem:[#allocation2 + $0x64] sm:$0xf] }
 0x160   : > { %2503 = vrot.lane.b32.xlu0 %v2212_v15, %s5167_s25  ;;  %v3322_v15 = vor.u32 %v3321_v3, %v3318_v2 }
 0x161   : > { %v1933_v29 = vpop.permute.xlu1 %1932 }
 0x162   : > { %v1931_v28 = vpop.permute.xlu0 %1930  ;;  %2026 = vst.msk [vmem:[#allocation3 + $0xc] sm:$0xf] %vm2022_vm3, %v1933_v29  ;;  %v3323_v24 = vrot.slane %v3322_v15, 4  ;;  %v3834_v29 = vrot.slane %v3721_v43, 5  ;;  %v2078_v43 = vld [vmem:[#allocation2 + $0x68] sm:$0x1] }
 0x163   : > { %2025 = vst.msk [vmem:[#allocation3 + $0x8] sm:$0xf] %vm2022_vm3, %v1931_v28  ;;  %2509 = vrot.lane.b32.xlu1 %v2246_v26, %s5167_s25  ;;  %v3333_v26 = vrot.slane %v3332_v16, 4  ;;  %v3720_v28 = vld [vmem:[#allocation2 + $0x48] sm:$0xe] }
 0x164   : > { %2507 = vrot.lane.b32.xlu0 %v2236_v25, %s5167_s25  ;;  %v2074_v25 = vld [vmem:[#allocation2 + $0x58] sm:$0xf]  ;;  %v3328_v56 = vsel %vm5256_vm9, %v3323_v24, %v6004_v4  ;;  %v4909_v36 = vrot.slane %v3720_v28, 9  ;;  %v3836_v51 = vrot.slane %v3834_v29, 4  ;;  %v2075_v4 = vld [vmem:[#allocation2 + $0x5c] sm:$0x1] }
 0x165   : > { %v1937_v50 = vpop.permute.xlu1 %1936  ;;  %v2257_v38 = vshll.u32 %v2074_v25, 16  ;;  %v2261_v39 = vshrl.u32 %v2074_v25, 16  ;;  %v2267_v15 = vshll.u32 %v2075_v4, 16  ;;  %v2291_v25 = vshll.u32 %v2078_v43, 16  ;;  %v2635_v28 = vld [vmem:[#allocation2 + $0x58] sm:$0xf] }
 0x166   : > { %v1935_v45 = vpop.permute.xlu0 %1934  ;;  %2028 = vst.msk [vmem:[#allocation3 + $0x14] sm:$0xf] %vm2022_vm3, %v1937_v50  ;;  %v3338_v50 = vsel %vm5256_vm9, %v3333_v26, %v3337_v27  ;;  %v3835_v5 = vsel %vm5631_vm14, %v4909_v36, %v3834_v29  ;;  %v3838_v6 = vsel %vm5631_vm14, %v3836_v51, %v3837_v52  ;;  %v2637_v36 = vld [vmem:[#allocation2 + $0x60] sm:$0xe]  ;;  %v4895_v51 = vrot.slane %v2634_v40, 9 }
 0x167   : > { %2027 = vst.msk [vmem:[#allocation3 + $0x10] sm:$0xf] %vm2022_vm3, %v1935_v45  ;;  %2842 = vrot.lane.b32.xlu1 %v2746_v37, %s5168_s26  ;;  %v3314_v37 = vsel %vm5256_vm9, %v3309_v21, %v3313_v46  ;;  %v2077_v45 = vld [vmem:[#allocation2 + $0x64] sm:$0xf]  ;;  %v2259_v62 = vrot.slane %v2257_v38, 5  ;;  %v3353_v4 = vshrl.u32 %v3166_v59, 16 }
 0x168   : > { %2840 = vrot.lane.b32.xlu0 %v2743_v35, %s5168_s26  ;;  %v3304_v35 = vsel %vm5256_vm9, %v3299_v20, %v6000_v61  ;;  %v3725_v61 = vld [vmem:[#allocation2 + $0x5c] sm:$0x1]  ;;  %v2285_v0 = vshrl.u32 %v2077_v45, 16 }
 0x169   : > { %v1941_v63 = vpop.permute.xlu1 %1940  ;;  %v3844_v10 = vrot.slane %v3725_v61, 5 }
 0x16a   : > { %v1939_v57 = vpop.permute.xlu0 %1938  ;;  %2030 = vst.msk [vmem:[#allocation3 + $0x1c] sm:$0xf] %vm2022_vm3, %v1941_v63  ;;  %v2281_v63 = vshll.u32 %v2077_v45, 16  ;;  %v2287_v17 = vrot.slane %v2285_v0, 4  ;;  %v2639_v45 = vld [vmem:[#allocation2 + $0x68] sm:$0x1] }
 0x16b   : > { %2029 = vst.msk [vmem:[#allocation3 + $0x18] sm:$0xf] %vm2022_vm3, %v1939_v57  ;;  %2846 = vrot.lane.b32.xlu1 %v2753_v58, %s5168_s26  ;;  %v2253_v58 = vrot.slane %v2251_v34, 5  ;;  %v2263_v57 = vrot.slane %v2261_v39, 4 }
 0x16c   : > { %2844 = vrot.lane.b32.xlu0 %v2750_v55, %s5168_s26  ;;  %v2250_v55 = vrot.slane %v2248_v32, 4  ;;  %v2283_v16 = vrot.slane %v2281_v63, 5 }
 0x16d   : > { %v1945_v14 = vpop.permute.xlu1 %1944 }
 0x16e   : > { %v1943_v13 = vpop.permute.xlu0 %1942  ;;  %2032 = vst.msk [vmem:[#allocation3 + $0x24] sm:$0xf] %vm2022_vm3, %v1945_v14  ;;  %v2254_v11 = vor.u32 %v2253_v58, %v2250_v55  ;;  %v2264_v14 = vor.u32 %v2263_v57, %v2259_v62  ;;  %v2288_v24 = vor.u32 %v2287_v17, %v2283_v16  ;;  %v3355_v17 = vrot.slane %v3353_v4, 4  ;;  %v3729_v4 = vld [vmem:[#allocation2 + $0x6c] sm:$0xe] }
 0x16f   : > { %2031 = vst.msk [vmem:[#allocation3 + $0x20] sm:$0xf] %vm2022_vm3, %v1943_v13  ;;  %3036 = vrot.lane.b32.xlu1 %v2963_v9, %s5169_s27  ;;  %v3843_v9 = vrot.slane %v3841_v54, 4  ;;  %v2277_v13 = vrot.slane %v2275_v60, 5  ;;  %v4896_v60 = vrot.slane %v2637_v36, 9 }
 0x170   : > { %3034 = vrot.lane.b32.xlu0 %v2962_v8, %s5169_s27  ;;  %v4910_v8 = vrot.slane %v3723_v47, 9  ;;  %v2255_v46 = vrot.slane %v2254_v11, 4  ;;  %v2289_v34 = vrot.slane %v2288_v24, 4  ;;  %v3165_v47 = vld [vmem:[#allocation2 + $0x60] sm:$0xf] }
 0x171   : > { %v1949_v23 = vpop.permute.xlu1 %1948  ;;  %v3845_v21 = vsel %vm5631_vm14, %v3843_v9, %v3844_v10  ;;  %v2278_v49 = vor.u32 %v2277_v13, %v2274_v12  ;;  %v3340_v57 = vshrl.u32 %v3165_v47, 16  ;;  %v3343_v63 = vshll.u32 %v3165_v47, 16  ;;  %v3169_v9 = vld [vmem:[#allocation2 + $0x70] sm:$0xf]  ;;  %v2967_v24 = vld [vmem:[#allocation2 + $0x64] sm:$0xf] }
 0x172   : > { %v1947_v22 = vpop.permute.xlu0 %1946  ;;  %2034 = vst.msk [vmem:[#allocation3 + $0x2c] sm:$0xf] %vm2022_vm3, %v1949_v23  ;;  %v3842_v20 = vsel %vm5631_vm14, %v4910_v8, %v3841_v54  ;;  %v2269_v23 = vrot.slane %v2267_v15, 5  ;;  %v2260_v29 = vsel %vm5256_vm9, %v2255_v46, %v2259_v62  ;;  %v2766_v62 = vrot.slane %v2639_v45, 5  ;;  %v2966_v46 = vld [vmem:[#allocation2 + $0x60] sm:$0xf] }
 0x173   : > { %2033 = vst.msk [vmem:[#allocation3 + $0x28] sm:$0xf] %vm2022_vm3, %v1947_v22  ;;  %3040 = vrot.lane.b32.xlu1 %v2965_v19, %s5169_s27  ;;  %v2265_v22 = vrot.slane %v2264_v14, 4  ;;  %v2279_v30 = vrot.slane %v2278_v49, 4  ;;  %v3342_v12 = vrot.slane %v3340_v57, 4  ;;  %v3345_v13 = vrot.slane %v3343_v63, 5 }
 0x174   : > { %3038 = vrot.lane.b32.xlu0 %v2964_v18, %s5169_s27  ;;  %v3726_v45 = vld [vmem:[#allocation2 + $0x60] sm:$0xe]  ;;  %v3730_v57 = vld [vmem:[#allocation2 + $0x70] sm:$0xf] }
 0x175   : > { %v1953_v44 = vpop.permute.xlu1 %1952  ;;  %v2270_v32 = vsel %vm5256_vm9, %v2265_v22, %v2269_v23  ;;  %v3346_v49 = vor.u32 %v3345_v13, %v3342_v12  ;;  %v2080_v63 = vld [vmem:[#allocation2 + $0x70] sm:$0xf]  ;;  %v2083_v13 = vld [vmem:[#allocation2 + $0x7c] sm:$0xf] }
 0x176   : > { %v1951_v42 = vpop.permute.xlu0 %1950  ;;  %2036 = vst.msk [vmem:[#allocation3 + $0x34] sm:$0xf] %vm2022_vm3, %v1953_v44  ;;  %v2763_v44 = vrot.slane %v2638_v31, 5  ;;  %v3170_v31 = vld [vmem:[#allocation2 + $0x74] sm:$0x1]  ;;  %v2309_v12 = vshrl.u32 %v2080_v63, 16 }
 0x177   : > { %2035 = vst.msk [vmem:[#allocation3 + $0x30] sm:$0xf] %vm2022_vm3, %v1951_v42  ;;  %3597 = vrot.lane.b32.xlu1 %v3314_v37, %s5170_s6  ;;  %v2756_v37 = vrot.slane %v2635_v28, 5  ;;  %v2636_v42 = vld [vmem:[#allocation2 + $0x5c] sm:$0x1] }
 0x178   : > { %3595 = vrot.lane.b32.xlu0 %v3304_v35, %s5170_s6  ;;  %v2293_v35 = vrot.slane %v2291_v25, 5  ;;  %v2759_v54 = vrot.slane %v2636_v42, 5  ;;  %v2765_v61 = vrot.slane %v2763_v44, 4  ;;  %v2764_v10 = vsel %vm5631_vm14, %v4896_v60, %v2763_v44 }
 0x179   : > { %v1957_v3 = vpop.permute.xlu1 %1956  ;;  %v2758_v52 = vrot.slane %v2756_v37, 4  ;;  %v2757_v0 = vsel %vm5631_vm14, %v4895_v51, %v2756_v37  ;;  %v3727_v37 = vld [vmem:[#allocation2 + $0x64] sm:$0xf]  ;;  %v3383_v44 = vshll.u32 %v3170_v31, 16 }
 0x17a   : > { %v1955_v2 = vpop.permute.xlu0 %1954  ;;  %2038 = vst.msk [vmem:[#allocation3 + $0x3c] sm:$0xf] %vm2022_vm3, %v1957_v3  ;;  %v3349_v3 = vshll.u32 %v3166_v59, 16  ;;  %v2767_v11 = vsel %vm5631_vm14, %v2765_v61, %v2766_v62  ;;  %v2079_v59 = vld [vmem:[#allocation2 + $0x6c] sm:$0xf]  ;;  %v4911_v62 = vrot.slane %v3726_v45, 9 }
 0x17b   : > { %2037 = vst.msk [vmem:[#allocation3 + $0x38] sm:$0xf] %vm2022_vm3, %v1955_v2  ;;  %3601 = vrot.lane.b32.xlu1 %v3338_v50, %s5170_s6  ;;  %v2294_v50 = vsel %vm5256_vm9, %v2289_v34, %v2293_v35  ;;  %v2760_v2 = vsel %vm5631_vm14, %v2758_v52, %v2759_v54  ;;  %v3347_v34 = vrot.slane %v3346_v49, 4  ;;  %v3728_v52 = vld [vmem:[#allocation2 + $0x68] sm:$0x1]  ;;  %v2329_v49 = vshll.u32 %v2083_v13, 16 }
 0x17c   : > { %3599 = vrot.lane.b32.xlu0 %v3328_v56, %s5170_s6  ;;  %v2284_v56 = vsel %vm5256_vm9, %v2279_v30, %v2283_v16  ;;  %v3351_v16 = vrot.slane %v3349_v3, 5 }
 0x17d   : > { %v1961_v19 = vpop.permute.xlu1 %1960 }
 0x17e   : > { %v1959_v18 = vpop.permute.xlu0 %1958  ;;  %2040 = vst.msk [vmem:[#allocation3 + $0x44] sm:$0xf] %vm2022_vm3, %v1961_v19  ;;  %v3377_v19 = vshrl.u32 %v3169_v9, 16  ;;  %v3356_v25 = vor.u32 %v3355_v17, %v3351_v16  ;;  %v3352_v54 = vsel %vm5256_vm9, %v3347_v34, %v3351_v16  ;;  %v3731_v17 = vld [vmem:[#allocation2 + $0x74] sm:$0x1] }
 0x17f   : > { %2039 = vst.msk [vmem:[#allocation3 + $0x40] sm:$0xf] %vm2022_vm3, %v1959_v18  ;;  %3934 = vrot.lane.b32.xlu1 %v3838_v6, %s5171_s9  ;;  %v3373_v18 = vshll.u32 %v3169_v9, 16 }
 0x180   : > { %3932 = vrot.lane.b32.xlu0 %v3835_v5, %s5171_s9  ;;  %v3168_v5 = vld [vmem:[#allocation2 + $0x6c] sm:$0xf]  ;;  %v3379_v28 = vrot.slane %v3377_v19, 4  ;;  %v4912_v19 = vrot.slane %v3729_v4, 9 }
 0x181   : > { %v2490_v27 = vpop.permute.xlu1 %2489  ;;  %v3364_v14 = vshrl.u32 %v3168_v5, 16  ;;  %v3367_v15 = vshll.u32 %v3168_v5, 16  ;;  %v2296_v5 = vshrl.u32 %v2079_v59, 16 }
 0x182   : > { %v2488_v26 = vpop.permute.xlu0 %2487  ;;  %2585 = vst.msk [vmem:[#allocation3 + $0x4] sm:$0xf] %vm2583_vm5, %v2490_v27  ;;  %v6084_v27 = vrot.slane %v3373_v18, 5 }
 0x183   : > { %2584 = vst.msk [vmem:[#allocation3] sm:$0xf] %vm2583_vm5, %v2488_v26  ;;  %3938 = vrot.lane.b32.xlu1 %v3845_v21, %s5171_s9  ;;  %v3167_v21 = vld [vmem:[#allocation2 + $0x68] sm:$0x1]  ;;  %v3366_v22 = vrot.slane %v3364_v14, 4  ;;  %v3369_v23 = vrot.slane %v3367_v15, 5 }
 0x184   : > { %3936 = vrot.lane.b32.xlu0 %v3842_v20, %s5171_s9  ;;  %v3359_v26 = vshll.u32 %v3167_v21, 16  ;;  %v3380_v42 = vor.u32 %v3379_v28, %v6084_v27  ;;  %v2298_v21 = vrot.slane %v2296_v5, 4  ;;  %v250_v5 = vld [vmem:[%s5244_s21 + $0xf8] sm:$0xff] }
 0x185   : > { %v2494_v39 = vpop.permute.xlu1 %2493  ;;  %v3370_v35 = vor.u32 %v3369_v23, %v3366_v22  ;;  %v2333_v22 = vshrl.u32 %v2083_v13, 16  ;;  %v2640_v13 = vld [vmem:[#allocation2 + $0x6c] sm:$0xe] }
 0x186   : > { %v2492_v38 = vpop.permute.xlu0 %2491  ;;  %2587 = vst.msk [vmem:[#allocation3 + $0xc] sm:$0xf] %vm2583_vm5, %v2494_v39  ;;  %v3357_v39 = vrot.slane %v3356_v25, 4  ;;  %v3361_v40 = vrot.slane %v3359_v26, 5  ;;  %v2311_v26 = vrot.slane %v2309_v12, 4 }
 0x187   : > { %2586 = vst.msk [vmem:[#allocation3 + $0x8] sm:$0xf] %vm2583_vm5, %v2492_v38  ;;  %2513 = vrot.lane.b32.xlu1 %v2270_v32, %s5167_s25  ;;  %v2968_v32 = vld [vmem:[#allocation2 + $0x6c] sm:$0xf]  ;;  %v2969_v38 = vld [vmem:[#allocation2 + $0x70] sm:$0xf] }
 0x188   : > { %2511 = vrot.lane.b32.xlu0 %v2260_v29, %s5167_s25  ;;  %v3371_v51 = vrot.slane %v3370_v35, 4  ;;  %v3362_v47 = vsel %vm5256_vm9, %v3357_v39, %v3361_v40 }
 0x189   : > { %v2827_v58 = vpop.permute.xlu1 %2826 }
 0x18a   : > { %v2825_v55 = vpop.permute.xlu0 %2824  ;;  %2922 = vst.msk [vmem:[#allocation3 + $0x4] sm:$0xf] %vm2920_vm6, %v2827_v58  ;;  %v3385_v58 = vrot.slane %v3383_v44, 5  ;;  %v3376_v3 = vsel %vm5256_vm9, %v3371_v51, %v6084_v27  ;;  %v1880_v51 = vld [vmem:[#allocation2 + $0x78] sm:$0xf] }
 0x18b   : > { %2921 = vst.msk [vmem:[#allocation3] sm:$0xf] %vm2920_vm6, %v2825_v55  ;;  %2517 = vrot.lane.b32.xlu1 %v2294_v50, %s5167_s25  ;;  %v3848_v50 = vrot.slane %v3727_v37, 5  ;;  %v3381_v55 = vrot.slane %v3380_v42, 4  ;;  %v6124_v37 = vrot.slane %v2329_v49, 5  ;;  %v4897_v49 = vrot.slane %v2640_v13, 9 }
 0x18c   : > { %2515 = vrot.lane.b32.xlu0 %v2284_v56, %s5167_s25 }
 0x18d   : > { %v2831_v8 = vpop.permute.xlu1 %2830  ;;  %v3386_v9 = vsel %vm5256_vm9, %v3381_v55, %v3385_v58  ;;  %v3849_v16 = vsel %vm5631_vm14, %v4911_v62, %v3848_v50 }
 0x18e   : > { %v2829_v6 = vpop.permute.xlu0 %2828  ;;  %2924 = vst.msk [vmem:[#allocation3 + $0xc] sm:$0xf] %vm2920_vm6, %v2831_v8  ;;  %v2082_v8 = vld [vmem:[#allocation2 + $0x78] sm:$0xf] }
 0x18f   : > { %2923 = vst.msk [vmem:[#allocation3 + $0x8] sm:$0xf] %vm2920_vm6, %v2829_v6  ;;  %2850 = vrot.lane.b32.xlu1 %v2760_v2, %s5168_s26  ;;  %v3851_v2 = vrot.slane %v3728_v52, 5  ;;  %v2299_v6 = vshll.u32 %v2079_v59, 16  ;;  %v1881_v52 = vld [vmem:[#allocation2 + $0x7c] sm:$0xf] }
 0x190   : > { %2848 = vrot.lane.b32.xlu0 %v2757_v0, %s5168_s26  ;;  %v3850_v0 = vrot.slane %v3848_v50, 4  ;;  %v6135_v59 = vld [vmem:[#allocation2 + $0x70] sm:$0xf] }
 0x191   : > { %v3021_v20 = vpop.permute.xlu1 %3020 }
 0x192   : > { %v3019_v43 = vpop.permute.xlu0 %3018  ;;  %3116 = vst.msk [vmem:[#allocation3 + $0x4] sm:$0xf] %vm3114_vm8, %v3021_v20  ;;  %v3852_v18 = vsel %vm5631_vm14, %v3850_v0, %v3851_v2  ;;  %v2323_v20 = vshll.u32 %v2082_v8, 16  ;;  %v6139_v2 = vld [vmem:[#allocation2 + $0x7c] sm:$0xf] }
 0x193   : > { %3115 = vst.msk [vmem:[#allocation3] sm:$0xf] %vm3114_vm8, %v3019_v43  ;;  %2854 = vrot.lane.b32.xlu1 %v2767_v11, %s5168_s26  ;;  %v2305_v11 = vshll.u32 %v2080_v63, 16  ;;  %v2320_v43 = vshrl.u32 %v2082_v8, 16  ;;  %v2770_v8 = vrot.slane %v6135_v59, 5 }
 0x194   : > { %2852 = vrot.lane.b32.xlu0 %v2764_v10, %s5168_s26  ;;  %v3855_v10 = vrot.slane %v3730_v57, 5  ;;  %v2325_v31 = vrot.slane %v2323_v20, 5  ;;  %v3175_v59 = vld [vmem:[#allocation2 + $0x88] sm:$0xf] }
 0x195   : > { %v3025_v30 = vpop.permute.xlu1 %3024  ;;  %v6116_v25 = vrot.slane %v2305_v11, 5 }
 0x196   : > { %v3023_v29 = vpop.permute.xlu0 %3022  ;;  %3118 = vst.msk [vmem:[#allocation3 + $0xc] sm:$0xf] %vm3114_vm8, %v3025_v30  ;;  %v3857_v23 = vrot.slane %v3855_v10, 4  ;;  %v2322_v30 = vrot.slane %v2320_v43, 4  ;;  %v3856_v34 = vsel %vm5631_vm14, %v4912_v19, %v3855_v10  ;;  %v5021_v10 = vpack.c.bf16 %v250_v5, %v250_v5  ;;  %v2643_v19 = vld [vmem:[#allocation2 + $0x78] sm:$0xe] }
 0x197   : > { %3117 = vst.msk [vmem:[#allocation3 + $0x8] sm:$0xf] %vm3114_vm8, %v3023_v29  ;;  %3044 = vrot.lane.b32.xlu1 %v2967_v24, %s5169_s27  ;;  %v3858_v24 = vrot.slane %v3731_v17, 5  ;;  %v2081_v29 = vld [vmem:[#allocation2 + $0x74] sm:$0x1]  ;;  %v2312_v40 = vor.u32 %v2311_v26, %v6116_v25 }
 0x198   : > { %3042 = vrot.lane.b32.xlu0 %v2966_v46, %s5169_s27  ;;  %v2301_v46 = vrot.slane %v2299_v6, 5  ;;  %v2315_v42 = vshll.u32 %v2081_v29, 16  ;;  %v2326_v50 = vor.u32 %v2325_v31, %v2322_v30 }
 0x199   : > { %v3582_v36 = vpop.permute.xlu1 %3581  ;;  %v3859_v39 = vsel %vm5631_vm14, %v3857_v23, %v3858_v24  ;;  %v2313_v55 = vrot.slane %v2312_v40, 4  ;;  %v2645_v24 = vld [vmem:[#allocation2 + $0x80] sm:$0x1] }
 0x19a   : > { %v3580_v56 = vpop.permute.xlu0 %3579  ;;  %3677 = vst.msk [vmem:[#allocation3 + $0x4] sm:$0xf] %vm3675_vm12, %v3582_v36  ;;  %v2302_v35 = vor.u32 %v2301_v46, %v2298_v21  ;;  %v2317_v58 = vrot.slane %v2315_v42, 5  ;;  %v2327_v0 = vrot.slane %v2326_v50, 4  ;;  %v724_v21 = vshrl.u32 %v5021_v10, 16 }
 0x19b   : > { %3676 = vst.msk [vmem:[#allocation3] sm:$0xf] %vm3675_vm12, %v3580_v56  ;;  %3048 = vrot.lane.b32.xlu1 %v2969_v38, %s5169_s27  ;;  %v2335_v38 = vrot.slane %v2333_v22, 4  ;;  %v727_v46 = vshll.u32 %v5021_v10, 16  ;;  %v2772_v22 = vrot.slane %v2770_v8, 4  ;;  %v2780_v7 = vrot.slane %v2645_v24, 5 }
 0x19c   : > { %3046 = vrot.lane.b32.xlu0 %v2968_v32, %s5169_s27  ;;  %v2084_v32 = vld [vmem:[#allocation2 + $0x80] sm:$0x1]  ;;  %v2318_v12 = vsel %vm5256_vm9, %v2313_v55, %v2317_v58  ;;  %v2332_v26 = vsel %vm5256_vm9, %v2327_v0, %v6124_v37  ;;  %v726_v30 = vrot.slane %v724_v21, 7  ;;  %v3176_v21 = vld [vmem:[#allocation2 + $0x8c] sm:$0x1] }
 0x19d   : > { %v3586_v61 = vpop.permute.xlu1 %3585  ;;  %v2339_v45 = vshll.u32 %v2084_v32, 16 }
 0x19e   : > { %v3584_v60 = vpop.permute.xlu0 %3583  ;;  %3679 = vst.msk [vmem:[#allocation3 + $0xc] sm:$0xf] %vm3675_vm12, %v3586_v61  ;;  %v729_v42 = vor.u32 %v727_v46, %v726_v30 }
 0x19f   : > { %3678 = vst.msk [vmem:[#allocation3 + $0x8] sm:$0xf] %vm3675_vm12, %v3584_v60  ;;  %3605 = vrot.lane.b32.xlu1 %v3362_v47, %s5170_s6  ;;  %v2336_v47 = vor.u32 %v2335_v38, %v6124_v37  ;;  %v309_v60 = vld [vmem:[#allocation2 + $0xc0] sm:$0x1]  ;;  %v2341_v63 = vrot.slane %v2339_v45, 5 }
 0x1a0   : > { %3603 = vrot.lane.b32.xlu0 %v3352_v54, %s5170_s6  ;;  %v2303_v54 = vrot.slane %v2302_v35, 4  ;;  %v310_v4 = vsel %vm5214_vm4, 0, %v309_v60  ;;  %v3172_v38 = vld [vmem:[#allocation2 + $0x7c] sm:$0xf] }
 0x1a1   : > { %v3919_v15 = vpop.permute.xlu1 %3918  ;;  %v2337_v6 = vrot.slane %v2336_v47, 4  ;;  %311 = vst [vmem:[#allocation2 + $0xc0] sm:$0x1] %v310_v4  ;;  %v3397_v50 = vshll.u32 %v3172_v38, 16  ;;  %v3425_v4 = vshrl.u32 %v3175_v59, 16 }
 0x1a2   : > { %v3917_v14 = vpop.permute.xlu0 %3916  ;;  %4014 = vst.msk [vmem:[#allocation3 + $0x4] sm:$0xf] %vm4012_vm13, %v3919_v15  ;;  %v2308_v11 = vsel %vm5256_vm9, %v2303_v54, %v6116_v25  ;;  %v359_v15 = vld [vmem:[#allocation2 + $0xc8] sm:$0x1] }
 0x1a3   : > { %4013 = vst.msk [vmem:[#allocation3] sm:$0xf] %vm4012_vm13, %v3917_v14  ;;  %3609 = vrot.lane.b32.xlu1 %v3386_v9, %s5170_s6  ;;  %v2642_v14 = vld [vmem:[#allocation2 + $0x74] sm:$0x1]  ;;  %v360_v25 = vsel %vm5226_vm7, 0, %v359_v15  ;;  %v3399_v0 = vrot.slane %v3397_v50, 5 }
 0x1a4   : > { %3607 = vrot.lane.b32.xlu0 %v3376_v3, %s5170_s6  ;;  %v249_v3 = vld [vmem:[%s5244_s21 + $0xf0] sm:$0xff]  ;;  %v2773_v23 = vrot.slane %v2642_v14, 5  ;;  %361 = vst [vmem:[#allocation2 + $0xc8] sm:$0x1] %v360_v25  ;;  %v2971_v15 = vld [vmem:[#allocation2 + $0x7c] sm:$0xf]  ;;  %s217_s21 = scalar_lea.vmem %s6694_s4, %s6710_s16 }
 0x1a5   : > { %v3923_v28 = vpop.permute.xlu1 %3922  ;;  %v5020_v9 = vpack.c.bf16 %v249_v3, %v249_v3  ;;  %v3421_v3 = vshll.u32 %v3175_v59, 16  ;;  %v2086_v59 = vld [vmem:[#allocation2 + $0x88] sm:$0xf]  ;;  %vm4461_vm7 = vcmask 57344  }
 0x1a6   : > { %v3921_v27 = vpop.permute.xlu0 %3920  ;;  %4016 = vst.msk [vmem:[#allocation3 + $0xc] sm:$0xf] %vm4012_vm13, %v3923_v28  ;;  %v3171_v28 = vld [vmem:[#allocation2 + $0x78] sm:$0xf] }
 0x1a7   : > { %4015 = vst.msk [vmem:[#allocation3 + $0x8] sm:$0xf] %vm4012_vm13, %v3921_v27  ;;  %3942 = vrot.lane.b32.xlu1 %v3852_v18, %s5171_s9  ;;  %v2777_v18 = vrot.slane %v6139_v2, 5  ;;  %v716_v43 = vshrl.u32 %v5020_v9, 16  ;;  %v719_v20 = vshll.u32 %v5020_v9, 16  ;;  %v2342_v27 = vsel %vm5256_vm9, %v2337_v6, %v2341_v63 }
 0x1a8   : > { %3940 = vrot.lane.b32.xlu0 %v3849_v16, %s5171_s9  ;;  %v887_v40 = vld [vmem:[#allocation2 + $0xc0] sm:$0xf]  ;;  %v3391_v45 = vshll.u32 %v3171_v28, 16 }
 0x1a9   : > { %v2498_v56 = vpop.permute.xlu1 %2497  ;;  %v718_v29 = vrot.slane %v716_v43, 7  ;;  %v2779_v35 = vrot.slane %v2777_v18, 4  ;;  %v3173_v9 = vld [vmem:[#allocation2 + $0x80] sm:$0x1] }
 0x1aa   : > { %v2496_v44 = vpop.permute.xlu0 %2495  ;;  %v5139_v36 = vld [vmem:[#allocation3] sm:$0xff]   ;;  %2589 = vst.msk [vmem:[#allocation3 + $0x14] sm:$0xf] %vm2583_vm5, %v2498_v56  ;;  %v2774_v56 = vsel %vm5631_vm14, %v2772_v22, %v2773_v23  ;;  %v2973_v22 = vld [vmem:[#allocation2 + $0x88] sm:$0xf] }
 0x1ab   : > { %2588 = vst.msk [vmem:[#allocation3 + $0x10] sm:$0xf] %vm2583_vm5, %v2496_v44  ;;  %3946 = vrot.lane.b32.xlu1 %v3859_v39, %s5171_s9  ;;  %5079 = vmatprep.mubr.msk.bf16.mxu0 %vm4177_vm15, %v5139_v36  ;;  %v721_v39 = vor.u32 %v719_v20, %v718_v29  ;;  %v722_v37 = vrot.slane %v718_v29, 4  ;;  %v2771_v44 = vsel %vm5631_vm14, %v4897_v49, %v2770_v8  ;;  %v3388_v36 = vshrl.u32 %v3171_v28, 16  ;;  %v891_v5 = vld [vmem:[#allocation2 + $0xc8] sm:$0x1] }
 0x1ac   : > { %3944 = vrot.lane.b32.xlu0 %v3856_v34, %s5171_s9  ;;  %v4898_v34 = vrot.slane %v2643_v19, 9  ;;  %v2781_v48 = vsel %vm5631_vm14, %v2779_v35, %v2780_v7  ;;  %v3427_v19 = vrot.slane %v3425_v4, 4  ;;  %v3733_v29 = vld [vmem:[#allocation2 + $0x7c] sm:$0xf]  ;;  %v2089_v4 = vld [vmem:[#allocation2 + $0x94] sm:$0xf] }
 0x1ad   : > { %v2502_v62 = vpop.permute.xlu1 %2501  ;;  %v888_v54 = vsel %vm5262_vm10, %v721_v39, %v887_v40  ;;  %v730_v47 = vsel %vm5268_vm11, %v722_v37, %v729_v42  ;;  %v3390_v53 = vrot.slane %v3388_v36, 4  ;;  %v3862_v7 = vrot.slane %v3733_v29, 5  ;;  %v3732_v37 = vld [vmem:[#allocation2 + $0x78] sm:$0xe]  ;;  %v3734_v42 = vld [vmem:[#allocation2 + $0x80] sm:$0x1] }
 0x1ae   : > { %v2500_v61 = vpop.permute.xlu0 %2499  ;;  %v5140_v57 = vld [vmem:[#allocation3 + $0x8] sm:$0xff]   ;;  %2591 = vst.msk [vmem:[#allocation3 + $0x1c] sm:$0xf] %vm2583_vm5, %v2502_v62  ;;  %889 = vst [vmem:[#allocation2 + $0xc0] sm:$0xf] %v888_v54  ;;  %v2778_v60 = vsel %vm5631_vm14, %v4898_v34, %v2777_v18  ;;  %v3393_v62 = vrot.slane %v3391_v45, 5 }
 0x1af   : > { %2590 = vst.msk [vmem:[#allocation3 + $0x18] sm:$0xf] %vm2583_vm5, %v2500_v61  ;;  %1964 = vrot.lane.b32.xlu1 %v1881_v52, %s5166_s24  ;;  %5080 = vmatmul.mubr.msk.bf16.vlgmr.msra.gmra.mxu0 %vm4177_vm15, %v5140_v57  ;;  %v3174_v52 = vld [vmem:[#allocation2 + $0x84] sm:$0xf]  ;;  %v731_v61 = vrot.slane %v726_v30, 4  ;;  %v3423_v18 = vrot.slane %v3421_v3, 5 }
 0x1b0   : > { %1962 = vrot.lane.b32.xlu0 %v1880_v51, %s5166_s24  ;;  %v3401_v51 = vshrl.u32 %v3172_v38, 16  ;;  %890 = vst.msk [vmem:[#allocation2 + $0xc4] sm:$0xf] %vm251_vm0, %v730_v47  ;;  %v3412_v57 = vshrl.u32 %v3174_v52, 16  ;;  %v3415_v63 = vshll.u32 %v3174_v52, 16  ;;  %v3864_v52 = vrot.slane %v3862_v7, 4 }
 0x1b1   : > { %v2835_v17 = vpop.permute.xlu1 %2834  ;;  %v892_v10 = vsel %vm5214_vm4, %v731_v61, %v891_v5  ;;  %v3428_v25 = vor.u32 %v3427_v19, %v3423_v18  ;;  %v3735_v36 = vld [vmem:[#allocation2 + $0x84] sm:$0xe]  ;;  %v3737_v45 = vld [vmem:[#allocation2 + $0x8c] sm:$0x1]  ;;  %v3865_v54 = vrot.slane %v3734_v42, 5  ;;  %v2381_v19 = vshrl.u32 %v2089_v4, 16 }
 0x1b2   : > { %v2833_v16 = vpop.permute.xlu0 %2832  ;;  %2926 = vst.msk [vmem:[#allocation3 + $0x14] sm:$0xf] %vm2920_vm6, %v2835_v17  ;;  %v3403_v2 = vrot.slane %v3401_v51, 4  ;;  %v3414_v13 = vrot.slane %v3412_v57, 4  ;;  %v3417_v14 = vrot.slane %v3415_v63, 5  ;;  %v3407_v17 = vshll.u32 %v3173_v9, 16 }
 0x1b3   : > { %2925 = vst.msk [vmem:[#allocation3 + $0x10] sm:$0xf] %vm2920_vm6, %v2833_v16  ;;  %2521 = vrot.lane.b32.xlu1 %v2318_v12, %s5167_s25  ;;  %v3394_v12 = vor.u32 %v3393_v62, %v3390_v53  ;;  %893 = vst [vmem:[#allocation2 + $0xc8] sm:$0x1] %v892_v10  ;;  %v3429_v35 = vrot.slane %v3428_v25, 4  ;;  %v4913_v51 = vrot.slane %v3732_v37, 9  ;;  %v3866_v63 = vsel %vm5631_vm14, %v3864_v52, %v3865_v54 }
 0x1b4   : > { %2519 = vrot.lane.b32.xlu0 %v2308_v11, %s5167_s25  ;;  %v2970_v11 = vld [vmem:[#allocation2 + $0x78] sm:$0xf]  ;;  %v3404_v16 = vor.u32 %v3403_v2, %v3399_v0  ;;  %v3418_v49 = vor.u32 %v3417_v14, %v3414_v13  ;;  %v3409_v24 = vrot.slane %v3407_v17, 5  ;;  %v2085_v47 = vld [vmem:[#allocation2 + $0x84] sm:$0xf]  ;;  %v3872_v61 = vrot.slane %v3737_v45, 5 }
 0x1b5   : > { %v2839_v32 = vpop.permute.xlu1 %2838  ;;  %v3395_v46 = vrot.slane %v3394_v12, 4  ;;  %v2344_v53 = vshrl.u32 %v2085_v47, 16  ;;  %v2347_v62 = vshll.u32 %v2085_v47, 16  ;;  %v3863_v57 = vsel %vm5631_vm14, %v4913_v51, %v3862_v7  ;;  %v2088_v3 = vld [vmem:[#allocation2 + $0x90] sm:$0xf] }
 0x1b6   : > { %v2837_v31 = vpop.permute.xlu0 %2836  ;;  %2928 = vst.msk [vmem:[#allocation3 + $0x1c] sm:$0xf] %vm2920_vm6, %v2839_v32  ;;  %v3405_v23 = vrot.slane %v3404_v16, 4  ;;  %v3736_v32 = vld [vmem:[#allocation2 + $0x88] sm:$0xf]  ;;  %v2357_v2 = vshrl.u32 %v2086_v59, 16 }
 0x1b7   : > { %2927 = vst.msk [vmem:[#allocation3 + $0x18] sm:$0xf] %vm2920_vm6, %v2837_v31  ;;  %2525 = vrot.lane.b32.xlu1 %v2342_v27, %s5167_s25  ;;  %v3400_v30 = vsel %vm5256_vm9, %v3395_v46, %v3399_v0  ;;  %v3419_v31 = vrot.slane %v3418_v49, 4  ;;  %v2353_v0 = vshll.u32 %v2086_v59, 16  ;;  %v2349_v12 = vrot.slane %v2347_v62, 5 }
 0x1b8   : > { %2523 = vrot.lane.b32.xlu0 %v2332_v26, %s5167_s25  ;;  %v3431_v26 = vshll.u32 %v3176_v21, 16  ;;  %v3410_v34 = vsel %vm5256_vm9, %v3405_v23, %v3409_v24  ;;  %v2368_v13 = vshrl.u32 %v2088_v3, 16  ;;  %v2371_v14 = vshll.u32 %v2088_v3, 16  ;;  %v2087_v16 = vld [vmem:[#allocation2 + $0x8c] sm:$0x1] }
 0x1b9   : > { %v3029_v58 = vpop.permute.xlu1 %3028  ;;  %v2359_v17 = vrot.slane %v2357_v2, 4  ;;  %v1883_v23 = vld [vmem:[#allocation2 + $0x88] sm:$0xf]  ;;  %v2363_v25 = vshll.u32 %v2087_v16, 16  ;;  %v2650_v45 = vld [vmem:[#allocation2 + $0x94] sm:$0xf] }
 0x1ba   : > { %v3027_v55 = vpop.permute.xlu0 %3026  ;;  %3120 = vst.msk [vmem:[#allocation3 + $0x14] sm:$0xf] %vm3114_vm8, %v3029_v58  ;;  %v3433_v38 = vrot.slane %v3431_v26, 5  ;;  %v2370_v49 = vrot.slane %v2368_v13, 4  ;;  %v2648_v59 = vld [vmem:[#allocation2 + $0x8c] sm:$0x1] }
 0x1bb   : > { %3119 = vst.msk [vmem:[#allocation3 + $0x10] sm:$0xf] %vm3114_vm8, %v3027_v55  ;;  %2858 = vrot.lane.b32.xlu1 %v2774_v56, %s5168_s26  ;;  %v3424_v56 = vsel %vm5256_vm9, %v3419_v31, %v3423_v18  ;;  %v2377_v18 = vshll.u32 %v2089_v4, 16  ;;  %v1884_v31 = vld [vmem:[#allocation2 + $0x90] sm:$0xf]  ;;  %v2365_v7 = vrot.slane %v2363_v25, 5 }
 0x1bc   : > { %2856 = vrot.lane.b32.xlu0 %v2771_v44, %s5168_s26  ;;  %v3869_v44 = vrot.slane %v3736_v32, 5  ;;  %v3434_v50 = vsel %vm5256_vm9, %v3429_v35, %v3433_v38  ;;  %v1885_v35 = vld [vmem:[#allocation2 + $0x94] sm:$0xf]  ;;  %v3177_v2 = vld [vmem:[#allocation2 + $0x90] sm:$0xf]  ;;  %vm4693_vm0 = vcmask 60416  }
 0x1bd   : > { %v3033_v8 = vpop.permute.xlu1 %3032  ;;  %v2379_v26 = vrot.slane %v2377_v18, 5  ;;  %v3180_v16 = vld [vmem:[#allocation2 + $0x9c] sm:$0xf]  ;;  %vm4391_vm4 = vcmask 64512  }
 0x1be   : > { %v3031_v6 = vpop.permute.xlu0 %3030  ;;  %3122 = vst.msk [vmem:[#allocation3 + $0x1c] sm:$0xf] %vm3114_vm8, %v3033_v8 }
 0x1bf   : > { %3121 = vst.msk [vmem:[#allocation3 + $0x18] sm:$0xf] %vm3114_vm8, %v3031_v6  ;;  %2862 = vrot.lane.b32.xlu1 %v2781_v48, %s5168_s26  ;;  %v3871_v48 = vrot.slane %v3869_v44, 4 }
 0x1c0   : > { %2860 = vrot.lane.b32.xlu0 %v2778_v60, %s5168_s26  ;;  %v4914_v60 = vrot.slane %v3735_v36, 9 }
 0x1c1   : > { %v3590_v20 = vpop.permute.xlu1 %3589  ;;  %v3873_v10 = vsel %vm5631_vm14, %v3871_v48, %v3872_v61  ;;  %v2649_v61 = vld [vmem:[#allocation2 + $0x90] sm:$0xe] }
 0x1c2   : > { %v3588_v43 = vpop.permute.xlu0 %3587  ;;  %3681 = vst.msk [vmem:[#allocation3 + $0x14] sm:$0xf] %vm3675_vm12, %v3590_v20  ;;  %v3870_v9 = vsel %vm5631_vm14, %v4914_v60, %v3869_v44  ;;  %v2647_v44 = vld [vmem:[#allocation2 + $0x88] sm:$0xf]  ;;  %v2791_v60 = vrot.slane %v2650_v45, 5 }
 0x1c3   : > { %3680 = vst.msk [vmem:[#allocation3 + $0x10] sm:$0xf] %vm3675_vm12, %v3588_v43  ;;  %3052 = vrot.lane.b32.xlu1 %v2971_v15, %s5169_s27  ;;  %v2355_v15 = vrot.slane %v2353_v0, 5  ;;  %v2784_v54 = vrot.slane %v2647_v44, 5  ;;  %v2787_v0 = vrot.slane %v2648_v59, 5 }
 0x1c4   : > { %3050 = vrot.lane.b32.xlu0 %v2970_v11, %s5169_s27  ;;  %v2346_v11 = vrot.slane %v2344_v53, 4  ;;  %v2651_v53 = vld [vmem:[#allocation2 + $0x98] sm:$0x1]  ;;  %v2976_v44 = vld [vmem:[#allocation2 + $0x9c] sm:$0xf] }
 0x1c5   : > { %v3594_v28 = vpop.permute.xlu1 %3593  ;;  %v2360_v24 = vor.u32 %v2359_v17, %v2355_v15  ;;  %v2977_v45 = vld [vmem:[#allocation2 + $0xa0] sm:$0xf] }
 0x1c6   : > { %v3592_v27 = vpop.permute.xlu0 %3591  ;;  %3683 = vst.msk [vmem:[#allocation3 + $0x1c] sm:$0xf] %vm3675_vm12, %v3594_v28  ;;  %v2350_v46 = vor.u32 %v2349_v12, %v2346_v11  ;;  %v3439_v11 = vshll.u32 %v3177_v2, 16 }
 0x1c7   : > { %3682 = vst.msk [vmem:[#allocation3 + $0x18] sm:$0xf] %vm3675_vm12, %v3592_v27  ;;  %3056 = vrot.lane.b32.xlu1 %v2973_v22, %s5169_s27  ;;  %v2373_v22 = vrot.slane %v2371_v14, 5  ;;  %v2383_v27 = vrot.slane %v2381_v19, 4  ;;  %v2361_v38 = vrot.slane %v2360_v24, 4 }
 0x1c8   : > { %3054 = vrot.lane.b32.xlu0 %v2972_v1, %s5169_s27  ;;  %v1882_v1 = vld [vmem:[#allocation2 + $0x84] sm:$0xf]  ;;  %v2351_v32 = vrot.slane %v2350_v46, 4  ;;  %v3181_v19 = vld [vmem:[#allocation2 + $0xa0] sm:$0xf]  ;;  %v3460_v46 = vshrl.u32 %v3180_v16, 16 }
 0x1c9   : > { %v3927_v40 = vpop.permute.xlu1 %3926  ;;  %v3469_v24 = vshll.u32 %v3181_v19, 16  ;;  %v3473_v25 = vshrl.u32 %v3181_v19, 16 }
 0x1ca   : > { %v3925_v39 = vpop.permute.xlu0 %3924  ;;  %4018 = vst.msk [vmem:[#allocation3 + $0x14] sm:$0xf] %vm4012_vm13, %v3927_v40 }
 0x1cb   : > { %4017 = vst.msk [vmem:[#allocation3 + $0x10] sm:$0xf] %vm4012_vm13, %v3925_v39  ;;  %3613 = vrot.lane.b32.xlu1 %v3410_v34, %s5170_s6  ;;  %v2374_v34 = vor.u32 %v2373_v22, %v2370_v49  ;;  %v2384_v39 = vor.u32 %v2383_v27, %v2379_v26  ;;  %v3463_v49 = vshll.u32 %v3180_v16, 16 }
 0x1cc   : > { %3611 = vrot.lane.b32.xlu0 %v3400_v30, %s5170_s6  ;;  %v2090_v30 = vld [vmem:[#allocation2 + $0x98] sm:$0x1] }
 0x1cd   : > { %v3931_v58 = vpop.permute.xlu1 %3930  ;;  %v2387_v40 = vshll.u32 %v2090_v30, 16  ;;  %v2375_v36 = vrot.slane %v2374_v34, 4  ;;  %v2385_v51 = vrot.slane %v2384_v39, 4  ;;  %v2975_v30 = vld [vmem:[#allocation2 + $0x94] sm:$0xf]  ;;  %v3465_v34 = vrot.slane %v3463_v49, 5 }
 0x1ce   : > { %v3929_v55 = vpop.permute.xlu0 %3928  ;;  %4020 = vst.msk [vmem:[#allocation3 + $0x1c] sm:$0xf] %vm4012_vm13, %v3931_v58  ;;  %v2646_v58 = vld [vmem:[#allocation2 + $0x84] sm:$0xe]  ;;  %v3182_v39 = vld [vmem:[#allocation2 + $0xa4] sm:$0x1] }
 0x1cf   : > { %4019 = vst.msk [vmem:[#allocation3 + $0x18] sm:$0xf] %vm4012_vm13, %v3929_v55  ;;  %3617 = vrot.lane.b32.xlu1 %v3434_v50, %s5170_s6  ;;  %v2366_v50 = vsel %vm5256_vm9, %v2361_v38, %v2365_v7  ;;  %v2389_v52 = vrot.slane %v2387_v40, 5  ;;  %v2380_v48 = vsel %vm5256_vm9, %v2375_v36, %v2379_v26  ;;  %v3471_v7 = vrot.slane %v3469_v24, 5 }
 0x1d0   : > { %3615 = vrot.lane.b32.xlu0 %v3424_v56, %s5170_s6  ;;  %v2356_v56 = vsel %vm5256_vm9, %v2351_v32, %v2355_v15  ;;  %v3462_v32 = vrot.slane %v3460_v46, 4  ;;  %v3475_v40 = vrot.slane %v3473_v25, 4  ;;  %v3479_v36 = vshll.u32 %v3182_v39, 16 }
 0x1d1   : > { %v2506_v6 = vpop.permute.xlu1 %2505  ;;  %v2390_v62 = vsel %vm5256_vm9, %v2385_v51, %v2389_v52 }
 0x1d2   : > { %v2504_v5 = vpop.permute.xlu0 %2503  ;;  %v5141_v8 = vld [vmem:[#allocation3 + $0x10] sm:$0xff]   ;;  %2593 = vst.msk [vmem:[#allocation3 + $0x24] sm:$0xf] %vm2583_vm5, %v2506_v6  ;;  %v4900_v6 = vrot.slane %v2649_v61, 9 }
 0x1d3   : > { %2592 = vst.msk [vmem:[#allocation3 + $0x20] sm:$0xf] %vm2583_vm5, %v2504_v5  ;;  %3950 = vrot.lane.b32.xlu1 %v3866_v63, %s5171_s9  ;;  %5083 = vmatprep.mubr.msk.bf16.mxu0 %vm4177_vm15, %v5141_v8  ;;  %v2786_v63 = vrot.slane %v2784_v54, 4  ;;  %v3178_v5 = vld [vmem:[#allocation2 + $0x94] sm:$0xf]  ;;  %v2793_v8 = vrot.slane %v2791_v60, 4 }
 0x1d4   : > { %3948 = vrot.lane.b32.xlu0 %v3863_v57, %s5171_s9  ;;  %v4899_v57 = vrot.slane %v2646_v58, 9  ;;  %v3445_v14 = vshll.u32 %v3178_v5, 16  ;;  %v3449_v15 = vshrl.u32 %v3178_v5, 16  ;;  %v3739_v58 = vld [vmem:[#allocation2 + $0x94] sm:$0xf] }
 0x1d5   : > { %v2510_v20 = vpop.permute.xlu1 %2509  ;;  %v2788_v13 = vsel %vm5631_vm14, %v2786_v63, %v2787_v0  ;;  %v3876_v63 = vrot.slane %v3739_v58, 5  ;;  %v3740_v0 = vld [vmem:[#allocation2 + $0x98] sm:$0x1] }
 0x1d6   : > { %v2508_v43 = vpop.permute.xlu0 %2507  ;;  %v5142_v21 = vld [vmem:[#allocation3 + $0x18] sm:$0xff]   ;;  %2595 = vst.msk [vmem:[#allocation3 + $0x2c] sm:$0xf] %vm2583_vm5, %v2510_v20  ;;  %v2785_v12 = vsel %vm5631_vm14, %v4899_v57, %v2784_v54  ;;  %v3447_v22 = vrot.slane %v3445_v14, 5  ;;  %v3476_v54 = vor.u32 %v3475_v40, %v3471_v7  ;;  %v2091_v14 = vld [vmem:[#allocation2 + $0x9c] sm:$0xf] }
 0x1d7   : > { %2594 = vst.msk [vmem:[#allocation3 + $0x28] sm:$0xf] %vm2583_vm5, %v2508_v43  ;;  %3954 = vrot.lane.b32.xlu1 %v3873_v10, %s5171_s9  ;;  %5084 = vmatmul.mubr.msk.bf16.gmra.mxu0 %vm4177_vm15, %v5142_v21  ;;  %v3436_v10 = vshrl.u32 %v3177_v2, 16  ;;  %v2792_v43 = vsel %vm5631_vm14, %v4900_v6, %v2791_v60  ;;  %v3481_v60 = vrot.slane %v3479_v36, 5  ;;  %v3738_v57 = vld [vmem:[#allocation2 + $0x90] sm:$0xe] }
 0x1d8   : > { %3952 = vrot.lane.b32.xlu0 %v3870_v9, %s5171_s9  ;;  %v2794_v9 = vrot.slane %v2651_v53, 5  ;;  %v4915_v6 = vrot.slane %v3738_v57, 9 }
 0x1d9   : > { %v2843_v29 = vpop.permute.xlu1 %2842  ;;  %v3438_v21 = vrot.slane %v3436_v10, 4 }
 0x1da   : > { %v2841_v28 = vpop.permute.xlu0 %2840  ;;  %2930 = vst.msk [vmem:[#allocation3 + $0x24] sm:$0xf] %vm2920_vm6, %v2843_v29  ;;  %v2795_v20 = vsel %vm5631_vm14, %v2793_v8, %v2794_v9  ;;  %v2974_v29 = vld [vmem:[#allocation2 + $0x90] sm:$0xf]  ;;  %v3741_v8 = vld [vmem:[#allocation2 + $0x9c] sm:$0xe] }
 0x1db   : > { %2929 = vst.msk [vmem:[#allocation3 + $0x20] sm:$0xf] %vm2920_vm6, %v2841_v28  ;;  %1968 = vrot.lane.b32.xlu1 %v1883_v23, %s5166_s24  ;;  %v3451_v23 = vrot.slane %v3449_v15, 4  ;;  %v3179_v28 = vld [vmem:[#allocation2 + $0x98] sm:$0x1]  ;;  %v4916_v19 = vrot.slane %v3741_v8, 9 }
 0x1dc   : > { %1966 = vrot.lane.b32.xlu0 %v1882_v1, %s5166_s24  ;;  %v3441_v1 = vrot.slane %v3439_v11, 5  ;;  %v3455_v38 = vshll.u32 %v3179_v28, 16  ;;  %v3743_v9 = vld [vmem:[#allocation2 + $0xa4] sm:$0x1]  ;;  %v2092_v15 = vld [vmem:[#allocation2 + $0xa0] sm:$0xf] }
 0x1dd   : > { %v2847_v42 = vpop.permute.xlu1 %2846  ;;  %v2401_v46 = vshll.u32 %v2092_v15, 16  ;;  %v2405_v49 = vshrl.u32 %v2092_v15, 16  ;;  %v2656_v8 = vld [vmem:[#allocation2 + $0xac] sm:$0xf] }
 0x1de   : > { %v2845_v37 = vpop.permute.xlu0 %2844  ;;  %2932 = vst.msk [vmem:[#allocation3 + $0x2c] sm:$0xf] %vm2920_vm6, %v2847_v42  ;;  %v3457_v52 = vrot.slane %v3455_v38, 5 }
 0x1df   : > { %2931 = vst.msk [vmem:[#allocation3 + $0x28] sm:$0xf] %vm2920_vm6, %v2845_v37  ;;  %1972 = vrot.lane.b32.xlu1 %v1885_v35, %s5166_s24  ;;  %v3452_v35 = vor.u32 %v3451_v23, %v3447_v22 }
 0x1e0   : > { %1970 = vrot.lane.b32.xlu0 %v1884_v31, %s5166_s24  ;;  %v3442_v31 = vor.u32 %v3441_v1, %v3438_v21  ;;  %v2392_v21 = vshrl.u32 %v2091_v14, 16  ;;  %v2395_v1 = vshll.u32 %v2091_v14, 16 }
 0x1e1   : > { %v3037_v55 = vpop.permute.xlu1 %3036  ;;  %v3453_v51 = vrot.slane %v3452_v35, 4  ;;  %v2093_v35 = vld [vmem:[#allocation2 + $0xa4] sm:$0x1] }
 0x1e2   : > { %v3035_v47 = vpop.permute.xlu0 %3034  ;;  %3124 = vst.msk [vmem:[#allocation3 + $0x24] sm:$0xf] %vm3114_vm8, %v3037_v55 }
 0x1e3   : > { %3123 = vst.msk [vmem:[#allocation3 + $0x20] sm:$0xf] %vm3114_vm8, %v3035_v47  ;;  %2529 = vrot.lane.b32.xlu1 %v2366_v50, %s5167_s25  ;;  %v3443_v50 = vrot.slane %v3442_v31, 4  ;;  %v3458_v53 = vsel %vm5256_vm9, %v3453_v51, %v3457_v52  ;;  %v2397_v31 = vrot.slane %v2395_v1, 5 }
 0x1e4   : > { %2527 = vrot.lane.b32.xlu0 %v2356_v56, %s5167_s25  ;;  %v3466_v56 = vor.u32 %v3465_v34, %v3462_v32  ;;  %v2403_v32 = vrot.slane %v2401_v46, 5  ;;  %v2407_v34 = vrot.slane %v2405_v49, 4  ;;  %v3183_v49 = vld [vmem:[#allocation2 + $0xa8] sm:$0xf] }
 0x1e5   : > { %v3041_v4 = vpop.permute.xlu1 %3040  ;;  %v3448_v61 = vsel %vm5256_vm9, %v3443_v50, %v3447_v22  ;;  %v3877_v22 = vsel %vm5631_vm14, %v4915_v6, %v3876_v63  ;;  %v1887_v50 = vld [vmem:[#allocation2 + $0xa0] sm:$0xf] }
 0x1e6   : > { %v3039_v3 = vpop.permute.xlu0 %3038  ;;  %3126 = vst.msk [vmem:[#allocation3 + $0x2c] sm:$0xf] %vm3114_vm8, %v3041_v4  ;;  %v3467_v59 = vrot.slane %v3466_v56, 4  ;;  %v2408_v36 = vor.u32 %v2407_v34, %v2403_v32 }
 0x1e7   : > { %3125 = vst.msk [vmem:[#allocation3 + $0x28] sm:$0xf] %vm3114_vm8, %v3039_v3  ;;  %2533 = vrot.lane.b32.xlu1 %v2390_v62, %s5167_s25  ;;  %v3477_v62 = vrot.slane %v3476_v54, 4 }
 0x1e8   : > { %2531 = vrot.lane.b32.xlu0 %v2380_v48, %s5167_s25  ;;  %v3742_v48 = vld [vmem:[#allocation2 + $0xa0] sm:$0xf]  ;;  %v3472_v10 = vsel %vm5256_vm9, %v3467_v59, %v3471_v7  ;;  %v2096_v59 = vld [vmem:[#allocation2 + $0xb0] sm:$0x1] }
 0x1e9   : > { %v3598_v18 = vpop.permute.xlu1 %3597  ;;  %v3883_v5 = vrot.slane %v3742_v48, 5  ;;  %v3482_v11 = vsel %vm5256_vm9, %v3477_v62, %v3481_v60  ;;  %v2409_v48 = vrot.slane %v2408_v36, 4  ;;  %v1889_v62 = vld [vmem:[#allocation2 + $0xac] sm:$0xf] }
 0x1ea   : > { %v3596_v17 = vpop.permute.xlu0 %3595  ;;  %3685 = vst.msk [vmem:[#allocation3 + $0x24] sm:$0xf] %vm3675_vm12, %v3598_v18 }
 0x1eb   : > { %3684 = vst.msk [vmem:[#allocation3 + $0x20] sm:$0xf] %vm3675_vm12, %v3596_v17  ;;  %2866 = vrot.lane.b32.xlu1 %v2788_v13, %s5168_s26  ;;  %v3879_v13 = vrot.slane %v3740_v0, 5  ;;  %v3884_v28 = vsel %vm5631_vm14, %v4916_v19, %v3883_v5  ;;  %v2435_v0 = vshll.u32 %v2096_v59, 16  ;;  %v2655_v19 = vld [vmem:[#allocation2 + $0xa8] sm:$0xe] }
 0x1ec   : > { %2864 = vrot.lane.b32.xlu0 %v2785_v12, %s5168_s26  ;;  %v3878_v12 = vrot.slane %v3876_v63, 4  ;;  %v2979_v59 = vld [vmem:[#allocation2 + $0xac] sm:$0xf] }
 0x1ed   : > { %v3602_v27 = vpop.permute.xlu1 %3601 }
 0x1ee   : > { %v3600_v26 = vpop.permute.xlu0 %3599  ;;  %3687 = vst.msk [vmem:[#allocation3 + $0x2c] sm:$0xf] %vm3675_vm12, %v3602_v27  ;;  %v3880_v23 = vsel %vm5631_vm14, %v3878_v12, %v3879_v13  ;;  %v2095_v27 = vld [vmem:[#allocation2 + $0xac] sm:$0xf]  ;;  %v2652_v12 = vld [vmem:[#allocation2 + $0x9c] sm:$0xe] }
 0x1ef   : > { %3686 = vst.msk [vmem:[#allocation3 + $0x28] sm:$0xf] %vm3675_vm12, %v3600_v26  ;;  %2870 = vrot.lane.b32.xlu1 %v2795_v20, %s5168_s26  ;;  %v3886_v20 = vrot.slane %v3743_v9, 5  ;;  %v2094_v26 = vld [vmem:[#allocation2 + $0xa8] sm:$0xf]  ;;  %v2425_v39 = vshll.u32 %v2095_v27, 16 }
 0x1f0   : > { %2868 = vrot.lane.b32.xlu0 %v2792_v43, %s5168_s26  ;;  %v3885_v43 = vrot.slane %v3883_v5, 4  ;;  %v2416_v38 = vshrl.u32 %v2094_v26, 16  ;;  %v2419_v7 = vshll.u32 %v2094_v26, 16  ;;  %v2429_v40 = vshrl.u32 %v2095_v27, 16 }
 0x1f1   : > { %v3935_v42 = vpop.permute.xlu1 %3934  ;;  %v2427_v54 = vrot.slane %v2425_v39, 5  ;;  %v3187_v39 = vld [vmem:[#allocation2 + $0xb8] sm:$0xf] }
 0x1f2   : > { %v3933_v37 = vpop.permute.xlu0 %3932  ;;  %4022 = vst.msk [vmem:[#allocation3 + $0x24] sm:$0xf] %vm4012_vm13, %v3935_v42  ;;  %v2418_v51 = vrot.slane %v2416_v38, 4  ;;  %v2421_v52 = vrot.slane %v2419_v7, 5  ;;  %v3186_v7 = vld [vmem:[#allocation2 + $0xb4] sm:$0xf] }
 0x1f3   : > { %4021 = vst.msk [vmem:[#allocation3 + $0x20] sm:$0xf] %vm4012_vm13, %v3933_v37  ;;  %3060 = vrot.lane.b32.xlu1 %v2975_v30, %s5169_s27  ;;  %v2394_v30 = vrot.slane %v2392_v21, 4 }
 0x1f4   : > { %3058 = vrot.lane.b32.xlu0 %v2974_v29, %s5169_s27  ;;  %v3887_v29 = vsel %vm5631_vm14, %v3885_v43, %v3886_v20  ;;  %v2422_v57 = vor.u32 %v2421_v52, %v2418_v51  ;;  %v2657_v43 = vld [vmem:[#allocation2 + $0xb0] sm:$0x1]  ;;  %v3511_v51 = vshll.u32 %v3186_v7, 16  ;;  %v3517_v52 = vshll.u32 %v3187_v39, 16 }
 0x1f5   : > { %v3939_v55 = vpop.permute.xlu1 %3938  ;;  %v2398_v56 = vor.u32 %v2397_v31, %v2394_v30  ;;  %v2808_v27 = vrot.slane %v2657_v43, 5  ;;  %v3748_v43 = vld [vmem:[#allocation2 + $0xb8] sm:$0xf] }
 0x1f6   : > { %v3937_v47 = vpop.permute.xlu0 %3936  ;;  %4024 = vst.msk [vmem:[#allocation3 + $0x2c] sm:$0xf] %vm4012_vm13, %v3939_v55  ;;  %v2423_v9 = vrot.slane %v2422_v57, 4  ;;  %v3519_v57 = vrot.slane %v3517_v52, 5 }
 0x1f7   : > { %4023 = vst.msk [vmem:[#allocation3 + $0x28] sm:$0xf] %vm4012_vm13, %v3937_v47  ;;  %3064 = vrot.lane.b32.xlu1 %v2977_v45, %s5169_s27  ;;  %v2411_v45 = vshll.u32 %v2093_v35, 16  ;;  %v2431_v47 = vrot.slane %v2429_v40, 4  ;;  %v2399_v60 = vrot.slane %v2398_v56, 4 }
 0x1f8   : > { %3062 = vrot.lane.b32.xlu0 %v2976_v44, %s5169_s27  ;;  %v1886_v44 = vld [vmem:[#allocation2 + $0x9c] sm:$0xf]  ;;  %v2428_v20 = vsel %vm5256_vm9, %v2423_v9, %v2427_v54 }
 0x1f9   : > { %v2514_v3 = vpop.permute.xlu1 %2513  ;;  %v2432_v63 = vor.u32 %v2431_v47, %v2427_v54  ;;  %v2404_v5 = vsel %vm5256_vm9, %v2399_v60, %v2403_v32  ;;  %v3521_v54 = vshrl.u32 %v3187_v39, 16 }
 0x1fa   : > { %v2512_v2 = vpop.permute.xlu0 %2511  ;;  %v5143_v4 = vld [vmem:[#allocation3 + $0x20] sm:$0xff]   ;;  %2597 = vst.msk [vmem:[#allocation3 + $0x34] sm:$0xf] %vm2583_vm5, %v2514_v3 }
 0x1fb   : > { %2596 = vst.msk [vmem:[#allocation3 + $0x30] sm:$0xf] %vm2583_vm5, %v2512_v2  ;;  %3621 = vrot.lane.b32.xlu1 %v3458_v53, %s5170_s6  ;;  %5087 = vmatprep.mubr.msk.bf16.mxu0 %vm4177_vm15, %v5143_v4  ;;  %v1888_v53 = vld [vmem:[#allocation2 + $0xa8] sm:$0xf]  ;;  %v2653_v4 = vld [vmem:[#allocation2 + $0xa0] sm:$0xf] }
 0x1fc   : > { %3619 = vrot.lane.b32.xlu0 %v3448_v61, %s5170_s6  ;;  %v2413_v61 = vrot.slane %v2411_v45, 5  ;;  %v2798_v13 = vrot.slane %v2653_v4, 5  ;;  %v3185_v45 = vld [vmem:[#allocation2 + $0xb0] sm:$0x1] }
 0x1fd   : > { %v2518_v17 = vpop.permute.xlu1 %2517 }
 0x1fe   : > { %v2516_v16 = vpop.permute.xlu0 %2515  ;;  %v5144_v18 = vld [vmem:[#allocation3 + $0x28] sm:$0xff]   ;;  %2599 = vst.msk [vmem:[#allocation3 + $0x3c] sm:$0xf] %vm2583_vm5, %v2518_v17  ;;  %v2414_v6 = vsel %vm5256_vm9, %v2409_v48, %v2413_v61  ;;  %v2805_v17 = vrot.slane %v2656_v8, 5  ;;  %v2800_v1 = vrot.slane %v2798_v13, 4  ;;  %v3503_v61 = vshll.u32 %v3185_v45, 16 }
 0x1ff   : > { %2598 = vst.msk [vmem:[#allocation3 + $0x38] sm:$0xf] %vm2583_vm5, %v2516_v16  ;;  %3625 = vrot.lane.b32.xlu1 %v3482_v11, %s5170_s6  ;;  %5088 = vmatmul.mubr.msk.bf16.gmra.mxu0 %vm4177_vm15, %v5144_v18  ;;  %v2437_v11 = vrot.slane %v2435_v0, 5  ;;  %v2654_v16 = vld [vmem:[#allocation2 + $0xa4] sm:$0x1]  ;;  %v4901_v18 = vrot.slane %v2652_v12, 9 }
 0x200   : > { %3623 = vrot.lane.b32.xlu0 %v3472_v10, %s5170_s6  ;;  %v2433_v10 = vrot.slane %v2432_v63, 4  ;;  %v2801_v46 = vrot.slane %v2654_v16, 5  ;;  %v2807_v26 = vrot.slane %v2805_v17, 4  ;;  %v3188_v63 = vld [vmem:[#allocation2 + $0xbc] sm:$0x1]  ;;  %v3523_v0 = vrot.slane %v3521_v54, 4 }
 0x201   : > { %v2851_v25 = vpop.permute.xlu1 %2850  ;;  %v2799_v32 = vsel %vm5631_vm14, %v4901_v18, %v2798_v13  ;;  %v3505_v9 = vrot.slane %v3503_v61, 5  ;;  %v3527_v13 = vshll.u32 %v3188_v63, 16  ;;  %v2100_v54 = vld [vmem:[#allocation2 + $0xc0] sm:$0xf] }
 0x202   : > { %v2849_v24 = vpop.permute.xlu0 %2848  ;;  %2934 = vst.msk [vmem:[#allocation3 + $0x34] sm:$0xf] %vm2920_vm6, %v2851_v25  ;;  %v2438_v21 = vsel %vm5256_vm9, %v2433_v10, %v2437_v11  ;;  %v4902_v25 = vrot.slane %v2655_v19, 9  ;;  %v2802_v34 = vsel %vm5631_vm14, %v2800_v1, %v2801_v46  ;;  %v2981_v10 = vld [vmem:[#allocation2 + $0xb8] sm:$0xf]  ;;  %v3524_v12 = vor.u32 %v3523_v0, %v3519_v57 }
 0x203   : > { %2933 = vst.msk [vmem:[#allocation3 + $0x30] sm:$0xf] %vm2920_vm6, %v2849_v24  ;;  %3958 = vrot.lane.b32.xlu1 %v3880_v23, %s5171_s9  ;;  %v3529_v1 = vrot.slane %v3527_v13, 5  ;;  %v3744_v46 = vld [vmem:[#allocation2 + $0xa8] sm:$0xe] }
 0x204   : > { %3956 = vrot.lane.b32.xlu0 %v3877_v22, %s5171_s9  ;;  %v3184_v22 = vld [vmem:[#allocation2 + $0xac] sm:$0xf]  ;;  %v2806_v40 = vsel %vm5631_vm14, %v4902_v25, %v2805_v17  ;;  %v3897_v25 = vrot.slane %v3748_v43, 5  ;;  %v1892_v43 = vld [vmem:[#allocation2 + $0xc0] sm:$0xf] }
 0x205   : > { %v2855_v42 = vpop.permute.xlu1 %2854  ;;  %v3493_v30 = vshll.u32 %v3184_v22, 16  ;;  %v3497_v31 = vshrl.u32 %v3184_v22, 16 }
 0x206   : > { %v2853_v37 = vpop.permute.xlu0 %2852  ;;  %2936 = vst.msk [vmem:[#allocation3 + $0x3c] sm:$0xf] %vm2920_vm6, %v2855_v42 }
 0x207   : > { %2935 = vst.msk [vmem:[#allocation3 + $0x38] sm:$0xf] %vm2920_vm6, %v2853_v37  ;;  %3962 = vrot.lane.b32.xlu1 %v3887_v29, %s5171_s9  ;;  %v3487_v29 = vshll.u32 %v3183_v49, 16  ;;  %v2809_v37 = vsel %vm5631_vm14, %v2807_v26, %v2808_v27  ;;  %v3495_v56 = vrot.slane %v3493_v30, 5  ;;  %v3499_v36 = vrot.slane %v3497_v31, 4 }
 0x208   : > { %3960 = vrot.lane.b32.xlu0 %v3884_v28, %s5171_s9  ;;  %v3484_v28 = vshrl.u32 %v3183_v49, 16  ;;  %v4917_v26 = vrot.slane %v3744_v46, 9  ;;  %v3747_v27 = vld [vmem:[#allocation2 + $0xb4] sm:$0xe] }
 0x209   : > { %v3045_v58 = vpop.permute.xlu1 %3044  ;;  %v3500_v48 = vor.u32 %v3499_v36, %v3495_v56  ;;  %v4918_v39 = vrot.slane %v3747_v27, 9 }
 0x20a   : > { %v3043_v55 = vpop.permute.xlu0 %3042  ;;  %3128 = vst.msk [vmem:[#allocation3 + $0x34] sm:$0xf] %vm3114_vm8, %v3045_v58  ;;  %v3486_v42 = vrot.slane %v3484_v28, 4  ;;  %v2978_v58 = vld [vmem:[#allocation2 + $0xa8] sm:$0xf] }
 0x20b   : > { %3127 = vst.msk [vmem:[#allocation3 + $0x30] sm:$0xf] %vm3114_vm8, %v3043_v55  ;;  %1976 = vrot.lane.b32.xlu1 %v1887_v50, %s5166_s24  ;;  %v3508_v50 = vshrl.u32 %v3186_v7, 16  ;;  %v3501_v8 = vrot.slane %v3500_v48, 4  ;;  %v3749_v28 = vld [vmem:[#allocation2 + $0xbc] sm:$0x1] }
 0x20c   : > { %1974 = vrot.lane.b32.xlu0 %v1886_v44, %s5166_s24  ;;  %v3489_v44 = vrot.slane %v3487_v29, 5 }
 0x20d   : > { %v3049_v3 = vpop.permute.xlu1 %3048  ;;  %v3506_v19 = vsel %vm5256_vm9, %v3501_v8, %v3505_v9  ;;  %v1891_v9 = vld [vmem:[#allocation2 + $0xb8] sm:$0xf] }
 0x20e   : > { %v3047_v2 = vpop.permute.xlu0 %3046  ;;  %3130 = vst.msk [vmem:[#allocation3 + $0x3c] sm:$0xf] %vm3114_vm8, %v3049_v3  ;;  %v3490_v60 = vor.u32 %v3489_v44, %v3486_v42 }
 0x20f   : > { %3129 = vst.msk [vmem:[#allocation3 + $0x38] sm:$0xf] %vm3114_vm8, %v3047_v2  ;;  %1980 = vrot.lane.b32.xlu1 %v1889_v62, %s5166_s24  ;;  %v3513_v62 = vrot.slane %v3511_v51, 5 }
 0x210   : > { %1978 = vrot.lane.b32.xlu0 %v1888_v53, %s5166_s24  ;;  %v3510_v53 = vrot.slane %v3508_v50, 4 }
 0x211   : > { %v3606_v15 = vpop.permute.xlu1 %3605 }
 0x212   : > { %v3604_v14 = vpop.permute.xlu0 %3603  ;;  %3689 = vst.msk [vmem:[#allocation3 + $0x34] sm:$0xf] %vm3675_vm12, %v3606_v15  ;;  %v3514_v11 = vor.u32 %v3513_v62, %v3510_v53  ;;  %v2099_v53 = vld [vmem:[#allocation2 + $0xbc] sm:$0x1]  ;;  %v2464_v62 = vshrl.u32 %v2100_v54, 16 }
 0x213   : > { %3688 = vst.msk [vmem:[#allocation3 + $0x30] sm:$0xf] %vm3675_vm12, %v3604_v14  ;;  %2537 = vrot.lane.b32.xlu1 %v2414_v6, %s5167_s25  ;;  %v3491_v6 = vrot.slane %v3490_v60, 4  ;;  %v3745_v14 = vld [vmem:[#allocation2 + $0xac] sm:$0xf]  ;;  %v2459_v8 = vshll.u32 %v2099_v53, 16 }
 0x214   : > { %2535 = vrot.lane.b32.xlu0 %v2404_v5, %s5167_s25  ;;  %v2980_v5 = vld [vmem:[#allocation2 + $0xb4] sm:$0xf]  ;;  %v3890_v49 = vrot.slane %v3745_v14, 5  ;;  %v3192_v53 = vld [vmem:[#allocation2 + $0xcc] sm:$0xf] }
 0x215   : > { %v3610_v24 = vpop.permute.xlu1 %3609  ;;  %v3496_v18 = vsel %vm5256_vm9, %v3491_v6, %v3495_v56 }
 0x216   : > { %v3608_v23 = vpop.permute.xlu0 %3607  ;;  %3691 = vst.msk [vmem:[#allocation3 + $0x3c] sm:$0xf] %vm3675_vm12, %v3610_v24  ;;  %v3746_v24 = vld [vmem:[#allocation2 + $0xb0] sm:$0x1]  ;;  %v3892_v31 = vrot.slane %v3890_v49, 4  ;;  %v3891_v45 = vsel %vm5631_vm14, %v4917_v26, %v3890_v49 }
 0x217   : > { %3690 = vst.msk [vmem:[#allocation3 + $0x38] sm:$0xf] %vm3675_vm12, %v3608_v23  ;;  %2541 = vrot.lane.b32.xlu1 %v2438_v21, %s5167_s25  ;;  %v3525_v21 = vrot.slane %v3524_v12, 4  ;;  %v2662_v26 = vld [vmem:[#allocation2 + $0xc4] sm:$0xf] }
 0x218   : > { %2539 = vrot.lane.b32.xlu0 %v2428_v20, %s5167_s25  ;;  %v3515_v20 = vrot.slane %v3514_v11, 4 }
 0x219   : > { %v3943_v38 = vpop.permute.xlu1 %3942  ;;  %v3530_v30 = vsel %vm5256_vm9, %v3525_v21, %v3529_v1 }
 0x21a   : > { %v3941_v35 = vpop.permute.xlu0 %3940  ;;  %4026 = vst.msk [vmem:[#allocation3 + $0x34] sm:$0xf] %vm4012_vm13, %v3943_v38  ;;  %v3520_v29 = vsel %vm5256_vm9, %v3515_v20, %v3519_v57  ;;  %v2467_v57 = vshll.u32 %v2100_v54, 16  ;;  %v1893_v20 = vld [vmem:[#allocation2 + $0xc4] sm:$0xf] }
 0x21b   : > { %4025 = vst.msk [vmem:[#allocation3 + $0x30] sm:$0xf] %vm4012_vm13, %v3941_v35  ;;  %2874 = vrot.lane.b32.xlu1 %v2802_v34, %s5168_s26  ;;  %v2097_v34 = vld [vmem:[#allocation2 + $0xb4] sm:$0xf]  ;;  %v2098_v35 = vld [vmem:[#allocation2 + $0xb8] sm:$0xf] }
 0x21c   : > { %2872 = vrot.lane.b32.xlu0 %v2799_v32, %s5168_s26  ;;  %v3893_v32 = vrot.slane %v3746_v24, 5  ;;  %v2440_v42 = vshrl.u32 %v2097_v34, 16  ;;  %v2443_v44 = vshll.u32 %v2097_v34, 16  ;;  %v2449_v56 = vshll.u32 %v2098_v35, 16 }
 0x21d   : > { %v3947_v55 = vpop.permute.xlu1 %3946  ;;  %v2453_v36 = vshrl.u32 %v2098_v35, 16  ;;  %v2469_v11 = vrot.slane %v2467_v57, 5  ;;  %v2660_v35 = vld [vmem:[#allocation2 + $0xbc] sm:$0x1] }
 0x21e   : > { %v3945_v47 = vpop.permute.xlu0 %3944  ;;  %4028 = vst.msk [vmem:[#allocation3 + $0x3c] sm:$0xf] %vm4012_vm13, %v3947_v55  ;;  %v3894_v50 = vsel %vm5631_vm14, %v3892_v31, %v3893_v32  ;;  %v3898_v55 = vsel %vm5631_vm14, %v4918_v39, %v3897_v25  ;;  %v2445_v60 = vrot.slane %v2443_v44, 5  ;;  %v2451_v48 = vrot.slane %v2449_v56, 5  ;;  %v2661_v39 = vld [vmem:[#allocation2 + $0xc0] sm:$0xe] }
 0x21f   : > { %4027 = vst.msk [vmem:[#allocation3 + $0x38] sm:$0xf] %vm4012_vm13, %v3945_v47  ;;  %2878 = vrot.lane.b32.xlu1 %v2809_v37, %s5168_s26  ;;  %v3900_v37 = vrot.slane %v3749_v28, 5  ;;  %v2101_v47 = vld [vmem:[#allocation2 + $0xc4] sm:$0xf]  ;;  %v2455_v61 = vrot.slane %v2453_v36, 4 }
 0x220   : > { %2876 = vrot.lane.b32.xlu0 %v2806_v40, %s5168_s26  ;;  %v3899_v40 = vrot.slane %v3897_v25, 4  ;;  %v2473_v63 = vshll.u32 %v2101_v47, 16  ;;  %v2477_v0 = vshrl.u32 %v2101_v47, 16  ;;  %v2815_v56 = vrot.slane %v2660_v35, 5  ;;  %v3189_v36 = vld [vmem:[#allocation2 + $0xc0] sm:$0xf] }
 0x221   : > { %v1965_v3 = vpop.permute.xlu1 %1964  ;;  %v2456_v6 = vor.u32 %v2455_v61, %v2451_v48 }
 0x222   : > { %v1963_v2 = vpop.permute.xlu0 %1962  ;;  %v5145_v4 = vld [vmem:[#allocation3 + $0x30] sm:$0xff]   ;;  %2042 = vst.msk [vmem:[#allocation3 + $0x4c] sm:$0xf] %vm2022_vm3, %v1965_v3  ;;  %v2475_v12 = vrot.slane %v2473_v63, 5  ;;  %v2479_v13 = vrot.slane %v2477_v0, 4 }
 0x223   : > { %2041 = vst.msk [vmem:[#allocation3 + $0x48] sm:$0xf] %vm2022_vm3, %v1963_v2  ;;  %3068 = vrot.lane.b32.xlu1 %v2979_v59, %s5169_s27  ;;  %5091 = vmatprep.mubr.msk.bf16.mxu0 %vm4177_vm15, %v5145_v4  ;;  %v2442_v59 = vrot.slane %v2440_v42, 4  ;;  %v1890_v4 = vld [vmem:[#allocation2 + $0xb4] sm:$0xf] }
 0x224   : > { %3066 = vrot.lane.b32.xlu0 %v2978_v58, %s5169_s27  ;;  %v3901_v58 = vsel %vm5631_vm14, %v3899_v40, %v3900_v37  ;;  %v2480_v1 = vor.u32 %v2479_v13, %v2475_v12  ;;  %v2663_v40 = vld [vmem:[#allocation2 + $0xc8] sm:$0x1]  ;;  %v3193_v63 = vld [vmem:[#allocation2 + $0xd0] sm:$0xf] }
 0x225   : > { %v2522_v16 = vpop.permute.xlu1 %2521  ;;  %v2822_v47 = vrot.slane %v2663_v40, 5 }
 0x226   : > { %v2520_v15 = vpop.permute.xlu0 %2519  ;;  %v5146_v17 = vld [vmem:[#allocation3 + $0x38] sm:$0xff]   ;;  %2601 = vst.msk [vmem:[#allocation3 + $0x44] sm:$0xf] %vm2583_vm5, %v2522_v16  ;;  %v2102_v16 = vld [vmem:[#allocation2 + $0xc8] sm:$0x1]  ;;  %v2481_v28 = vrot.slane %v2480_v1, 4 }
 0x227   : > { %2600 = vst.msk [vmem:[#allocation3 + $0x40] sm:$0xf] %vm2583_vm5, %v2520_v15  ;;  %3072 = vrot.lane.b32.xlu1 %v2981_v10, %s5169_s27  ;;  %5092 = vmatmul.mubr.msk.bf16.gmra.mxu0 %vm4177_vm15, %v5146_v17  ;;  %v2466_v10 = vrot.slane %v2464_v62, 4  ;;  %v2483_v46 = vshll.u32 %v2102_v16, 16  ;;  %v2982_v16 = vld [vmem:[#allocation2 + $0xc0] sm:$0xf] }
 0x228   : > { %3070 = vrot.lane.b32.xlu0 %v2980_v5, %s5169_s27  ;;  %v2446_v5 = vor.u32 %v2445_v60, %v2442_v59 }
 0x229   : > { %v2526_v23 = vpop.permute.xlu1 %2525  ;;  %v2470_v21 = vor.u32 %v2469_v11, %v2466_v10  ;;  %v3565_v11 = vshll.u32 %v3193_v63, 16 }
 0x22a   : > { %v2524_v22 = vpop.permute.xlu0 %2523  ;;  %2603 = vst.msk [vmem:[#allocation3 + $0x4c] sm:$0xf] %vm2583_vm5, %v2526_v23  ;;  %v2447_v17 = vrot.slane %v2446_v5, 4  ;;  %v2659_v23 = vld [vmem:[#allocation2 + $0xb8] sm:$0xf]  ;;  %v3556_v5 = vshrl.u32 %v3192_v53, 16 }
 0x22b   : > { %2602 = vst.msk [vmem:[#allocation3 + $0x48] sm:$0xf] %vm2583_vm5, %v2524_v22  ;;  %3629 = vrot.lane.b32.xlu1 %v3506_v19, %s5170_s6  ;;  %v2461_v19 = vrot.slane %v2459_v8, 5  ;;  %v2471_v27 = vrot.slane %v2470_v21, 4  ;;  %v2812_v31 = vrot.slane %v2659_v23, 5  ;;  %v3567_v1 = vrot.slane %v3565_v11, 5 }
 0x22c   : > { %3627 = vrot.lane.b32.xlu0 %v3496_v18, %s5170_s6  ;;  %v2457_v18 = vrot.slane %v2456_v6, 4  ;;  %v2452_v24 = vsel %vm5256_vm9, %v2447_v17, %v2451_v48  ;;  %v3559_v6 = vshll.u32 %v3192_v53, 16  ;;  %v2983_v17 = vld [vmem:[#allocation2 + $0xc4] sm:$0xf]  ;;  %v3755_v53 = vld [vmem:[#allocation2 + $0xd4] sm:$0x1] }
 0x22d   : > { %v2859_v7 = vpop.permute.xlu1 %2858  ;;  %v2476_v37 = vsel %vm5256_vm9, %v2471_v27, %v2475_v12  ;;  %v2814_v44 = vrot.slane %v2812_v31, 4  ;;  %v3569_v12 = vshrl.u32 %v3193_v63, 16 }
 0x22e   : > { %v2857_v38 = vpop.permute.xlu0 %2856  ;;  %2938 = vst.msk [vmem:[#allocation3 + $0x44] sm:$0xf] %vm2920_vm6, %v2859_v7  ;;  %v2462_v25 = vsel %vm5256_vm9, %v2457_v18, %v2461_v19  ;;  %v3558_v19 = vrot.slane %v3556_v5, 4 }
 0x22f   : > { %2937 = vst.msk [vmem:[#allocation3 + $0x40] sm:$0xf] %vm2920_vm6, %v2857_v38  ;;  %3633 = vrot.lane.b32.xlu1 %v3530_v30, %s5170_s6  ;;  %v2658_v30 = vld [vmem:[#allocation2 + $0xb4] sm:$0xe]  ;;  %v2819_v38 = vrot.slane %v2662_v26, 5  ;;  %v2816_v60 = vsel %vm5631_vm14, %v2814_v44, %v2815_v56 }
 0x230   : > { %3631 = vrot.lane.b32.xlu0 %v3520_v29, %s5170_s6  ;;  %v2485_v29 = vrot.slane %v2483_v46, 5  ;;  %v4903_v7 = vrot.slane %v2658_v30, 9  ;;  %v3194_v46 = vld [vmem:[#allocation2 + $0xd4] sm:$0x1]  ;;  %v3750_v44 = vld [vmem:[#allocation2 + $0xc0] sm:$0xe] }
 0x231   : > { %v2863_v52 = vpop.permute.xlu1 %2862  ;;  %v2821_v54 = vrot.slane %v2819_v38, 4 }
 0x232   : > { %v2861_v51 = vpop.permute.xlu0 %2860  ;;  %2940 = vst.msk [vmem:[#allocation3 + $0x4c] sm:$0xf] %vm2920_vm6, %v2863_v52  ;;  %v2486_v42 = vsel %vm5256_vm9, %v2481_v28, %v2485_v29  ;;  %v4904_v52 = vrot.slane %v2661_v39, 9  ;;  %v2813_v59 = vsel %vm5631_vm14, %v4903_v7, %v2812_v31  ;;  %v2985_v28 = vld [vmem:[#allocation2 + $0xd0] sm:$0xf] }
 0x233   : > { %2939 = vst.msk [vmem:[#allocation3 + $0x48] sm:$0xf] %vm2920_vm6, %v2861_v51  ;;  %3966 = vrot.lane.b32.xlu1 %v3894_v50, %s5171_s9  ;;  %v3190_v51 = vld [vmem:[#allocation2 + $0xc4] sm:$0xf] }
 0x234   : > { %3964 = vrot.lane.b32.xlu0 %v3891_v45, %s5171_s9  ;;  %v3541_v48 = vshll.u32 %v3190_v51, 16  ;;  %v3545_v61 = vshrl.u32 %v3190_v51, 16  ;;  %v2820_v0 = vsel %vm5631_vm14, %v4904_v52, %v2819_v38  ;;  %v3751_v38 = vld [vmem:[#allocation2 + $0xc4] sm:$0xf]  ;;  %v3754_v51 = vld [vmem:[#allocation2 + $0xd0] sm:$0xf] }
 0x235   : > { %v3053_v3 = vpop.permute.xlu1 %3052  ;;  %v3904_v56 = vrot.slane %v3751_v38, 5 }
 0x236   : > { %v3051_v2 = vpop.permute.xlu0 %3050  ;;  %3132 = vst.msk [vmem:[#allocation3 + $0x44] sm:$0xf] %vm3114_vm8, %v3053_v3  ;;  %v3543_v8 = vrot.slane %v3541_v48, 5  ;;  %v3547_v10 = vrot.slane %v3545_v61, 4  ;;  %v3753_v61 = vld [vmem:[#allocation2 + $0xcc] sm:$0xe] }
 0x237   : > { %3131 = vst.msk [vmem:[#allocation3 + $0x40] sm:$0xf] %vm3114_vm8, %v3051_v2  ;;  %3970 = vrot.lane.b32.xlu1 %v3901_v58, %s5171_s9  ;;  %v3535_v58 = vshll.u32 %v3189_v36, 16  ;;  %v2823_v2 = vsel %vm5631_vm14, %v2821_v54, %v2822_v47  ;;  %v4919_v54 = vrot.slane %v3750_v44, 9 }
 0x238   : > { %3968 = vrot.lane.b32.xlu0 %v3898_v55, %s5171_s9  ;;  %v3532_v55 = vshrl.u32 %v3189_v36, 16 }
 0x239   : > { %v3057_v15 = vpop.permute.xlu1 %3056 }
 0x23a   : > { %v3055_v14 = vpop.permute.xlu0 %3054  ;;  %3134 = vst.msk [vmem:[#allocation3 + $0x4c] sm:$0xf] %vm3114_vm8, %v3057_v15  ;;  %v3534_v3 = vrot.slane %v3532_v55, 4  ;;  %v3906_v55 = vrot.slane %v3904_v56, 4 }
 0x23b   : > { %3133 = vst.msk [vmem:[#allocation3 + $0x48] sm:$0xf] %vm3114_vm8, %v3055_v14  ;;  %1984 = vrot.lane.b32.xlu1 %v1891_v9, %s5166_s24  ;;  %v3191_v9 = vld [vmem:[#allocation2 + $0xc8] sm:$0x1] }
 0x23c   : > { %1982 = vrot.lane.b32.xlu0 %v1890_v4, %s5166_s24  ;;  %v3537_v4 = vrot.slane %v3535_v58, 5  ;;  %v3551_v21 = vshll.u32 %v3191_v9, 16 }
 0x23d   : > { %v3614_v22 = vpop.permute.xlu1 %3613 }
 0x23e   : > { %v3612_v49 = vpop.permute.xlu0 %3611  ;;  %3693 = vst.msk [vmem:[#allocation3 + $0x44] sm:$0xf] %vm3675_vm12, %v3614_v22  ;;  %v3538_v18 = vor.u32 %v3537_v4, %v3534_v3  ;;  %v3553_v30 = vrot.slane %v3551_v21, 5 }
 0x23f   : > { %3692 = vst.msk [vmem:[#allocation3 + $0x40] sm:$0xf] %vm3675_vm12, %v3612_v49  ;;  %1988 = vrot.lane.b32.xlu1 %v1893_v20, %s5166_s24  ;;  %v3548_v20 = vor.u32 %v3547_v10, %v3543_v8  ;;  %v3571_v49 = vrot.slane %v3569_v12, 4 }
 0x240   : > { %1986 = vrot.lane.b32.xlu0 %v1892_v43, %s5166_s24  ;;  %v3561_v43 = vrot.slane %v3559_v6, 5  ;;  %v3539_v26 = vrot.slane %v3538_v18, 4 }
 0x241   : > { %v3618_v34 = vpop.permute.xlu1 %3617  ;;  %v3549_v29 = vrot.slane %v3548_v20, 4  ;;  %v3572_v31 = vor.u32 %v3571_v49, %v3567_v1 }
 0x242   : > { %v3616_v32 = vpop.permute.xlu0 %3615  ;;  %3695 = vst.msk [vmem:[#allocation3 + $0x4c] sm:$0xf] %vm3675_vm12, %v3618_v34  ;;  %v3562_v27 = vor.u32 %v3561_v43, %v3558_v19  ;;  %v3544_v7 = vsel %vm5256_vm9, %v3539_v26, %v3543_v8 }
 0x243   : > { %3694 = vst.msk [vmem:[#allocation3 + $0x48] sm:$0xf] %vm3675_vm12, %v3616_v32  ;;  %2545 = vrot.lane.b32.xlu1 %v2462_v25, %s5167_s25  ;;  %v2984_v25 = vld [vmem:[#allocation2 + $0xcc] sm:$0xf]  ;;  %v3575_v32 = vshll.u32 %v3194_v46, 16  ;;  %v3554_v40 = vsel %vm5256_vm9, %v3549_v29, %v3553_v30 }
 0x244   : > { %2543 = vrot.lane.b32.xlu0 %v2452_v24, %s5167_s25  ;;  %v3563_v39 = vrot.slane %v3562_v27, 4 }
 0x245   : > { %v3951_v50 = vpop.permute.xlu1 %3950 }
 0x246   : > { %v3949_v45 = vpop.permute.xlu0 %3948  ;;  %4030 = vst.msk [vmem:[#allocation3 + $0x44] sm:$0xf] %vm4012_vm13, %v3951_v50  ;;  %v3752_v50 = vld [vmem:[#allocation2 + $0xc8] sm:$0x1]  ;;  %v3568_v52 = vsel %vm5256_vm9, %v3563_v39, %v3567_v1 }
 0x247   : > { %4029 = vst.msk [vmem:[#allocation3 + $0x40] sm:$0xf] %vm4012_vm13, %v3949_v45  ;;  %2549 = vrot.lane.b32.xlu1 %v2486_v42, %s5167_s25  ;;  %v3577_v42 = vrot.slane %v3575_v32, 5  ;;  %v3907_v58 = vrot.slane %v3752_v50, 5 }
 0x248   : > { %2547 = vrot.lane.b32.xlu0 %v2476_v37, %s5167_s25  ;;  %v3573_v37 = vrot.slane %v3572_v31, 4 }
 0x249   : > { %v3955_v57 = vpop.permute.xlu1 %3954  ;;  %v3908_v41 = vsel %vm5631_vm14, %v3906_v55, %v3907_v58 }
 0x24a   : > { %v3953_v62 = vpop.permute.xlu0 %3952  ;;  %4032 = vst.msk [vmem:[#allocation3 + $0x4c] sm:$0xf] %vm4012_vm13, %v3955_v57  ;;  %v3578_v47 = vsel %vm5256_vm9, %v3573_v37, %v3577_v42  ;;  %v4920_v57 = vrot.slane %v3753_v61, 9 }
 0x24b   : > { %4031 = vst.msk [vmem:[#allocation3 + $0x48] sm:$0xf] %vm4012_vm13, %v3953_v62  ;;  %2882 = vrot.lane.b32.xlu1 %v2816_v60, %s5168_s26  ;;  %v3905_v62 = vsel %vm5631_vm14, %v4919_v54, %v3904_v56 }
 0x24c   : > { %2880 = vrot.lane.b32.xlu0 %v2813_v59, %s5168_s26  ;;  %v3911_v59 = vrot.slane %v3754_v51, 5 }
 0x24d   : > { %v1969_v14 = vpop.permute.xlu1 %1968 }
 0x24e   : > { %v1967_v13 = vpop.permute.xlu0 %1966  ;;  %v5147_v15 = vld [vmem:[#allocation3 + $0x40] sm:$0xff]   ;;  %2044 = vst.msk [vmem:[#allocation3 + $0x54] sm:$0xf] %vm2022_vm3, %v1969_v14  ;;  %v3913_v63 = vrot.slane %v3911_v59, 4  ;;  %v3912_v4 = vsel %vm5631_vm14, %v4920_v57, %v3911_v59 }
 0x24f   : > { %2043 = vst.msk [vmem:[#allocation3 + $0x50] sm:$0xf] %vm2022_vm3, %v1967_v13  ;;  %2886 = vrot.lane.b32.xlu1 %v2823_v2, %s5168_s26  ;;  %5095 = vmatprep.mubr.msk.bf16.mxu1 %vm4177_vm15, %v5147_v15 }
 0x250   : > { %2884 = vrot.lane.b32.xlu0 %v2820_v0, %s5168_s26  ;;  %v3914_v0 = vrot.slane %v3755_v53, 5 }
 0x251   : > { %v1973_v23 = vpop.permute.xlu1 %1972 }
 0x252   : > { %v1971_v22 = vpop.permute.xlu0 %1970  ;;  %v5148_v24 = vld [vmem:[#allocation3 + $0x48] sm:$0xff]   ;;  %2046 = vst.msk [vmem:[#allocation3 + $0x5c] sm:$0xf] %vm2022_vm3, %v1973_v23  ;;  %v3915_v5 = vsel %vm5631_vm14, %v3913_v63, %v3914_v0 }
 0x253   : > { %2045 = vst.msk [vmem:[#allocation3 + $0x58] sm:$0xf] %vm2022_vm3, %v1971_v22  ;;  %3076 = vrot.lane.b32.xlu1 %v2983_v17, %s5169_s27  ;;  %5096 = vmatmul.mubr.msk.bf16.vlgmr.msra.gmra.mxu1 %vm4177_vm15, %v5148_v24 }
 0x254   : > { %3074 = vrot.lane.b32.xlu0 %v2982_v16, %s5169_s27 }
 0x255   : > { %v2530_v35 = vpop.permute.xlu1 %2529 }
 0x256   : > { %v2528_v34 = vpop.permute.xlu0 %2527  ;;  %2605 = vst.msk [vmem:[#allocation3 + $0x54] sm:$0xf] %vm2583_vm5, %v2530_v35 }
 0x257   : > { %2604 = vst.msk [vmem:[#allocation3 + $0x50] sm:$0xf] %vm2583_vm5, %v2528_v34  ;;  %3080 = vrot.lane.b32.xlu1 %v2985_v28, %s5169_s27 }
 0x258   : > { %3078 = vrot.lane.b32.xlu0 %v2984_v25, %s5169_s27 }
 0x259   : > { %v2534_v45 = vpop.permute.xlu1 %2533 }
 0x25a   : > { %v2532_v36 = vpop.permute.xlu0 %2531  ;;  %2607 = vst.msk [vmem:[#allocation3 + $0x5c] sm:$0xf] %vm2583_vm5, %v2534_v45 }
 0x25b   : > { %2606 = vst.msk [vmem:[#allocation3 + $0x58] sm:$0xf] %vm2583_vm5, %v2532_v36  ;;  %3637 = vrot.lane.b32.xlu1 %v3554_v40, %s5170_s6 }
 0x25c   : > { %3635 = vrot.lane.b32.xlu0 %v3544_v7, %s5170_s6 }
 0x25d   : > { %v2867_v48 = vpop.permute.xlu1 %2866 }
 0x25e   : > { %v2865_v60 = vpop.permute.xlu0 %2864  ;;  %2942 = vst.msk [vmem:[#allocation3 + $0x54] sm:$0xf] %vm2920_vm6, %v2867_v48 }
 0x25f   : > { %2941 = vst.msk [vmem:[#allocation3 + $0x50] sm:$0xf] %vm2920_vm6, %v2865_v60  ;;  %3641 = vrot.lane.b32.xlu1 %v3578_v47, %s5170_s6 }
 0x260   : > { %3639 = vrot.lane.b32.xlu0 %v3568_v52, %s5170_s6 }
 0x261   : > { %v2871_v3 = vpop.permute.xlu1 %2870 }
 0x262   : > { %v2869_v2 = vpop.permute.xlu0 %2868  ;;  %2944 = vst.msk [vmem:[#allocation3 + $0x5c] sm:$0xf] %vm2920_vm6, %v2871_v3 }
 0x263   : > { %2943 = vst.msk [vmem:[#allocation3 + $0x58] sm:$0xf] %vm2920_vm6, %v2869_v2  ;;  %3974 = vrot.lane.b32.xlu1 %v3908_v41, %s5171_s9 }
 0x264   : > { %3972 = vrot.lane.b32.xlu0 %v3905_v62, %s5171_s9 }
 0x265   : > { %v3061_v8 = vpop.permute.xlu1 %3060 }
 0x266   : > { %v3059_v6 = vpop.permute.xlu0 %3058  ;;  %3136 = vst.msk [vmem:[#allocation3 + $0x54] sm:$0xf] %vm3114_vm8, %v3061_v8 }
 0x267   : > { %3135 = vst.msk [vmem:[#allocation3 + $0x50] sm:$0xf] %vm3114_vm8, %v3059_v6  ;;  %3978 = vrot.lane.b32.xlu1 %v3915_v5, %s5171_s9 }
 0x268   : > { %3976 = vrot.lane.b32.xlu0 %v3912_v4, %s5171_s9 }
 0x269   : > { %v3065_v10 = vpop.permute.xlu1 %3064 }
 0x26a   : > { %v3063_v9 = vpop.permute.xlu0 %3062  ;;  %3138 = vst.msk [vmem:[#allocation3 + $0x5c] sm:$0xf] %vm3114_vm8, %v3065_v10 }
 0x26b   : > { %3137 = vst.msk [vmem:[#allocation3 + $0x58] sm:$0xf] %vm3114_vm8, %v3063_v9 }
 0x26d   : > { %v3622_v12 = vpop.permute.xlu1 %3621 }
 0x26e   : > { %v3620_v11 = vpop.permute.xlu0 %3619  ;;  %3697 = vst.msk [vmem:[#allocation3 + $0x54] sm:$0xf] %vm3675_vm12, %v3622_v12 }
 0x26f   : > { %3696 = vst.msk [vmem:[#allocation3 + $0x50] sm:$0xf] %vm3675_vm12, %v3620_v11  ;;  %v5081_v33 = vpop.f32.mrf.mxu0 }
 0x270   : > { %v5024_v13 = vpack.c.bf16 %v5081_v33, %v5081_v33  ;;  %v4465_v1 = vmul.f32 %v5081_v33, %v5081_v33  ;;  %v4395_v26 = vsel %vm4391_vm4, %v5081_v33, 0.0 }
 0x271   : > { %v3626_v15 = vpop.permute.xlu1 %3625  ;;  %v4264_v16 = vpop.f32.mrf.mxu0 }
 0x272   : > { %v3624_v14 = vpop.permute.xlu0 %3623  ;;  %3699 = vst.msk [vmem:[#allocation3 + $0x5c] sm:$0xf] %vm3675_vm12, %v3626_v15  ;;  %v5022_v17 = vpack.c.bf16 %v4264_v16, %v4264_v16  ;;  %v4463_v19 = vmul.f32 %v4264_v16, %v4264_v16  ;;  %v4392_v49 = vsel %vm4391_vm4, %v4264_v16, 0.0  ;;  %v4498_v35 = vsel %vm4391_vm4, %v4465_v1, 0.0 }
 0x273   : > { %3698 = vst.msk [vmem:[#allocation3 + $0x58] sm:$0xf] %vm3675_vm12, %v3624_v14  ;;  %v5082_v18 = vpop.f32.mrf.mxu0 }
 0x274   : > { %4696 = vst.msk [vmem:[%s6489_s13 + $0x8] sm:$0xf] %vm4693_vm0, %v5024_v13  ;;  %4694 = vst.msk [vmem:[%s6489_s13] sm:$0xf] %vm4693_vm0, %v5022_v17  ;;  %v5025_v43 = vpack.c.bf16 %v5082_v18, %v5082_v18  ;;  %v4495_v27 = vsel %vm4391_vm4, %v4463_v19, 0.0  ;;  %v4466_v28 = vmul.f32 %v5082_v18, %v5082_v18  ;;  %v4397_v38 = vsel %vm4391_vm4, %v5082_v18, 0.0 }
 0x275   : > { %v3959_v21 = vpop.permute.xlu1 %3958  ;;  %v4267_v46 = vpop.f32.mrf.mxu0 }
 0x276   : > { %v3957_v20 = vpop.permute.xlu0 %3956  ;;  %4034 = vst.msk [vmem:[#allocation3 + $0x54] sm:$0xf] %vm4012_vm13, %v3959_v21  ;;  %v4393_v22 = vsel %vm4391_vm4, %v4267_v46, 0.0  ;;  %v4464_v23 = vmul.f32 %v4267_v46, %v4267_v46  ;;  %v5023_v24 = vpack.c.bf16 %v4267_v46, %v4267_v46  ;;  %v4500_v40 = vsel %vm4391_vm4, %v4466_v28, 0.0 }
 0x277   : > { %4033 = vst.msk [vmem:[#allocation3 + $0x50] sm:$0xf] %vm4012_vm13, %v3957_v20  ;;  %v4394_v25 = vadd.f32 %v4393_v22, %v4392_v49 }
 0x278   : > { %4697 = vst.msk [vmem:[%s6489_s13 + $0xc] sm:$0xf] %vm4693_vm0, %v5025_v43  ;;  %v4496_v29 = vsel %vm4391_vm4, %v4464_v23, 0.0  ;;  %4695 = vst.msk [vmem:[%s6489_s13 + $0x4] sm:$0xf] %vm4693_vm0, %v5023_v24 }
 0x279   : > { %v3963_v31 = vpop.permute.xlu1 %3962  ;;  %v4396_v32 = vadd.f32 %v4395_v26, %v4394_v25  ;;  %v4497_v34 = vadd.f32 %v4496_v29, %v4495_v27 }
 0x27a   : > { %v3961_v30 = vpop.permute.xlu0 %3960  ;;  %4036 = vst.msk [vmem:[#allocation3 + $0x5c] sm:$0xf] %vm4012_vm13, %v3963_v31 }
 0x27b   : > { %4035 = vst.msk [vmem:[#allocation3 + $0x58] sm:$0xf] %vm4012_vm13, %v3961_v30  ;;  %v4499_v7 = vadd.f32 %v4498_v35, %v4497_v34  ;;  %v4398_v39 = vadd.f32 %v4397_v38, %v4396_v32 }
 0x27d   : > { %v1977_v42 = vpop.permute.xlu1 %1976  ;;  %v4501_v56 = vadd.f32 %v4500_v40, %v4499_v7 }
 0x27e   : > { %v1975_v37 = vpop.permute.xlu0 %1974  ;;  %v5149_v44 = vld [vmem:[#allocation3 + $0x50] sm:$0xff]   ;;  %2048 = vst.msk [vmem:[#allocation3 + $0x64] sm:$0xf] %vm2022_vm3, %v1977_v42 }
 0x27f   : > { %2047 = vst.msk [vmem:[#allocation3 + $0x60] sm:$0xf] %vm2022_vm3, %v1975_v37  ;;  %5099 = vmatprep.mubr.msk.bf16.mxu1 %vm4177_vm15, %v5149_v44 }
 0x281   : > { %v1981_v45 = vpop.permute.xlu1 %1980 }
 0x282   : > { %v1979_v36 = vpop.permute.xlu0 %1978  ;;  %v5150_v50 = vld [vmem:[#allocation3 + $0x58] sm:$0xff]   ;;  %2050 = vst.msk [vmem:[#allocation3 + $0x6c] sm:$0xf] %vm2022_vm3, %v1981_v45 }
 0x283   : > { %2049 = vst.msk [vmem:[#allocation3 + $0x68] sm:$0xf] %vm2022_vm3, %v1979_v36  ;;  %5100 = vmatmul.mubr.msk.bf16.gmra.mxu1 %vm4177_vm15, %v5150_v50 }
 0x285   : > { %v2538_v52 = vpop.permute.xlu1 %2537 }
 0x286   : > { %v2536_v51 = vpop.permute.xlu0 %2535  ;;  %2609 = vst.msk [vmem:[#allocation3 + $0x64] sm:$0xf] %vm2583_vm5, %v2538_v52 }
 0x287   : > { %2608 = vst.msk [vmem:[#allocation3 + $0x60] sm:$0xf] %vm2583_vm5, %v2536_v51 }
 0x289   : > { %v2542_v47 = vpop.permute.xlu1 %2541 }
 0x28a   : > { %v2540_v54 = vpop.permute.xlu0 %2539  ;;  %2611 = vst.msk [vmem:[#allocation3 + $0x6c] sm:$0xf] %vm2583_vm5, %v2542_v47 }
 0x28b   : > { %2610 = vst.msk [vmem:[#allocation3 + $0x68] sm:$0xf] %vm2583_vm5, %v2540_v54 }
 0x28d   : > { %v2875_v58 = vpop.permute.xlu1 %2874 }
 0x28e   : > { %v2873_v55 = vpop.permute.xlu0 %2872  ;;  %2946 = vst.msk [vmem:[#allocation3 + $0x64] sm:$0xf] %vm2920_vm6, %v2875_v58 }
 0x28f   : > { %2945 = vst.msk [vmem:[#allocation3 + $0x60] sm:$0xf] %vm2920_vm6, %v2873_v55 }
 0x291   : > { %v2879_v60 = vpop.permute.xlu1 %2878 }
 0x292   : > { %v2877_v59 = vpop.permute.xlu0 %2876  ;;  %2948 = vst.msk [vmem:[#allocation3 + $0x6c] sm:$0xf] %vm2920_vm6, %v2879_v60 }
 0x293   : > { %2947 = vst.msk [vmem:[#allocation3 + $0x68] sm:$0xf] %vm2920_vm6, %v2877_v59 }
 0x295   : > { %v3069_v61 = vpop.permute.xlu1 %3068 }
 0x296   : > { %v3067_v48 = vpop.permute.xlu0 %3066  ;;  %3140 = vst.msk [vmem:[#allocation3 + $0x64] sm:$0xf] %vm3114_vm8, %v3069_v61 }
 0x297   : > { %3139 = vst.msk [vmem:[#allocation3 + $0x60] sm:$0xf] %vm3114_vm8, %v3067_v48  ;;  %v5085_v53 = vpop.f32.mrf.mxu0 }
 0x298   : > { %v5028_v62 = vpack.c.bf16 %v5085_v53, %v5085_v53  ;;  %v4469_v33 = vmul.f32 %v5085_v53, %v5085_v53  ;;  %v4403_v17 = vsel %vm4391_vm4, %v5085_v53, 0.0 }
 0x299   : > { %v3073_v57 = vpop.permute.xlu1 %3072  ;;  %v4280_v63 = vpop.f32.mrf.mxu0 }
 0x29a   : > { %v3071_v41 = vpop.permute.xlu0 %3070  ;;  %3142 = vst.msk [vmem:[#allocation3 + $0x6c] sm:$0xf] %vm3114_vm8, %v3073_v57  ;;  %v4399_v0 = vsel %vm4391_vm4, %v4280_v63, 0.0  ;;  %v4467_v2 = vmul.f32 %v4280_v63, %v4280_v63  ;;  %v5026_v3 = vpack.c.bf16 %v4280_v63, %v4280_v63  ;;  %v4506_v46 = vsel %vm4391_vm4, %v4469_v33, 0.0 }
 0x29b   : > { %3141 = vst.msk [vmem:[#allocation3 + $0x68] sm:$0xf] %vm3114_vm8, %v3071_v41  ;;  %v4400_v4 = vadd.f32 %v4399_v0, %v4398_v39  ;;  %v5086_v5 = vpop.f32.mrf.mxu0 }
 0x29c   : > { %4700 = vst.msk [vmem:[%s6489_s13 + $0x18] sm:$0xf] %vm4693_vm0, %v5028_v62  ;;  %v4502_v6 = vsel %vm4391_vm4, %v4467_v2, 0.0  ;;  %4698 = vst.msk [vmem:[%s6489_s13 + $0x10] sm:$0xf] %vm4693_vm0, %v5026_v3  ;;  %v5029_v8 = vpack.c.bf16 %v5086_v5, %v5086_v5  ;;  %v4470_v18 = vmul.f32 %v5086_v5, %v5086_v5  ;;  %v4405_v49 = vsel %vm4391_vm4, %v5086_v5, 0.0 }
 0x29d   : > { %v3630_v10 = vpop.permute.xlu1 %3629  ;;  %v4503_v11 = vadd.f32 %v4502_v6, %v4501_v56  ;;  %v4283_v12 = vpop.f32.mrf.mxu0 }
 0x29e   : > { %v3628_v9 = vpop.permute.xlu0 %3627  ;;  %3701 = vst.msk [vmem:[#allocation3 + $0x64] sm:$0xf] %vm3675_vm12, %v3630_v10  ;;  %v4401_v13 = vsel %vm4391_vm4, %v4283_v12, 0.0  ;;  %v4468_v14 = vmul.f32 %v4283_v12, %v4283_v12  ;;  %v5027_v15 = vpack.c.bf16 %v4283_v12, %v4283_v12  ;;  %v4508_v24 = vsel %vm4391_vm4, %v4470_v18, 0.0 }
 0x29f   : > { %3700 = vst.msk [vmem:[#allocation3 + $0x60] sm:$0xf] %vm3675_vm12, %v3628_v9  ;;  %v4402_v16 = vadd.f32 %v4401_v13, %v4400_v4 }
 0x2a0   : > { %4701 = vst.msk [vmem:[%s6489_s13 + $0x1c] sm:$0xf] %vm4693_vm0, %v5029_v8  ;;  %v4504_v19 = vsel %vm4391_vm4, %v4468_v14, 0.0  ;;  %4699 = vst.msk [vmem:[%s6489_s13 + $0x14] sm:$0xf] %vm4693_vm0, %v5027_v15 }
 0x2a1   : > { %v3634_v20 = vpop.permute.xlu1 %3633  ;;  %v4404_v21 = vadd.f32 %v4403_v17, %v4402_v16  ;;  %v4505_v1 = vadd.f32 %v4504_v19, %v4503_v11 }
 0x2a2   : > { %v3632_v43 = vpop.permute.xlu0 %3631  ;;  %3703 = vst.msk [vmem:[#allocation3 + $0x6c] sm:$0xf] %vm3675_vm12, %v3634_v20 }
 0x2a3   : > { %3702 = vst.msk [vmem:[#allocation3 + $0x68] sm:$0xf] %vm3675_vm12, %v3632_v43  ;;  %v4507_v22 = vadd.f32 %v4506_v46, %v4505_v1  ;;  %v4406_v23 = vadd.f32 %v4405_v49, %v4404_v21 }
 0x2a5   : > { %v3967_v26 = vpop.permute.xlu1 %3966  ;;  %v4509_v27 = vadd.f32 %v4508_v24, %v4507_v22 }
 0x2a6   : > { %v3965_v25 = vpop.permute.xlu0 %3964  ;;  %4038 = vst.msk [vmem:[#allocation3 + $0x64] sm:$0xf] %vm4012_vm13, %v3967_v26 }
 0x2a7   : > { %4037 = vst.msk [vmem:[#allocation3 + $0x60] sm:$0xf] %vm4012_vm13, %v3965_v25 }
 0x2a9   : > { %v3971_v29 = vpop.permute.xlu1 %3970 }
 0x2aa   : > { %v3969_v28 = vpop.permute.xlu0 %3968  ;;  %4040 = vst.msk [vmem:[#allocation3 + $0x6c] sm:$0xf] %vm4012_vm13, %v3971_v29 }
 0x2ab   : > { %4039 = vst.msk [vmem:[#allocation3 + $0x68] sm:$0xf] %vm4012_vm13, %v3969_v28 }
 0x2ad   : > { %v1985_v31 = vpop.permute.xlu1 %1984 }
 0x2ae   : > { %v1983_v30 = vpop.permute.xlu0 %1982  ;;  %v5151_v32 = vld [vmem:[#allocation3 + $0x60] sm:$0xff]   ;;  %2052 = vst.msk [vmem:[#allocation3 + $0x74] sm:$0xf] %vm2022_vm3, %v1985_v31 }
 0x2af   : > { %2051 = vst.msk [vmem:[#allocation3 + $0x70] sm:$0xf] %vm2022_vm3, %v1983_v30  ;;  %5103 = vmatprep.mubr.msk.bf16.mxu1 %vm4177_vm15, %v5151_v32 }
 0x2b1   : > { %v1989_v35 = vpop.permute.xlu1 %1988 }
 0x2b2   : > { %v1987_v34 = vpop.permute.xlu0 %1986  ;;  %v5152_v38 = vld [vmem:[#allocation3 + $0x68] sm:$0xff]   ;;  %2054 = vst.msk [vmem:[#allocation3 + $0x7c] sm:$0xf] %vm2022_vm3, %v1989_v35 }
 0x2b3   : > { %2053 = vst.msk [vmem:[#allocation3 + $0x78] sm:$0xf] %vm2022_vm3, %v1987_v34  ;;  %5104 = vmatmul.mubr.msk.bf16.gmra.mxu1 %vm4177_vm15, %v5152_v38 }
 0x2b5   : > { %v2546_v39 = vpop.permute.xlu1 %2545 }
 0x2b6   : > { %v2544_v7 = vpop.permute.xlu0 %2543  ;;  %2613 = vst.msk [vmem:[#allocation3 + $0x74] sm:$0xf] %vm2583_vm5, %v2546_v39 }
 0x2b7   : > { %2612 = vst.msk [vmem:[#allocation3 + $0x70] sm:$0xf] %vm2583_vm5, %v2544_v7 }
 0x2b9   : > { %v2550_v37 = vpop.permute.xlu1 %2549 }
 0x2ba   : > { %v2548_v40 = vpop.permute.xlu0 %2547  ;;  %2615 = vst.msk [vmem:[#allocation3 + $0x7c] sm:$0xf] %vm2583_vm5, %v2550_v37 }
 0x2bb   : > { %2614 = vst.msk [vmem:[#allocation3 + $0x78] sm:$0xf] %vm2583_vm5, %v2548_v40 }
 0x2bd   : > { %v2883_v44 = vpop.permute.xlu1 %2882 }
 0x2be   : > { %v2881_v42 = vpop.permute.xlu0 %2880  ;;  %2950 = vst.msk [vmem:[#allocation3 + $0x74] sm:$0xf] %vm2920_vm6, %v2883_v44 }
 0x2bf   : > { %2949 = vst.msk [vmem:[#allocation3 + $0x70] sm:$0xf] %vm2920_vm6, %v2881_v42  ;;  %v5089_v56 = vpop.f32.mrf.mxu0 }
 0x2c0   : > { %v5032_v36 = vpack.c.bf16 %v5089_v56, %v5089_v56  ;;  %v4473_v41 = vmul.f32 %v5089_v56, %v5089_v56  ;;  %v4411_v3 = vsel %vm4391_vm4, %v5089_v56, 0.0 }
 0x2c1   : > { %v2887_v50 = vpop.permute.xlu1 %2886  ;;  %v4296_v51 = vpop.f32.mrf.mxu0 }
 0x2c2   : > { %v2885_v45 = vpop.permute.xlu0 %2884  ;;  %2952 = vst.msk [vmem:[#allocation3 + $0x7c] sm:$0xf] %vm2920_vm6, %v2887_v50  ;;  %v4407_v52 = vsel %vm4391_vm4, %v4296_v51, 0.0  ;;  %v4471_v54 = vmul.f32 %v4296_v51, %v4296_v51  ;;  %v5030_v47 = vpack.c.bf16 %v4296_v51, %v4296_v51  ;;  %v4514_v11 = vsel %vm4391_vm4, %v4473_v41, 0.0 }
 0x2c3   : > { %2951 = vst.msk [vmem:[#allocation3 + $0x78] sm:$0xf] %vm2920_vm6, %v2885_v45  ;;  %v4408_v55 = vadd.f32 %v4407_v52, %v4406_v23  ;;  %v5090_v58 = vpop.f32.mrf.mxu0 }
 0x2c4   : > { %4704 = vst.msk [vmem:[%s6489_s13 + $0x28] sm:$0xf] %vm4693_vm0, %v5032_v36  ;;  %v4510_v59 = vsel %vm4391_vm4, %v4471_v54, 0.0  ;;  %4702 = vst.msk [vmem:[%s6489_s13 + $0x20] sm:$0xf] %vm4693_vm0, %v5030_v47  ;;  %v5033_v60 = vpack.c.bf16 %v5090_v58, %v5090_v58  ;;  %v4474_v4 = vmul.f32 %v5090_v58, %v5090_v58  ;;  %v4413_v12 = vsel %vm4391_vm4, %v5090_v58, 0.0 }
 0x2c5   : > { %v3077_v61 = vpop.permute.xlu1 %3076  ;;  %v4511_v53 = vadd.f32 %v4510_v59, %v4509_v27  ;;  %v4299_v62 = vpop.f32.mrf.mxu0 }
 0x2c6   : > { %v3075_v48 = vpop.permute.xlu0 %3074  ;;  %3144 = vst.msk [vmem:[#allocation3 + $0x74] sm:$0xf] %vm3114_vm8, %v3077_v61  ;;  %v4409_v57 = vsel %vm4391_vm4, %v4299_v62, 0.0  ;;  %v4472_v63 = vmul.f32 %v4299_v62, %v4299_v62  ;;  %v5031_v0 = vpack.c.bf16 %v4299_v62, %v4299_v62  ;;  %v4516_v14 = vsel %vm4391_vm4, %v4474_v4, 0.0 }
 0x2c7   : > { %3143 = vst.msk [vmem:[#allocation3 + $0x70] sm:$0xf] %vm3114_vm8, %v3075_v48  ;;  %v4410_v2 = vadd.f32 %v4409_v57, %v4408_v55 }
 0x2c8   : > { %4705 = vst.msk [vmem:[%s6489_s13 + $0x2c] sm:$0xf] %vm4693_vm0, %v5033_v60  ;;  %v4512_v5 = vsel %vm4391_vm4, %v4472_v63, 0.0  ;;  %4703 = vst.msk [vmem:[%s6489_s13 + $0x24] sm:$0xf] %vm4693_vm0, %v5031_v0 }
 0x2c9   : > { %v3081_v8 = vpop.permute.xlu1 %3080  ;;  %v4412_v9 = vadd.f32 %v4411_v3, %v4410_v2  ;;  %v4513_v10 = vadd.f32 %v4512_v5, %v4511_v53 }
 0x2ca   : > { %v3079_v6 = vpop.permute.xlu0 %3078  ;;  %3146 = vst.msk [vmem:[#allocation3 + $0x7c] sm:$0xf] %vm3114_vm8, %v3081_v8 }
 0x2cb   : > { %3145 = vst.msk [vmem:[#allocation3 + $0x78] sm:$0xf] %vm3114_vm8, %v3079_v6  ;;  %v4515_v33 = vadd.f32 %v4514_v11, %v4513_v10  ;;  %v4414_v13 = vadd.f32 %v4413_v12, %v4412_v9 }
 0x2cd   : > { %v3638_v16 = vpop.permute.xlu1 %3637  ;;  %v4517_v17 = vadd.f32 %v4516_v14, %v4515_v33 }
 0x2ce   : > { %v3636_v15 = vpop.permute.xlu0 %3635  ;;  %3705 = vst.msk [vmem:[#allocation3 + $0x74] sm:$0xf] %vm3675_vm12, %v3638_v16 }
 0x2cf   : > { %3704 = vst.msk [vmem:[#allocation3 + $0x70] sm:$0xf] %vm3675_vm12, %v3636_v15 }
 0x2d1   : > { %v3642_v19 = vpop.permute.xlu1 %3641 }
 0x2d2   : > { %v3640_v18 = vpop.permute.xlu0 %3639  ;;  %3707 = vst.msk [vmem:[#allocation3 + $0x7c] sm:$0xf] %vm3675_vm12, %v3642_v19 }
 0x2d3   : > { %3706 = vst.msk [vmem:[#allocation3 + $0x78] sm:$0xf] %vm3675_vm12, %v3640_v18 }
 0x2d5   : > { %v3975_v20 = vpop.permute.xlu1 %3974 }
 0x2d6   : > { %v3973_v43 = vpop.permute.xlu0 %3972  ;;  %4042 = vst.msk [vmem:[#allocation3 + $0x74] sm:$0xf] %vm4012_vm13, %v3975_v20 }
 0x2d7   : > { %4041 = vst.msk [vmem:[#allocation3 + $0x70] sm:$0xf] %vm4012_vm13, %v3973_v43 }
 0x2d9   : > { %v3979_v1 = vpop.permute.xlu1 %3978 }
 0x2da   : > { %v3977_v21 = vpop.permute.xlu0 %3976  ;;  %4044 = vst.msk [vmem:[#allocation3 + $0x7c] sm:$0xf] %vm4012_vm13, %v3979_v1 }
 0x2db   : > { %4043 = vst.msk [vmem:[#allocation3 + $0x78] sm:$0xf] %vm4012_vm13, %v3977_v21 }
 0x2de   : > { %v5153_v46 = vld [vmem:[#allocation3 + $0x70] sm:$0xff]  }
 0x2df   : > { %5107 = vmatprep.mubr.msk.bf16.mxu1 %vm4177_vm15, %v5153_v46 }
 0x2e2   : > { %v5154_v49 = vld [vmem:[#allocation3 + $0x78] sm:$0xff]  }
 0x2e3   : > { %5108 = vmatmul.mubr.msk.bf16.gmra.mxu1 %vm4177_vm15, %v5154_v49 }
 0x2e7   : > { %v5093_v22 = vpop.f32.mrf.mxu0 }
 0x2e8   : > { %v5036_v23 = vpack.c.bf16 %v5093_v22, %v5093_v22  ;;  %v4477_v35 = vmul.f32 %v5093_v22, %v5093_v22  ;;  %v4419_v37 = vsel %vm4391_vm4, %v5093_v22, 0.0 }
 0x2e9   : > { %v4312_v24 = vpop.f32.mrf.mxu0 }
 0x2ea   : > { %4708 = vst.msk [vmem:[%s6489_s13 + $0x38] sm:$0xf] %vm4693_vm0, %v5036_v23  ;;  %v4415_v25 = vsel %vm4391_vm4, %v4312_v24, 0.0  ;;  %v4475_v26 = vmul.f32 %v4312_v24, %v4312_v24  ;;  %v5034_v27 = vpack.c.bf16 %v4312_v24, %v4312_v24  ;;  %v4522_v45 = vsel %vm4391_vm4, %v4477_v35, 0.0 }
 0x2eb   : > { %v4416_v28 = vadd.f32 %v4415_v25, %v4414_v13  ;;  %v5094_v29 = vpop.f32.mrf.mxu0 }
 0x2ec   : > { %v4518_v30 = vsel %vm4391_vm4, %v4475_v26, 0.0  ;;  %4706 = vst.msk [vmem:[%s6489_s13 + $0x30] sm:$0xf] %vm4693_vm0, %v5034_v27  ;;  %v5037_v31 = vpack.c.bf16 %v5094_v29, %v5094_v29  ;;  %v4478_v42 = vmul.f32 %v5094_v29, %v5094_v29  ;;  %v4421_v50 = vsel %vm4391_vm4, %v5094_v29, 0.0 }
 0x2ed   : > { %v4519_v32 = vadd.f32 %v4518_v30, %v4517_v17  ;;  %v4315_v34 = vpop.f32.mrf.mxu0 }
 0x2ee   : > { %4709 = vst.msk [vmem:[%s6489_s13 + $0x3c] sm:$0xf] %vm4693_vm0, %v5037_v31  ;;  %v4417_v38 = vsel %vm4391_vm4, %v4315_v34, 0.0  ;;  %v4476_v7 = vmul.f32 %v4315_v34, %v4315_v34  ;;  %v5035_v39 = vpack.c.bf16 %v4315_v34, %v4315_v34  ;;  %v4524_v54 = vsel %vm4391_vm4, %v4478_v42, 0.0 }
 0x2ef   : > { %v4418_v40 = vadd.f32 %v4417_v38, %v4416_v28 }
 0x2f0   : > { %v4520_v44 = vsel %vm4391_vm4, %v4476_v7, 0.0  ;;  %4707 = vst.msk [vmem:[%s6489_s13 + $0x34] sm:$0xf] %vm4693_vm0, %v5035_v39 }
 0x2f1   : > { %v4420_v56 = vadd.f32 %v4419_v37, %v4418_v40  ;;  %v4521_v36 = vadd.f32 %v4520_v44, %v4519_v32 }
 0x2f3   : > { %v4523_v51 = vadd.f32 %v4522_v45, %v4521_v36  ;;  %v4422_v52 = vadd.f32 %v4421_v50, %v4420_v56 }
 0x2f5   : > { %v4525_v47 = vadd.f32 %v4524_v54, %v4523_v51 }
 0x313   : > { %v5097_v55 = vpop.f32.mrf.mxu1 }
 0x314   : > { %v5040_v58 = vpack.c.bf16 %v5097_v55, %v5097_v55  ;;  %v4481_v2 = vmul.f32 %v5097_v55, %v5097_v55  ;;  %v4427_v8 = vsel %vm4391_vm4, %v5097_v55, 0.0 }
 0x315   : > { %v4328_v59 = vpop.f32.mrf.mxu1 }
 0x316   : > { %4712 = vst.msk [vmem:[%s6489_s13 + $0x48] sm:$0xf] %vm4693_vm0, %v5040_v58  ;;  %v4423_v60 = vsel %vm4391_vm4, %v4328_v59, 0.0  ;;  %v4479_v48 = vmul.f32 %v4328_v59, %v4328_v59  ;;  %v5038_v61 = vpack.c.bf16 %v4328_v59, %v4328_v59  ;;  %v4530_v33 = vsel %vm4391_vm4, %v4481_v2, 0.0 }
 0x317   : > { %v4424_v53 = vadd.f32 %v4423_v60, %v4422_v52  ;;  %v5098_v62 = vpop.f32.mrf.mxu1 }
 0x318   : > { %v4526_v41 = vsel %vm4391_vm4, %v4479_v48, 0.0  ;;  %4710 = vst.msk [vmem:[%s6489_s13 + $0x40] sm:$0xf] %vm4693_vm0, %v5038_v61  ;;  %v5041_v57 = vpack.c.bf16 %v5098_v62, %v5098_v62  ;;  %v4482_v9 = vmul.f32 %v5098_v62, %v5098_v62  ;;  %v4429_v13 = vsel %vm4391_vm4, %v5098_v62, 0.0 }
 0x319   : > { %v4527_v63 = vadd.f32 %v4526_v41, %v4525_v47  ;;  %v4331_v0 = vpop.f32.mrf.mxu1 }
 0x31a   : > { %4713 = vst.msk [vmem:[%s6489_s13 + $0x4c] sm:$0xf] %vm4693_vm0, %v5041_v57  ;;  %v4425_v3 = vsel %vm4391_vm4, %v4331_v0, 0.0  ;;  %v4480_v4 = vmul.f32 %v4331_v0, %v4331_v0  ;;  %v5039_v5 = vpack.c.bf16 %v4331_v0, %v4331_v0  ;;  %v4532_v16 = vsel %vm4391_vm4, %v4482_v9, 0.0 }
 0x31b   : > { %v4426_v6 = vadd.f32 %v4425_v3, %v4424_v53 }
 0x31c   : > { %v4528_v10 = vsel %vm4391_vm4, %v4480_v4, 0.0  ;;  %4711 = vst.msk [vmem:[%s6489_s13 + $0x44] sm:$0xf] %vm4693_vm0, %v5039_v5 }
 0x31d   : > { %v4428_v11 = vadd.f32 %v4427_v8, %v4426_v6  ;;  %v4529_v12 = vadd.f32 %v4528_v10, %v4527_v63 }
 0x31f   : > { %v4531_v14 = vadd.f32 %v4530_v33, %v4529_v12  ;;  %v4430_v15 = vadd.f32 %v4429_v13, %v4428_v11 }
 0x321   : > { %v4533_v17 = vadd.f32 %v4532_v16, %v4531_v14 }
 0x343   : > { %v5101_v18 = vpop.f32.mrf.mxu1 }
 0x344   : > { %v5044_v19 = vpack.c.bf16 %v5101_v18, %v5101_v18  ;;  %v4485_v26 = vmul.f32 %v5101_v18, %v5101_v18  ;;  %v4435_v31 = vsel %vm4391_vm4, %v5101_v18, 0.0 }
 0x345   : > { %v4344_v43 = vpop.f32.mrf.mxu1 }
 0x346   : > { %4716 = vst.msk [vmem:[%s6489_s13 + $0x58] sm:$0xf] %vm4693_vm0, %v5044_v19  ;;  %v4431_v20 = vsel %vm4391_vm4, %v4344_v43, 0.0  ;;  %v4483_v21 = vmul.f32 %v4344_v43, %v4344_v43  ;;  %v5042_v1 = vpack.c.bf16 %v4344_v43, %v4344_v43  ;;  %v4538_v7 = vsel %vm4391_vm4, %v4485_v26, 0.0 }
 0x347   : > { %v4432_v46 = vadd.f32 %v4431_v20, %v4430_v15  ;;  %v5102_v49 = vpop.f32.mrf.mxu1 }
 0x348   : > { %v4534_v22 = vsel %vm4391_vm4, %v4483_v21, 0.0  ;;  %4714 = vst.msk [vmem:[%s6489_s13 + $0x50] sm:$0xf] %vm4693_vm0, %v5042_v1  ;;  %v5045_v23 = vpack.c.bf16 %v5102_v49, %v5102_v49  ;;  %v4486_v32 = vmul.f32 %v5102_v49, %v5102_v49  ;;  %v4437_v39 = vsel %vm4391_vm4, %v5102_v49, 0.0 }
 0x349   : > { %v4535_v24 = vadd.f32 %v4534_v22, %v4533_v17  ;;  %v4347_v25 = vpop.f32.mrf.mxu1 }
 0x34a   : > { %4717 = vst.msk [vmem:[%s6489_s13 + $0x5c] sm:$0xf] %vm4693_vm0, %v5045_v23  ;;  %v4433_v27 = vsel %vm4391_vm4, %v4347_v25, 0.0  ;;  %v4484_v28 = vmul.f32 %v4347_v25, %v4347_v25  ;;  %v5043_v29 = vpack.c.bf16 %v4347_v25, %v4347_v25  ;;  %v4540_v42 = vsel %vm4391_vm4, %v4486_v32, 0.0 }
 0x34b   : > { %v4434_v30 = vadd.f32 %v4433_v27, %v4432_v46 }
 0x34c   : > { %v4536_v34 = vsel %vm4391_vm4, %v4484_v28, 0.0  ;;  %4715 = vst.msk [vmem:[%s6489_s13 + $0x54] sm:$0xf] %vm4693_vm0, %v5043_v29 }
 0x34d   : > { %v4436_v35 = vadd.f32 %v4435_v31, %v4434_v30  ;;  %v4537_v38 = vadd.f32 %v4536_v34, %v4535_v24 }
 0x34f   : > { %v4539_v40 = vadd.f32 %v4538_v7, %v4537_v38  ;;  %v4438_v37 = vadd.f32 %v4437_v39, %v4436_v35 }
 0x351   : > { %v4541_v44 = vadd.f32 %v4540_v42, %v4539_v40 }
 0x373   : > { %v5105_v56 = vpop.f32.mrf.mxu1 }
 0x374   : > { %v5048_v36 = vpack.c.bf16 %v5105_v56, %v5105_v56  ;;  %v4489_v57 = vmul.f32 %v5105_v56, %v5105_v56  ;;  %v4443_v0 = vsel %vm4391_vm4, %v5105_v56, 0.0 }
 0x375   : > { %v4360_v45 = vpop.f32.mrf.mxu1 }
 0x376   : > { %4720 = vst.msk [vmem:[%s6489_s13 + $0x68] sm:$0xf] %vm4693_vm0, %v5048_v36  ;;  %v5046_v50 = vpack.c.bf16 %v4360_v45, %v4360_v45  ;;  %v4487_v55 = vmul.f32 %v4360_v45, %v4360_v45  ;;  %v4439_v58 = vsel %vm4391_vm4, %v4360_v45, 0.0  ;;  %v4546_v4 = vsel %vm4391_vm4, %v4489_v57, 0.0 }
 0x377   : > { %v5106_v51 = vpop.f32.mrf.mxu1  ;;  %v4440_v61 = vadd.f32 %v4439_v58, %v4438_v37 }
 0x378   : > { %4718 = vst.msk [vmem:[%s6489_s13 + $0x60] sm:$0xf] %vm4693_vm0, %v5046_v50  ;;  %v5049_v52 = vpack.c.bf16 %v5106_v51, %v5106_v51  ;;  %v4542_v60 = vsel %vm4391_vm4, %v4487_v55, 0.0  ;;  %v4490_v5 = vmul.f32 %v5106_v51, %v5106_v51  ;;  %v4445_v10 = vsel %vm4391_vm4, %v5106_v51, 0.0 }
 0x379   : > { %v4363_v54 = vpop.f32.mrf.mxu1  ;;  %v4543_v62 = vadd.f32 %v4542_v60, %v4541_v44 }
 0x37a   : > { %4721 = vst.msk [vmem:[%s6489_s13 + $0x6c] sm:$0xf] %vm4693_vm0, %v5049_v52  ;;  %v5047_v47 = vpack.c.bf16 %v4363_v54, %v4363_v54  ;;  %v4488_v59 = vmul.f32 %v4363_v54, %v4363_v54  ;;  %v4441_v48 = vsel %vm4391_vm4, %v4363_v54, 0.0  ;;  %v4548_v15 = vsel %vm4391_vm4, %v4490_v5, 0.0 }
 0x37b   : > { %v4442_v41 = vadd.f32 %v4441_v48, %v4440_v61 }
 0x37c   : > { %4719 = vst.msk [vmem:[%s6489_s13 + $0x64] sm:$0xf] %vm4693_vm0, %v5047_v47  ;;  %v4544_v53 = vsel %vm4391_vm4, %v4488_v59, 0.0 }
 0x37d   : > { %v4545_v63 = vadd.f32 %v4544_v53, %v4543_v62  ;;  %v4444_v2 = vadd.f32 %v4443_v0, %v4442_v41 }
 0x37f   : > { %v4547_v8 = vadd.f32 %v4546_v4, %v4545_v63  ;;  %v4446_v13 = vadd.f32 %v4445_v10, %v4444_v2 }
 0x381   : > { %v4549_v19 = vadd.f32 %v4548_v15, %v4547_v8 }
 0x3a3   : > { %v5109_v3 = vpop.f32.mrf.mxu1 }
 0x3a4   : > { %v5052_v6 = vpack.c.bf16 %v5109_v3, %v5109_v3  ;;  %v4493_v20 = vmul.f32 %v5109_v3, %v5109_v3  ;;  %v4451_v23 = vsel %vm4391_vm4, %v5109_v3, 0.0 }
 0x3a5   : > { %v4376_v9 = vpop.f32.mrf.mxu1 }
 0x3a6   : > { %4724 = vst.msk [vmem:[%s6489_s13 + $0x78] sm:$0xf] %vm4693_vm0, %v5052_v6  ;;  %v4447_v11 = vsel %vm4391_vm4, %v4376_v9, 0.0  ;;  %v4491_v12 = vmul.f32 %v4376_v9, %v4376_v9  ;;  %v5050_v33 = vpack.c.bf16 %v4376_v9, %v4376_v9  ;;  %v4554_v28 = vsel %vm4391_vm4, %v4493_v20, 0.0 }
 0x3a7   : > { %v5110_v14 = vpop.f32.mrf.mxu1  ;;  %v4448_v18 = vadd.f32 %v4447_v11, %v4446_v13 }
 0x3a8   : > { %v4550_v16 = vsel %vm4391_vm4, %v4491_v12, 0.0  ;;  %4722 = vst.msk [vmem:[%s6489_s13 + $0x70] sm:$0xf] %vm4693_vm0, %v5050_v33  ;;  %v5053_v17 = vpack.c.bf16 %v5110_v14, %v5110_v14  ;;  %v4494_v24 = vmul.f32 %v5110_v14, %v5110_v14  ;;  %v4453_v29 = vsel %vm4391_vm4, %v5110_v14, 0.0 }
 0x3a9   : > { %v4379_v43 = vpop.f32.mrf.mxu1  ;;  %v4551_v49 = vadd.f32 %v4550_v16, %v4549_v19 }
 0x3aa   : > { %4725 = vst.msk [vmem:[%s6489_s13 + $0x7c] sm:$0xf] %vm4693_vm0, %v5053_v17  ;;  %v4449_v21 = vsel %vm4391_vm4, %v4379_v43, 0.0  ;;  %v4492_v1 = vmul.f32 %v4379_v43, %v4379_v43  ;;  %v5051_v46 = vpack.c.bf16 %v4379_v43, %v4379_v43  ;;  %v4556_v32 = vsel %vm4391_vm4, %v4494_v24, 0.0 }
 0x3ab   : > { %v4450_v22 = vadd.f32 %v4449_v21, %v4448_v18 }
 0x3ac   : > { %v4552_v25 = vsel %vm4391_vm4, %v4492_v1, 0.0  ;;  %4723 = vst.msk [vmem:[%s6489_s13 + $0x74] sm:$0xf] %vm4693_vm0, %v5051_v46 }
 0x3ad   : > { %v4452_v26 = vadd.f32 %v4451_v23, %v4450_v22  ;;  %v4553_v27 = vadd.f32 %v4552_v25, %v4551_v49 }
 0x3af   : > { %v4454_v30 = vadd.f32 %v4453_v29, %v4452_v26  ;;  %v4555_v31 = vadd.f32 %v4554_v28, %v4553_v27 }
 0x3b1   : > { %v4455_v34 = vrot.slane %v4454_v30, 4  ;;  %v4557_v35 = vadd.f32 %v4556_v32, %v4555_v31 }
 0x3b3   : > { %v4456_v38 = vadd.f32 %v4455_v34, %v4454_v30  ;;  %v4558_v7 = vrot.slane %v4557_v35, 4 }
 0x3b5   : > { %v4457_v39 = vrot.slane %v4456_v38, 2  ;;  %v4559_v40 = vadd.f32 %v4558_v7, %v4557_v35 }
 0x3b7   : > { %v4458_v37 = vadd.f32 %v4457_v39, %v4456_v38  ;;  %v4560_v42 = vrot.slane %v4559_v40, 2 }
 0x3b9   : > { %v4459_v44 = vrot.slane %v4458_v37, 1  ;;  %v4561_v56 = vadd.f32 %v4560_v42, %v4559_v40 }
 0x3bb   : > { %v4460_v36 = vadd.f32 %v4459_v44, %v4458_v37  ;;  %v4562_v45 = vrot.slane %v4561_v56, 1 }
 0x3bd   : > { %4462 = vst.msk [vmem:[%s214_s18] sm:$0x1] %vm4461_vm7, %v4460_v36  ;;  %v4563_v50 = vadd.f32 %v4562_v45, %v4561_v56 }
 0x3bf   : > { %4564 = vst.msk [vmem:[%s217_s21] sm:$0x1] %vm4461_vm7, %v4563_v50 }
 0x3c0 PF: > { %s15_s15 = sadd.s32 1, %s5161_s15  }
 0x3c1   : > { %p12_p5 = scmp.ge.s32.totalorder %s15_s15, 4  }
 0x3c3   :  { %14 = sbr.rel (!%p12_p5) target bundleno = 1 (0x1), region = 85 }

// kernel: unet_block_forward.4
= control target key start
LH: loop header
LB: loop body
LE: loop exit
PB: predicated region body
PF: predicated region fallthrough
CT: control target
= control target key end

     0   :  { %s5516_s21 = smov 0   ;;  %s7062_s0 = inlined_call_operand.vmem [shape: bf16[512,8], index: 0, kind: input, shape index: {}]   ;;  %s7063_s1 = inlined_call_operand.vmem [shape: f32[1,8], index: 1, kind: input, shape index: {}]   ;;  %s7064_s2 = inlined_call_operand.vmem [shape: f32[1,8], index: 2, kind: input, shape index: {}]   ;;  %s7065_s3 = inlined_call_operand.vmem [shape: bf16[72,8], index: 3, kind: input, shape index: {}]   ;;  %s7066_s4 = inlined_call_operand.vmem [shape: bf16[512,8], index: 4, kind: output, shape index: {0}]   ;;  %s7067_s5 = inlined_call_operand.vmem [shape: f32[2,1,8], index: 5, kind: output, shape index: {1}]   ;;  %s7068_s6 = inlined_call_operand.vmem [shape: f32[2,1,8], index: 6, kind: output, shape index: {2}]  }
   0x1 LB: > { %s5522_s22 = sadd.s32 4294967295, %s5470_s21   ;;  %p5046_p0 = scmp.ge.s32.totalorder %s5470_s21, 1  ;;  %s5470_s21 = sphi %s5516_s21, %s17_s21  }
   0x2   : > { %p218_p1 = scmp.lt.s32.totalorder %s5470_s21, 3 }
   0x4   : > { %p219_p2 = pnand %p5046_p0, %p218_p1 }
   0x5   : > { %s5047_s23 = sshll.u32 (!%p219_p2), %s5522_s22, 5  ;;  %s5473_s8 = smov (!%p219_p2), 8  }
   0x6   : > { %222 = sbr.rel (%p219_p2) target bundleno = 989 (0x3dd), region = 36  ;;  %p255_p3 = scmp.lt.s32.totalorder (!%p219_p2), %s5047_s23, 63 }
   0x7   : > { %s5474_s13 = smov (!%p219_p2), 16   ;;  %s5475_s14 = smov (!%p219_p2), 24  }
   0x8   : > { %s5476_s15 = smov (!%p219_p2), 32   ;;  %s5477_s16 = smov (!%p219_p2), 40  }
   0x9   : > { %s5478_s25 = smov (!%p219_p2), 48   ;;  %s5479_s7 = smov (!%p219_p2), 56  }
   0xa   : > { %s5480_s10 = smov (!%p219_p2), 64   ;;  %p266_p4 = scmp.lt.s32.totalorder (!%p219_p2), %s5522_s22, 1 }
   0xb   : > { %vm447_vm0 = vcmask 60416   ;;  %v5472_v0 = vmov 0   ;;  %vm450_vm1 = vcmask 57344   ;;  %vm458_vm2 = vsmask.f32 256  ;;  %s7082_s23 = smov (!%p255_p3, %s5047_s23), 63 }
   0xc   : > { %448 = vst.msk [vmem:[#allocation2] sm:$0xf] %vm447_vm0, %v5472_v0  ;;  %449 = vst.msk [vmem:[#allocation2 + $0x4] sm:$0xf] %vm447_vm0, %v5472_v0  ;;  %v460_v1 = vld [vmem:[#allocation2 + $0xc] sm:$0x1] }
   0xd   : > { %453 = vst.msk [vmem:[#allocation2 + $0xcc] sm:$0xf] %vm447_vm0, %v5472_v0  ;;  %454 = vst.msk [vmem:[#allocation2 + $0xd0] sm:$0xf] %vm447_vm0, %v5472_v0  ;;  %vm1202_vm3 = vsmask.f32 3328 }
   0xe   : > { %vm1203_vm4 = vsmask.f32 7440  ;;  %vm5533_vm5 = vmand %vm450_vm1, %vm458_vm2  ;;  %vm508_vm6 = vsmask.f32 7938  ;;  %451 = vst.msk [vmem:[#allocation2 + $0x8] sm:$0x1] %vm450_vm1, %v5472_v0 }
   0xf   : > { %455 = vst.msk [vmem:[#allocation2 + $0xd4] sm:$0x1] %vm450_vm1, %v5472_v0  ;;  %v510_v3 = vld [vmem:[#allocation2 + $0x14] sm:$0x1]  ;;  %v461_v4 = vsel %vm5533_vm5, 0, %v460_v1  ;;  %s5048_s24 = sshll.u32 %s7082_s23, 2  ;;  %vm5548_vm7 = vmand %vm450_vm1, %vm508_vm6 }
  0x10   : > { %v463_v5 = vld [vmem:[#allocation2 + $0x18] sm:$0x1]  ;;  %v513_v6 = vld [vmem:[#allocation2 + $0x20] sm:$0x1]  ;;  %462 = vst [vmem:[#allocation2 + $0xc] sm:$0x1] %v461_v4  ;;  %s5559_s27 = scalar_lea.vmem %s7062_s0, %s5048_s24  ;;  %vm5590_vm9 = vmor %vm1202_vm3, %vm1203_vm4 }
  0x11   : > { %v464_v7 = vsel %vm5533_vm5, 0, %v463_v5  ;;  %v466_v8 = vld [vmem:[#allocation2 + $0x24] sm:$0x1]  ;;  %v516_v9 = vld [vmem:[#allocation2 + $0x2c] sm:$0x1]  ;;  %v511_v15 = vsel %vm5548_vm7, 0, %v510_v3  ;;  %vm5617_vm11 = vmand %vm447_vm0, %vm508_vm6 }
  0x12   : > { %465 = vst [vmem:[#allocation2 + $0x18] sm:$0x1] %v464_v7  ;;  %v467_v11 = vsel %vm5533_vm5, 0, %v466_v8  ;;  %v469_v12 = vld [vmem:[#allocation2 + $0x30] sm:$0x1]  ;;  %v514_v16 = vsel %vm5548_vm7, 0, %v513_v6 }
  0x13   : > { %v519_v13 = vld [vmem:[#allocation2 + $0x38] sm:$0x1]  ;;  %v5564_v14 = vld [vmem:[%s7063_s1] ss:$0 sm:$0xff]  ;;  %468 = vst [vmem:[#allocation2 + $0x24] sm:$0x1] %v467_v11 }
  0x14   : > { %v517_v17 = vsel %vm5548_vm7, 0, %v516_v9  ;;  %v470_v18 = vsel %vm5533_vm5, 0, %v469_v12  ;;  %v1154_v19 = vld [vmem:[#allocation2] sm:$0xf]  ;;  %v1155_v20 = vld [vmem:[#allocation2 + $0x4] sm:$0xf] }
  0x15   : > { %v5269_v21 = vld [vmem:[%s5559_s27] sm:$0xff]   ;;  %512 = vst [vmem:[#allocation2 + $0x14] sm:$0x1] %v511_v15  ;;  %515 = vst [vmem:[#allocation2 + $0x20] sm:$0x1] %v514_v16  ;;  %v520_v22 = vsel %vm5548_vm7, 0, %v519_v13 }
  0x16   : > { %518 = vst [vmem:[#allocation2 + $0x2c] sm:$0x1] %v517_v17  ;;  %471 = vst [vmem:[#allocation2 + $0x30] sm:$0x1] %v470_v18  ;;  %v1206_v23 = vshrl.u32 %v1154_v19, 16  ;;  %v1209_v24 = vshll.u32 %v1154_v19, 16  ;;  %v5270_v28 = vunpack.c.l.bf16 %v5269_v21  ;;  %v5271_v29 = vunpack.c.h.bf16 %v5269_v21 }
  0x17   : > { %v1215_v25 = vshll.u32 %v1155_v20, 16  ;;  %v1219_v26 = vshrl.u32 %v1155_v20, 16  ;;  %v5332_v27 = vld [vmem:[%s5559_s27 + $0x8] sm:$0xff]   ;;  %521 = vst [vmem:[#allocation2 + $0x38] sm:$0x1] %v520_v22  ;;  %v5333_v33 = vld [vmem:[%s5559_s27 + $0x10] sm:$0xff]  }
  0x18   : > { %v1156_v30 = vld [vmem:[#allocation2 + $0x8] sm:$0x1]  ;;  %v5274_v31 = vunpack.c.l.bf16 %v5332_v27  ;;  %v5275_v32 = vunpack.c.h.bf16 %v5332_v27  ;;  %v1208_v34 = vrot.slane %v1206_v23, 4  ;;  %v1211_v35 = vrot.slane %v1209_v24, 5  ;;  %v5582_v38 = vld [vmem:[%s7064_s2] ss:$0 sm:$0xff] }
  0x19   : > { %v1217_v36 = vrot.slane %v1215_v25, 5  ;;  %v1221_v37 = vrot.slane %v1219_v26, 4  ;;  %vm654_vm8 = vsmask.f32 4368  ;;  %v344_v39 = vmul.f32 %v5270_v28, %v5564_v14  ;;  %v5334_v60 = vld [vmem:[%s5559_s27 + $0x18] sm:$0xff]   ;;  %s7084_s22 = smov (!%p266_p4, %s5522_s22), 1 }
  0x1a   : > { %v345_v40 = vmul.f32 %v5271_v29, %v5564_v14  ;;  %v1225_v41 = vshll.u32 %v1156_v30, 16  ;;  %v346_v42 = vmul.f32 %v5274_v31, %v5564_v14  ;;  %v1212_v43 = vor.u32 %v1211_v35, %v1208_v34  ;;  %vm5610_vm10 = vmor %vm458_vm2, %vm654_vm8  ;;  %v978_v26 = vld [vmem:[#allocation2 + $0xc] sm:$0xf]  ;;  %s268_s17 = scalar_lea.vmem %s7067_s5, %s7084_s22  ;;  %s271_s20 = scalar_lea.vmem %s7068_s6, %s7084_s22 }
  0x1b   : > { %v1222_v44 = vor.u32 %v1221_v37, %v1217_v36  ;;  %v347_v45 = vmul.f32 %v5275_v32, %v5564_v14  ;;  %v5278_v46 = vunpack.c.l.bf16 %v5333_v33  ;;  %v383_v48 = vadd.f32 %v5582_v38, %v344_v39 }
  0x1c   : > { %v384_v49 = vadd.f32 %v5582_v38, %v345_v40  ;;  %v1227_v50 = vrot.slane %v1225_v41, 5  ;;  %v385_v51 = vadd.f32 %v5582_v38, %v346_v42  ;;  %v1213_v52 = vrot.slane %v1212_v43, 4  ;;  %v982_v27 = vld [vmem:[#allocation2 + $0x14] sm:$0x1]  ;;  %v989_v37 = vld [vmem:[#allocation2 + $0x20] sm:$0x1] }
  0x1d   : > { %v1223_v53 = vrot.slane %v1222_v44, 4  ;;  %v386_v54 = vadd.f32 %v5582_v38, %v347_v45  ;;  %v5279_v55 = vunpack.c.h.bf16 %v5333_v33  ;;  %v415_v56 = vmax.f32 %v383_v48, 0.0  ;;  %v5335_v48 = vld [vmem:[%s5559_s27 + $0x20] sm:$0xff]  }
  0x1e   : > { %v416_v57 = vmax.f32 %v384_v49, 0.0  ;;  %v417_v58 = vmax.f32 %v385_v51, 0.0  ;;  %v348_v59 = vmul.f32 %v5278_v46, %v5564_v14  ;;  %v1218_v61 = vsel %vm5590_vm9, %v1213_v52, %v1217_v36  ;;  %v985_v36 = vld [vmem:[#allocation2 + $0x18] sm:$0xf] }
  0x1f   : > { %v1228_v62 = vsel %vm5590_vm9, %v1223_v53, %v1227_v50  ;;  %v418_v63 = vmax.f32 %v386_v54, 0.0  ;;  %v349_v0 = vmul.f32 %v5279_v55, %v5564_v14  ;;  %1589 = vrot.lane.b32.xlu0 %v1218_v61, %s5473_s8  ;;  %v5204_v1 = vpack.c.bf16 %v415_v56, %v415_v56  ;;  %v472_v53 = vld [vmem:[#allocation2 + $0x3c] sm:$0x1]  ;;  %v522_v54 = vld [vmem:[#allocation2 + $0x44] sm:$0x1] }
  0x20   : > { %v5205_v3 = vpack.c.bf16 %v416_v57, %v416_v57  ;;  %v5206_v4 = vpack.c.bf16 %v417_v58, %v417_v58  ;;  %v387_v5 = vadd.f32 %v5582_v38, %v348_v59  ;;  %v5282_v8 = vunpack.c.l.bf16 %v5334_v60  ;;  %v992_v61 = vld [vmem:[#allocation2 + $0x24] sm:$0xf] }
  0x21   : > { %v5207_v6 = vpack.c.bf16 %v418_v63, %v418_v63  ;;  %v388_v7 = vadd.f32 %v5582_v38, %v349_v0  ;;  %v5283_v9 = vunpack.c.h.bf16 %v5334_v60  ;;  %v657_v11 = vshrl.u32 %v5204_v1, 16  ;;  %v5641_v0 = vld [vmem:[%s5559_s27 + $0x28] sm:$0xff]  }
  0x22   : > { %v660_v12 = vshll.u32 %v5204_v1, 16  ;;  %v665_v13 = vshrl.u32 %v5205_v3, 16  ;;  %v668_v15 = vshll.u32 %v5205_v3, 16  ;;  %v674_v16 = vshrl.u32 %v5206_v4, 16  ;;  %v5644_v1 = vld [vmem:[%s5559_s27 + $0x30] sm:$0xff]  }
  0x23   : > { %v677_v17 = vshll.u32 %v5206_v4, 16  ;;  %v682_v18 = vshrl.u32 %v5207_v6, 16  ;;  %v685_v19 = vshll.u32 %v5207_v6, 16  ;;  %v659_v21 = vrot.slane %v657_v11, 7  ;;  %1591 = vrot.lane.b32.xlu0 %v1228_v62, %s5473_s8 }
  0x24   : > { %v667_v22 = vrot.slane %v665_v13, 7  ;;  %v419_v23 = vmax.f32 %v387_v5, 0.0  ;;  %v420_v24 = vmax.f32 %v388_v7, 0.0  ;;  %v676_v28 = vrot.slane %v674_v16, 7 }
  0x25   : > { %v684_v29 = vrot.slane %v682_v18, 7  ;;  %v350_v30 = vmul.f32 %v5282_v8, %v5564_v14  ;;  %v351_v31 = vmul.f32 %v5283_v9, %v5564_v14  ;;  %v662_v32 = vor.u32 %v660_v12, %v659_v21 }
  0x26   : > { %v663_v33 = vrot.slane %v659_v21, 4  ;;  %v670_v34 = vor.u32 %v668_v15, %v667_v22  ;;  %v672_v35 = vrot.slane %v667_v22, 4  ;;  %v679_v39 = vor.u32 %v677_v17, %v676_v28 }
  0x27   : > { %v680_v40 = vrot.slane %v676_v28, 4  ;;  %v687_v41 = vor.u32 %v685_v19, %v684_v29  ;;  %v689_v42 = vrot.slane %v684_v29, 4  ;;  %v979_v44 = vsel %vm5617_vm11, %v662_v32, %v978_v26 }
  0x28   : > { %v671_v43 = vsel %vm5610_vm10, %v663_v33, %v670_v34  ;;  %v983_v45 = vsel %vm5533_vm5, %v672_v35, %v982_v27  ;;  %v5208_v46 = vpack.c.bf16 %v419_v23, %v419_v23  ;;  %980 = vst [vmem:[#allocation2 + $0xc] sm:$0xf] %v979_v44  ;;  %v986_v50 = vsel %vm5617_vm11, %v679_v39, %v985_v36  ;;  %v996_v35 = vld [vmem:[#allocation2 + $0x2c] sm:$0x1] }
  0x29   : > { %981 = vst.msk [vmem:[#allocation2 + $0x10] sm:$0xf] %vm447_vm0, %v671_v43  ;;  %984 = vst [vmem:[#allocation2 + $0x14] sm:$0x1] %v983_v45  ;;  %v688_v49 = vsel %vm5610_vm10, %v680_v40, %v687_v41  ;;  %v990_v51 = vsel %vm5533_vm5, %v689_v42, %v989_v37  ;;  %v5209_v52 = vpack.c.bf16 %v420_v24, %v420_v24  ;;  %v5286_v62 = vunpack.c.l.bf16 %v5335_v48 }
  0x2a   : > { %987 = vst [vmem:[#allocation2 + $0x18] sm:$0xf] %v986_v50  ;;  %988 = vst.msk [vmem:[#allocation2 + $0x1c] sm:$0xf] %vm447_vm0, %v688_v49  ;;  %v691_v55 = vshrl.u32 %v5208_v46, 16  ;;  %v694_v56 = vshll.u32 %v5208_v46, 16  ;;  %v389_v57 = vadd.f32 %v5582_v38, %v350_v30  ;;  %v390_v58 = vadd.f32 %v5582_v38, %v351_v31 }
  0x2b   : > { %991 = vst [vmem:[#allocation2 + $0x20] sm:$0x1] %v990_v51  ;;  %v699_v59 = vshrl.u32 %v5209_v52, 16  ;;  %v702_v60 = vshll.u32 %v5209_v52, 16  ;;  %v5287_v63 = vunpack.c.h.bf16 %v5335_v48  ;;  %v473_v6 = vsel %vm5533_vm5, 0, %v472_v53 }
  0x2c   : > { %v693_v3 = vrot.slane %v691_v55, 7  ;;  %v421_v4 = vmax.f32 %v389_v57, 0.0  ;;  %v422_v5 = vmax.f32 %v390_v58, 0.0  ;;  %v352_v8 = vmul.f32 %v5286_v62, %v5564_v14  ;;  %474 = vst [vmem:[#allocation2 + $0x3c] sm:$0x1] %v473_v6 }
  0x2d   : > { %v701_v7 = vrot.slane %v699_v59, 7  ;;  %v353_v9 = vmul.f32 %v5287_v63, %v5564_v14  ;;  %v523_v11 = vsel %vm5548_vm7, 0, %v522_v54  ;;  %v5290_v27 = vunpack.c.l.bf16 %v5641_v0 }
  0x2e   : > { %v696_v12 = vor.u32 %v694_v56, %v693_v3  ;;  %v697_v13 = vrot.slane %v693_v3, 4  ;;  %v5652_v15 = vpack.c.bf16 %v421_v4, %v421_v4  ;;  %v5654_v16 = vpack.c.bf16 %v422_v5, %v422_v5  ;;  %524 = vst [vmem:[#allocation2 + $0x44] sm:$0x1] %v523_v11 }
  0x2f   : > { %v704_v17 = vor.u32 %v702_v60, %v701_v7  ;;  %v706_v18 = vrot.slane %v701_v7, 4  ;;  %v5657_v19 = vadd.f32 %v5582_v38, %v352_v8  ;;  %v5660_v21 = vadd.f32 %v5582_v38, %v353_v9  ;;  %v1157_v22 = vld [vmem:[#allocation2 + $0xc] sm:$0xf] }
  0x30   : > { %v1158_v23 = vld [vmem:[#allocation2 + $0x10] sm:$0xf]  ;;  %v1159_v24 = vld [vmem:[#allocation2 + $0x14] sm:$0x1]  ;;  %v993_v26 = vsel %vm5617_vm11, %v696_v12, %v992_v61  ;;  %v5291_v28 = vunpack.c.h.bf16 %v5641_v0  ;;  %v5294_v29 = vunpack.c.l.bf16 %v5644_v1  ;;  %v1230_v30 = vshrl.u32 %v1157_v22, 16 }
  0x31   : > { %v1233_v31 = vshll.u32 %v1157_v22, 16  ;;  %v1239_v32 = vshll.u32 %v1158_v23, 16  ;;  %v1243_v33 = vshrl.u32 %v1158_v23, 16  ;;  %v1160_v34 = vld [vmem:[#allocation2 + $0x18] sm:$0xf]  ;;  %v1249_v36 = vshll.u32 %v1159_v24, 16 }
  0x32   : > { %994 = vst [vmem:[#allocation2 + $0x24] sm:$0xf] %v993_v26  ;;  %v1161_v37 = vld [vmem:[#allocation2 + $0x1c] sm:$0xf]  ;;  %v1254_v39 = vshrl.u32 %v1160_v34, 16  ;;  %v1257_v40 = vshll.u32 %v1160_v34, 16  ;;  %v705_v41 = vsel %vm5610_vm10, %v697_v13, %v704_v17  ;;  %v997_v58 = vsel %vm5533_vm5, %v706_v18, %v996_v35 }
  0x33   : > { %v1232_v42 = vrot.slane %v1230_v30, 4  ;;  %v1235_v43 = vrot.slane %v1233_v31, 5  ;;  %v1241_v44 = vrot.slane %v1239_v32, 5  ;;  %v1245_v45 = vrot.slane %v1243_v33, 4  ;;  %v1162_v46 = vld [vmem:[#allocation2 + $0x20] sm:$0x1] }
  0x34   : > { %995 = vst.msk [vmem:[#allocation2 + $0x28] sm:$0xf] %vm447_vm0, %v705_v41  ;;  %v1251_v48 = vrot.slane %v1249_v36, 5  ;;  %v1256_v49 = vrot.slane %v1254_v39, 4  ;;  %v1259_v50 = vrot.slane %v1257_v40, 5  ;;  %v1263_v51 = vshll.u32 %v1161_v37, 16 }
  0x35   : > { %v1236_v52 = vor.u32 %v1235_v43, %v1232_v42  ;;  %v1246_v53 = vor.u32 %v1245_v45, %v1241_v44  ;;  %v1267_v54 = vshrl.u32 %v1161_v37, 16  ;;  %v1273_v55 = vshll.u32 %v1162_v46, 16  ;;  %998 = vst [vmem:[#allocation2 + $0x2c] sm:$0x1] %v997_v58  ;;  %v999_v13 = vld [vmem:[#allocation2 + $0x30] sm:$0xf] }
  0x36   : > { %v1260_v56 = vor.u32 %v1259_v50, %v1256_v49  ;;  %v1265_v57 = vrot.slane %v1263_v51, 5  ;;  %v708_v59 = vshrl.u32 %v5652_v15, 16  ;;  %v711_v6 = vshll.u32 %v5652_v15, 16  ;;  %v1003_v40 = vld [vmem:[#allocation2 + $0x38] sm:$0x1] }
  0x37   : > { %v1237_v60 = vrot.slane %v1236_v52, 4  ;;  %v1247_v61 = vrot.slane %v1246_v53, 4  ;;  %v1269_v62 = vrot.slane %v1267_v54, 4  ;;  %v1275_v63 = vrot.slane %v1273_v55, 5  ;;  %v475_v54 = vld [vmem:[#allocation2 + $0x48] sm:$0x1] }
  0x38   : > { %v1261_v3 = vrot.slane %v1260_v56, 4  ;;  %v710_v5 = vrot.slane %v708_v59, 7  ;;  %v716_v7 = vshrl.u32 %v5654_v16, 16  ;;  %v719_v34 = vshll.u32 %v5654_v16, 16  ;;  %v525_v58 = vld [vmem:[#allocation2 + $0x50] sm:$0x1] }
  0x39   : > { %v1163_v4 = vld [vmem:[#allocation2 + $0x24] sm:$0xf]  ;;  %v1242_v8 = vsel %vm5590_vm9, %v1237_v60, %v1241_v44  ;;  %v1252_v9 = vsel %vm5590_vm9, %v1247_v61, %v1251_v48  ;;  %v1270_v11 = vor.u32 %v1269_v62, %v1265_v57  ;;  %v423_v41 = vmax.f32 %v5657_v19, 0.0 }
  0x3a   : > { %v1278_v12 = vshrl.u32 %v1163_v4, 16  ;;  %1593 = vrot.lane.b32.xlu1 %v1242_v8, %s5473_s8  ;;  %v1266_v17 = vsel %vm5590_vm9, %v1261_v3, %v1265_v57  ;;  %v1281_v22 = vshll.u32 %v1163_v4, 16  ;;  %v713_v23 = vor.u32 %v711_v6, %v710_v5 }
  0x3b   : > { %v1164_v18 = vld [vmem:[#allocation2 + $0x28] sm:$0xf]  ;;  %v714_v15 = vrot.slane %v710_v5, 4  ;;  %1597 = vrot.lane.b32.xlu0 %v1266_v17, %s5473_s8  ;;  %v1271_v24 = vrot.slane %v1270_v11, 4  ;;  %v718_v33 = vrot.slane %v716_v7, 7  ;;  %v424_v16 = vmax.f32 %v5660_v21, 0.0 }
  0x3c   : > { %v1280_v26 = vrot.slane %v1278_v12, 4  ;;  %v1287_v30 = vshll.u32 %v1164_v18, 16  ;;  %v1291_v31 = vshrl.u32 %v1164_v18, 16  ;;  %v1283_v32 = vrot.slane %v1281_v22, 5  ;;  %v1165_v43 = vld [vmem:[#allocation2 + $0x2c] sm:$0x1] }
  0x3d   : > { %v1000_v35 = vsel %vm5617_vm11, %v713_v23, %v999_v13  ;;  %v1276_v36 = vsel %vm5590_vm9, %v1271_v24, %v1275_v63  ;;  %v721_v44 = vor.u32 %v719_v34, %v718_v33  ;;  %v723_v45 = vrot.slane %v718_v33, 4  ;;  %v1006_v7 = vld [vmem:[#allocation2 + $0x3c] sm:$0xf]  ;;  %v1010_v17 = vld [vmem:[#allocation2 + $0x44] sm:$0x1] }
  0x3e   : > { %v1289_v37 = vrot.slane %v1287_v30, 5  ;;  %v1293_v39 = vrot.slane %v1291_v31, 4  ;;  %1001 = vst [vmem:[#allocation2 + $0x30] sm:$0xf] %v1000_v35  ;;  %1595 = vrot.lane.b32.xlu1 %v1252_v9, %s5473_s8  ;;  %v1284_v42 = vor.u32 %v1283_v32, %v1280_v26  ;;  %v1297_v48 = vshll.u32 %v1165_v43, 16 }
  0x3f   : > { %v5212_v49 = vpack.c.bf16 %v423_v41, %v423_v41  ;;  %v354_v50 = vmul.f32 %v5290_v27, %v5564_v14  ;;  %v722_v52 = vsel %vm5610_vm10, %v714_v15, %v721_v44  ;;  %v1004_v19 = vsel %vm5533_vm5, %v723_v45, %v1003_v40 }
  0x40   : > { %v1294_v46 = vor.u32 %v1293_v39, %v1289_v37  ;;  %v1285_v51 = vrot.slane %v1284_v42, 4  ;;  %v5213_v53 = vpack.c.bf16 %v424_v16, %v424_v16  ;;  %v1299_v56 = vrot.slane %v1297_v48, 5  ;;  %1002 = vst.msk [vmem:[#allocation2 + $0x34] sm:$0xf] %vm447_vm0, %v722_v52  ;;  %1005 = vst [vmem:[#allocation2 + $0x38] sm:$0x1] %v1004_v19 }
  0x41   : > { %v725_v21 = vshrl.u32 %v5212_v49, 16  ;;  %v728_v57 = vshll.u32 %v5212_v49, 16  ;;  %v355_v61 = vmul.f32 %v5291_v28, %v5564_v14  ;;  %v393_v3 = vadd.f32 %v5582_v38, %v354_v50  ;;  %v528_v16 = vld [vmem:[#allocation2 + $0x5c] sm:$0x1] }
  0x42   : > { %v1295_v55 = vrot.slane %v1294_v46, 4  ;;  %1599 = vrot.lane.b32.xlu1 %v1276_v36, %s5473_s8  ;;  %v1290_v27 = vsel %vm5590_vm9, %v1285_v51, %v1289_v37  ;;  %v733_v59 = vshrl.u32 %v5213_v53, 16  ;;  %v736_v60 = vshll.u32 %v5213_v53, 16 }
  0x43   : > { %1601 = vrot.lane.b32.xlu0 %v1290_v27, %s5473_s8  ;;  %v727_v63 = vrot.slane %v725_v21, 7  ;;  %v476_v4 = vsel %vm5533_vm5, 0, %v475_v54  ;;  %v394_v8 = vadd.f32 %v5582_v38, %v355_v61  ;;  %v526_v0 = vsel %vm5548_vm7, 0, %v525_v58  ;;  %v5338_v54 = vld [vmem:[%s5559_s27 + $0x38] sm:$0xff]  }
  0x44   : > { %v1300_v62 = vsel %vm5590_vm9, %v1295_v55, %v1299_v56  ;;  %v735_v6 = vrot.slane %v733_v59, 7  ;;  %477 = vst [vmem:[#allocation2 + $0x48] sm:$0x1] %v476_v4  ;;  %v5295_v28 = vunpack.c.h.bf16 %v5644_v1  ;;  %527 = vst [vmem:[#allocation2 + $0x50] sm:$0x1] %v526_v0  ;;  %v425_v23 = vmax.f32 %v393_v3, 0.0 }
  0x45   : > { %v1166_v5 = vld [vmem:[#allocation2 + $0x30] sm:$0xf]  ;;  %v730_v12 = vor.u32 %v728_v57, %v727_v63  ;;  %v731_v13 = vrot.slane %v727_v63, 4  ;;  %v426_v15 = vmax.f32 %v394_v8, 0.0  ;;  %v356_v31 = vmul.f32 %v5294_v29, %v5564_v14  ;;  %v478_v1 = vld [vmem:[#allocation2 + $0x54] sm:$0x1] }
  0x46   : > { %v1302_v9 = vshrl.u32 %v1166_v5, 16  ;;  %v1305_v11 = vshll.u32 %v1166_v5, 16  ;;  %1603 = vrot.lane.b32.xlu1 %v1300_v62, %s5473_s8  ;;  %v738_v18 = vor.u32 %v736_v60, %v735_v6  ;;  %v740_v22 = vrot.slane %v735_v6, 4 }
  0x47   : > { %v1007_v30 = vsel %vm5617_vm11, %v730_v12, %v1006_v7  ;;  %v1167_v32 = vld [vmem:[#allocation2 + $0x34] sm:$0xf]  ;;  %v1168_v33 = vld [vmem:[#allocation2 + $0x38] sm:$0x1]  ;;  %v5214_v36 = vpack.c.bf16 %v425_v23, %v425_v23  ;;  %v5215_v37 = vpack.c.bf16 %v426_v15, %v426_v15  ;;  %v357_v19 = vmul.f32 %v5295_v28, %v5564_v14 }
  0x48   : > { %v1304_v24 = vrot.slane %v1302_v9, 4  ;;  %v1307_v26 = vrot.slane %v1305_v11, 5  ;;  %v739_v34 = vsel %vm5610_vm10, %v731_v13, %v738_v18  ;;  %1008 = vst [vmem:[#allocation2 + $0x3c] sm:$0xf] %v1007_v30  ;;  %v1011_v35 = vsel %vm5533_vm5, %v740_v22, %v1010_v17 }
  0x49   : > { %v1311_v40 = vshll.u32 %v1167_v32, 16  ;;  %v1315_v41 = vshrl.u32 %v1167_v32, 16  ;;  %v1321_v42 = vshll.u32 %v1168_v33, 16  ;;  %1009 = vst.msk [vmem:[#allocation2 + $0x40] sm:$0xf] %vm447_vm0, %v739_v34  ;;  %v742_v29 = vshrl.u32 %v5214_v36, 16 }
  0x4a   : > { %v1308_v39 = vor.u32 %v1307_v26, %v1304_v24  ;;  %1012 = vst [vmem:[#allocation2 + $0x44] sm:$0x1] %v1011_v35  ;;  %v745_v43 = vshll.u32 %v5214_v36, 16  ;;  %v750_v44 = vshrl.u32 %v5215_v37, 16  ;;  %v753_v45 = vshll.u32 %v5215_v37, 16  ;;  %v5748_v26 = vld [vmem:[%s5559_s27 + $0x40] sm:$0xff]  }
  0x4b   : > { %v1313_v48 = vrot.slane %v1311_v40, 5  ;;  %v1317_v49 = vrot.slane %v1315_v41, 4  ;;  %v1323_v50 = vrot.slane %v1321_v42, 5  ;;  %v744_v51 = vrot.slane %v742_v29, 7  ;;  %v1013_v21 = vld [vmem:[#allocation2 + $0x48] sm:$0xf] }
  0x4c   : > { %v1309_v46 = vrot.slane %v1308_v39, 4  ;;  %v752_v52 = vrot.slane %v750_v44, 7  ;;  %v395_v53 = vadd.f32 %v5582_v38, %v356_v31  ;;  %v479_v57 = vsel %vm5533_vm5, 0, %v478_v1  ;;  %v1017_v3 = vld [vmem:[#allocation2 + $0x50] sm:$0x1] }
  0x4d   : > { %v1318_v56 = vor.u32 %v1317_v49, %v1313_v48  ;;  %v529_v58 = vsel %vm5548_vm7, 0, %v528_v16  ;;  %v747_v27 = vor.u32 %v745_v43, %v744_v51  ;;  %v748_v59 = vrot.slane %v744_v51, 4  ;;  %480 = vst [vmem:[#allocation2 + $0x54] sm:$0x1] %v479_v57  ;;  %v481_v39 = vld [vmem:[#allocation2 + $0x60] sm:$0x1] }
  0x4e   : > { %v1314_v55 = vsel %vm5590_vm9, %v1309_v46, %v1313_v48  ;;  %v755_v60 = vor.u32 %v753_v45, %v752_v52  ;;  %v757_v61 = vrot.slane %v752_v52, 4  ;;  %530 = vst [vmem:[#allocation2 + $0x5c] sm:$0x1] %v529_v58  ;;  %v396_v4 = vadd.f32 %v5582_v38, %v357_v19  ;;  %v531_v1 = vld [vmem:[#allocation2 + $0x68] sm:$0x1] }
  0x4f   : > { %1605 = vrot.lane.b32.xlu0 %v1314_v55, %s5473_s8  ;;  %v1319_v62 = vrot.slane %v1318_v56, 4  ;;  %v1169_v63 = vld [vmem:[#allocation2 + $0x3c] sm:$0xf]  ;;  %v427_v5 = vmax.f32 %v395_v53, 0.0  ;;  %v5298_v6 = vunpack.c.l.bf16 %v5338_v54  ;;  %v1014_v11 = vsel %vm5617_vm11, %v747_v27, %v1013_v21 }
  0x50   : > { %v1170_v7 = vld [vmem:[#allocation2 + $0x40] sm:$0xf]  ;;  %v1326_v8 = vshrl.u32 %v1169_v63, 16  ;;  %v1329_v0 = vshll.u32 %v1169_v63, 16  ;;  %v756_v9 = vsel %vm5610_vm10, %v748_v59, %v755_v60  ;;  %1015 = vst [vmem:[#allocation2 + $0x48] sm:$0xf] %v1014_v11  ;;  %v1018_v15 = vsel %vm5533_vm5, %v757_v61, %v1017_v3 }
  0x51   : > { %v1171_v28 = vld [vmem:[#allocation2 + $0x44] sm:$0x1]  ;;  %v1324_v12 = vsel %vm5590_vm9, %v1319_v62, %v1323_v50  ;;  %v1335_v13 = vshll.u32 %v1170_v7, 16  ;;  %v1339_v17 = vshrl.u32 %v1170_v7, 16  ;;  %1016 = vst.msk [vmem:[#allocation2 + $0x4c] sm:$0xf] %vm447_vm0, %v756_v9  ;;  %v5216_v33 = vpack.c.bf16 %v427_v5, %v427_v5 }
  0x52   : > { %v1345_v18 = vshll.u32 %v1171_v28, 16  ;;  %1607 = vrot.lane.b32.xlu1 %v1324_v12, %s5473_s8  ;;  %v1328_v22 = vrot.slane %v1326_v8, 4  ;;  %v1331_v23 = vrot.slane %v1329_v0, 5  ;;  %v428_v24 = vmax.f32 %v396_v4, 0.0  ;;  %1019 = vst [vmem:[#allocation2 + $0x50] sm:$0x1] %v1018_v15 }
  0x53   : > { %v1337_v30 = vrot.slane %v1335_v13, 5  ;;  %v1341_v31 = vrot.slane %v1339_v17, 4  ;;  %v5299_v36 = vunpack.c.h.bf16 %v5338_v54  ;;  %v358_v37 = vmul.f32 %v5298_v6, %v5564_v14  ;;  %v484_v11 = vld [vmem:[#allocation2 + $0x6c] sm:$0x1] }
  0x54   : > { %v1347_v32 = vrot.slane %v1345_v18, 5  ;;  %v1332_v34 = vor.u32 %v1331_v23, %v1328_v22  ;;  %v5217_v35 = vpack.c.bf16 %v428_v24, %v428_v24  ;;  %v759_v41 = vshrl.u32 %v5216_v33, 16  ;;  %v1020_v27 = vld [vmem:[#allocation2 + $0x54] sm:$0xf] }
  0x55   : > { %v1342_v40 = vor.u32 %v1341_v31, %v1337_v30  ;;  %v762_v42 = vshll.u32 %v5216_v33, 16  ;;  %v5302_v29 = vunpack.c.l.bf16 %v5748_v26  ;;  %v359_v16 = vmul.f32 %v5299_v36, %v5564_v14  ;;  %v1024_v7 = vld [vmem:[#allocation2 + $0x5c] sm:$0x1]  ;;  %v534_v22 = vld [vmem:[#allocation2 + $0x74] sm:$0x1] }
  0x56   : > { %v1333_v43 = vrot.slane %v1332_v34, 4  ;;  %v767_v44 = vshrl.u32 %v5217_v35, 16  ;;  %v770_v45 = vshll.u32 %v5217_v35, 16  ;;  %v761_v48 = vrot.slane %v759_v41, 7 }
  0x57   : > { %v1343_v46 = vrot.slane %v1342_v40, 4  ;;  %v397_v49 = vadd.f32 %v5582_v38, %v358_v37  ;;  %v482_v50 = vsel %vm5533_vm5, 0, %v481_v39  ;;  %v1172_v52 = vld [vmem:[#allocation2 + $0x48] sm:$0xf]  ;;  %v398_v54 = vadd.f32 %v5582_v38, %v359_v16 }
  0x58   : > { %v1338_v51 = vsel %vm5590_vm9, %v1333_v43, %v1337_v30  ;;  %v1173_v19 = vld [vmem:[#allocation2 + $0x4c] sm:$0xf]  ;;  %v769_v53 = vrot.slane %v767_v44, 7  ;;  %483 = vst [vmem:[#allocation2 + $0x60] sm:$0x1] %v482_v50  ;;  %v532_v55 = vsel %vm5548_vm7, 0, %v531_v1  ;;  %v764_v61 = vor.u32 %v762_v42, %v761_v48 }
  0x59   : > { %1609 = vrot.lane.b32.xlu0 %v1338_v51, %s5473_s8  ;;  %v1348_v56 = vsel %vm5590_vm9, %v1343_v46, %v1347_v32  ;;  %v1350_v21 = vshrl.u32 %v1172_v52, 16  ;;  %v1353_v57 = vshll.u32 %v1172_v52, 16  ;;  %v1359_v58 = vshll.u32 %v1173_v19, 16  ;;  %533 = vst [vmem:[#allocation2 + $0x68] sm:$0x1] %v532_v55  ;;  %v5784_v43 = vld [vmem:[%s5559_s27 + $0x50] sm:$0xff]  }
  0x5a   : > { %1611 = vrot.lane.b32.xlu1 %v1348_v56, %s5473_s8  ;;  %v1363_v59 = vshrl.u32 %v1173_v19, 16  ;;  %v1174_v60 = vld [vmem:[#allocation2 + $0x50] sm:$0x1]  ;;  %v765_v62 = vrot.slane %v761_v48, 4  ;;  %v772_v63 = vor.u32 %v770_v45, %v769_v53  ;;  %v1021_v28 = vsel %vm5617_vm11, %v764_v61, %v1020_v27 }
  0x5b   : > { %v1352_v3 = vrot.slane %v1350_v21, 4  ;;  %v1355_v4 = vrot.slane %v1353_v57, 5  ;;  %v1361_v5 = vrot.slane %v1359_v58, 5  ;;  %v1369_v6 = vshll.u32 %v1174_v60, 16  ;;  %1022 = vst [vmem:[#allocation2 + $0x54] sm:$0xf] %v1021_v28 }
  0x5c   : > { %v1365_v8 = vrot.slane %v1363_v59, 4  ;;  %v773_v0 = vsel %vm5610_vm10, %v765_v62, %v772_v63  ;;  %v774_v9 = vrot.slane %v769_v53, 4  ;;  %v429_v17 = vmax.f32 %v397_v49, 0.0 }
  0x5d   : > { %v1356_v12 = vor.u32 %v1355_v4, %v1352_v3  ;;  %v1371_v13 = vrot.slane %v1369_v6, 5  ;;  %1023 = vst.msk [vmem:[#allocation2 + $0x58] sm:$0xf] %vm447_vm0, %v773_v0  ;;  %v430_v18 = vmax.f32 %v398_v54, 0.0  ;;  %v5303_v24 = vunpack.c.h.bf16 %v5748_v26  ;;  %v5340_v26 = vld [vmem:[%s5559_s27 + $0x48] sm:$0xff]  }
  0x5e   : > { %v1366_v23 = vor.u32 %v1365_v8, %v1361_v5  ;;  %v1025_v15 = vsel %vm5533_vm5, %v774_v9, %v1024_v7  ;;  %v360_v30 = vmul.f32 %v5302_v29, %v5564_v14  ;;  %v5218_v32 = vpack.c.bf16 %v429_v17, %v429_v17  ;;  %v487_v29 = vld [vmem:[#allocation2 + $0x78] sm:$0x1] }
  0x5f   : > { %v1357_v31 = vrot.slane %v1356_v12, 4  ;;  %1026 = vst [vmem:[#allocation2 + $0x5c] sm:$0x1] %v1025_v15  ;;  %v5219_v33 = vpack.c.bf16 %v430_v18, %v430_v18  ;;  %v485_v34 = vsel %vm5533_vm5, 0, %v484_v11  ;;  %v361_v36 = vmul.f32 %v5303_v24, %v5564_v14  ;;  %v1027_v50 = vld [vmem:[#allocation2 + $0x60] sm:$0xf] }
  0x60   : > { %v1367_v35 = vrot.slane %v1366_v23, 4  ;;  %v399_v37 = vadd.f32 %v5582_v38, %v360_v30  ;;  %486 = vst [vmem:[#allocation2 + $0x6c] sm:$0x1] %v485_v34  ;;  %v535_v39 = vsel %vm5548_vm7, 0, %v534_v22  ;;  %v776_v41 = vshrl.u32 %v5218_v32, 16 }
  0x61   : > { %v1362_v40 = vsel %vm5590_vm9, %v1357_v31, %v1361_v5  ;;  %v779_v42 = vshll.u32 %v5218_v32, 16  ;;  %v784_v1 = vshrl.u32 %v5219_v33, 16  ;;  %536 = vst [vmem:[#allocation2 + $0x74] sm:$0x1] %v535_v39  ;;  %v787_v45 = vshll.u32 %v5219_v33, 16 }
  0x62   : > { %1613 = vrot.lane.b32.xlu0 %v1362_v40, %s5473_s8  ;;  %v1372_v44 = vsel %vm5590_vm9, %v1367_v35, %v1371_v13  ;;  %v400_v16 = vadd.f32 %v5582_v38, %v361_v36  ;;  %v431_v46 = vmax.f32 %v399_v37, 0.0  ;;  %v778_v48 = vrot.slane %v776_v41, 7  ;;  %v1175_v19 = vld [vmem:[#allocation2 + $0x54] sm:$0xf]  ;;  %v1031_v60 = vld [vmem:[#allocation2 + $0x68] sm:$0x1] }
  0x63   : > { %1615 = vrot.lane.b32.xlu1 %v1372_v44, %s5473_s8  ;;  %v786_v49 = vrot.slane %v784_v1, 7  ;;  %v5306_v51 = vunpack.c.l.bf16 %v5340_v26  ;;  %v5307_v52 = vunpack.c.h.bf16 %v5340_v26  ;;  %v488_v56 = vsel %vm5533_vm5, 0, %v487_v29  ;;  %v537_v22 = vld [vmem:[#allocation2 + $0x80] sm:$0x1]  ;;  %v490_v35 = vld [vmem:[#allocation2 + $0x84] sm:$0x1] }
  0x64   : > { %v1176_v53 = vld [vmem:[#allocation2 + $0x58] sm:$0xf]  ;;  %v432_v54 = vmax.f32 %v400_v16, 0.0  ;;  %v5220_v55 = vpack.c.bf16 %v431_v46, %v431_v46  ;;  %v5310_v21 = vunpack.c.l.bf16 %v5784_v43  ;;  %v1374_v57 = vshrl.u32 %v1175_v19, 16  ;;  %489 = vst [vmem:[#allocation2 + $0x78] sm:$0x1] %v488_v56 }
  0x65   : > { %v1377_v58 = vshll.u32 %v1175_v19, 16  ;;  %v1383_v27 = vshll.u32 %v1176_v53, 16  ;;  %v1387_v59 = vshrl.u32 %v1176_v53, 16  ;;  %v781_v62 = vor.u32 %v779_v42, %v778_v48  ;;  %v540_v41 = vld [vmem:[#allocation2 + $0x8c] sm:$0x1] }
  0x66   : > { %v1177_v61 = vld [vmem:[#allocation2 + $0x5c] sm:$0x1]  ;;  %v782_v63 = vrot.slane %v778_v48, 4  ;;  %v789_v3 = vor.u32 %v787_v45, %v786_v49  ;;  %v791_v4 = vrot.slane %v786_v49, 4  ;;  %v1376_v5 = vrot.slane %v1374_v57, 4 }
  0x67   : > { %v1379_v6 = vrot.slane %v1377_v58, 5  ;;  %v1385_v7 = vrot.slane %v1383_v27, 5  ;;  %v1389_v8 = vrot.slane %v1387_v59, 4  ;;  %v1393_v0 = vshll.u32 %v1177_v61, 16  ;;  %v1034_v37 = vld [vmem:[#allocation2 + $0x6c] sm:$0xf] }
  0x68   : > { %v790_v28 = vsel %vm5610_vm10, %v782_v63, %v789_v3  ;;  %v1028_v9 = vsel %vm5617_vm11, %v781_v62, %v1027_v50  ;;  %v1032_v11 = vsel %vm5533_vm5, %v791_v4, %v1031_v60  ;;  %v5221_v17 = vpack.c.bf16 %v432_v54, %v432_v54  ;;  %v1038_v60 = vld [vmem:[#allocation2 + $0x74] sm:$0x1] }
  0x69   : > { %v1380_v12 = vor.u32 %v1379_v6, %v1376_v5  ;;  %v1390_v13 = vor.u32 %v1389_v8, %v1385_v7  ;;  %1029 = vst [vmem:[#allocation2 + $0x60] sm:$0xf] %v1028_v9  ;;  %1030 = vst.msk [vmem:[#allocation2 + $0x64] sm:$0xf] %vm447_vm0, %v790_v28  ;;  %v793_v18 = vshrl.u32 %v5220_v55, 16  ;;  %v1395_v23 = vrot.slane %v1393_v0, 5 }
  0x6a   : > { %1033 = vst [vmem:[#allocation2 + $0x68] sm:$0x1] %v1032_v11  ;;  %v796_v15 = vshll.u32 %v5220_v55, 16  ;;  %v362_v24 = vmul.f32 %v5306_v51, %v5564_v14  ;;  %v363_v30 = vmul.f32 %v5307_v52, %v5564_v14  ;;  %v801_v34 = vshrl.u32 %v5221_v17, 16  ;;  %v5828_v11 = vld [vmem:[%s5559_s27 + $0x58] sm:$0xff]  }
  0x6b   : > { %v1381_v31 = vrot.slane %v1380_v12, 4  ;;  %v1391_v32 = vrot.slane %v1390_v13, 4  ;;  %v795_v33 = vrot.slane %v793_v18, 7  ;;  %v804_v36 = vshll.u32 %v5221_v17, 16  ;;  %v1041_v9 = vld [vmem:[#allocation2 + $0x78] sm:$0xf] }
  0x6c   : > { %v401_v39 = vadd.f32 %v5582_v38, %v362_v24  ;;  %v402_v26 = vadd.f32 %v5582_v38, %v363_v30  ;;  %v538_v40 = vsel %vm5548_vm7, 0, %v537_v22  ;;  %v803_v45 = vrot.slane %v801_v34, 7  ;;  %v1090_v22 = vld [vmem:[#allocation2] sm:$0xf] }
  0x6d   : > { %v1386_v42 = vsel %vm5590_vm9, %v1381_v31, %v1385_v7  ;;  %v1396_v1 = vsel %vm5590_vm9, %v1391_v32, %v1395_v23  ;;  %v798_v29 = vor.u32 %v796_v15, %v795_v33  ;;  %v799_v44 = vrot.slane %v795_v33, 4  ;;  %539 = vst [vmem:[#allocation2 + $0x80] sm:$0x1] %v538_v40  ;;  %v1092_v23 = vld [vmem:[#allocation2 + $0xc] sm:$0xf] }
  0x6e   : > { %1617 = vrot.lane.b32.xlu0 %v1386_v42, %s5473_s8  ;;  %1619 = vrot.lane.b32.xlu1 %v1396_v1, %s5473_s8  ;;  %v433_v16 = vmax.f32 %v401_v39, 0.0  ;;  %v434_v46 = vmax.f32 %v402_v26, 0.0  ;;  %v5311_v48 = vunpack.c.h.bf16 %v5784_v43  ;;  %v364_v50 = vmul.f32 %v5310_v21, %v5564_v14  ;;  %1122 = vst.msk [vmem:[#allocation3] sm:$0xf] %vm447_vm0, %v1090_v22  ;;  %1124 = vst.msk [vmem:[#allocation3 + $0x8] sm:$0xf] %vm447_vm0, %v1092_v23 }
  0x6f   : > { %v1035_v49 = vsel %vm5617_vm11, %v798_v29, %v1034_v37  ;;  %v491_v51 = vsel %vm5533_vm5, 0, %v490_v35  ;;  %v541_v52 = vsel %vm5548_vm7, 0, %v540_v41  ;;  %v806_v55 = vor.u32 %v804_v36, %v803_v45 }
  0x70   : > { %v1178_v19 = vld [vmem:[#allocation2 + $0x60] sm:$0xf]  ;;  %v1179_v53 = vld [vmem:[#allocation2 + $0x64] sm:$0xf]  ;;  %1036 = vst [vmem:[#allocation2 + $0x6c] sm:$0xf] %v1035_v49  ;;  %v5222_v56 = vpack.c.bf16 %v433_v16, %v433_v16  ;;  %v5223_v57 = vpack.c.bf16 %v434_v46, %v434_v46  ;;  %v365_v43 = vmul.f32 %v5311_v48, %v5564_v14  ;;  %v403_v30 = vadd.f32 %v5582_v38, %v364_v50 }
  0x71   : > { %v1180_v54 = vld [vmem:[#allocation2 + $0x68] sm:$0x1]  ;;  %492 = vst [vmem:[#allocation2 + $0x84] sm:$0x1] %v491_v51  ;;  %542 = vst [vmem:[#allocation2 + $0x8c] sm:$0x1] %v541_v52  ;;  %v807_v62 = vsel %vm5610_vm10, %v799_v44, %v806_v55  ;;  %v5314_v36 = vunpack.c.l.bf16 %v5828_v11 }
  0x72   : > { %v1398_v58 = vshrl.u32 %v1178_v19, 16  ;;  %v1401_v27 = vshll.u32 %v1178_v19, 16  ;;  %v1407_v21 = vshll.u32 %v1179_v53, 16  ;;  %v1411_v59 = vshrl.u32 %v1179_v53, 16  ;;  %1037 = vst.msk [vmem:[#allocation2 + $0x70] sm:$0xf] %vm447_vm0, %v807_v62 }
  0x73   : > { %v1417_v61 = vshll.u32 %v1180_v54, 16  ;;  %v808_v63 = vrot.slane %v803_v45, 4  ;;  %v810_v3 = vshrl.u32 %v5222_v56, 16  ;;  %v813_v28 = vshll.u32 %v5222_v56, 16  ;;  %v1091_v19 = vld [vmem:[#allocation2 + $0x4] sm:$0xf] }
  0x74   : > { %v1400_v4 = vrot.slane %v1398_v58, 4  ;;  %v1403_v5 = vrot.slane %v1401_v27, 5  ;;  %v1409_v6 = vrot.slane %v1407_v21, 5  ;;  %v1413_v7 = vrot.slane %v1411_v59, 4  ;;  %v1045_v40 = vld [vmem:[#allocation2 + $0x80] sm:$0x1] }
  0x75   : > { %v1419_v14 = vrot.slane %v1417_v61, 5  ;;  %v1039_v8 = vsel %vm5533_vm5, %v808_v63, %v1038_v60  ;;  %v812_v0 = vrot.slane %v810_v3, 7  ;;  %v818_v17 = vshrl.u32 %v5223_v57, 16  ;;  %1123 = vst.msk [vmem:[#allocation3 + $0x4] sm:$0xf] %vm447_vm0, %v1091_v19 }
  0x76   : > { %v1404_v12 = vor.u32 %v1403_v5, %v1400_v4  ;;  %v1414_v13 = vor.u32 %v1413_v7, %v1409_v6  ;;  %1040 = vst [vmem:[#allocation2 + $0x74] sm:$0x1] %v1039_v8  ;;  %v821_v18 = vshll.u32 %v5223_v57, 16  ;;  %v404_v31 = vadd.f32 %v5582_v38, %v365_v43  ;;  %v1093_v60 = vld [vmem:[#allocation2 + $0x10] sm:$0xf] }
  0x77   : > { %v815_v15 = vor.u32 %v813_v28, %v812_v0  ;;  %v816_v24 = vrot.slane %v812_v0, 4  ;;  %v1181_v34 = vld [vmem:[#allocation2 + $0x6c] sm:$0xf]  ;;  %v820_v35 = vrot.slane %v818_v17, 7  ;;  %v435_v41 = vmax.f32 %v403_v30, 0.0 }
  0x78   : > { %v1405_v32 = vrot.slane %v1404_v12, 4  ;;  %v1415_v33 = vrot.slane %v1414_v13, 4  ;;  %v1422_v37 = vshrl.u32 %v1181_v34, 16  ;;  %v1425_v39 = vshll.u32 %v1181_v34, 16  ;;  %v1048_v21 = vld [vmem:[#allocation2 + $0x84] sm:$0xf] }
  0x79   : > { %v1042_v26 = vsel %vm5617_vm11, %v815_v15, %v1041_v9  ;;  %v823_v1 = vor.u32 %v821_v18, %v820_v35  ;;  %v825_v29 = vrot.slane %v820_v35, 4  ;;  %v1182_v44 = vld [vmem:[#allocation2 + $0x70] sm:$0xf]  ;;  %v436_v46 = vmax.f32 %v404_v31, 0.0  ;;  %1125 = vst.msk [vmem:[#allocation3 + $0xc] sm:$0xf] %vm447_vm0, %v1093_v60 }
  0x7a   : > { %v1410_v38 = vsel %vm5590_vm9, %v1405_v32, %v1409_v6  ;;  %v1420_v42 = vsel %vm5590_vm9, %v1415_v33, %v1419_v14  ;;  %1043 = vst [vmem:[#allocation2 + $0x78] sm:$0xf] %v1042_v26  ;;  %v1424_v45 = vrot.slane %v1422_v37, 4  ;;  %v1427_v16 = vrot.slane %v1425_v39, 5  ;;  %v1094_v4 = vld [vmem:[#allocation2 + $0x18] sm:$0xf] }
  0x7b   : > { %1621 = vrot.lane.b32.xlu0 %v1410_v38, %s5473_s8  ;;  %1623 = vrot.lane.b32.xlu1 %v1420_v42, %s5473_s8  ;;  %v5224_v48 = vpack.c.bf16 %v435_v41, %v435_v41  ;;  %v1431_v49 = vshll.u32 %v1182_v44, 16  ;;  %v1435_v50 = vshrl.u32 %v1182_v44, 16  ;;  %v824_v51 = vsel %vm5610_vm10, %v816_v24, %v823_v1  ;;  %v5854_v7 = vld [vmem:[%s7063_s1] ss:$0 sm:$0xff]  ;;  %1126 = vst.msk [vmem:[#allocation3 + $0x10] sm:$0xf] %vm447_vm0, %v1094_v4 }
  0x7c   : > { %v1046_v52 = vsel %vm5533_vm5, %v825_v29, %v1045_v40  ;;  %v1428_v53 = vor.u32 %v1427_v16, %v1424_v45  ;;  %1044 = vst.msk [vmem:[#allocation2 + $0x7c] sm:$0xf] %vm447_vm0, %v824_v51  ;;  %v5225_v55 = vpack.c.bf16 %v436_v46, %v436_v46  ;;  %v5315_v59 = vunpack.c.h.bf16 %v5828_v11  ;;  %v1095_v0 = vld [vmem:[#allocation2 + $0x1c] sm:$0xf]  ;;  %v1096_v28 = vld [vmem:[#allocation2 + $0x24] sm:$0xf] }
  0x7d   : > { %v1183_v54 = vld [vmem:[#allocation2 + $0x74] sm:$0x1]  ;;  %1047 = vst [vmem:[#allocation2 + $0x80] sm:$0x1] %v1046_v52  ;;  %v827_v56 = vshrl.u32 %v5224_v48, 16  ;;  %v830_v57 = vshll.u32 %v5224_v48, 16  ;;  %v366_v14 = vmul.f32 %v5854_v7, %v5314_v36 }
  0x7e   : > { %v1433_v43 = vrot.slane %v1431_v49, 5  ;;  %v1437_v58 = vrot.slane %v1435_v50, 4  ;;  %v1441_v27 = vshll.u32 %v1183_v54, 16  ;;  %v1429_v61 = vrot.slane %v1428_v53, 4  ;;  %v5862_v18 = vld [vmem:[%s5559_s27 + $0x60] sm:$0xff]  }
  0x7f   : > { %v829_v62 = vrot.slane %v827_v56, 7  ;;  %v835_v63 = vshrl.u32 %v5225_v55, 16  ;;  %v838_v3 = vshll.u32 %v5225_v55, 16  ;;  %v367_v8 = vmul.f32 %v5854_v7, %v5315_v59  ;;  %1127 = vst.msk [vmem:[#allocation3 + $0x14] sm:$0xf] %vm447_vm0, %v1095_v0 }
  0x80   : > { %v1438_v5 = vor.u32 %v1437_v58, %v1433_v43  ;;  %v1443_v6 = vrot.slane %v1441_v27, 5  ;;  %v1434_v9 = vsel %vm5590_vm9, %v1429_v61, %v1433_v43  ;;  %1128 = vst.msk [vmem:[#allocation3 + $0x18] sm:$0xf] %vm447_vm0, %v1096_v28  ;;  %v5870_v24 = vld [vmem:[%s7064_s2] ss:$0 sm:$0xff]  ;;  %v5318_v42 = vunpack.c.l.bf16 %v5862_v18 }
  0x81   : > { %v1184_v11 = vld [vmem:[#allocation2 + $0x78] sm:$0xf]  ;;  %v832_v12 = vor.u32 %v830_v57, %v829_v62  ;;  %v833_v13 = vrot.slane %v829_v62, 4  ;;  %v837_v17 = vrot.slane %v835_v63, 7  ;;  %1625 = vrot.lane.b32.xlu0 %v1434_v9, %s5473_s8  ;;  %v405_v30 = vadd.f32 %v5870_v24, %v366_v14  ;;  %v1097_v31 = vld [vmem:[#allocation2 + $0x28] sm:$0xf] }
  0x82   : > { %v1439_v22 = vrot.slane %v1438_v5, 4  ;;  %v1446_v23 = vshrl.u32 %v1184_v11, 16  ;;  %v1449_v15 = vshll.u32 %v1184_v11, 16  ;;  %v1052_v35 = vld [vmem:[#allocation2 + $0x8c] sm:$0x1]  ;;  %v406_v36 = vadd.f32 %v5870_v24, %v367_v8 }
  0x83   : > { %v840_v32 = vor.u32 %v838_v3, %v837_v17  ;;  %v1049_v33 = vsel %vm5617_vm11, %v832_v12, %v1048_v21  ;;  %v842_v34 = vrot.slane %v837_v17, 4  ;;  %v493_v37 = vld [vmem:[#allocation2 + $0x90] sm:$0x1]  ;;  %1129 = vst.msk [vmem:[#allocation3 + $0x1c] sm:$0xf] %vm447_vm0, %v1097_v31  ;;  %v437_v49 = vmax.f32 %v405_v30, 0.0 }
  0x84   : > { %v1444_v39 = vsel %vm5590_vm9, %v1439_v22, %v1443_v6  ;;  %v1185_v26 = vld [vmem:[#allocation2 + $0x7c] sm:$0xf]  ;;  %v1448_v40 = vrot.slane %v1446_v23, 4  ;;  %v1451_v41 = vrot.slane %v1449_v15, 5  ;;  %v1186_v38 = vld [vmem:[#allocation2 + $0x80] sm:$0x1]  ;;  %v5319_v59 = vunpack.c.h.bf16 %v5862_v18 }
  0x85   : > { %1050 = vst [vmem:[#allocation2 + $0x84] sm:$0xf] %v1049_v33  ;;  %1627 = vrot.lane.b32.xlu1 %v1444_v39, %s5473_s8  ;;  %v1455_v1 = vshll.u32 %v1185_v26, 16  ;;  %v1459_v29 = vshrl.u32 %v1185_v26, 16  ;;  %v1465_v44 = vshll.u32 %v1186_v38, 16  ;;  %v841_v45 = vsel %vm5610_vm10, %v833_v13, %v840_v32 }
  0x86   : > { %v543_v16 = vld [vmem:[#allocation2 + $0x98] sm:$0x1]  ;;  %v1452_v46 = vor.u32 %v1451_v41, %v1448_v40  ;;  %1051 = vst.msk [vmem:[#allocation2 + $0x88] sm:$0xf] %vm447_vm0, %v841_v45  ;;  %v1053_v48 = vsel %vm5533_vm5, %v842_v34, %v1052_v35  ;;  %v438_v50 = vmax.f32 %v406_v36, 0.0  ;;  %v494_v55 = vsel %vm5533_vm5, 0, %v493_v37 }
  0x87   : > { %v496_v51 = vld [vmem:[#allocation2 + $0x9c] sm:$0x1]  ;;  %v1098_v52 = vld [vmem:[#allocation2 + $0x30] sm:$0xf]  ;;  %v1457_v19 = vrot.slane %v1455_v1, 5  ;;  %v1461_v53 = vrot.slane %v1459_v29, 4  ;;  %v5226_v43 = vpack.c.bf16 %v437_v49, %v437_v49  ;;  %v368_v60 = vmul.f32 %v5854_v7, %v5318_v42 }
  0x88   : > { %v1467_v54 = vrot.slane %v1465_v44, 5  ;;  %1054 = vst [vmem:[#allocation2 + $0x8c] sm:$0x1] %v1053_v48  ;;  %1130 = vst.msk [vmem:[#allocation3 + $0x20] sm:$0xf] %vm447_vm0, %v1098_v52  ;;  %v1453_v57 = vrot.slane %v1452_v46, 4  ;;  %v5227_v58 = vpack.c.bf16 %v438_v50, %v438_v50  ;;  %v369_v9 = vmul.f32 %v5854_v7, %v5319_v59 }
  0x89   : > { %v1099_v56 = vld [vmem:[#allocation2 + $0x34] sm:$0xf]  ;;  %495 = vst [vmem:[#allocation2 + $0x90] sm:$0x1] %v494_v55  ;;  %v544_v27 = vsel %vm5548_vm7, 0, %v543_v16  ;;  %v1462_v21 = vor.u32 %v1461_v53, %v1457_v19  ;;  %v497_v61 = vsel %vm5533_vm5, 0, %v496_v51  ;;  %v407_v11 = vadd.f32 %v5870_v24, %v368_v60 }
  0x8a   : > { %1131 = vst.msk [vmem:[#allocation3 + $0x24] sm:$0xf] %vm447_vm0, %v1099_v56  ;;  %545 = vst [vmem:[#allocation2 + $0x98] sm:$0x1] %v544_v27  ;;  %v1100_v62 = vld [vmem:[#allocation2 + $0x3c] sm:$0xf]  ;;  %v1458_v3 = vsel %vm5590_vm9, %v1453_v57, %v1457_v19  ;;  %v408_v15 = vadd.f32 %v5870_v24, %v369_v9 }
  0x8b   : > { %v1101_v63 = vld [vmem:[#allocation2 + $0x40] sm:$0xf]  ;;  %v844_v4 = vshrl.u32 %v5226_v43, 16  ;;  %v847_v5 = vshll.u32 %v5226_v43, 16  ;;  %v852_v6 = vshrl.u32 %v5227_v58, 16  ;;  %1629 = vrot.lane.b32.xlu0 %v1458_v3, %s5473_s8  ;;  %v1463_v8 = vrot.slane %v1462_v21, 4 }
  0x8c   : > { %498 = vst [vmem:[#allocation2 + $0x9c] sm:$0x1] %v497_v61  ;;  %v546_v14 = vld [vmem:[#allocation2 + $0xa4] sm:$0x1]  ;;  %1132 = vst.msk [vmem:[#allocation3 + $0x28] sm:$0xf] %vm447_vm0, %v1100_v62 }
  0x8d   : > { %1133 = vst.msk [vmem:[#allocation3 + $0x2c] sm:$0xf] %vm447_vm0, %v1101_v63  ;;  %v1187_v0 = vld [vmem:[#allocation2 + $0x84] sm:$0xf]  ;;  %v855_v28 = vshll.u32 %v5227_v58, 16  ;;  %v846_v17 = vrot.slane %v844_v4, 7  ;;  %v1468_v22 = vsel %vm5590_vm9, %v1463_v8, %v1467_v54 }
  0x8e   : > { %v1470_v12 = vshrl.u32 %v1187_v0, 16  ;;  %v1473_v13 = vshll.u32 %v1187_v0, 16  ;;  %v854_v18 = vrot.slane %v852_v6, 7  ;;  %v1188_v23 = vld [vmem:[#allocation2 + $0x88] sm:$0xf]  ;;  %v439_v30 = vmax.f32 %v407_v11, 0.0  ;;  %1631 = vrot.lane.b32.xlu1 %v1468_v22, %s5473_s8 }
  0x8f   : > { %v547_v31 = vsel %vm5548_vm7, 0, %v546_v14  ;;  %v1479_v34 = vshll.u32 %v1188_v23, 16  ;;  %v1483_v35 = vshrl.u32 %v1188_v23, 16  ;;  %v1189_v36 = vld [vmem:[#allocation2 + $0x8c] sm:$0x1]  ;;  %v849_v39 = vor.u32 %v847_v5, %v846_v17  ;;  %v5345_v21 = vld [vmem:[%s5559_s27 + $0x70] sm:$0xff]  }
  0x90   : > { %v1472_v32 = vrot.slane %v1470_v12, 4  ;;  %v1475_v33 = vrot.slane %v1473_v13, 5  ;;  %548 = vst [vmem:[#allocation2 + $0xa4] sm:$0x1] %v547_v31  ;;  %v1489_v37 = vshll.u32 %v1189_v36, 16  ;;  %v850_v26 = vrot.slane %v846_v17, 4 }
  0x91   : > { %v857_v40 = vor.u32 %v855_v28, %v854_v18  ;;  %v1055_v41 = vld [vmem:[#allocation2 + $0x90] sm:$0xf]  ;;  %v499_v38 = vld [vmem:[#allocation2 + $0xa8] sm:$0x1]  ;;  %v1481_v1 = vrot.slane %v1479_v34, 5  ;;  %v1485_v29 = vrot.slane %v1483_v35, 4  ;;  %v5228_v54 = vpack.c.bf16 %v439_v30, %v439_v30 }
  0x92   : > { %v1476_v42 = vor.u32 %v1475_v33, %v1472_v32  ;;  %v859_v44 = vrot.slane %v854_v18, 4  ;;  %v1059_v45 = vld [vmem:[#allocation2 + $0x98] sm:$0x1]  ;;  %v5344_v16 = vld [vmem:[%s5559_s27 + $0x68] sm:$0xff]   ;;  %v1491_v46 = vrot.slane %v1489_v37, 5  ;;  %v1056_v49 = vsel %vm5617_vm11, %v849_v39, %v1055_v41 }
  0x93   : > { %v858_v48 = vsel %vm5610_vm10, %v850_v26, %v857_v40  ;;  %v440_v50 = vmax.f32 %v408_v15, 0.0  ;;  %v1102_v51 = vld [vmem:[#allocation2 + $0x48] sm:$0xf]  ;;  %v1486_v19 = vor.u32 %v1485_v29, %v1481_v1  ;;  %1057 = vst [vmem:[#allocation2 + $0x90] sm:$0xf] %v1056_v49  ;;  %v5322_v57 = vunpack.c.l.bf16 %v5344_v16 }
  0x94   : > { %v1477_v52 = vrot.slane %v1476_v42, 4  ;;  %1058 = vst.msk [vmem:[#allocation2 + $0x94] sm:$0xf] %vm447_vm0, %v858_v48  ;;  %v1060_v53 = vsel %vm5533_vm5, %v859_v44, %v1059_v45  ;;  %1134 = vst.msk [vmem:[#allocation3 + $0x30] sm:$0xf] %vm447_vm0, %v1102_v51  ;;  %v5323_v43 = vunpack.c.h.bf16 %v5344_v16  ;;  %v500_v58 = vsel %vm5533_vm5, 0, %v499_v38 }
  0x95   : > { %v1103_v55 = vld [vmem:[#allocation2 + $0x4c] sm:$0xf]  ;;  %1061 = vst [vmem:[#allocation2 + $0x98] sm:$0x1] %v1060_v53  ;;  %v5229_v56 = vpack.c.bf16 %v440_v50, %v440_v50  ;;  %v549_v27 = vld [vmem:[#allocation2 + $0xb0] sm:$0x1]  ;;  %v370_v6 = vmul.f32 %v5854_v7, %v5322_v57  ;;  %v5326_v11 = vunpack.c.l.bf16 %v5345_v21  ;;  %v5327_v23 = vunpack.c.h.bf16 %v5345_v21 }
  0x96   : > { %1135 = vst.msk [vmem:[#allocation3 + $0x34] sm:$0xf] %vm447_vm0, %v1103_v55  ;;  %v1104_v59 = vld [vmem:[#allocation2 + $0x54] sm:$0xf]  ;;  %v1482_v60 = vsel %vm5590_vm9, %v1477_v52, %v1481_v1  ;;  %v1487_v61 = vrot.slane %v1486_v19, 4  ;;  %v861_v62 = vshrl.u32 %v5228_v54, 16  ;;  %v371_v14 = vmul.f32 %v5854_v7, %v5323_v43 }
  0x97   : > { %v864_v63 = vshll.u32 %v5228_v54, 16  ;;  %501 = vst [vmem:[#allocation2 + $0xa8] sm:$0x1] %v500_v58  ;;  %1136 = vst.msk [vmem:[#allocation3 + $0x38] sm:$0xf] %vm447_vm0, %v1104_v59  ;;  %1633 = vrot.lane.b32.xlu0 %v1482_v60, %s5473_s8  ;;  %v869_v4 = vshrl.u32 %v5229_v56, 16  ;;  %v409_v18 = vadd.f32 %v5870_v24, %v370_v6  ;;  %v372_v33 = vmul.f32 %v5854_v7, %v5326_v11 }
  0x98   : > { %v1105_v3 = vld [vmem:[#allocation2 + $0x58] sm:$0xf]  ;;  %v872_v5 = vshll.u32 %v5229_v56, 16  ;;  %v502_v8 = vld [vmem:[#allocation2 + $0xb4] sm:$0x1]  ;;  %v1492_v0 = vsel %vm5590_vm9, %v1487_v61, %v1491_v46  ;;  %v863_v28 = vrot.slane %v861_v62, 7  ;;  %v410_v22 = vadd.f32 %v5870_v24, %v371_v14 }
  0x99   : > { %1137 = vst.msk [vmem:[#allocation3 + $0x3c] sm:$0xf] %vm447_vm0, %v1105_v3  ;;  %v550_v9 = vsel %vm5548_vm7, 0, %v549_v27  ;;  %v1106_v12 = vld [vmem:[#allocation2 + $0x60] sm:$0xf]  ;;  %1635 = vrot.lane.b32.xlu1 %v1492_v0, %s5473_s8  ;;  %v871_v13 = vrot.slane %v869_v4, 7  ;;  %v373_v41 = vmul.f32 %v5854_v7, %v5327_v23  ;;  %v411_v55 = vadd.f32 %v5870_v24, %v372_v33 }
  0x9a   : > { %v1062_v17 = vld [vmem:[#allocation2 + $0x9c] sm:$0xf]  ;;  %551 = vst [vmem:[#allocation2 + $0xb0] sm:$0x1] %v550_v9  ;;  %1138 = vst.msk [vmem:[#allocation3 + $0x40] sm:$0xf] %vm447_vm0, %v1106_v12  ;;  %v866_v30 = vor.u32 %v864_v63, %v863_v28 }
  0x9b   : > { %v1107_v15 = vld [vmem:[#allocation2 + $0x64] sm:$0xf]  ;;  %v867_v31 = vrot.slane %v863_v28, 4  ;;  %v503_v34 = vsel %vm5533_vm5, 0, %v502_v8  ;;  %v1108_v35 = vld [vmem:[#allocation2 + $0x6c] sm:$0xf]  ;;  %v874_v39 = vor.u32 %v872_v5, %v871_v13  ;;  %v412_v58 = vadd.f32 %v5870_v24, %v373_v41 }
  0x9c   : > { %v1066_v32 = vld [vmem:[#allocation2 + $0xa4] sm:$0x1]  ;;  %1139 = vst.msk [vmem:[#allocation3 + $0x44] sm:$0xf] %vm447_vm0, %v1107_v15  ;;  %v1190_v36 = vld [vmem:[#allocation2 + $0x90] sm:$0xf]  ;;  %v1063_v46 = vsel %vm5617_vm11, %v866_v30, %v1062_v17 }
  0x9d   : > { %v1191_v37 = vld [vmem:[#allocation2 + $0x94] sm:$0xf]  ;;  %v876_v26 = vrot.slane %v871_v13, 4  ;;  %v441_v40 = vmax.f32 %v409_v18, 0.0  ;;  %504 = vst [vmem:[#allocation2 + $0xb4] sm:$0x1] %v503_v34  ;;  %v875_v16 = vsel %vm5610_vm10, %v867_v31, %v874_v39 }
  0x9e   : > { %1140 = vst.msk [vmem:[#allocation3 + $0x48] sm:$0xf] %vm447_vm0, %v1108_v35  ;;  %v1494_v38 = vshrl.u32 %v1190_v36, 16  ;;  %v1497_v42 = vshll.u32 %v1190_v36, 16  ;;  %v1503_v1 = vshll.u32 %v1191_v37, 16  ;;  %v1507_v29 = vshrl.u32 %v1191_v37, 16 }
  0x9f   : > { %v1192_v44 = vld [vmem:[#allocation2 + $0x98] sm:$0x1]  ;;  %v1067_v48 = vsel %vm5533_vm5, %v876_v26, %v1066_v32  ;;  %v552_v49 = vld [vmem:[#allocation2 + $0xbc] sm:$0x1]  ;;  %1064 = vst [vmem:[#allocation2 + $0x9c] sm:$0xf] %v1063_v46  ;;  %v5230_v54 = vpack.c.bf16 %v441_v40, %v441_v40 }
  0xa0   : > { %v1513_v45 = vshll.u32 %v1192_v44, 16  ;;  %v1496_v7 = vrot.slane %v1494_v38, 4  ;;  %v1499_v50 = vrot.slane %v1497_v42, 5  ;;  %v1505_v51 = vrot.slane %v1503_v1, 5  ;;  %1065 = vst.msk [vmem:[#allocation2 + $0xa0] sm:$0xf] %vm447_vm0, %v875_v16 }
  0xa1   : > { %v1509_v52 = vrot.slane %v1507_v29, 4  ;;  %1068 = vst [vmem:[#allocation2 + $0xa4] sm:$0x1] %v1067_v48  ;;  %v442_v53 = vmax.f32 %v410_v22, 0.0  ;;  %v1109_v56 = vld [vmem:[#allocation2 + $0x70] sm:$0xf] }
  0xa2   : > { %v1515_v19 = vrot.slane %v1513_v45, 5  ;;  %v1500_v57 = vor.u32 %v1499_v50, %v1496_v7  ;;  %v553_v27 = vsel %vm5548_vm7, 0, %v552_v49  ;;  %1141 = vst.msk [vmem:[#allocation3 + $0x4c] sm:$0xf] %vm447_vm0, %v1109_v56  ;;  %v878_v59 = vshrl.u32 %v5230_v54, 16 }
  0xa3   : > { %v1510_v43 = vor.u32 %v1509_v52, %v1505_v51  ;;  %v5231_v21 = vpack.c.bf16 %v442_v53, %v442_v53  ;;  %v881_v60 = vshll.u32 %v5230_v54, 16  ;;  %v443_v61 = vmax.f32 %v411_v55, 0.0  ;;  %554 = vst [vmem:[#allocation2 + $0xbc] sm:$0x1] %v553_v27  ;;  %v1110_v6 = vld [vmem:[#allocation2 + $0x78] sm:$0xf] }
  0xa4   : > { %v1501_v62 = vrot.slane %v1500_v57, 4  ;;  %v444_v3 = vmax.f32 %v412_v58, 0.0  ;;  %v880_v4 = vrot.slane %v878_v59, 7  ;;  %v1069_v0 = vld [vmem:[#allocation2 + $0xa8] sm:$0xf]  ;;  %vm1814_vm12 = vcmask 1042432  }
  0xa5   : > { %v1511_v63 = vrot.slane %v1510_v43, 4  ;;  %v886_v5 = vshrl.u32 %v5231_v21, 16  ;;  %v889_v8 = vshll.u32 %v5231_v21, 16  ;;  %1142 = vst.msk [vmem:[#allocation3 + $0x50] sm:$0xf] %vm447_vm0, %v1110_v6  ;;  %v5232_v17 = vpack.c.bf16 %v443_v61, %v443_v61 }
  0xa6   : > { %v1506_v14 = vsel %vm5590_vm9, %v1501_v62, %v1505_v51  ;;  %v1111_v28 = vld [vmem:[#allocation2 + $0x7c] sm:$0xf]  ;;  %v883_v13 = vor.u32 %v881_v60, %v880_v4  ;;  %v5233_v18 = vpack.c.bf16 %v444_v3, %v444_v3  ;;  %v884_v32 = vrot.slane %v880_v4, 4  ;;  %v1073_v26 = vld [vmem:[#allocation2 + $0xb0] sm:$0x1]  ;;  %v5981_v62 = vpop.permute.xlu0 %1589 }
  0xa7   : > { %v1516_v24 = vsel %vm5590_vm9, %v1511_v63, %v1515_v19  ;;  %1637 = vrot.lane.b32.xlu0 %v1506_v14, %s5473_s8  ;;  %v1193_v9 = vld [vmem:[#allocation2 + $0x9c] sm:$0xf]  ;;  %v1194_v11 = vld [vmem:[#allocation2 + $0xa0] sm:$0xf]  ;;  %1143 = vst.msk [vmem:[#allocation3 + $0x54] sm:$0xf] %vm447_vm0, %v1111_v28 }
  0xa8   : > { %1639 = vrot.lane.b32.xlu1 %v1516_v24, %s5473_s8  ;;  %v1195_v12 = vld [vmem:[#allocation2 + $0xa4] sm:$0x1]  ;;  %v1518_v22 = vshrl.u32 %v1193_v9, 16  ;;  %v1521_v23 = vshll.u32 %v1193_v9, 16  ;;  %v1527_v15 = vshll.u32 %v1194_v11, 16  ;;  %v1531_v30 = vshrl.u32 %v1194_v11, 16 }
  0xa9   : > { %v1537_v31 = vshll.u32 %v1195_v12, 16  ;;  %v888_v33 = vrot.slane %v886_v5, 7  ;;  %v1070_v34 = vsel %vm5617_vm11, %v883_v13, %v1069_v0  ;;  %v895_v42 = vshrl.u32 %v5232_v17, 16  ;;  %v1112_v16 = vld [vmem:[#allocation2 + $0x84] sm:$0xf] }
  0xaa   : > { %v1520_v35 = vrot.slane %v1518_v22, 4  ;;  %v1523_v36 = vrot.slane %v1521_v23, 5  ;;  %v1529_v37 = vrot.slane %v1527_v15, 5  ;;  %v1533_v39 = vrot.slane %v1531_v30, 4  ;;  %1071 = vst [vmem:[#allocation2 + $0xa8] sm:$0xf] %v1070_v34 }
  0xab   : > { %v1539_v40 = vrot.slane %v1537_v31, 5  ;;  %v891_v41 = vor.u32 %v889_v8, %v888_v33  ;;  %v893_v38 = vrot.slane %v888_v33, 4  ;;  %v898_v44 = vshll.u32 %v5232_v17, 16  ;;  %1144 = vst.msk [vmem:[#allocation3 + $0x58] sm:$0xf] %vm447_vm0, %v1112_v16 }
  0xac   : > { %v1524_v1 = vor.u32 %v1523_v36, %v1520_v35  ;;  %v1534_v29 = vor.u32 %v1533_v39, %v1529_v37  ;;  %v903_v45 = vshrl.u32 %v5233_v18, 16  ;;  %v897_v49 = vrot.slane %v895_v42, 7  ;;  %v1113_v50 = vld [vmem:[#allocation2 + $0x88] sm:$0xf]  ;;  %v1076_v53 = vld [vmem:[#allocation2 + $0xb4] sm:$0xf]  ;;  %v5983_v63 = vpop.permute.xlu1 %1593 }
  0xad   : > { %v892_v46 = vsel %vm5610_vm10, %v884_v32, %v891_v41  ;;  %v1074_v48 = vsel %vm5533_vm5, %v893_v38, %v1073_v26  ;;  %v906_v7 = vshll.u32 %v5233_v18, 16  ;;  %1145 = vst.msk [vmem:[#allocation3 + $0x5c] sm:$0xf] %vm447_vm0, %v1113_v50  ;;  %v1080_v56 = vld [vmem:[#allocation2 + $0xbc] sm:$0x1]  ;;  %v5993_v18 = vpop.permute.xlu0 %1591  ;;  %vm1815_vm13 = vcmask 1046532  }
  0xae   : > { %v1525_v51 = vrot.slane %v1524_v1, 4  ;;  %v1535_v52 = vrot.slane %v1534_v29, 4  ;;  %1072 = vst.msk [vmem:[#allocation2 + $0xac] sm:$0xf] %vm447_vm0, %v892_v46  ;;  %1075 = vst [vmem:[#allocation2 + $0xb0] sm:$0x1] %v1074_v48  ;;  %v900_v54 = vor.u32 %v898_v44, %v897_v49 }
  0xaf   : > { %v905_v19 = vrot.slane %v903_v45, 7  ;;  %v901_v55 = vrot.slane %v897_v49, 4  ;;  %v1114_v57 = vld [vmem:[#allocation2 + $0x90] sm:$0xf]  ;;  %v1115_v59 = vld [vmem:[#allocation2 + $0x94] sm:$0xf]  ;;  %vm6010_vm14 = vmor %vm1814_vm12, %vm1815_vm13 }
  0xb0   : > { %v1530_v43 = vsel %vm5590_vm9, %v1525_v51, %v1529_v37  ;;  %v1540_v58 = vsel %vm5590_vm9, %v1535_v52, %v1539_v40  ;;  %1146 = vst.msk [vmem:[#allocation3 + $0x60] sm:$0xf] %vm447_vm0, %v1114_v57  ;;  %v1077_v61 = vsel %vm5617_vm11, %v900_v54, %v1076_v53  ;;  %1147 = vst.msk [vmem:[#allocation3 + $0x64] sm:$0xf] %vm447_vm0, %v1115_v59  ;;  %v1116_v14 = vld [vmem:[#allocation2 + $0x9c] sm:$0xf]  ;;  %v5995_v22 = vpop.permute.xlu1 %1595 }
  0xb1   : > { %v908_v27 = vor.u32 %v906_v7, %v905_v19  ;;  %v910_v21 = vrot.slane %v905_v19, 4  ;;  %1641 = vrot.lane.b32.xlu0 %v1530_v43, %s5473_s8  ;;  %1643 = vrot.lane.b32.xlu1 %v1540_v58, %s5473_s8  ;;  %v1196_v60 = vld [vmem:[#allocation2 + $0xa8] sm:$0xf]  ;;  %1078 = vst [vmem:[#allocation2 + $0xb4] sm:$0xf] %v1077_v61  ;;  %v6000_v7 = vpop.permute.xlu0 %1597  ;;  %vm1685_vm15 = vcmask 126016  }
  0xb2   : > { %v1542_v3 = vshrl.u32 %v1196_v60, 16  ;;  %v1545_v4 = vshll.u32 %v1196_v60, 16  ;;  %1148 = vst.msk [vmem:[#allocation3 + $0x68] sm:$0xf] %vm447_vm0, %v1116_v14  ;;  %v1117_v0 = vld [vmem:[#allocation2 + $0xa0] sm:$0xf] }
  0xb3   : > { %v909_v5 = vsel %vm5610_vm10, %v901_v55, %v908_v27  ;;  %v1081_v6 = vsel %vm5533_vm5, %v910_v21, %v1080_v56  ;;  %1149 = vst.msk [vmem:[#allocation3 + $0x6c] sm:$0xf] %vm447_vm0, %v1117_v0  ;;  %v1719_v33 = vld [vmem:[#allocation2 + $0x4] sm:$0xf]  ;;  %v1718_v44 = vld [vmem:[#allocation2] sm:$0xe] }
  0xb4   : > { %1079 = vst.msk [vmem:[#allocation2 + $0xb8] sm:$0xf] %vm447_vm0, %v909_v5  ;;  %1082 = vst [vmem:[#allocation2 + $0xbc] sm:$0x1] %v1081_v6  ;;  %v1544_v24 = vrot.slane %v1542_v3, 4  ;;  %v1547_v8 = vrot.slane %v1545_v4, 5  ;;  %v6002_v50 = vpop.permute.xlu1 %1599 }
  0xb5   : > { %v1197_v28 = vld [vmem:[#allocation2 + $0xac] sm:$0xf]  ;;  %v1198_v9 = vld [vmem:[#allocation2 + $0xb0] sm:$0x1]  ;;  %v1819_v45 = vrot.slane %v1719_v33, 5  ;;  %v5085_v57 = vrot.slane %v1718_v44, 9 }
  0xb6   : > { %v1548_v11 = vor.u32 %v1547_v8, %v1544_v24  ;;  %v1551_v12 = vshll.u32 %v1197_v28, 16  ;;  %v1555_v13 = vshrl.u32 %v1197_v28, 16  ;;  %v1561_v17 = vshll.u32 %v1198_v9, 16  ;;  %v1720_v48 = vld [vmem:[#allocation2 + $0x8] sm:$0x1]  ;;  %v1602_v24 = vpop.permute.xlu0 %1601 }
  0xb7   : > { %v1722_v49 = vld [vmem:[#allocation2 + $0x10] sm:$0xf]  ;;  %v1118_v19 = vld [vmem:[#allocation2 + $0xa8] sm:$0xf]  ;;  %v1119_v53 = vld [vmem:[#allocation2 + $0xac] sm:$0xf]  ;;  %v1820_v0 = vsel %vm6010_vm14, %v5085_v57, %v1819_v45 }
  0xb8   : > { %v1549_v23 = vrot.slane %v1548_v11, 4  ;;  %v1553_v15 = vrot.slane %v1551_v12, 5  ;;  %v1557_v30 = vrot.slane %v1555_v13, 4  ;;  %v1563_v31 = vrot.slane %v1561_v17, 5  ;;  %v1199_v32 = vld [vmem:[#allocation2 + $0xb4] sm:$0xf]  ;;  %v1604_v8 = vpop.permute.xlu1 %1603 }
  0xb9   : > { %v1566_v37 = vshrl.u32 %v1199_v32, 16  ;;  %v1569_v39 = vshll.u32 %v1199_v32, 16  ;;  %1150 = vst.msk [vmem:[#allocation3 + $0x70] sm:$0xf] %vm447_vm0, %v1118_v19  ;;  %1151 = vst.msk [vmem:[#allocation3 + $0x74] sm:$0xf] %vm447_vm0, %v1119_v53 }
  0xba   : > { %v1554_v34 = vsel %vm5590_vm9, %v1549_v23, %v1553_v15  ;;  %v1558_v35 = vor.u32 %v1557_v30, %v1553_v15  ;;  %v1821_v43 = vrot.slane %v1819_v45, 4  ;;  %v1822_v58 = vrot.slane %v1720_v48, 5  ;;  %v1721_v27 = vld [vmem:[#allocation2 + $0xc] sm:$0xe]  ;;  %v1120_v61 = vld [vmem:[#allocation2 + $0xb4] sm:$0xf] }
  0xbb   : > { %v1200_v36 = vld [vmem:[#allocation2 + $0xb8] sm:$0xf]  ;;  %v1201_v26 = vld [vmem:[#allocation2 + $0xbc] sm:$0x1]  ;;  %1645 = vrot.lane.b32.xlu0 %v1554_v34, %s5473_s8  ;;  %v1568_v1 = vrot.slane %v1566_v37, 4  ;;  %v1571_v29 = vrot.slane %v1569_v39, 5 }
  0xbc   : > { %v1575_v40 = vshll.u32 %v1200_v36, 16  ;;  %v1579_v41 = vshrl.u32 %v1200_v36, 16  ;;  %v1585_v38 = vshll.u32 %v1201_v26, 16  ;;  %v1559_v42 = vrot.slane %v1558_v35, 4  ;;  %v1121_v3 = vld [vmem:[#allocation2 + $0xb8] sm:$0xf] }
  0xbd   : > { %v1572_v52 = vor.u32 %v1571_v29, %v1568_v1  ;;  %v1826_v60 = vrot.slane %v1722_v49, 5  ;;  %v1723_v5 = vld [vmem:[#allocation2 + $0x14] sm:$0x1]  ;;  %v1725_v6 = vld [vmem:[#allocation2 + $0x1c] sm:$0xf]  ;;  %v5086_v28 = vrot.slane %v1721_v27, 9  ;;  %v1823_v9 = vsel %vm6010_vm14, %v1821_v43, %v1822_v58 }
  0xbe   : > { %v1577_v16 = vrot.slane %v1575_v40, 5  ;;  %v1581_v46 = vrot.slane %v1579_v41, 4  ;;  %v1564_v51 = vsel %vm5590_vm9, %v1559_v42, %v1563_v31  ;;  %v1587_v55 = vrot.slane %v1585_v38, 5  ;;  %1152 = vst.msk [vmem:[#allocation3 + $0x78] sm:$0xf] %vm447_vm0, %v1120_v61 }
  0xbf   : > { %1647 = vrot.lane.b32.xlu1 %v1564_v51, %s5473_s8  ;;  %v1573_v56 = vrot.slane %v1572_v52, 4  ;;  %1153 = vst.msk [vmem:[#allocation3 + $0x7c] sm:$0xf] %vm447_vm0, %v1121_v3  ;;  %v1828_v11 = vrot.slane %v1826_v60, 4  ;;  %v1829_v12 = vrot.slane %v1723_v5, 5  ;;  %v1833_v17 = vrot.slane %v1725_v6, 5 }
  0xc0   : > { %v1582_v54 = vor.u32 %v1581_v46, %v1577_v16  ;;  %v1724_v13 = vld [vmem:[#allocation2 + $0x18] sm:$0xe]  ;;  %v1726_v23 = vld [vmem:[#allocation2 + $0x20] sm:$0x1]  ;;  %v1728_v15 = vld [vmem:[#allocation2 + $0x28] sm:$0xf]  ;;  %v1827_v30 = vsel %vm6010_vm14, %v5086_v28, %v1826_v60 }
  0xc1   : > { %v1578_v4 = vsel %vm5590_vm9, %v1573_v56, %v1577_v16  ;;  %v5087_v31 = vrot.slane %v1724_v13, 9  ;;  %v1830_v32 = vsel %vm6010_vm14, %v1828_v11, %v1829_v12  ;;  %v1835_v33 = vrot.slane %v1833_v17, 4  ;;  %v1727_v35 = vld [vmem:[#allocation2 + $0x24] sm:$0xe]  ;;  %v1606_v37 = vpop.permute.xlu0 %1605  ;;  %v1729_v26 = vld [vmem:[#allocation2 + $0x2c] sm:$0x1] }
  0xc2   : > { %v1583_v21 = vrot.slane %v1582_v54, 4  ;;  %1649 = vrot.lane.b32.xlu0 %v1578_v4, %s5473_s8  ;;  %v1836_v34 = vrot.slane %v1726_v23, 5  ;;  %v1840_v36 = vrot.slane %v1728_v15, 5  ;;  %v1731_v40 = vld [vmem:[#allocation2 + $0x34] sm:$0xf]  ;;  %v5088_v38 = vrot.slane %v1727_v35, 9 }
  0xc3   : > { %v1834_v41 = vsel %vm6010_vm14, %v5087_v31, %v1833_v17  ;;  %1686 = vst.msk [vmem:[#allocation3] sm:$0xf] %vm1685_vm15, %v5981_v62  ;;  %1688 = vst.msk [vmem:[#allocation3 + $0x8] sm:$0xf] %vm1685_vm15, %v5983_v63  ;;  %v1847_v42 = vrot.slane %v1731_v40, 5  ;;  %vm2025_vm2 = vcmask 191616  }
  0xc4   : > { %v1588_v14 = vsel %vm5590_vm9, %v1583_v21, %v1587_v55  ;;  %v1608_v39 = vpop.permute.xlu1 %1607  ;;  %1687 = vst.msk [vmem:[#allocation3 + $0x4] sm:$0xf] %vm1685_vm15, %v5993_v18  ;;  %1689 = vst.msk [vmem:[#allocation3 + $0xc] sm:$0xf] %vm1685_vm15, %v5995_v22  ;;  %v1837_v62 = vsel %vm6010_vm14, %v1835_v33, %v1836_v34  ;;  %v1842_v63 = vrot.slane %v1840_v36, 4  ;;  %v1843_v18 = vrot.slane %v1729_v26, 5 }
  0xc5   : > { %1651 = vrot.lane.b32.xlu1 %v1588_v14, %s5473_s8  ;;  %1690 = vst.msk [vmem:[#allocation3 + $0x10] sm:$0xf] %vm1685_vm15, %v6000_v7  ;;  %1691 = vst.msk [vmem:[#allocation3 + $0x14] sm:$0xf] %vm1685_vm15, %v6002_v50  ;;  %v1730_v22 = vld [vmem:[#allocation2 + $0x30] sm:$0xe]  ;;  %v1841_v44 = vsel %vm6010_vm14, %v5088_v38, %v1840_v36 }
  0xc6   : > { %1929 = vrot.lane.b32.xlu0 %v1820_v0, %s5474_s13  ;;  %1692 = vst.msk [vmem:[#allocation3 + $0x18] sm:$0xf] %vm1685_vm15, %v1602_v24  ;;  %1693 = vst.msk [vmem:[#allocation3 + $0x1c] sm:$0xf] %vm1685_vm15, %v1604_v8  ;;  %v1732_v1 = vld [vmem:[#allocation2 + $0x38] sm:$0x1]  ;;  %v1844_v46 = vsel %vm6010_vm14, %v1842_v63, %v1843_v18 }
  0xc7   : > { %1694 = vst.msk [vmem:[#allocation3 + $0x20] sm:$0xf] %vm1685_vm15, %v1606_v37  ;;  %1695 = vst.msk [vmem:[#allocation3 + $0x24] sm:$0xf] %vm1685_vm15, %v1608_v39  ;;  %v1734_v29 = vld [vmem:[#allocation2 + $0x40] sm:$0xf] }
  0xc8   : > { %v5089_v45 = vrot.slane %v1730_v22, 9  ;;  %v1849_v48 = vrot.slane %v1847_v42, 4  ;;  %v1850_v49 = vrot.slane %v1732_v1, 5  ;;  %v1733_v7 = vld [vmem:[#allocation2 + $0x3c] sm:$0xe]  ;;  %v1854_v50 = vrot.slane %v1734_v29, 5 }
  0xc9   : > { %1931 = vrot.lane.b32.xlu1 %v1823_v9, %s5474_s13  ;;  %v1735_v52 = vld [vmem:[#allocation2 + $0x44] sm:$0x1]  ;;  %v1737_v19 = vld [vmem:[#allocation2 + $0x4c] sm:$0xf]  ;;  %v5090_v54 = vrot.slane %v1733_v7, 9  ;;  %vm4438_vm3 = vcmask 1043456  }
  0xca   : > { %1933 = vrot.lane.b32.xlu0 %v1827_v30, %s5474_s13  ;;  %v1848_v53 = vsel %vm6010_vm14, %v5089_v45, %v1847_v42  ;;  %v1851_v55 = vsel %vm6010_vm14, %v1849_v48, %v1850_v49  ;;  %v1856_v56 = vrot.slane %v1854_v50, 4  ;;  %v1857_v57 = vrot.slane %v1735_v52, 5  ;;  %v1736_v43 = vld [vmem:[#allocation2 + $0x48] sm:$0xe]  ;;  %v1738_v27 = vld [vmem:[#allocation2 + $0x50] sm:$0x1] }
  0xcb   : > { %v1610_v16 = vpop.permute.xlu0 %1609  ;;  %v1861_v58 = vrot.slane %v1737_v19, 5  ;;  %v1740_v21 = vld [vmem:[#allocation2 + $0x58] sm:$0xf]  ;;  %v1855_v60 = vsel %vm6010_vm14, %v5090_v54, %v1854_v50  ;;  %v5091_v61 = vrot.slane %v1736_v43, 9  ;;  %v1864_v5 = vrot.slane %v1738_v27, 5 }
  0xcc   : > { %1696 = vst.msk [vmem:[#allocation3 + $0x28] sm:$0xf] %vm1685_vm15, %v1610_v16  ;;  %v1612_v51 = vpop.permute.xlu1 %1611  ;;  %v1858_v3 = vsel %vm6010_vm14, %v1856_v56, %v1857_v57  ;;  %v1739_v6 = vld [vmem:[#allocation2 + $0x54] sm:$0xe]  ;;  %v1868_v14 = vrot.slane %v1740_v21, 5  ;;  %vm2218_vm4 = vcmask 257216  }
  0xcd   : > { %1935 = vrot.lane.b32.xlu1 %v1830_v32, %s5474_s13  ;;  %1697 = vst.msk [vmem:[#allocation3 + $0x2c] sm:$0xf] %vm1685_vm15, %v1612_v51  ;;  %v1863_v4 = vrot.slane %v1861_v58, 4  ;;  %v1741_v8 = vld [vmem:[#allocation2 + $0x5c] sm:$0x1]  ;;  %v1862_v9 = vsel %vm6010_vm14, %v5091_v61, %v1861_v58  ;;  %v5092_v11 = vrot.slane %v1739_v6, 9 }
  0xce   : > { %1937 = vrot.lane.b32.xlu0 %v1834_v41, %s5474_s13  ;;  %v1743_v0 = vld [vmem:[#allocation2 + $0x64] sm:$0xf]  ;;  %v1870_v13 = vrot.slane %v1868_v14, 4  ;;  %v1871_v17 = vrot.slane %v1741_v8, 5  ;;  %v1742_v23 = vld [vmem:[#allocation2 + $0x60] sm:$0xe] }
  0xcf   : > { %v1865_v12 = vsel %vm6010_vm14, %v1863_v4, %v1864_v5  ;;  %v1875_v15 = vrot.slane %v1743_v0, 5  ;;  %v1744_v30 = vld [vmem:[#allocation2 + $0x68] sm:$0x1]  ;;  %v1746_v31 = vld [vmem:[#allocation2 + $0x70] sm:$0xf]  ;;  %v1869_v32 = vsel %vm6010_vm14, %v5092_v11, %v1868_v14  ;;  %v5093_v33 = vrot.slane %v1742_v23, 9 }
  0xd0   : > { %v1872_v34 = vsel %vm6010_vm14, %v1870_v13, %v1871_v17  ;;  %v1878_v36 = vrot.slane %v1744_v30, 5  ;;  %v1745_v37 = vld [vmem:[#allocation2 + $0x6c] sm:$0xe]  ;;  %v1882_v39 = vrot.slane %v1746_v31, 5  ;;  %v1747_v26 = vld [vmem:[#allocation2 + $0x74] sm:$0x1] }
  0xd1   : > { %1939 = vrot.lane.b32.xlu1 %v1837_v62, %s5474_s13  ;;  %v1877_v35 = vrot.slane %v1875_v15, 4  ;;  %v1749_v40 = vld [vmem:[#allocation2 + $0x7c] sm:$0xf]  ;;  %v1876_v41 = vsel %vm6010_vm14, %v5093_v33, %v1875_v15  ;;  %v5094_v38 = vrot.slane %v1745_v37, 9  ;;  %v1885_v18 = vrot.slane %v1747_v26, 5 }
  0xd2   : > { %1941 = vrot.lane.b32.xlu0 %v1841_v44, %s5474_s13  ;;  %v1884_v63 = vrot.slane %v1882_v39, 4  ;;  %v1748_v22 = vld [vmem:[#allocation2 + $0x78] sm:$0xe]  ;;  %v1889_v42 = vrot.slane %v1749_v40, 5  ;;  %v1750_v44 = vld [vmem:[#allocation2 + $0x80] sm:$0x1] }
  0xd3   : > { %v1879_v62 = vsel %vm6010_vm14, %v1877_v35, %v1878_v36  ;;  %v1752_v45 = vld [vmem:[#allocation2 + $0x88] sm:$0xf]  ;;  %v1883_v16 = vsel %vm6010_vm14, %v5094_v38, %v1882_v39  ;;  %v1892_v7 = vrot.slane %v1750_v44, 5  ;;  %v1751_v50 = vld [vmem:[#allocation2 + $0x84] sm:$0xe]  ;;  %vm2779_vm6 = vcmask 322816  }
  0xd4   : > { %v1614_v24 = vpop.permute.xlu0 %1613  ;;  %v1886_v48 = vsel %vm6010_vm14, %v1884_v63, %v1885_v18  ;;  %v1891_v49 = vrot.slane %v1889_v42, 4  ;;  %v1896_v51 = vrot.slane %v1752_v45, 5  ;;  %v1753_v52 = vld [vmem:[#allocation2 + $0x8c] sm:$0x1]  ;;  %v1755_v19 = vld [vmem:[#allocation2 + $0x94] sm:$0xf] }
  0xd5   : > { %1943 = vrot.lane.b32.xlu1 %v1844_v46, %s5474_s13  ;;  %1698 = vst.msk [vmem:[#allocation3 + $0x30] sm:$0xf] %vm1685_vm15, %v1614_v24  ;;  %v1616_v28 = vpop.permute.xlu1 %1615  ;;  %v5095_v46 = vrot.slane %v1748_v22, 9  ;;  %v5096_v54 = vrot.slane %v1751_v50, 9  ;;  %v1899_v57 = vrot.slane %v1753_v52, 5  ;;  %v1903_v58 = vrot.slane %v1755_v19, 5 }
  0xd6   : > { %1945 = vrot.lane.b32.xlu0 %v1848_v53, %s5474_s13  ;;  %1699 = vst.msk [vmem:[#allocation3 + $0x34] sm:$0xf] %vm1685_vm15, %v1616_v28  ;;  %v1898_v56 = vrot.slane %v1896_v51, 4  ;;  %v1754_v43 = vld [vmem:[#allocation2 + $0x90] sm:$0xe]  ;;  %vm3116_vm8 = vcmask 388416  }
  0xd7   : > { %v1890_v53 = vsel %vm6010_vm14, %v5095_v46, %v1889_v42  ;;  %v1756_v27 = vld [vmem:[#allocation2 + $0x98] sm:$0x1]  ;;  %v1758_v21 = vld [vmem:[#allocation2 + $0xa0] sm:$0xf]  ;;  %v5097_v61 = vrot.slane %v1754_v43, 9  ;;  %v1905_v4 = vrot.slane %v1903_v58, 4 }
  0xd8   : > { %v1906_v5 = vrot.slane %v1756_v27, 5  ;;  %v1757_v6 = vld [vmem:[#allocation2 + $0x9c] sm:$0xe]  ;;  %v1910_v14 = vrot.slane %v1758_v21, 5  ;;  %v1759_v0 = vld [vmem:[#allocation2 + $0xa4] sm:$0x1] }
  0xd9   : > { %1947 = vrot.lane.b32.xlu1 %v1851_v55, %s5474_s13  ;;  %v1893_v55 = vsel %vm6010_vm14, %v1891_v49, %v1892_v7  ;;  %v1761_v28 = vld [vmem:[#allocation2 + $0xac] sm:$0xf]  ;;  %v5098_v11 = vrot.slane %v1757_v6, 9  ;;  %v1913_v17 = vrot.slane %v1759_v0, 5  ;;  %v1760_v23 = vld [vmem:[#allocation2 + $0xa8] sm:$0xe] }
  0xda   : > { %1949 = vrot.lane.b32.xlu0 %v1855_v60, %s5474_s13  ;;  %v1897_v60 = vsel %vm6010_vm14, %v5096_v54, %v1896_v51  ;;  %v1912_v13 = vrot.slane %v1910_v14, 4  ;;  %v1917_v15 = vrot.slane %v1761_v28, 5  ;;  %v1762_v30 = vld [vmem:[#allocation2 + $0xb0] sm:$0x1]  ;;  %v1764_v31 = vld [vmem:[#allocation2 + $0xb8] sm:$0xf] }
  0xdb   : > { %v5099_v33 = vrot.slane %v1760_v23, 9  ;;  %v1920_v37 = vrot.slane %v1762_v30, 5  ;;  %v1763_v39 = vld [vmem:[#allocation2 + $0xb4] sm:$0xe]  ;;  %v1924_v26 = vrot.slane %v1764_v31, 5  ;;  %vm3310_vm12 = vcmask 454016  }
  0xdc   : > { %v1914_v35 = vsel %vm6010_vm14, %v1912_v13, %v1913_v17  ;;  %v1919_v36 = vrot.slane %v1917_v15, 4  ;;  %v1765_v40 = vld [vmem:[#allocation2 + $0xbc] sm:$0x1]  ;;  %v2058_v44 = vld [vmem:[#allocation2 + $0xc] sm:$0xf]  ;;  %vm3871_vm13 = vcmask 519616  }
  0xdd   : > { %1951 = vrot.lane.b32.xlu1 %v1858_v3, %s5474_s13  ;;  %v1900_v3 = vsel %vm6010_vm14, %v1898_v56, %v1899_v57  ;;  %v1918_v38 = vsel %vm6010_vm14, %v5099_v33, %v1917_v15  ;;  %v1926_v18 = vrot.slane %v1924_v26, 4  ;;  %v1927_v22 = vrot.slane %v1765_v40, 5  ;;  %v2060_v46 = vld [vmem:[#allocation2 + $0x18] sm:$0xf]  ;;  %v2062_v7 = vld [vmem:[#allocation2 + $0x24] sm:$0xf] }
  0xde   : > { %1953 = vrot.lane.b32.xlu0 %v1862_v9, %s5474_s13  ;;  %v1904_v9 = vsel %vm6010_vm14, %v5097_v61, %v1903_v58  ;;  %v1921_v63 = vsel %vm6010_vm14, %v1919_v36, %v1920_v37  ;;  %v2063_v50 = vld [vmem:[#allocation2 + $0x28] sm:$0xf]  ;;  %v2064_v52 = vld [vmem:[#allocation2 + $0x30] sm:$0xf]  ;;  %v2065_v19 = vld [vmem:[#allocation2 + $0x34] sm:$0xf] }
  0xdf   : > { %v2067_v54 = vld [vmem:[#allocation2 + $0x40] sm:$0xf]  ;;  %v2252_v56 = vld [vmem:[#allocation2 + $0x10] sm:$0xf]  ;;  %v2068_v57 = vld [vmem:[#allocation2 + $0x48] sm:$0xf] }
  0xe0   : > { %v1618_v1 = vpop.permute.xlu0 %1617  ;;  %v1620_v29 = vpop.permute.xlu1 %1619  ;;  %v2069_v27 = vld [vmem:[#allocation2 + $0x4c] sm:$0xf]  ;;  %v2309_v61 = vshll.u32 %v2252_v56, 16  ;;  %v2070_v6 = vld [vmem:[#allocation2 + $0x54] sm:$0xf] }
  0xe1   : > { %1955 = vrot.lane.b32.xlu1 %v1865_v12, %s5474_s13  ;;  %1700 = vst.msk [vmem:[#allocation3 + $0x38] sm:$0xf] %vm1685_vm15, %v1618_v1  ;;  %1701 = vst.msk [vmem:[#allocation3 + $0x3c] sm:$0xf] %vm1685_vm15, %v1620_v29  ;;  %v1907_v12 = vsel %vm6010_vm14, %v1905_v4, %v1906_v5  ;;  %v1928_v1 = vsel %vm6010_vm14, %v1926_v18, %v1927_v22  ;;  %v2254_v4 = vld [vmem:[#allocation2 + $0x18] sm:$0xf] }
  0xe2   : > { %1957 = vrot.lane.b32.xlu0 %v1869_v32, %s5474_s13  ;;  %v1911_v32 = vsel %vm6010_vm14, %v5098_v11, %v1910_v14  ;;  %v2255_v5 = vld [vmem:[#allocation2 + $0x1c] sm:$0xf]  ;;  %v2327_v0 = vshll.u32 %v2254_v4, 16  ;;  %v2071_v28 = vld [vmem:[#allocation2 + $0x58] sm:$0xf] }
  0xe3   : > { %v2337_v13 = vshrl.u32 %v2255_v5, 16  ;;  %v2253_v17 = vld [vmem:[#allocation2 + $0x14] sm:$0x1]  ;;  %v2072_v23 = vld [vmem:[#allocation2 + $0x60] sm:$0xf] }
  0xe4   : > { %v2329_v31 = vrot.slane %v2327_v0, 5  ;;  %v2256_v37 = vld [vmem:[#allocation2 + $0x20] sm:$0x1]  ;;  %v2074_v40 = vld [vmem:[#allocation2 + $0x6c] sm:$0xf] }
  0xe5   : > { %1959 = vrot.lane.b32.xlu1 %v1872_v34, %s5474_s13  ;;  %v2339_v36 = vrot.slane %v2337_v13, 4 }
  0xe6   : > { %1961 = vrot.lane.b32.xlu0 %v1876_v41, %s5474_s13 }
  0xe9   : > { %1963 = vrot.lane.b32.xlu1 %v1879_v62, %s5474_s13  ;;  %v5100_v62 = vrot.slane %v1763_v39, 9 }
  0xea   : > { %1965 = vrot.lane.b32.xlu0 %v1883_v16, %s5474_s13  ;;  %v2059_v16 = vld [vmem:[#allocation2 + $0x10] sm:$0xf] }
  0xeb   : > { %v1925_v42 = vsel %vm6010_vm14, %v5100_v62, %v1924_v26  ;;  %v2075_v62 = vld [vmem:[#allocation2 + $0x70] sm:$0xf] }
  0xed   : > { %1967 = vrot.lane.b32.xlu1 %v1886_v48, %s5474_s13  ;;  %v1622_v24 = vpop.permute.xlu0 %1621  ;;  %v1624_v8 = vpop.permute.xlu1 %1623  ;;  %v2061_v48 = vld [vmem:[#allocation2 + $0x1c] sm:$0xf] }
  0xee   : > { %1969 = vrot.lane.b32.xlu0 %v1890_v53, %s5474_s13  ;;  %1702 = vst.msk [vmem:[#allocation3 + $0x40] sm:$0xf] %vm1685_vm15, %v1622_v24  ;;  %1703 = vst.msk [vmem:[#allocation3 + $0x44] sm:$0xf] %vm1685_vm15, %v1624_v8  ;;  %v2066_v53 = vld [vmem:[#allocation2 + $0x3c] sm:$0xf] }
  0xef   : > { %v2324_v8 = vshrl.u32 %v2254_v4, 16 }
  0xf1   : > { %1971 = vrot.lane.b32.xlu1 %v1893_v55, %s5474_s13  ;;  %v2251_v55 = vld [vmem:[#allocation2 + $0xc] sm:$0xf]  ;;  %v2326_v30 = vrot.slane %v2324_v8, 4 }
  0xf2   : > { %1973 = vrot.lane.b32.xlu0 %v1897_v60, %s5474_s13  ;;  %v2300_v43 = vshrl.u32 %v2251_v55, 16  ;;  %v2303_v58 = vshll.u32 %v2251_v55, 16 }
  0xf3   : > { %v1626_v34 = vpop.permute.xlu0 %1625 }
  0xf4   : > { %1704 = vst.msk [vmem:[#allocation3 + $0x48] sm:$0xf] %vm1685_vm15, %v1626_v34  ;;  %v2302_v14 = vrot.slane %v2300_v43, 4  ;;  %v2305_v24 = vrot.slane %v2303_v58, 5  ;;  %v2319_v34 = vshll.u32 %v2253_v17, 16 }
  0xf5   : > { %1975 = vrot.lane.b32.xlu1 %v1900_v3, %s5474_s13  ;;  %v2313_v3 = vshrl.u32 %v2252_v56, 16  ;;  %v3343_v58 = vld [vmem:[#allocation2 + $0x18] sm:$0xf] }
  0xf6   : > { %1977 = vrot.lane.b32.xlu0 %v1904_v9, %s5474_s13  ;;  %v2311_v9 = vrot.slane %v2309_v61, 5  ;;  %v2306_v15 = vor.u32 %v2305_v24, %v2302_v14  ;;  %v2321_v18 = vrot.slane %v2319_v34, 5  ;;  %v3392_v4 = vshrl.u32 %v3343_v58, 16 }
  0xf7   : > { %v1628_v41 = vpop.permute.xlu1 %1627  ;;  %v2315_v11 = vrot.slane %v2313_v3, 4 }
  0xf8   : > { %1705 = vst.msk [vmem:[#allocation3 + $0x4c] sm:$0xf] %vm1685_vm15, %v1628_v41  ;;  %v2307_v41 = vrot.slane %v2306_v15, 4 }
  0xf9   : > { %1979 = vrot.lane.b32.xlu1 %v1907_v12, %s5474_s13  ;;  %v2333_v12 = vshll.u32 %v2255_v5, 16  ;;  %v2316_v33 = vor.u32 %v2315_v11, %v2311_v9  ;;  %v3395_v5 = vshll.u32 %v3343_v58, 16 }
  0xfa   : > { %1981 = vrot.lane.b32.xlu0 %v1911_v32, %s5474_s13  ;;  %v2073_v32 = vld [vmem:[#allocation2 + $0x64] sm:$0xf] }
  0xfb   : > { %v3397_v15 = vrot.slane %v3395_v5, 5 }
  0xfd   : > { %1983 = vrot.lane.b32.xlu1 %v1914_v35, %s5474_s13  ;;  %v1630_v29 = vpop.permute.xlu0 %1629  ;;  %v2335_v35 = vrot.slane %v2333_v12, 5 }
  0xfe   : > { %1985 = vrot.lane.b32.xlu0 %v1918_v38, %s5474_s13  ;;  %1706 = vst.msk [vmem:[#allocation3 + $0x50] sm:$0xf] %vm1685_vm15, %v1630_v29  ;;  %v2330_v38 = vor.u32 %v2329_v31, %v2326_v30  ;;  %v2312_v29 = vsel %vm5590_vm9, %v2307_v41, %v2311_v9  ;;  %v3150_v41 = vld [vmem:[#allocation2 + $0x18] sm:$0xf] }
  0xff   : > { %v2340_v22 = vor.u32 %v2339_v36, %v2335_v35 }
 0x100   : > { %v1632_v45 = vpop.permute.xlu1 %1631 }
 0x101   : > { %1987 = vrot.lane.b32.xlu1 %v1921_v63, %s5474_s13  ;;  %1707 = vst.msk [vmem:[#allocation3 + $0x54] sm:$0xf] %vm1685_vm15, %v1632_v45  ;;  %v2317_v63 = vrot.slane %v2316_v33, 4 }
 0x102   : > { %1989 = vrot.lane.b32.xlu0 %v1925_v42, %s5474_s13  ;;  %v2343_v42 = vshll.u32 %v2256_v37, 16  ;;  %v5439_v37 = vld [vmem:[%s7065_s3 + $0x20] ss:$0 sps:$4 sm:$0xff]  }
 0x103   : > { %v2322_v45 = vsel %vm5590_vm9, %v2317_v63, %v2321_v18  ;;  %5420 = vmatprep.subr.msk.bf16.mxu0 %vm4438_vm3, %v5439_v37  ;;  %v4440_v63 = vsel %vm4438_vm3, %v5439_v37, 0  ;;  %5421 = vmatprep.subr.msk.bf16.mxu1 %vm4438_vm3, %v5439_v37 }
 0x104   : > { %5369 = vmatpush3.bf16.msra.mxu0 %v4440_v63  ;;  %5415 = vmatpush3.bf16.msra.mxu1 %v4440_v63  ;;  %v5443_v63 = vld [vmem:[%s7065_s3] sm:$0xff]  }
 0x105   : > { %1991 = vrot.lane.b32.xlu1 %v1928_v1, %s5474_s13  ;;  %v2813_v1 = vld [vmem:[#allocation2 + $0x10] sm:$0xf] }
 0x106   : > { %2122 = vrot.lane.b32.xlu0 %v2058_v44, %s5475_s14  ;;  %v2331_v44 = vrot.slane %v2330_v38, 4 }
 0x109   : > { %2124 = vrot.lane.b32.xlu1 %v2059_v16, %s5475_s14  ;;  %v1634_v49 = vpop.permute.xlu0 %1633  ;;  %v2341_v16 = vrot.slane %v2340_v22, 4  ;;  %v3151_v22 = vld [vmem:[#allocation2 + $0x1c] sm:$0xf] }
 0x10a   : > { %2126 = vrot.lane.b32.xlu0 %v2060_v46, %s5475_s14  ;;  %1708 = vst.msk [vmem:[#allocation3 + $0x58] sm:$0xf] %vm1685_vm15, %v1634_v49  ;;  %v2345_v46 = vrot.slane %v2343_v42, 5  ;;  %v2910_v49 = vrot.slane %v2813_v1, 5 }
 0x10b   : > { %v1636_v51 = vpop.permute.xlu1 %1635 }
 0x10c   : > { %1709 = vst.msk [vmem:[#allocation3 + $0x5c] sm:$0xf] %vm1685_vm15, %v1636_v51  ;;  %v2336_v51 = vsel %vm5590_vm9, %v2331_v44, %v2335_v35  ;;  %v2912_v56 = vrot.slane %v2910_v49, 4  ;;  %v3345_v35 = vld [vmem:[#allocation2 + $0x20] sm:$0x1]  ;;  %v5440_v44 = vld [vmem:[%s7065_s3 + $0x18] sm:$0xff]  }
 0x10d   : > { %2128 = vrot.lane.b32.xlu1 %v2061_v48, %s5475_s14  ;;  %v2812_v48 = vld [vmem:[#allocation2 + $0xc] sm:$0xe]  ;;  %v3411_v1 = vshll.u32 %v3345_v35, 16  ;;  %5370 = vmatprep.subr.bf16.mxu0 %v5440_v44 }
 0x10e   : > { %2130 = vrot.lane.b32.xlu0 %v2062_v7, %s5475_s14  ;;  %v2814_v7 = vld [vmem:[#allocation2 + $0x14] sm:$0x1]  ;;  %5371 = vmatpush3.bf16.msra.mxu0 %v5440_v44 }
 0x10f   : > { %5411 = vmatprep.subr.bf16.mxu1 %v5440_v44 }
 0x110   : > { %5416 = vmatpush3.bf16.msra.mxu1 %v5440_v44 }
 0x111   : > { %2132 = vrot.lane.b32.xlu1 %v2063_v50, %s5475_s14  ;;  %v2816_v50 = vld [vmem:[#allocation2 + $0x1c] sm:$0xf] }
 0x112   : > { %2134 = vrot.lane.b32.xlu0 %v2064_v52, %s5475_s14  ;;  %v5101_v52 = vrot.slane %v2812_v48, 9  ;;  %v2917_v43 = vrot.slane %v2816_v50, 5  ;;  %v3152_v48 = vld [vmem:[#allocation2 + $0x24] sm:$0xf] }
 0x114   : > { %v2911_v61 = vsel %vm6010_vm14, %v5101_v52, %v2910_v49  ;;  %v2919_v8 = vrot.slane %v2917_v43, 4 }
 0x115   : > { %2136 = vrot.lane.b32.xlu1 %v2065_v19, %s5475_s14  ;;  %v2815_v19 = vld [vmem:[#allocation2 + $0x18] sm:$0xe] }
 0x116   : > { %2138 = vrot.lane.b32.xlu0 %v2066_v53, %s5475_s14  ;;  %v2817_v53 = vld [vmem:[#allocation2 + $0x20] sm:$0x1] }
 0x117   : > { %v2920_v3 = vrot.slane %v2817_v53, 5  ;;  %v2257_v53 = vld [vmem:[#allocation2 + $0x24] sm:$0xf] }
 0x118   : > { %v2351_v5 = vshll.u32 %v2257_v53, 16 }
 0x119   : > { %2140 = vrot.lane.b32.xlu1 %v2067_v54, %s5475_s14  ;;  %v1638_v21 = vpop.permute.xlu0 %1637  ;;  %v2346_v54 = vsel %vm5590_vm9, %v2341_v16, %v2345_v46  ;;  %v2921_v31 = vsel %vm6010_vm14, %v2919_v8, %v2920_v3  ;;  %v6227_v3 = vld [vmem:[#allocation2 + $0x28] sm:$0xf] }
 0x11a   : > { %v1640_v60 = vpop.permute.xlu1 %1639  ;;  %1710 = vst.msk [vmem:[#allocation3 + $0x60] sm:$0xf] %vm1685_vm15, %v1638_v21  ;;  %2142 = vrot.lane.b32.xlu0 %v2068_v57, %s5475_s14  ;;  %v2913_v57 = vrot.slane %v2814_v7, 5  ;;  %v5102_v21 = vrot.slane %v2815_v19, 9  ;;  %v6214_v7 = vld [vmem:[#allocation2 + $0x1c] sm:$0xf] }
 0x11b   : > { %1711 = vst.msk [vmem:[#allocation3 + $0x64] sm:$0xf] %vm1685_vm15, %v1640_v60  ;;  %v3346_v60 = vld [vmem:[#allocation2 + $0x24] sm:$0xf]  ;;  %v3413_v19 = vrot.slane %v3411_v1, 5 }
 0x11c   : > { %v2914_v24 = vsel %vm6010_vm14, %v2912_v56, %v2913_v57  ;;  %v3416_v9 = vshrl.u32 %v3346_v60, 16  ;;  %v3419_v11 = vshll.u32 %v3346_v60, 16  ;;  %v2918_v17 = vsel %vm6010_vm14, %v5102_v21, %v2917_v43  ;;  %v2258_v56 = vld [vmem:[#allocation2 + $0x28] sm:$0xf]  ;;  %v5441_v57 = vld [vmem:[%s7065_s3 + $0x10] sm:$0xff]  }
 0x11d   : > { %2144 = vrot.lane.b32.xlu1 %v2069_v27, %s5475_s14  ;;  %v3344_v27 = vld [vmem:[#allocation2 + $0x1c] sm:$0xf]  ;;  %v4002_v21 = vrot.slane %v6214_v7, 5  ;;  %v3906_v60 = vld [vmem:[#allocation2 + $0x20] sm:$0x1]  ;;  %5372 = vmatprep.subr.bf16.mxu0 %v5441_v57  ;;  %v2361_v8 = vshrl.u32 %v2258_v56, 16 }
 0x11e   : > { %2146 = vrot.lane.b32.xlu0 %v2070_v6, %s5475_s14  ;;  %v3347_v6 = vld [vmem:[#allocation2 + $0x28] sm:$0xf]  ;;  %v3401_v0 = vshll.u32 %v3344_v27, 16  ;;  %v3418_v36 = vrot.slane %v3416_v9, 4  ;;  %5373 = vmatpush3.bf16.msra.mxu0 %v5441_v57 }
 0x11f   : > { %v3425_v12 = vshll.u32 %v3347_v6, 16  ;;  %v3429_v13 = vshrl.u32 %v3347_v6, 16  ;;  %5412 = vmatprep.subr.bf16.mxu1 %v5441_v57 }
 0x120   : > { %5417 = vmatpush3.bf16.msra.mxu1 %v5441_v57 }
 0x121   : > { %2148 = vrot.lane.b32.xlu1 %v2071_v28, %s5475_s14  ;;  %v3405_v28 = vshrl.u32 %v3344_v27, 16 }
 0x122   : > { %2150 = vrot.lane.b32.xlu0 %v2072_v23, %s5475_s14  ;;  %v3394_v23 = vrot.slane %v3392_v4, 4  ;;  %v2348_v4 = vshrl.u32 %v2257_v53, 16 }
 0x123   : > { %v1642_v39 = vpop.permute.xlu0 %1641  ;;  %v1644_v26 = vpop.permute.xlu1 %1643  ;;  %v3407_v33 = vrot.slane %v3405_v28, 4 }
 0x124   : > { %1712 = vst.msk [vmem:[#allocation3 + $0x68] sm:$0xf] %vm1685_vm15, %v1642_v39  ;;  %1713 = vst.msk [vmem:[#allocation3 + $0x6c] sm:$0xf] %vm1685_vm15, %v1644_v26  ;;  %v3421_v39 = vrot.slane %v3419_v11, 5  ;;  %v6202_v26 = vrot.slane %v3425_v12, 5  ;;  %v3398_v38 = vor.u32 %v3397_v15, %v3394_v23 }
 0x125   : > { %2152 = vrot.lane.b32.xlu1 %v2073_v32, %s5475_s14  ;;  %v6194_v32 = vrot.slane %v3401_v0, 5  ;;  %v2260_v0 = vld [vmem:[#allocation2 + $0x30] sm:$0xf]  ;;  %v4005_v11 = vrot.slane %v3906_v60, 5  ;;  %v2261_v12 = vld [vmem:[#allocation2 + $0x34] sm:$0xf] }
 0x126   : > { %2154 = vrot.lane.b32.xlu0 %v2074_v40, %s5475_s14  ;;  %v3431_v40 = vrot.slane %v3429_v13, 4  ;;  %v3399_v49 = vrot.slane %v3398_v38, 4  ;;  %v5442_v13 = vld [vmem:[%s7065_s3 + $0x8] sm:$0xff]   ;;  %v4004_v15 = vrot.slane %v4002_v21, 4  ;;  %v2372_v35 = vshrl.u32 %v2260_v0, 16 }
 0x127   : > { %v3408_v42 = vor.u32 %v3407_v33, %v6194_v32  ;;  %v2350_v33 = vrot.slane %v2348_v4, 4  ;;  %5374 = vmatprep.subr.bf16.mxu0 %v5442_v13  ;;  %5413 = vmatprep.subr.bf16.mxu1 %v5442_v13  ;;  %v2819_v60 = vld [vmem:[#allocation2 + $0x28] sm:$0xf]  ;;  %v2818_v4 = vld [vmem:[#allocation2 + $0x24] sm:$0xe] }
 0x128   : > { %v3432_v16 = vor.u32 %v3431_v40, %v6202_v26  ;;  %v2363_v40 = vrot.slane %v2361_v8, 4  ;;  %5375 = vmatpush3.bf16.msra.mxu0 %v5442_v13  ;;  %5418 = vmatpush3.bf16.msra.mxu1 %v5442_v13  ;;  %v2924_v8 = vrot.slane %v2819_v60, 5  ;;  %v2821_v13 = vld [vmem:[#allocation2 + $0x30] sm:$0xe]  ;;  %v3155_v60 = vld [vmem:[#allocation2 + $0x34] sm:$0xf] }
 0x129   : > { %2156 = vrot.lane.b32.xlu1 %v2075_v62, %s5475_s14  ;;  %v3348_v62 = vld [vmem:[#allocation2 + $0x2c] sm:$0x1]  ;;  %v3409_v52 = vrot.slane %v3408_v42, 4  ;;  %5376 = vmatprep.subr.bf16.mxu0 %v5443_v63 }
 0x12a   : > { %2683 = vrot.lane.b32.xlu0 %v2312_v29, %s5476_s15  ;;  %v3435_v46 = vshll.u32 %v3348_v62, 16  ;;  %v3433_v58 = vrot.slane %v3432_v16, 4  ;;  %v2259_v62 = vld [vmem:[#allocation2 + $0x2c] sm:$0x1]  ;;  %5414 = vmatprep.subr.bf16.mxu1 %v5443_v63 }
 0x12c   : > { %v3437_v27 = vrot.slane %v3435_v46, 5  ;;  %5377 = vmatpush3.bf16.msra.mxu0 %v5443_v63  ;;  %5419 = vmatpush3.bf16.msra.mxu1 %v5443_v63 }
 0x12d   : > { %2685 = vrot.lane.b32.xlu1 %v2322_v45, %s5476_s15  ;;  %v1646_v55 = vpop.permute.xlu0 %1645  ;;  %v3422_v45 = vor.u32 %v3421_v39, %v3418_v36  ;;  %v2375_v36 = vshll.u32 %v2260_v0, 16 }
 0x12e   : > { %1714 = vst.msk [vmem:[#allocation3 + $0x70] sm:$0xf] %vm1685_vm15, %v1646_v55  ;;  %2687 = vrot.lane.b32.xlu0 %v2336_v51, %s5476_s15  ;;  %v3153_v51 = vld [vmem:[#allocation2 + $0x28] sm:$0xf]  ;;  %v3904_v55 = vld [vmem:[#allocation2 + $0x18] sm:$0xe]  ;;  %v3438_v23 = vsel %vm5590_vm9, %v3433_v58, %v3437_v27 }
 0x12f   : > { %v3423_v43 = vrot.slane %v3422_v45, 4  ;;  %v5117_v9 = vrot.slane %v3904_v55, 9  ;;  %v2374_v45 = vrot.slane %v2372_v35, 4  ;;  %v2377_v16 = vrot.slane %v2375_v36, 5  ;;  %v3350_v35 = vld [vmem:[#allocation2 + $0x34] sm:$0xf] }
 0x131   : > { %2689 = vrot.lane.b32.xlu1 %v2346_v54, %s5476_s15  ;;  %v1648_v14 = vpop.permute.xlu1 %1647  ;;  %v2378_v55 = vor.u32 %v2377_v16, %v2374_v45 }
 0x132   : > { %1715 = vst.msk [vmem:[#allocation3 + $0x74] sm:$0xf] %vm1685_vm15, %v1648_v14  ;;  %3020 = vrot.lane.b32.xlu0 %v2911_v61, %s5477_s16  ;;  %v3404_v61 = vsel %vm5590_vm9, %v3399_v49, %v6194_v32  ;;  %v3414_v14 = vsel %vm5590_vm9, %v3409_v52, %v3413_v19  ;;  %v3909_v32 = vld [vmem:[#allocation2 + $0x2c] sm:$0x1]  ;;  %v2367_v49 = vshll.u32 %v2259_v62, 16 }
 0x133   : > { %v4012_v1 = vrot.slane %v3909_v32, 5  ;;  %v2262_v52 = vld [vmem:[#allocation2 + $0x38] sm:$0x1] }
 0x134   : > { %v1650_v30 = vpop.permute.xlu0 %1649  ;;  %v2391_v27 = vshll.u32 %v2262_v52, 16 }
 0x135   : > { %3022 = vrot.lane.b32.xlu1 %v2914_v24, %s5477_s16  ;;  %1716 = vst.msk [vmem:[#allocation3 + $0x78] sm:$0xf] %vm1685_vm15, %v1650_v30  ;;  %v2357_v24 = vshll.u32 %v2258_v56, 16  ;;  %v3907_v30 = vld [vmem:[#allocation2 + $0x24] sm:$0xe] }
 0x136   : > { %3024 = vrot.lane.b32.xlu0 %v2918_v17, %s5477_s16  ;;  %v3428_v17 = vsel %vm5590_vm9, %v3423_v43, %v6202_v26  ;;  %v2381_v26 = vshll.u32 %v2261_v12, 16  ;;  %v5118_v42 = vrot.slane %v3907_v30, 9  ;;  %v2369_v43 = vrot.slane %v2367_v49, 5 }
 0x137   : > { %v1652_v34 = vpop.permute.xlu1 %1651  ;;  %v6244_v39 = vrot.slane %v2357_v24, 5  ;;  %v2393_v24 = vrot.slane %v2391_v27, 5  ;;  %v2926_v30 = vrot.slane %v2924_v8, 4  ;;  %v3354_v27 = vld [vmem:[#allocation2 + $0x44] sm:$0x1] }
 0x138   : > { %1717 = vst.msk [vmem:[#allocation3 + $0x7c] sm:$0xf] %vm1685_vm15, %v1652_v34  ;;  %v1930_v18 = vpop.permute.xlu0 %1929  ;;  %v2353_v34 = vrot.slane %v2351_v5, 5  ;;  %v2383_v7 = vrot.slane %v2381_v26, 5  ;;  %vm4208_vm15 = vcmask 585216  }
 0x139   : > { %3026 = vrot.lane.b32.xlu1 %v2921_v31, %s5477_s16  ;;  %2026 = vst.msk [vmem:[#allocation3] sm:$0xf] %vm2025_vm2, %v1930_v18  ;;  %v4009_v31 = vrot.slane %v6227_v3, 5  ;;  %v4003_v18 = vsel %vm6010_vm14, %v5117_v9, %v4002_v21  ;;  %v2379_v3 = vrot.slane %v2378_v55, 4  ;;  %v2822_v9 = vld [vmem:[#allocation2 + $0x34] sm:$0xf] }
 0x13a   : > { %3214 = vrot.lane.b32.xlu0 %v3150_v41, %s5478_s25  ;;  %v2385_v41 = vshrl.u32 %v2261_v12, 16  ;;  %v2354_v44 = vor.u32 %v2353_v34, %v2350_v33  ;;  %v2931_v32 = vrot.slane %v2822_v9, 5  ;;  %v3349_v33 = vld [vmem:[#allocation2 + $0x30] sm:$0xf]  ;;  %v3157_v9 = vld [vmem:[#allocation2 + $0x40] sm:$0xf] }
 0x13b   : > { %v1932_v29 = vpop.permute.xlu1 %1931  ;;  %v4010_v19 = vsel %vm6010_vm14, %v5118_v42, %v4009_v31  ;;  %v2384_v12 = vsel %vm5590_vm9, %v2379_v3, %v2383_v7  ;;  %v3440_v26 = vshrl.u32 %v3349_v33, 16  ;;  %v3453_v42 = vshrl.u32 %v3350_v35, 16 }
 0x13c   : > { %2027 = vst.msk [vmem:[#allocation3 + $0x4] sm:$0xf] %vm2025_vm2, %v1932_v29  ;;  %v1934_v50 = vpop.permute.xlu0 %1933  ;;  %v4011_v29 = vrot.slane %v4009_v31, 4 }
 0x13d   : > { %3216 = vrot.lane.b32.xlu1 %v3151_v22, %s5478_s25  ;;  %2028 = vst.msk [vmem:[#allocation3 + $0x8] sm:$0xf] %vm2025_vm2, %v1934_v50  ;;  %v4006_v22 = vsel %vm6010_vm14, %v4004_v15, %v4005_v11  ;;  %v2387_v50 = vrot.slane %v2385_v41, 4  ;;  %v5103_v11 = vrot.slane %v2818_v4, 9  ;;  %v3443_v41 = vshll.u32 %v3349_v33, 16 }
 0x13e   : > { %3218 = vrot.lane.b32.xlu0 %v3152_v48, %s5478_s25  ;;  %v2364_v48 = vor.u32 %v2363_v40, %v6244_v39  ;;  %v4013_v53 = vsel %vm6010_vm14, %v4011_v29, %v4012_v1  ;;  %v3455_v52 = vrot.slane %v3453_v42, 4  ;;  %v2267_v42 = vld [vmem:[#allocation2 + $0x4c] sm:$0xf] }
 0x13f   : > { %v1936_v54 = vpop.permute.xlu1 %1935  ;;  %v2388_v58 = vor.u32 %v2387_v50, %v2383_v7  ;;  %v2925_v36 = vsel %vm6010_vm14, %v5103_v11, %v2924_v8  ;;  %v3445_v49 = vrot.slane %v3443_v41, 5 }
 0x140   : > { %2029 = vst.msk [vmem:[#allocation3 + $0xc] sm:$0xf] %vm2025_vm2, %v1936_v54  ;;  %v1938_v6 = vpop.permute.xlu0 %1937  ;;  %v2355_v54 = vrot.slane %v2354_v44, 4  ;;  %v2365_v57 = vrot.slane %v2364_v48, 4  ;;  %v3442_v48 = vrot.slane %v3440_v26, 4 }
 0x141   : > { %3220 = vrot.lane.b32.xlu1 %v3153_v51, %s5478_s25  ;;  %2030 = vst.msk [vmem:[#allocation3 + $0x10] sm:$0xf] %vm2025_vm2, %v1938_v6 }
 0x142   : > { %3775 = vrot.lane.b32.xlu0 %v3404_v61, %s5479_s7  ;;  %v2360_v61 = vsel %vm5590_vm9, %v2355_v54, %v6244_v39  ;;  %v2370_v6 = vsel %vm5590_vm9, %v2365_v57, %v2369_v43  ;;  %v5104_v39 = vrot.slane %v2821_v13, 9  ;;  %v3154_v43 = vld [vmem:[#allocation2 + $0x30] sm:$0xf]  ;;  %v2263_v13 = vld [vmem:[#allocation2 + $0x3c] sm:$0xf] }
 0x143   : > { %v1940_v28 = vpop.permute.xlu1 %1939 }
 0x144   : > { %2031 = vst.msk [vmem:[#allocation3 + $0x14] sm:$0xf] %vm2025_vm2, %v1940_v28  ;;  %v1942_v37 = vpop.permute.xlu0 %1941  ;;  %v2820_v28 = vld [vmem:[#allocation2 + $0x2c] sm:$0x1] }
 0x145   : > { %3777 = vrot.lane.b32.xlu1 %v3414_v14, %s5479_s7  ;;  %2032 = vst.msk [vmem:[#allocation3 + $0x18] sm:$0xf] %vm2025_vm2, %v1942_v37  ;;  %v2389_v14 = vrot.slane %v2388_v58, 4  ;;  %v2927_v31 = vrot.slane %v2820_v28, 5  ;;  %v3352_v37 = vld [vmem:[#allocation2 + $0x3c] sm:$0xf]  ;;  %v3446_v58 = vor.u32 %v3445_v49, %v3442_v48 }
 0x146   : > { %3779 = vrot.lane.b32.xlu0 %v3428_v17, %s5479_s7  ;;  %v2823_v17 = vld [vmem:[#allocation2 + $0x38] sm:$0x1]  ;;  %v3464_v29 = vshrl.u32 %v3352_v37, 16  ;;  %v3467_v44 = vshll.u32 %v3352_v37, 16  ;;  %v2396_v37 = vshrl.u32 %v2263_v13, 16 }
 0x147   : > { %v1944_v38 = vpop.permute.xlu1 %1943  ;;  %v2394_v15 = vsel %vm5590_vm9, %v2389_v14, %v2393_v24  ;;  %v2934_v40 = vrot.slane %v2823_v17, 5  ;;  %v2928_v63 = vsel %vm6010_vm14, %v2926_v30, %v2927_v31  ;;  %v3483_v14 = vshll.u32 %v3354_v27, 16  ;;  %v3156_v24 = vld [vmem:[#allocation2 + $0x3c] sm:$0xf] }
 0x148   : > { %2033 = vst.msk [vmem:[#allocation3 + $0x1c] sm:$0xf] %vm2025_vm2, %v1944_v38  ;;  %v1946_v46 = vpop.permute.xlu0 %1945  ;;  %v3353_v38 = vld [vmem:[#allocation2 + $0x40] sm:$0xf]  ;;  %v3466_v54 = vrot.slane %v3464_v29, 4  ;;  %v3469_v55 = vrot.slane %v3467_v44, 5 }
 0x149   : > { %3781 = vrot.lane.b32.xlu1 %v3438_v23, %s5479_s7  ;;  %2034 = vst.msk [vmem:[#allocation3 + $0x20] sm:$0xf] %vm2025_vm2, %v1946_v46  ;;  %v3473_v45 = vshll.u32 %v3353_v38, 16  ;;  %v3477_v16 = vshrl.u32 %v3353_v38, 16  ;;  %v2932_v46 = vsel %vm6010_vm14, %v5104_v39, %v2931_v32  ;;  %v3447_v8 = vrot.slane %v3446_v58, 4 }
 0x14a   : > { %4112 = vrot.lane.b32.xlu0 %v4003_v18, %s5480_s10  ;;  %v2933_v18 = vrot.slane %v2931_v32, 4  ;;  %v3485_v32 = vrot.slane %v3483_v14, 5  ;;  %v2399_v39 = vshll.u32 %v2263_v13, 16  ;;  %v2398_v48 = vrot.slane %v2396_v37, 4 }
 0x14b   : > { %v1948_v51 = vpop.permute.xlu1 %1947  ;;  %v3479_v57 = vrot.slane %v3477_v16, 4 }
 0x14c   : > { %2035 = vst.msk [vmem:[#allocation3 + $0x24] sm:$0xf] %vm2025_vm2, %v1948_v51  ;;  %v1950_v56 = vpop.permute.xlu0 %1949  ;;  %v2935_v50 = vsel %vm6010_vm14, %v2933_v18, %v2934_v40  ;;  %v2401_v49 = vrot.slane %v2399_v39, 5 }
 0x14d   : > { %4114 = vrot.lane.b32.xlu1 %v4006_v22, %s5480_s10  ;;  %2036 = vst.msk [vmem:[#allocation3 + $0x28] sm:$0xf] %vm2025_vm2, %v1950_v56  ;;  %v3449_v22 = vshll.u32 %v3350_v35, 16  ;;  %v6302_v56 = vrot.slane %v3473_v45, 5  ;;  %v3913_v45 = vld [vmem:[#allocation2 + $0x3c] sm:$0xe] }
 0x14e   : > { %4116 = vrot.lane.b32.xlu0 %v4010_v19, %s5480_s10  ;;  %v5120_v58 = vrot.slane %v3913_v45, 9 }
 0x14f   : > { %v1952_v21 = vpop.permute.xlu1 %1951  ;;  %v3451_v51 = vrot.slane %v3449_v22, 5 }
 0x150   : > { %2037 = vst.msk [vmem:[#allocation3 + $0x2c] sm:$0xf] %vm2025_vm2, %v1952_v21  ;;  %v1954_v5 = vpop.permute.xlu0 %1953 }
 0x151   : > { %4118 = vrot.lane.b32.xlu1 %v4013_v53, %s5480_s10  ;;  %2038 = vst.msk [vmem:[#allocation3 + $0x30] sm:$0xf] %vm2025_vm2, %v1954_v5  ;;  %v3351_v53 = vld [vmem:[#allocation2 + $0x38] sm:$0x1]  ;;  %v3470_v5 = vor.u32 %v3469_v55, %v3466_v54  ;;  %v3452_v35 = vsel %vm5590_vm9, %v3447_v8, %v3451_v51  ;;  %v2433_v54 = vshrl.u32 %v2267_v42, 16 }
 0x152   : > { %2691 = vrot.lane.b32.xlu0 %v2360_v61, %s5476_s15  ;;  %v3456_v61 = vor.u32 %v3455_v52, %v3451_v51  ;;  %v3459_v3 = vshll.u32 %v3351_v53, 16  ;;  %v2429_v53 = vshll.u32 %v2267_v42, 16 }
 0x153   : > { %v1956_v0 = vpop.permute.xlu1 %1955  ;;  %v3471_v30 = vrot.slane %v3470_v5, 4 }
 0x154   : > { %2039 = vst.msk [vmem:[#allocation3 + $0x34] sm:$0xf] %vm2025_vm2, %v1956_v0  ;;  %v1958_v23 = vpop.permute.xlu0 %1957  ;;  %v3911_v0 = vld [vmem:[#allocation2 + $0x34] sm:$0xf]  ;;  %v3457_v11 = vrot.slane %v3456_v61, 4  ;;  %v2431_v14 = vrot.slane %v2429_v53, 5 }
 0x155   : > { %2693 = vrot.lane.b32.xlu1 %v2370_v6, %s5476_s15  ;;  %2040 = vst.msk [vmem:[#allocation3 + $0x38] sm:$0xf] %vm2025_vm2, %v1958_v23  ;;  %v3480_v6 = vor.u32 %v3479_v57, %v6302_v56  ;;  %v3910_v23 = vld [vmem:[#allocation2 + $0x30] sm:$0xe]  ;;  %v4016_v33 = vrot.slane %v3911_v0, 5 }
 0x156   : > { %2695 = vrot.lane.b32.xlu0 %v2384_v12, %s5476_s15  ;;  %v3461_v12 = vrot.slane %v3459_v3, 5  ;;  %v5119_v18 = vrot.slane %v3910_v23, 9  ;;  %v2268_v0 = vld [vmem:[#allocation2 + $0x50] sm:$0x1] }
 0x157   : > { %v1960_v34 = vpop.permute.xlu1 %1959  ;;  %v3481_v31 = vrot.slane %v3480_v6, 4  ;;  %v4018_v44 = vrot.slane %v4016_v33, 4 }
 0x158   : > { %2041 = vst.msk [vmem:[#allocation3 + $0x3c] sm:$0xf] %vm2025_vm2, %v1960_v34  ;;  %v1962_v62 = vpop.permute.xlu0 %1961  ;;  %v3912_v34 = vld [vmem:[#allocation2 + $0x38] sm:$0x1]  ;;  %v3462_v26 = vsel %vm5590_vm9, %v3457_v11, %v3461_v12  ;;  %v4017_v57 = vsel %vm6010_vm14, %v5119_v18, %v4016_v33 }
 0x159   : > { %2697 = vrot.lane.b32.xlu1 %v2394_v15, %s5476_s15  ;;  %2042 = vst.msk [vmem:[#allocation3 + $0x40] sm:$0xf] %vm2025_vm2, %v1962_v62  ;;  %v2264_v15 = vld [vmem:[#allocation2 + $0x40] sm:$0xf]  ;;  %v2266_v62 = vld [vmem:[#allocation2 + $0x48] sm:$0xf]  ;;  %v3486_v29 = vsel %vm5590_vm9, %v3481_v31, %v3485_v32 }
 0x15a   : > { %3028 = vrot.lane.b32.xlu0 %v2925_v36, %s5477_s16  ;;  %v3914_v36 = vld [vmem:[#allocation2 + $0x40] sm:$0xf]  ;;  %v2405_v41 = vshll.u32 %v2264_v15, 16  ;;  %v2409_v38 = vshrl.u32 %v2264_v15, 16  ;;  %v4019_v22 = vrot.slane %v3912_v34, 5 }
 0x15b   : > { %v1964_v1 = vpop.permute.xlu1 %1963  ;;  %v4023_v16 = vrot.slane %v3914_v36, 5  ;;  %v2825_v31 = vld [vmem:[#allocation2 + $0x40] sm:$0xf] }
 0x15c   : > { %2043 = vst.msk [vmem:[#allocation3 + $0x44] sm:$0xf] %vm2025_vm2, %v1964_v1  ;;  %v1966_v7 = vpop.permute.xlu0 %1965  ;;  %v3476_v1 = vsel %vm5590_vm9, %v3471_v30, %v6302_v56  ;;  %v2407_v52 = vrot.slane %v2405_v41, 5  ;;  %v2265_v56 = vld [vmem:[#allocation2 + $0x44] sm:$0x1]  ;;  %v2439_v30 = vshll.u32 %v2268_v0, 16 }
 0x15d   : > { %3030 = vrot.lane.b32.xlu1 %v2928_v63, %s5477_s16  ;;  %2044 = vst.msk [vmem:[#allocation3 + $0x48] sm:$0xf] %vm2025_vm2, %v1966_v7  ;;  %v2420_v7 = vshrl.u32 %v2266_v62, 16  ;;  %v2415_v6 = vshll.u32 %v2265_v56, 16  ;;  %v2938_v36 = vrot.slane %v2825_v31, 5 }
 0x15e   : > { %3032 = vrot.lane.b32.xlu0 %v2932_v46, %s5477_s16  ;;  %v3915_v46 = vld [vmem:[#allocation2 + $0x44] sm:$0x1] }
 0x15f   : > { %v1968_v19 = vpop.permute.xlu1 %1967  ;;  %v4026_v27 = vrot.slane %v3915_v46, 5  ;;  %v2422_v61 = vrot.slane %v2420_v7, 4  ;;  %v2417_v23 = vrot.slane %v2415_v6, 5  ;;  %v2826_v41 = vld [vmem:[#allocation2 + $0x44] sm:$0x1] }
 0x160   : > { %2045 = vst.msk [vmem:[#allocation3 + $0x4c] sm:$0xf] %vm2025_vm2, %v1968_v19  ;;  %v1970_v21 = vpop.permute.xlu0 %1969  ;;  %v2411_v19 = vrot.slane %v2409_v38, 4  ;;  %v2941_v42 = vrot.slane %v2826_v41, 5  ;;  %v3917_v41 = vld [vmem:[#allocation2 + $0x4c] sm:$0xf] }
 0x161   : > { %3034 = vrot.lane.b32.xlu1 %v2935_v50, %s5477_s16  ;;  %2046 = vst.msk [vmem:[#allocation3 + $0x50] sm:$0xf] %vm2025_vm2, %v1970_v21  ;;  %v2423_v50 = vshll.u32 %v2266_v62, 16  ;;  %v4025_v21 = vrot.slane %v4023_v16, 4  ;;  %v2828_v62 = vld [vmem:[#allocation2 + $0x4c] sm:$0xf] }
 0x162   : > { %3222 = vrot.lane.b32.xlu0 %v3154_v43, %s5478_s25  ;;  %v4020_v43 = vsel %vm6010_vm14, %v4018_v44, %v4019_v22  ;;  %v2412_v5 = vor.u32 %v2411_v19, %v2407_v52  ;;  %v2940_v22 = vrot.slane %v2938_v36, 4  ;;  %v2827_v44 = vld [vmem:[#allocation2 + $0x48] sm:$0xe]  ;;  %v2945_v45 = vrot.slane %v2828_v62, 5  ;;  %v3161_v62 = vld [vmem:[#allocation2 + $0x58] sm:$0xf] }
 0x163   : > { %v1972_v4 = vpop.permute.xlu1 %1971  ;;  %v2425_v3 = vrot.slane %v2423_v50, 5  ;;  %v3358_v50 = vld [vmem:[#allocation2 + $0x54] sm:$0xf] }
 0x164   : > { %2047 = vst.msk [vmem:[#allocation3 + $0x54] sm:$0xf] %vm2025_vm2, %v1972_v4  ;;  %v1974_v28 = vpop.permute.xlu0 %1973  ;;  %v2947_v56 = vrot.slane %v2945_v45, 4 }
 0x165   : > { %3224 = vrot.lane.b32.xlu1 %v3155_v60, %s5478_s25  ;;  %2048 = vst.msk [vmem:[#allocation3 + $0x58] sm:$0xf] %vm2025_vm2, %v1974_v28  ;;  %v2402_v60 = vor.u32 %v2401_v49, %v2398_v48  ;;  %v4024_v28 = vsel %vm6010_vm14, %v5120_v58, %v4023_v16  ;;  %v2426_v12 = vor.u32 %v2425_v3, %v2422_v61  ;;  %v3355_v16 = vld [vmem:[#allocation2 + $0x48] sm:$0xf]  ;;  %v2829_v48 = vld [vmem:[#allocation2 + $0x50] sm:$0x1] }
 0x166   : > { %3226 = vrot.lane.b32.xlu0 %v3156_v24, %s5478_s25  ;;  %v2435_v24 = vrot.slane %v2433_v54, 4  ;;  %v3356_v49 = vld [vmem:[#allocation2 + $0x4c] sm:$0xf]  ;;  %v3488_v19 = vshrl.u32 %v3355_v16, 16  ;;  %v3491_v53 = vshll.u32 %v3355_v16, 16 }
 0x167   : > { %v1976_v17 = vpop.permute.xlu1 %1975  ;;  %v2403_v11 = vrot.slane %v2402_v60, 4  ;;  %v2427_v34 = vrot.slane %v2426_v12, 4  ;;  %v3359_v54 = vld [vmem:[#allocation2 + $0x58] sm:$0xf]  ;;  %v3501_v58 = vshrl.u32 %v3356_v49, 16  ;;  %v3515_v60 = vshll.u32 %v3358_v50, 16 }
 0x168   : > { %2049 = vst.msk [vmem:[#allocation3 + $0x5c] sm:$0xf] %vm2025_vm2, %v1976_v17  ;;  %v1978_v40 = vpop.permute.xlu0 %1977  ;;  %v2413_v17 = vrot.slane %v2412_v5, 4  ;;  %v2436_v15 = vor.u32 %v2435_v24, %v2431_v14  ;;  %v3521_v61 = vshll.u32 %v3359_v54, 16  ;;  %v3525_v3 = vshrl.u32 %v3359_v54, 16 }
 0x169   : > { %3228 = vrot.lane.b32.xlu1 %v3157_v9, %s5478_s25  ;;  %2050 = vst.msk [vmem:[#allocation3 + $0x60] sm:$0xf] %vm2025_vm2, %v1978_v40  ;;  %v4027_v9 = vsel %vm6010_vm14, %v4025_v21, %v4026_v27  ;;  %v2408_v33 = vsel %vm5590_vm9, %v2403_v11, %v2407_v52  ;;  %v2432_v18 = vsel %vm5590_vm9, %v2427_v34, %v2431_v14  ;;  %v5106_v52 = vrot.slane %v2827_v44, 9  ;;  %v3916_v16 = vld [vmem:[#allocation2 + $0x48] sm:$0xe] }
 0x16a   : > { %3783 = vrot.lane.b32.xlu0 %v3452_v35, %s5479_s7  ;;  %v2824_v35 = vld [vmem:[#allocation2 + $0x3c] sm:$0xe]  ;;  %v2418_v39 = vsel %vm5590_vm9, %v2413_v17, %v2417_v23  ;;  %v2437_v40 = vrot.slane %v2436_v15, 4  ;;  %v3512_v21 = vshrl.u32 %v3358_v50, 16  ;;  %v3490_v5 = vrot.slane %v3488_v19, 4 }
 0x16b   : > { %v1980_v63 = vpop.permute.xlu1 %1979  ;;  %v3493_v6 = vrot.slane %v3491_v53, 5  ;;  %v3503_v0 = vrot.slane %v3501_v58, 4  ;;  %v3517_v12 = vrot.slane %v3515_v60, 5  ;;  %v3527_v17 = vrot.slane %v3525_v3, 4  ;;  %v3158_v23 = vld [vmem:[#allocation2 + $0x48] sm:$0xf] }
 0x16c   : > { %2051 = vst.msk [vmem:[#allocation3 + $0x64] sm:$0xf] %vm2025_vm2, %v1980_v63  ;;  %v1982_v51 = vpop.permute.xlu0 %1981  ;;  %v5105_v63 = vrot.slane %v2824_v35, 9  ;;  %v3514_v11 = vrot.slane %v3512_v21, 4  ;;  %v2273_v58 = vld [vmem:[#allocation2 + $0x64] sm:$0xf] }
 0x16d   : > { %3785 = vrot.lane.b32.xlu1 %v3462_v26, %s5479_s7  ;;  %2052 = vst.msk [vmem:[#allocation3 + $0x68] sm:$0xf] %vm2025_vm2, %v1982_v51  ;;  %v2441_v26 = vrot.slane %v2439_v30, 5  ;;  %v2942_v51 = vsel %vm6010_vm14, %v2940_v22, %v2941_v42  ;;  %v3494_v15 = vor.u32 %v3493_v6, %v3490_v5  ;;  %v3360_v30 = vld [vmem:[#allocation2 + $0x5c] sm:$0x1] }
 0x16e   : > { %3787 = vrot.lane.b32.xlu0 %v3476_v1, %s5479_s7  ;;  %v2939_v7 = vsel %vm6010_vm14, %v5105_v63, %v2938_v36  ;;  %v3518_v36 = vor.u32 %v3517_v12, %v3514_v11  ;;  %v2269_v22 = vld [vmem:[#allocation2 + $0x54] sm:$0xf]  ;;  %v2481_v11 = vshrl.u32 %v2273_v58, 16 }
 0x16f   : > { %v1984_v55 = vpop.permute.xlu1 %1983  ;;  %v2444_v50 = vshrl.u32 %v2269_v22, 16  ;;  %v3919_v3 = vld [vmem:[#allocation2 + $0x54] sm:$0xe] }
 0x170   : > { %2053 = vst.msk [vmem:[#allocation3 + $0x6c] sm:$0xf] %vm2025_vm2, %v1984_v55  ;;  %v1986_v4 = vpop.permute.xlu0 %1985 }
 0x171   : > { %3789 = vrot.lane.b32.xlu1 %v3486_v29, %s5479_s7  ;;  %2054 = vst.msk [vmem:[#allocation3 + $0x70] sm:$0xf] %vm2025_vm2, %v1986_v4  ;;  %v2442_v29 = vsel %vm5590_vm9, %v2437_v40, %v2441_v26  ;;  %v2946_v4 = vsel %vm6010_vm14, %v5106_v52, %v2945_v45  ;;  %v3160_v40 = vld [vmem:[#allocation2 + $0x54] sm:$0xf]  ;;  %v3495_v26 = vrot.slane %v3494_v15, 4  ;;  %v5122_v15 = vrot.slane %v3919_v3, 9 }
 0x172   : > { %4120 = vrot.lane.b32.xlu0 %v4017_v57, %s5480_s10  ;;  %v2948_v57 = vrot.slane %v2829_v48, 5 }
 0x173   : > { %v1988_v8 = vpop.permute.xlu1 %1987 }
 0x174   : > { %2055 = vst.msk [vmem:[#allocation3 + $0x74] sm:$0xf] %vm2025_vm2, %v1988_v8  ;;  %v1990_v13 = vpop.permute.xlu0 %1989  ;;  %v2949_v24 = vsel %vm6010_vm14, %v2947_v56, %v2948_v57 }
 0x175   : > { %4122 = vrot.lane.b32.xlu1 %v4020_v43, %s5480_s10  ;;  %2056 = vst.msk [vmem:[#allocation3 + $0x78] sm:$0xf] %vm2025_vm2, %v1990_v13  ;;  %v3497_v43 = vshll.u32 %v3356_v49, 16  ;;  %v6378_v13 = vrot.slane %v3521_v61, 5  ;;  %v3918_v49 = vld [vmem:[#allocation2 + $0x50] sm:$0x1] }
 0x176   : > { %4124 = vrot.lane.b32.xlu0 %v4024_v28, %s5480_s10  ;;  %v4033_v60 = vrot.slane %v3918_v49, 5  ;;  %v2834_v49 = vld [vmem:[#allocation2 + $0x64] sm:$0xf] }
 0x177   : > { %v1992_v32 = vpop.permute.xlu1 %1991  ;;  %v3499_v8 = vrot.slane %v3497_v43, 5  ;;  %v5121_v43 = vrot.slane %v3916_v16, 9  ;;  %v2831_v16 = vld [vmem:[#allocation2 + $0x58] sm:$0xf] }
 0x178   : > { %2057 = vst.msk [vmem:[#allocation3 + $0x7c] sm:$0xf] %vm2025_vm2, %v1992_v32  ;;  %v2123_v37 = vpop.permute.xlu0 %2122  ;;  %v3159_v32 = vld [vmem:[#allocation2 + $0x4c] sm:$0xf]  ;;  %vm4389_vm2 = vcmask 588800  }
 0x179   : > { %4126 = vrot.lane.b32.xlu1 %v4027_v9, %s5480_s10  ;;  %2219 = vst.msk [vmem:[#allocation3] sm:$0xf] %vm2218_vm4, %v2123_v37  ;;  %v3357_v9 = vld [vmem:[#allocation2 + $0x50] sm:$0x1]  ;;  %v3528_v37 = vor.u32 %v3527_v17, %v6378_v13  ;;  %v3500_v48 = vsel %vm5590_vm9, %v3495_v26, %v3499_v8 }
 0x17a   : > { %2699 = vrot.lane.b32.xlu0 %v2408_v33, %s5476_s15  ;;  %v3504_v33 = vor.u32 %v3503_v0, %v3499_v8  ;;  %v3507_v34 = vshll.u32 %v3357_v9, 16  ;;  %v3921_v8 = vld [vmem:[#allocation2 + $0x5c] sm:$0x1]  ;;  %v2477_v9 = vshll.u32 %v2273_v58, 16  ;;  %v2833_v58 = vld [vmem:[#allocation2 + $0x60] sm:$0xe] }
 0x17b   : > { %v2125_v38 = vpop.permute.xlu1 %2124  ;;  %v3529_v44 = vrot.slane %v3528_v37, 4 }
 0x17c   : > { %2220 = vst.msk [vmem:[#allocation3 + $0x4] sm:$0xf] %vm2218_vm4, %v2125_v38  ;;  %v2127_v1 = vpop.permute.xlu0 %2126  ;;  %v3505_v63 = vrot.slane %v3504_v33, 4 }
 0x17d   : > { %2701 = vrot.lane.b32.xlu1 %v2418_v39, %s5476_s15  ;;  %2221 = vst.msk [vmem:[#allocation3 + $0x8] sm:$0xf] %vm2218_vm4, %v2127_v1  ;;  %v3531_v39 = vshll.u32 %v3360_v30, 16  ;;  %v3519_v1 = vrot.slane %v3518_v36, 4 }
 0x17e   : > { %2703 = vrot.lane.b32.xlu0 %v2432_v18, %s5476_s15  ;;  %v3509_v18 = vrot.slane %v3507_v34, 5 }
 0x17f   : > { %v2129_v46 = vpop.permute.xlu1 %2128  ;;  %v3533_v45 = vrot.slane %v3531_v39, 5  ;;  %v3524_v57 = vsel %vm5590_vm9, %v3519_v1, %v6378_v13  ;;  %v2271_v13 = vld [vmem:[#allocation2 + $0x5c] sm:$0x1]  ;;  %v2479_v39 = vrot.slane %v2477_v9, 5 }
 0x180   : > { %2222 = vst.msk [vmem:[#allocation3 + $0xc] sm:$0xf] %vm2218_vm4, %v2129_v46  ;;  %v2131_v55 = vpop.permute.xlu0 %2130  ;;  %v4030_v46 = vrot.slane %v3917_v41, 5  ;;  %v3510_v19 = vsel %vm5590_vm9, %v3505_v63, %v3509_v18  ;;  %v2463_v37 = vshll.u32 %v2271_v13, 16  ;;  %v2274_v41 = vld [vmem:[#allocation2 + $0x68] sm:$0x1] }
 0x181   : > { %2705 = vrot.lane.b32.xlu1 %v2442_v29, %s5476_s15  ;;  %2223 = vst.msk [vmem:[#allocation3 + $0x10] sm:$0xf] %vm2218_vm4, %v2131_v55  ;;  %v2270_v29 = vld [vmem:[#allocation2 + $0x58] sm:$0xf]  ;;  %v2272_v55 = vld [vmem:[#allocation2 + $0x60] sm:$0xf] }
 0x182   : > { %3036 = vrot.lane.b32.xlu0 %v2939_v7, %s5477_s16  ;;  %v3920_v7 = vld [vmem:[#allocation2 + $0x58] sm:$0xf]  ;;  %v2453_v53 = vshll.u32 %v2270_v29, 16  ;;  %v2457_v54 = vshrl.u32 %v2270_v29, 16  ;;  %v4032_v21 = vrot.slane %v4030_v46, 4  ;;  %v2468_v6 = vshrl.u32 %v2272_v55, 16 }
 0x183   : > { %v2133_v27 = vpop.permute.xlu1 %2132  ;;  %v4037_v61 = vrot.slane %v3920_v7, 5  ;;  %v4031_v17 = vsel %vm6010_vm14, %v5121_v43, %v4030_v46  ;;  %v2465_v1 = vrot.slane %v2463_v37, 5 }
 0x184   : > { %2224 = vst.msk [vmem:[#allocation3 + $0x14] sm:$0xf] %vm2218_vm4, %v2133_v27  ;;  %v2135_v14 = vpop.permute.xlu0 %2134  ;;  %v3534_v27 = vsel %vm5590_vm9, %v3529_v44, %v3533_v45  ;;  %v2455_v0 = vrot.slane %v2453_v53, 5  ;;  %v2470_v33 = vrot.slane %v2468_v6, 4  ;;  %v2487_v44 = vshll.u32 %v2274_v41, 16 }
 0x185   : > { %3038 = vrot.lane.b32.xlu1 %v2942_v51, %s5477_s16  ;;  %2225 = vst.msk [vmem:[#allocation3 + $0x18] sm:$0xf] %vm2218_vm4, %v2135_v14  ;;  %v2447_v51 = vshll.u32 %v2269_v22, 16  ;;  %v2471_v14 = vshll.u32 %v2272_v55, 16  ;;  %v4039_v30 = vrot.slane %v4037_v61, 4  ;;  %v2952_v53 = vrot.slane %v2831_v16, 5 }
 0x186   : > { %3040 = vrot.lane.b32.xlu0 %v2946_v4, %s5477_s16  ;;  %v2446_v4 = vrot.slane %v2444_v50, 4  ;;  %v2832_v55 = vld [vmem:[#allocation2 + $0x5c] sm:$0x1]  ;;  %v3362_v6 = vld [vmem:[#allocation2 + $0x64] sm:$0xf] }
 0x187   : > { %v2137_v28 = vpop.permute.xlu1 %2136  ;;  %v2449_v5 = vrot.slane %v2447_v51, 5  ;;  %v2473_v34 = vrot.slane %v2471_v14, 5  ;;  %v2955_v3 = vrot.slane %v2832_v55, 5  ;;  %v5108_v14 = vrot.slane %v2833_v58, 9 }
 0x188   : > { %2226 = vst.msk [vmem:[#allocation3 + $0x1c] sm:$0xf] %vm2218_vm4, %v2137_v28  ;;  %v2139_v31 = vpop.permute.xlu0 %2138  ;;  %v2459_v28 = vrot.slane %v2457_v54, 4  ;;  %v3545_v13 = vshll.u32 %v3362_v6, 16 }
 0x189   : > { %3042 = vrot.lane.b32.xlu1 %v2949_v24, %s5477_s16  ;;  %2227 = vst.msk [vmem:[#allocation3 + $0x20] sm:$0xf] %vm2218_vm4, %v2139_v31  ;;  %v4040_v31 = vrot.slane %v3921_v8, 5  ;;  %v2474_v18 = vor.u32 %v2473_v34, %v2470_v33 }
 0x18a   : > { %3230 = vrot.lane.b32.xlu0 %v3158_v23, %s5478_s25  ;;  %v4034_v23 = vsel %vm6010_vm14, %v4032_v21, %v4033_v60  ;;  %v2460_v36 = vor.u32 %v2459_v28, %v2455_v0 }
 0x18b   : > { %v2141_v35 = vpop.permute.xlu1 %2140 }
 0x18c   : > { %2228 = vst.msk [vmem:[#allocation3 + $0x24] sm:$0xf] %vm2218_vm4, %v2141_v35  ;;  %v2143_v38 = vpop.permute.xlu0 %2142 }
 0x18d   : > { %3232 = vrot.lane.b32.xlu1 %v3159_v32, %s5478_s25  ;;  %2229 = vst.msk [vmem:[#allocation3 + $0x28] sm:$0xf] %vm2218_vm4, %v2143_v38  ;;  %v2450_v32 = vor.u32 %v2449_v5, %v2446_v4  ;;  %v4038_v38 = vsel %vm6010_vm14, %v5122_v15, %v4037_v61  ;;  %v2954_v61 = vrot.slane %v2952_v53, 4  ;;  %v3361_v4 = vld [vmem:[#allocation2 + $0x60] sm:$0xf] }
 0x18e   : > { %3234 = vrot.lane.b32.xlu0 %v3160_v40, %s5478_s25  ;;  %v2483_v40 = vrot.slane %v2481_v11, 4  ;;  %v3536_v28 = vshrl.u32 %v3361_v4, 16  ;;  %v3539_v9 = vshll.u32 %v3361_v4, 16 }
 0x18f   : > { %v2145_v42 = vpop.permute.xlu1 %2144  ;;  %v2451_v63 = vrot.slane %v2450_v32, 4 }
 0x190   : > { %2230 = vst.msk [vmem:[#allocation3 + $0x2c] sm:$0xf] %vm2218_vm4, %v2145_v42  ;;  %v2147_v52 = vpop.permute.xlu0 %2146  ;;  %v2461_v42 = vrot.slane %v2460_v36, 4  ;;  %v2484_v29 = vor.u32 %v2483_v40, %v2479_v39  ;;  %v3538_v33 = vrot.slane %v3536_v28, 4  ;;  %v3541_v34 = vrot.slane %v3539_v9, 5 }
 0x191   : > { %3236 = vrot.lane.b32.xlu1 %v3161_v62, %s5478_s25  ;;  %2231 = vst.msk [vmem:[#allocation3 + $0x30] sm:$0xf] %vm2218_vm4, %v2147_v52  ;;  %v4041_v62 = vsel %vm6010_vm14, %v4039_v30, %v4040_v31  ;;  %v2456_v46 = vsel %vm5590_vm9, %v2451_v63, %v2455_v0  ;;  %v2489_v52 = vrot.slane %v2487_v44, 5  ;;  %v3365_v30 = vld [vmem:[#allocation2 + $0x70] sm:$0xf] }
 0x192   : > { %3791 = vrot.lane.b32.xlu0 %v3500_v48, %s5479_s7  ;;  %v2475_v48 = vrot.slane %v2474_v18, 4  ;;  %v2466_v50 = vsel %vm5590_vm9, %v2461_v42, %v2465_v1  ;;  %v2485_v51 = vrot.slane %v2484_v29, 4  ;;  %v3573_v41 = vshrl.u32 %v3365_v30, 16  ;;  %v3162_v63 = vld [vmem:[#allocation2 + $0x60] sm:$0xf] }
 0x193   : > { %v2149_v56 = vpop.permute.xlu1 %2148  ;;  %v3542_v18 = vor.u32 %v3541_v34, %v3538_v33  ;;  %v3163_v29 = vld [vmem:[#allocation2 + $0x64] sm:$0xf]  ;;  %v3925_v28 = vld [vmem:[#allocation2 + $0x6c] sm:$0xe] }
 0x194   : > { %2232 = vst.msk [vmem:[#allocation3 + $0x34] sm:$0xf] %vm2218_vm4, %v2149_v56  ;;  %v2151_v24 = vpop.permute.xlu0 %2150  ;;  %v2959_v56 = vrot.slane %v2834_v49, 5  ;;  %v2490_v60 = vsel %vm5590_vm9, %v2485_v51, %v2489_v52  ;;  %v3366_v49 = vld [vmem:[#allocation2 + $0x74] sm:$0x1] }
 0x195   : > { %3793 = vrot.lane.b32.xlu1 %v3510_v19, %s5479_s7  ;;  %2233 = vst.msk [vmem:[#allocation3 + $0x38] sm:$0xf] %vm2218_vm4, %v2151_v24  ;;  %v2830_v19 = vld [vmem:[#allocation2 + $0x54] sm:$0xe]  ;;  %v3543_v51 = vrot.slane %v3542_v18, 4 }
 0x196   : > { %3795 = vrot.lane.b32.xlu0 %v3524_v57, %s5479_s7  ;;  %v2480_v57 = vsel %vm5590_vm9, %v2475_v48, %v2479_v39  ;;  %v5107_v43 = vrot.slane %v2830_v19, 9  ;;  %v2961_v24 = vrot.slane %v2959_v56, 4  ;;  %v2960_v31 = vsel %vm6010_vm14, %v5108_v14, %v2959_v56  ;;  %v3924_v14 = vld [vmem:[#allocation2 + $0x68] sm:$0x1]  ;;  %v2277_v18 = vld [vmem:[#allocation2 + $0x74] sm:$0x1] }
 0x197   : > { %v2153_v12 = vpop.permute.xlu1 %2152  ;;  %v3547_v39 = vrot.slane %v3545_v13, 5  ;;  %v3579_v56 = vshll.u32 %v3366_v49, 16 }
 0x198   : > { %2234 = vst.msk [vmem:[#allocation3 + $0x3c] sm:$0xf] %vm2218_vm4, %v2153_v12  ;;  %v2155_v35 = vpop.permute.xlu0 %2154  ;;  %v2953_v0 = vsel %vm6010_vm14, %v5107_v43, %v2952_v53  ;;  %v2956_v12 = vsel %vm6010_vm14, %v2954_v61, %v2955_v3 }
 0x199   : > { %3797 = vrot.lane.b32.xlu1 %v3534_v27, %s5479_s7  ;;  %2235 = vst.msk [vmem:[#allocation3 + $0x40] sm:$0xf] %vm2218_vm4, %v2155_v35  ;;  %v2835_v27 = vld [vmem:[#allocation2 + $0x68] sm:$0x1]  ;;  %v3548_v58 = vsel %vm5590_vm9, %v3543_v51, %v3547_v39 }
 0x19a   : > { %4128 = vrot.lane.b32.xlu0 %v4031_v17, %s5480_s10  ;;  %v2962_v8 = vrot.slane %v2835_v27, 5  ;;  %v3549_v17 = vshrl.u32 %v3362_v6, 16  ;;  %v3922_v6 = vld [vmem:[#allocation2 + $0x60] sm:$0xe] }
 0x19b   : > { %v2157_v26 = vpop.permute.xlu1 %2156  ;;  %v5123_v13 = vrot.slane %v3922_v6, 9  ;;  %v2076_v6 = vld [vmem:[#allocation2 + $0x78] sm:$0xf] }
 0x19c   : > { %2236 = vst.msk [vmem:[#allocation3 + $0x44] sm:$0xf] %vm2218_vm4, %v2157_v26  ;;  %v2684_v22 = vpop.permute.xlu0 %2683  ;;  %v2963_v32 = vsel %vm6010_vm14, %v2961_v24, %v2962_v8  ;;  %v3551_v40 = vrot.slane %v3549_v17, 4  ;;  %v3569_v26 = vshll.u32 %v3365_v30, 16  ;;  %v3926_v8 = vld [vmem:[#allocation2 + $0x70] sm:$0xf] }
 0x19d   : > { %4130 = vrot.lane.b32.xlu1 %v4034_v23, %s5480_s10  ;;  %2780 = vst.msk [vmem:[#allocation3] sm:$0xf] %vm2779_vm6, %v2684_v22  ;;  %v3364_v23 = vld [vmem:[#allocation2 + $0x6c] sm:$0xf] }
 0x19e   : > { %4132 = vrot.lane.b32.xlu0 %v4038_v38, %s5480_s10  ;;  %v3560_v35 = vshrl.u32 %v3364_v23, 16  ;;  %v3563_v36 = vshll.u32 %v3364_v23, 16  ;;  %v3552_v44 = vor.u32 %v3551_v40, %v3547_v39  ;;  %v3571_v16 = vrot.slane %v3569_v26, 5  ;;  %v3927_v39 = vld [vmem:[#allocation2 + $0x74] sm:$0x1] }
 0x19f   : > { %v2686_v45 = vpop.permute.xlu1 %2685  ;;  %v4047_v23 = vrot.slane %v3924_v14, 5  ;;  %v2077_v14 = vld [vmem:[#allocation2 + $0x7c] sm:$0xf] }
 0x1a0   : > { %2781 = vst.msk [vmem:[#allocation3 + $0x4] sm:$0xf] %vm2779_vm6, %v2686_v45  ;;  %v2688_v7 = vpop.permute.xlu0 %2687  ;;  %v3562_v22 = vrot.slane %v3560_v35, 4  ;;  %v3565_v42 = vrot.slane %v3563_v36, 5  ;;  %v3553_v53 = vrot.slane %v3552_v44, 4  ;;  %v4054_v44 = vrot.slane %v3927_v39, 5 }
 0x1a1   : > { %4134 = vrot.lane.b32.xlu1 %v4041_v62, %s5480_s10  ;;  %2782 = vst.msk [vmem:[#allocation3 + $0x8] sm:$0xf] %vm2779_vm6, %v2688_v7  ;;  %v3363_v62 = vld [vmem:[#allocation2 + $0x68] sm:$0x1]  ;;  %v3164_v7 = vld [vmem:[#allocation2 + $0x6c] sm:$0xf] }
 0x1a2   : > { %2707 = vrot.lane.b32.xlu0 %v2456_v46, %s5476_s15  ;;  %v3555_v45 = vshll.u32 %v3363_v62, 16  ;;  %v3575_v46 = vrot.slane %v3573_v41, 4  ;;  %v3566_v52 = vor.u32 %v3565_v42, %v3562_v22  ;;  %v2279_v35 = vld [vmem:[#allocation2 + $0x7c] sm:$0xf] }
 0x1a3   : > { %v2690_v54 = vpop.permute.xlu1 %2689  ;;  %v2525_v22 = vshll.u32 %v2279_v35, 16  ;;  %v2529_v42 = vshrl.u32 %v2279_v35, 16 }
 0x1a4   : > { %2783 = vst.msk [vmem:[#allocation3 + $0xc] sm:$0xf] %vm2779_vm6, %v2690_v54  ;;  %v3021_v21 = vpop.permute.xlu0 %3020  ;;  %v3557_v54 = vrot.slane %v3555_v45, 5  ;;  %v3576_v55 = vor.u32 %v3575_v46, %v3571_v16  ;;  %v3567_v27 = vrot.slane %v3566_v52, 4  ;;  %v5346_v46 = vld [vmem:[%s5559_s27 + $0x78] sm:$0xff]   ;;  %v2511_v52 = vshll.u32 %v2277_v18, 16 }
 0x1a5   : > { %2709 = vrot.lane.b32.xlu1 %v2466_v50, %s5476_s15  ;;  %3117 = vst.msk [vmem:[#allocation3] sm:$0xf] %vm3116_vm8, %v3021_v21  ;;  %v3165_v50 = vld [vmem:[#allocation2 + $0x70] sm:$0xf] }
 0x1a6   : > { %2711 = vrot.lane.b32.xlu0 %v2480_v57, %s5476_s15  ;;  %v3923_v57 = vld [vmem:[#allocation2 + $0x64] sm:$0xf]  ;;  %v3558_v3 = vsel %vm5590_vm9, %v3553_v53, %v3557_v54  ;;  %v3577_v4 = vrot.slane %v3576_v55, 4  ;;  %v6492_v54 = vrot.slane %v2525_v22, 5  ;;  %v2531_v55 = vrot.slane %v2529_v42, 4 }
 0x1a7   : > { %v3023_v5 = vpop.permute.xlu1 %3022  ;;  %v4044_v21 = vrot.slane %v3923_v57, 5  ;;  %v555_v42 = vld [vmem:[#allocation2 + $0xc8] sm:$0x1] }
 0x1a8   : > { %3118 = vst.msk [vmem:[#allocation3 + $0x4] sm:$0xf] %vm3116_vm8, %v3023_v5  ;;  %v3025_v11 = vpop.permute.xlu0 %3024  ;;  %v3581_v5 = vrot.slane %v3579_v56, 5  ;;  %v5462_v56 = vld [vmem:[%s7063_s1] ss:$0 sm:$0xff] }
 0x1a9   : > { %2713 = vrot.lane.b32.xlu1 %v2490_v60, %s5476_s15  ;;  %3119 = vst.msk [vmem:[#allocation3 + $0x8] sm:$0xf] %vm3116_vm8, %v3025_v11  ;;  %v2275_v60 = vld [vmem:[#allocation2 + $0x6c] sm:$0xf]  ;;  %v4046_v17 = vrot.slane %v4044_v21, 4  ;;  %v4045_v62 = vsel %vm6010_vm14, %v5123_v13, %v4044_v21 }
 0x1aa   : > { %3044 = vrot.lane.b32.xlu0 %v2953_v0, %s5477_s16  ;;  %v2276_v0 = vld [vmem:[#allocation2 + $0x70] sm:$0xf]  ;;  %v2492_v9 = vshrl.u32 %v2275_v60, 16  ;;  %v2495_v11 = vshll.u32 %v2275_v60, 16  ;;  %v2280_v60 = vld [vmem:[#allocation2 + $0x80] sm:$0x1] }
 0x1ab   : > { %v3027_v15 = vpop.permute.xlu1 %3026  ;;  %v2501_v33 = vshll.u32 %v2276_v0, 16  ;;  %v2505_v34 = vshrl.u32 %v2276_v0, 16  ;;  %v2513_v0 = vrot.slane %v2511_v52, 5  ;;  %v505_v13 = vld [vmem:[#allocation2 + $0xc0] sm:$0x1] }
 0x1ac   : > { %3120 = vst.msk [vmem:[#allocation3 + $0xc] sm:$0xf] %vm3116_vm8, %v3027_v15  ;;  %v3215_v37 = vpop.permute.xlu0 %3214  ;;  %v2278_v15 = vld [vmem:[#allocation2 + $0x78] sm:$0xf]  ;;  %v2494_v40 = vrot.slane %v2492_v9, 4  ;;  %v2497_v26 = vrot.slane %v2495_v11, 5  ;;  %v2532_v9 = vor.u32 %v2531_v55, %v6492_v54 }
 0x1ad   : > { %3046 = vrot.lane.b32.xlu1 %v2956_v12, %s5477_s16  ;;  %3311 = vst.msk [vmem:[#allocation3] sm:$0xf] %vm3310_vm12, %v3215_v37  ;;  %v3572_v12 = vsel %vm5590_vm9, %v3567_v27, %v3571_v16  ;;  %v5124_v37 = vrot.slane %v3925_v28, 9  ;;  %v2516_v41 = vshrl.u32 %v2278_v15, 16  ;;  %v6483_v45 = vrot.slane %v2501_v33, 5 }
 0x1ae   : > { %3048 = vrot.lane.b32.xlu0 %v2960_v31, %s5477_s16  ;;  %v3582_v31 = vsel %vm5590_vm9, %v3577_v4, %v3581_v5  ;;  %v2507_v16 = vrot.slane %v2505_v34, 4  ;;  %v2498_v51 = vor.u32 %v2497_v26, %v2494_v40  ;;  %v5463_v4 = vld [vmem:[%s7064_s2] ss:$0 sm:$0xff]  ;;  %v2535_v11 = vshll.u32 %v2280_v60, 16  ;;  %v3367_v52 = vld [vmem:[#allocation2 + $0x78] sm:$0xf] }
 0x1af   : > { %v3217_v38 = vpop.permute.xlu1 %3216  ;;  %v2533_v39 = vrot.slane %v2532_v9, 4 }
 0x1b0   : > { %3312 = vst.msk [vmem:[#allocation3 + $0x4] sm:$0xf] %vm3310_vm12, %v3217_v38  ;;  %v3219_v1 = vpop.permute.xlu0 %3218  ;;  %v2519_v38 = vshll.u32 %v2278_v15, 16  ;;  %v2508_v21 = vor.u32 %v2507_v16, %v6483_v45  ;;  %v2537_v40 = vrot.slane %v2535_v11, 5  ;;  %v2839_v16 = vld [vmem:[#allocation2 + $0x78] sm:$0xe] }
 0x1b1   : > { %3050 = vrot.lane.b32.xlu1 %v2963_v32, %s5477_s16  ;;  %3313 = vst.msk [vmem:[#allocation3 + $0x8] sm:$0xf] %vm3310_vm12, %v3219_v1  ;;  %v4051_v32 = vrot.slane %v3926_v8, 5  ;;  %v3370_v11 = vld [vmem:[#allocation2 + $0x84] sm:$0xf] }
 0x1b2   : > { %3238 = vrot.lane.b32.xlu0 %v3162_v63, %s5478_s25  ;;  %v4048_v63 = vsel %vm6010_vm14, %v4046_v17, %v4047_v23  ;;  %v2521_v53 = vrot.slane %v2519_v38, 5  ;;  %v2509_v23 = vrot.slane %v2508_v21, 4  ;;  %v2538_v55 = vsel %vm5590_vm9, %v2533_v39, %v2537_v40 }
 0x1b3   : > { %v3221_v48 = vpop.permute.xlu1 %3220  ;;  %v4052_v49 = vsel %vm6010_vm14, %v5124_v37, %v4051_v32 }
 0x1b4   : > { %3314 = vst.msk [vmem:[#allocation3 + $0xc] sm:$0xf] %vm3310_vm12, %v3221_v48  ;;  %v3776_v19 = vpop.permute.xlu0 %3775 }
 0x1b5   : > { %3240 = vrot.lane.b32.xlu1 %v3163_v29, %s5478_s25  ;;  %3872 = vst.msk [vmem:[#allocation3] sm:$0xf] %vm3871_vm13, %v3776_v19  ;;  %v4053_v29 = vrot.slane %v4051_v32, 4  ;;  %v2518_v19 = vrot.slane %v2516_v41, 4  ;;  %v2840_v41 = vld [vmem:[#allocation2 + $0x7c] sm:$0xf] }
 0x1b6   : > { %3242 = vrot.lane.b32.xlu0 %v3164_v7, %s5478_s25  ;;  %v5330_v7 = vunpack.c.l.bf16 %v5346_v46 }
 0x1b7   : > { %v3778_v43 = vpop.permute.xlu1 %3777  ;;  %v4055_v27 = vsel %vm6010_vm14, %v4053_v29, %v4054_v44  ;;  %v2522_v28 = vor.u32 %v2521_v53, %v2518_v19  ;;  %v2838_v29 = vld [vmem:[#allocation2 + $0x74] sm:$0x1]  ;;  %v556_v19 = vsel %vm5548_vm7, 0, %v555_v42 }
 0x1b8   : > { %3873 = vst.msk [vmem:[#allocation3 + $0x4] sm:$0xf] %vm3871_vm13, %v3778_v43  ;;  %v3780_v61 = vpop.permute.xlu0 %3779  ;;  %v374_v57 = vmul.f32 %v5462_v56, %v5330_v7  ;;  %557 = vst [vmem:[#allocation2 + $0xc8] sm:$0x1] %v556_v19 }
 0x1b9   : > { %3244 = vrot.lane.b32.xlu1 %v3165_v50, %s5478_s25  ;;  %3874 = vst.msk [vmem:[#allocation3 + $0x8] sm:$0xf] %vm3871_vm13, %v3780_v61  ;;  %v5331_v50 = vunpack.c.h.bf16 %v5346_v46  ;;  %v2523_v37 = vrot.slane %v2522_v28, 4  ;;  %v2973_v46 = vrot.slane %v2840_v41, 5  ;;  %v3166_v41 = vld [vmem:[#allocation2 + $0x78] sm:$0xf] }
 0x1ba   : > { %3799 = vrot.lane.b32.xlu0 %v3548_v58, %s5479_s7  ;;  %v413_v5 = vadd.f32 %v5463_v4, %v374_v57  ;;  %v2969_v57 = vrot.slane %v2838_v29, 5 }
 0x1bb   : > { %v3782_v24 = vpop.permute.xlu1 %3781  ;;  %v375_v43 = vmul.f32 %v5462_v56, %v5331_v50  ;;  %v2528_v7 = vsel %vm5590_vm9, %v2523_v37, %v6492_v54  ;;  %v5110_v54 = vrot.slane %v2839_v16, 9  ;;  %v2975_v10 = vrot.slane %v2973_v46, 4  ;;  %v3168_v16 = vld [vmem:[#allocation2 + $0x84] sm:$0xf] }
 0x1bc   : > { %3875 = vst.msk [vmem:[#allocation3 + $0xc] sm:$0xf] %vm3871_vm13, %v3782_v24  ;;  %v4113_v30 = vpop.permute.xlu0 %4112  ;;  %v2499_v24 = vrot.slane %v2498_v51, 4  ;;  %v445_v15 = vmax.f32 %v413_v5, 0.0  ;;  %v2841_v51 = vld [vmem:[#allocation2 + $0x80] sm:$0x1] }
 0x1bd   : > { %3801 = vrot.lane.b32.xlu1 %v3558_v3, %s5479_s7  ;;  %4209 = vst.msk [vmem:[#allocation3] sm:$0xf] %vm4208_vm15, %v4113_v30  ;;  %v414_v8 = vadd.f32 %v5463_v4, %v375_v43  ;;  %v506_v30 = vsel %vm5533_vm5, 0, %v505_v13  ;;  %v3368_v43 = vld [vmem:[#allocation2 + $0x7c] sm:$0xf]  ;;  %v3584_v4 = vshrl.u32 %v3367_v52, 16  ;;  %v2974_v20 = vsel %vm6010_vm14, %v5110_v54, %v2973_v46 }
 0x1be   : > { %3803 = vrot.lane.b32.xlu0 %v3572_v12, %s5479_s7  ;;  %v6509_v12 = vld [vmem:[#allocation2 + $0x70] sm:$0xf]  ;;  %507 = vst [vmem:[#allocation2 + $0xc0] sm:$0x1] %v506_v30  ;;  %v2504_v34 = vsel %vm5590_vm9, %v2499_v24, %v6483_v45  ;;  %v5234_v35 = vpack.c.bf16 %v445_v15, %v445_v15  ;;  %v3593_v24 = vshll.u32 %v3368_v43, 16  ;;  %v3597_v9 = vshrl.u32 %v3368_v43, 16 }
 0x1bf   : > { %v4115_v36 = vpop.permute.xlu1 %4114  ;;  %v2966_v26 = vrot.slane %v6509_v12, 5  ;;  %v3371_v13 = vld [vmem:[#allocation2 + $0x88] sm:$0xf] }
 0x1c0   : > { %4210 = vst.msk [vmem:[#allocation3 + $0x4] sm:$0xf] %vm4208_vm15, %v4115_v36  ;;  %v4117_v1 = vpop.permute.xlu0 %4116  ;;  %v912_v18 = vshrl.u32 %v5234_v35, 16  ;;  %v915_v44 = vshll.u32 %v5234_v35, 16  ;;  %v3595_v30 = vrot.slane %v3593_v24, 5  ;;  %v3599_v35 = vrot.slane %v3597_v9, 4 }
 0x1c1   : > { %3805 = vrot.lane.b32.xlu1 %v3582_v31, %s5479_s7  ;;  %4211 = vst.msk [vmem:[#allocation3 + $0x8] sm:$0xf] %vm4208_vm15, %v4117_v1  ;;  %v446_v31 = vmax.f32 %v414_v8, 0.0  ;;  %v2968_v56 = vrot.slane %v2966_v26, 4  ;;  %v3621_v37 = vshrl.u32 %v3371_v13, 16 }
 0x1c2   : > { %4136 = vrot.lane.b32.xlu0 %v4045_v62, %s5480_s10  ;;  %v2514_v62 = vsel %vm5590_vm9, %v2509_v23, %v2513_v0  ;;  %v3586_v23 = vrot.slane %v3584_v4, 4  ;;  %v3600_v42 = vor.u32 %v3599_v35, %v3595_v30  ;;  %v3932_v43 = vld [vmem:[#allocation2 + $0x88] sm:$0xf]  ;;  %v3933_v24 = vld [vmem:[#allocation2 + $0x8c] sm:$0x1] }
 0x1c3   : > { %v4119_v48 = vpop.permute.xlu1 %4118  ;;  %v5235_v36 = vpack.c.bf16 %v446_v31, %v446_v31  ;;  %v2970_v28 = vsel %vm6010_vm14, %v2968_v56, %v2969_v57  ;;  %v3608_v31 = vshrl.u32 %v3370_v11, 16  ;;  %v3623_v29 = vrot.slane %v3621_v37, 4  ;;  %v2284_v35 = vld [vmem:[#allocation2 + $0x90] sm:$0xf] }
 0x1c4   : > { %4212 = vst.msk [vmem:[#allocation3 + $0xc] sm:$0xf] %vm4208_vm15, %v4119_v48  ;;  %v2692_v58 = vpop.permute.xlu0 %2691  ;;  %v914_v48 = vrot.slane %v912_v18, 7  ;;  %v4065_v4 = vrot.slane %v3932_v43, 5 }
 0x1c5   : > { %4138 = vrot.lane.b32.xlu1 %v4048_v63, %s5480_s10  ;;  %2784 = vst.msk [vmem:[#allocation3 + $0x10] sm:$0xf] %vm2779_vm6, %v2692_v58  ;;  %v2836_v63 = vld [vmem:[#allocation2 + $0x6c] sm:$0xe]  ;;  %v920_v22 = vshrl.u32 %v5235_v36, 16  ;;  %v923_v45 = vshll.u32 %v5235_v36, 16 }
 0x1c6   : > { %4140 = vrot.lane.b32.xlu0 %v4052_v49, %s5480_s10  ;;  %v5109_v50 = vrot.slane %v2836_v63, 9  ;;  %v917_v58 = vor.u32 %v915_v44, %v914_v48  ;;  %v918_v60 = vrot.slane %v914_v48, 4  ;;  %v3617_v36 = vshll.u32 %v3371_v13, 16 }
 0x1c7   : > { %v2694_v61 = vpop.permute.xlu1 %2693  ;;  %v5444_v3 = vld [vmem:[#allocation3] sm:$0xff]   ;;  %v922_v49 = vrot.slane %v920_v22, 7 }
 0x1c8   : > { %2785 = vst.msk [vmem:[#allocation3 + $0x14] sm:$0xf] %vm2779_vm6, %v2694_v61  ;;  %5378 = vmatprep.mubr.msk.bf16.mxu0 %vm4389_vm2, %v5444_v3  ;;  %v2696_v17 = vpop.permute.xlu0 %2695  ;;  %v2976_v3 = vrot.slane %v2841_v51, 5  ;;  %v3167_v22 = vld [vmem:[#allocation2 + $0x7c] sm:$0xf] }
 0x1c9   : > { %4142 = vrot.lane.b32.xlu1 %v4055_v27, %s5480_s10  ;;  %2786 = vst.msk [vmem:[#allocation3 + $0x18] sm:$0xf] %vm2779_vm6, %v2696_v17  ;;  %v1083_v27 = vld [vmem:[#allocation2 + $0xc0] sm:$0xf]  ;;  %v925_v61 = vor.u32 %v923_v45, %v922_v49  ;;  %v927_v12 = vrot.slane %v922_v49, 4 }
 0x1ca   : > { %2158 = vrot.lane.b32.xlu0 %v2076_v6, %s5475_s14  ;;  %v1084_v5 = vsel %vm5617_vm11, %v917_v58, %v1083_v27  ;;  %v2967_v6 = vsel %vm6010_vm14, %v5109_v50, %v2966_v26  ;;  %v2977_v17 = vsel %vm6010_vm14, %v2975_v10, %v2976_v3  ;;  %v3369_v26 = vld [vmem:[#allocation2 + $0x80] sm:$0x1]  ;;  %v3372_v45 = vld [vmem:[#allocation2 + $0x8c] sm:$0x1]  ;;  %v3601_v50 = vrot.slane %v3600_v42, 4 }
 0x1cb   : > { %v2698_v32 = vpop.permute.xlu1 %2697  ;;  %v5445_v33 = vld [vmem:[#allocation3 + $0x8] sm:$0xff]   ;;  %1085 = vst [vmem:[#allocation2 + $0xc0] sm:$0xf] %v1084_v5  ;;  %v926_v8 = vsel %vm5610_vm10, %v918_v60, %v925_v61  ;;  %v3603_v2 = vshll.u32 %v3369_v26, 16  ;;  %v3627_v19 = vshll.u32 %v3372_v45, 16 }
 0x1cc   : > { %2787 = vst.msk [vmem:[#allocation3 + $0x1c] sm:$0xf] %vm2779_vm6, %v2698_v32  ;;  %5379 = vmatmul.mubr.msk.bf16.vlgmr.msra.gmra.mxu0 %vm4389_vm2, %v5445_v33  ;;  %v3029_v38 = vpop.permute.xlu0 %3028  ;;  %v3611_v32 = vshll.u32 %v3370_v11, 16  ;;  %v1087_v33 = vld [vmem:[#allocation2 + $0xc8] sm:$0x1] }
 0x1cd   : > { %2160 = vrot.lane.b32.xlu1 %v2077_v14, %s5475_s14  ;;  %3121 = vst.msk [vmem:[#allocation3 + $0x10] sm:$0xf] %vm3116_vm8, %v3029_v38  ;;  %v3587_v14 = vshll.u32 %v3367_v52, 16  ;;  %v1088_v39 = vsel %vm5533_vm5, %v927_v12, %v1087_v33  ;;  %v3605_v51 = vrot.slane %v3603_v2, 5  ;;  %v3629_v54 = vrot.slane %v3627_v19, 5 }
 0x1ce   : > { %2715 = vrot.lane.b32.xlu0 %v2504_v34, %s5476_s15  ;;  %1086 = vst.msk [vmem:[#allocation2 + $0xc4] sm:$0xf] %vm447_vm0, %v926_v8  ;;  %1089 = vst [vmem:[#allocation2 + $0xc8] sm:$0x1] %v1088_v39  ;;  %v3613_v63 = vrot.slane %v3611_v32, 5  ;;  %vm4603_vm5 = vcmask 64512  }
 0x1cf   : > { %v3031_v1 = vpop.permute.xlu1 %3030  ;;  %v3589_v15 = vrot.slane %v3587_v14, 5  ;;  %v3606_v27 = vsel %vm5590_vm9, %v3601_v50, %v3605_v51  ;;  %v3928_v60 = vld [vmem:[#allocation2 + $0x78] sm:$0xe]  ;;  %v3930_v3 = vld [vmem:[#allocation2 + $0x80] sm:$0x1] }
 0x1d0   : > { %3122 = vst.msk [vmem:[#allocation3 + $0x14] sm:$0xf] %vm3116_vm8, %v3031_v1  ;;  %v3033_v53 = vpop.permute.xlu0 %3032  ;;  %v3619_v1 = vrot.slane %v3617_v36, 5  ;;  %v3931_v14 = vld [vmem:[#allocation2 + $0x84] sm:$0xe]  ;;  %v4061_v9 = vrot.slane %v3930_v3, 5 }
 0x1d1   : > { %2717 = vrot.lane.b32.xlu1 %v2514_v62, %s5476_s15  ;;  %3123 = vst.msk [vmem:[#allocation3 + $0x18] sm:$0xf] %vm3116_vm8, %v3033_v53  ;;  %v3590_v38 = vor.u32 %v3589_v15, %v3586_v23  ;;  %v3610_v62 = vrot.slane %v3608_v31, 4  ;;  %v2281_v11 = vld [vmem:[#allocation2 + $0x84] sm:$0xf]  ;;  %v5126_v13 = vrot.slane %v3931_v14, 9 }
 0x1d2   : > { %2719 = vrot.lane.b32.xlu0 %v2528_v7, %s5476_s15  ;;  %v3169_v7 = vld [vmem:[#allocation2 + $0x88] sm:$0xf]  ;;  %v3624_v52 = vor.u32 %v3623_v29, %v3619_v1  ;;  %v2540_v15 = vshrl.u32 %v2281_v11, 16  ;;  %v2285_v39 = vld [vmem:[#allocation2 + $0x94] sm:$0xf] }
 0x1d3   : > { %v3035_v21 = vpop.permute.xlu1 %3034  ;;  %v3591_v46 = vrot.slane %v3590_v38, 4  ;;  %v3614_v48 = vor.u32 %v3613_v63, %v3610_v62  ;;  %v2564_v62 = vshrl.u32 %v2284_v35, 16  ;;  %v2567_v63 = vshll.u32 %v2284_v35, 16  ;;  %v2283_v45 = vld [vmem:[#allocation2 + $0x8c] sm:$0x1] }
 0x1d4   : > { %3124 = vst.msk [vmem:[#allocation3 + $0x1c] sm:$0xf] %vm3116_vm8, %v3035_v21  ;;  %v3223_v0 = vpop.permute.xlu0 %3222  ;;  %v3625_v21 = vrot.slane %v3624_v52, 4  ;;  %v2573_v2 = vshll.u32 %v2285_v39, 16  ;;  %v2079_v50 = vld [vmem:[#allocation2 + $0x88] sm:$0xf] }
 0x1d5   : > { %2721 = vrot.lane.b32.xlu1 %v2538_v55, %s5476_s15  ;;  %3315 = vst.msk [vmem:[#allocation3 + $0x10] sm:$0xf] %vm3310_vm12, %v3223_v0  ;;  %v3929_v55 = vld [vmem:[#allocation2 + $0x7c] sm:$0xf]  ;;  %v3596_v56 = vsel %vm5590_vm9, %v3591_v46, %v3595_v30  ;;  %v3615_v57 = vrot.slane %v3614_v48, 4  ;;  %v2543_v30 = vshll.u32 %v2281_v11, 16 }
 0x1d6   : > { %3052 = vrot.lane.b32.xlu0 %v2967_v6, %s5477_s16  ;;  %v4058_v61 = vrot.slane %v3929_v55, 5  ;;  %v5125_v6 = vrot.slane %v3928_v60, 9  ;;  %v3630_v0 = vsel %vm5590_vm9, %v3625_v21, %v3629_v54  ;;  %v2566_v48 = vrot.slane %v2564_v62, 4  ;;  %v2081_v21 = vld [vmem:[#allocation2 + $0x94] sm:$0xf] }
 0x1d7   : > { %v3225_v25 = vpop.permute.xlu1 %3224  ;;  %v3620_v5 = vsel %vm5590_vm9, %v3615_v57, %v3619_v1  ;;  %v2545_v38 = vrot.slane %v2543_v30, 5  ;;  %v2577_v1 = vshrl.u32 %v2285_v39, 16  ;;  %v2559_v52 = vshll.u32 %v2283_v45, 16  ;;  %v2080_v57 = vld [vmem:[#allocation2 + $0x90] sm:$0xf] }
 0x1d8   : > { %3316 = vst.msk [vmem:[#allocation3 + $0x14] sm:$0xf] %vm3310_vm12, %v3225_v25  ;;  %v3227_v34 = vpop.permute.xlu0 %3226  ;;  %v2282_v25 = vld [vmem:[#allocation2 + $0x88] sm:$0xf]  ;;  %v4059_v23 = vsel %vm6010_vm14, %v5125_v6, %v4058_v61  ;;  %v2575_v19 = vrot.slane %v2573_v2, 5 }
 0x1d9   : > { %3054 = vrot.lane.b32.xlu1 %v2970_v28, %s5477_s16  ;;  %3317 = vst.msk [vmem:[#allocation3 + $0x18] sm:$0xf] %vm3310_vm12, %v3227_v34  ;;  %v4060_v28 = vrot.slane %v4058_v61, 4  ;;  %v2549_v33 = vshll.u32 %v2282_v25, 16  ;;  %v2553_v34 = vshrl.u32 %v2282_v25, 16  ;;  %v2561_v60 = vrot.slane %v2559_v52, 5 }
 0x1da   : > { %3056 = vrot.lane.b32.xlu0 %v2974_v20, %s5477_s16  ;;  %v4067_v20 = vrot.slane %v4065_v4, 4  ;;  %v2846_v14 = vld [vmem:[#allocation2 + $0x94] sm:$0xf]  ;;  %v2844_v25 = vld [vmem:[#allocation2 + $0x8c] sm:$0x1] }
 0x1db   : > { %v3229_v40 = vpop.permute.xlu1 %3228  ;;  %v4062_v32 = vsel %vm6010_vm14, %v4060_v28, %v4061_v9  ;;  %v2555_v42 = vrot.slane %v2553_v34, 4  ;;  %v2842_v9 = vld [vmem:[#allocation2 + $0x84] sm:$0xe]  ;;  %v3373_v34 = vld [vmem:[#allocation2 + $0x90] sm:$0xf] }
 0x1dc   : > { %3318 = vst.msk [vmem:[#allocation3 + $0x1c] sm:$0xf] %vm3310_vm12, %v3229_v40  ;;  %v3784_v18 = vpop.permute.xlu0 %3783  ;;  %v4066_v40 = vsel %vm6010_vm14, %v5126_v13, %v4065_v4  ;;  %v2843_v4 = vld [vmem:[#allocation2 + $0x88] sm:$0xf]  ;;  %v2987_v13 = vrot.slane %v2846_v14, 5 }
 0x1dd   : > { %3058 = vrot.lane.b32.xlu1 %v2977_v17, %s5477_s16  ;;  %3876 = vst.msk [vmem:[#allocation3 + $0x10] sm:$0xf] %vm3871_vm13, %v3784_v18  ;;  %v4068_v17 = vrot.slane %v3933_v24, 5  ;;  %v2980_v11 = vrot.slane %v2843_v4, 5  ;;  %v3172_v4 = vld [vmem:[#allocation2 + $0x9c] sm:$0xf] }
 0x1de   : > { %3246 = vrot.lane.b32.xlu0 %v3166_v41, %s5478_s25  ;;  %v2542_v41 = vrot.slane %v2540_v15, 4  ;;  %v2847_v15 = vld [vmem:[#allocation2 + $0x98] sm:$0x1]  ;;  %v2989_v39 = vrot.slane %v2987_v13, 4 }
 0x1df   : > { %v3786_v44 = vpop.permute.xlu1 %3785  ;;  %v4069_v26 = vsel %vm6010_vm14, %v4067_v20, %v4068_v17  ;;  %v5111_v17 = vrot.slane %v2842_v9, 9 }
 0x1e0   : > { %3877 = vst.msk [vmem:[#allocation3 + $0x14] sm:$0xf] %vm3871_vm13, %v3786_v44  ;;  %v3788_v49 = vpop.permute.xlu0 %3787  ;;  %v2546_v46 = vor.u32 %v2545_v38, %v2542_v41  ;;  %v3632_v41 = vshrl.u32 %v3373_v34, 16  ;;  %v3635_v38 = vshll.u32 %v3373_v34, 16 }
 0x1e1   : > { %3248 = vrot.lane.b32.xlu1 %v3167_v22, %s5478_s25  ;;  %3878 = vst.msk [vmem:[#allocation3 + $0x18] sm:$0xf] %vm3871_vm13, %v3788_v49  ;;  %v2551_v22 = vrot.slane %v2549_v33, 5  ;;  %v2569_v49 = vrot.slane %v2567_v63, 5  ;;  %v2983_v33 = vrot.slane %v2844_v25, 5 }
 0x1e2   : > { %3250 = vrot.lane.b32.xlu0 %v3168_v16, %s5478_s25  ;;  %v2078_v16 = vld [vmem:[#allocation2 + $0x84] sm:$0xf]  ;;  %v2547_v43 = vrot.slane %v2546_v46, 4  ;;  %v3634_v45 = vrot.slane %v3632_v41, 4 }
 0x1e3   : > { %v3790_v53 = vpop.permute.xlu1 %3789  ;;  %v2556_v51 = vor.u32 %v2555_v42, %v2551_v22  ;;  %v3376_v42 = vld [vmem:[#allocation2 + $0x9c] sm:$0xf] }
 0x1e4   : > { %3879 = vst.msk [vmem:[#allocation3 + $0x1c] sm:$0xf] %vm3871_vm13, %v3790_v53  ;;  %v4121_v58 = vpop.permute.xlu0 %4120  ;;  %v2579_v53 = vrot.slane %v2577_v1, 4  ;;  %v3377_v1 = vld [vmem:[#allocation2 + $0xa0] sm:$0xf]  ;;  %v3656_v46 = vshrl.u32 %v3376_v42, 16 }
 0x1e5   : > { %3252 = vrot.lane.b32.xlu1 %v3169_v7, %s5478_s25  ;;  %4213 = vst.msk [vmem:[#allocation3 + $0x10] sm:$0xf] %vm4208_vm15, %v4121_v58  ;;  %v2570_v58 = vor.u32 %v2569_v49, %v2566_v48  ;;  %v2557_v54 = vrot.slane %v2556_v51, 4  ;;  %v3659_v48 = vshll.u32 %v3376_v42, 16  ;;  %v3665_v51 = vshll.u32 %v3377_v1, 16 }
 0x1e6   : > { %3807 = vrot.lane.b32.xlu0 %v3596_v56, %s5479_s7  ;;  %v2286_v56 = vld [vmem:[#allocation2 + $0x98] sm:$0x1]  ;;  %v2580_v61 = vor.u32 %v2579_v53, %v2575_v19  ;;  %v3669_v52 = vshrl.u32 %v3377_v1, 16 }
 0x1e7   : > { %v4123_v10 = vpop.permute.xlu1 %4122  ;;  %v2571_v6 = vrot.slane %v2570_v58, 4  ;;  %v3375_v53 = vld [vmem:[#allocation2 + $0x98] sm:$0x1]  ;;  %v3661_v58 = vrot.slane %v3659_v48, 5 }
 0x1e8   : > { %4214 = vst.msk [vmem:[#allocation3 + $0x14] sm:$0xf] %vm4208_vm15, %v4123_v10  ;;  %v4125_v8 = vpop.permute.xlu0 %4124  ;;  %v2583_v10 = vshll.u32 %v2286_v56, 16  ;;  %v3171_v56 = vld [vmem:[#allocation2 + $0x94] sm:$0xf] }
 0x1e9   : > { %3809 = vrot.lane.b32.xlu1 %v3606_v27, %s5479_s7  ;;  %4215 = vst.msk [vmem:[#allocation3 + $0x18] sm:$0xf] %vm4208_vm15, %v4125_v8  ;;  %v2562_v8 = vsel %vm5590_vm9, %v2557_v54, %v2561_v60  ;;  %v2576_v20 = vsel %vm5590_vm9, %v2571_v6, %v2575_v19  ;;  %v3651_v54 = vshll.u32 %v3375_v53, 16  ;;  %v3667_v60 = vrot.slane %v3665_v51, 5  ;;  %v2290_v51 = vld [vmem:[#allocation2 + $0xa8] sm:$0xf] }
 0x1ea   : > { %3811 = vrot.lane.b32.xlu0 %v3620_v5, %s5479_s7  ;;  %v2552_v5 = vsel %vm5590_vm9, %v2547_v43, %v2551_v22  ;;  %v2585_v28 = vrot.slane %v2583_v10, 5  ;;  %v3658_v43 = vrot.slane %v3656_v46, 4  ;;  %v3671_v10 = vrot.slane %v3669_v52, 4 }
 0x1eb   : > { %v4127_v12 = vpop.permute.xlu1 %4126 }
 0x1ec   : > { %4216 = vst.msk [vmem:[#allocation3 + $0x1c] sm:$0xf] %vm4208_vm15, %v4127_v12  ;;  %v2700_v31 = vpop.permute.xlu0 %2699  ;;  %v3662_v6 = vor.u32 %v3661_v58, %v3658_v43  ;;  %v3672_v9 = vor.u32 %v3671_v10, %v3667_v60  ;;  %v2612_v43 = vshrl.u32 %v2290_v51, 16  ;;  %v2615_v58 = vshll.u32 %v2290_v51, 16 }
 0x1ed   : > { %3813 = vrot.lane.b32.xlu1 %v3630_v0, %s5479_s7  ;;  %2788 = vst.msk [vmem:[#allocation3 + $0x20] sm:$0xf] %vm2779_vm6, %v2700_v31  ;;  %v2581_v0 = vrot.slane %v2580_v61, 4  ;;  %v3378_v61 = vld [vmem:[#allocation2 + $0xa4] sm:$0x1] }
 0x1ee   : > { %4144 = vrot.lane.b32.xlu0 %v4059_v23, %s5480_s10  ;;  %v2845_v23 = vld [vmem:[#allocation2 + $0x90] sm:$0xe]  ;;  %v3675_v14 = vshll.u32 %v3378_v61, 16 }
 0x1ef   : > { %v2702_v36 = vpop.permute.xlu1 %2701  ;;  %v5446_v37 = vld [vmem:[#allocation3 + $0x10] sm:$0xff]   ;;  %v2586_v31 = vsel %vm5590_vm9, %v2581_v0, %v2585_v28  ;;  %v3653_v28 = vrot.slane %v3651_v54, 5 }
 0x1f0   : > { %2789 = vst.msk [vmem:[#allocation3 + $0x24] sm:$0xf] %vm2779_vm6, %v2702_v36  ;;  %5382 = vmatprep.mubr.msk.bf16.mxu0 %vm4389_vm2, %v5446_v37  ;;  %v2704_v18 = vpop.permute.xlu0 %2703  ;;  %v3374_v36 = vld [vmem:[#allocation2 + $0x94] sm:$0xf]  ;;  %v5112_v37 = vrot.slane %v2845_v23, 9 }
 0x1f1   : > { %4146 = vrot.lane.b32.xlu1 %v4062_v32, %s5480_s10  ;;  %2790 = vst.msk [vmem:[#allocation3 + $0x28] sm:$0xf] %vm2779_vm6, %v2704_v18  ;;  %v2982_v32 = vrot.slane %v2980_v11, 4  ;;  %v3641_v18 = vshll.u32 %v3374_v36, 16  ;;  %v3645_v22 = vshrl.u32 %v3374_v36, 16 }
 0x1f2   : > { %4148 = vrot.lane.b32.xlu0 %v4066_v40, %s5480_s10  ;;  %v2990_v40 = vrot.slane %v2847_v15, 5 }
 0x1f3   : > { %v2706_v29 = vpop.permute.xlu1 %2705  ;;  %v5447_v44 = vld [vmem:[#allocation3 + $0x18] sm:$0xff]   ;;  %v2984_v63 = vsel %vm6010_vm14, %v2982_v32, %v2983_v33 }
 0x1f4   : > { %2791 = vst.msk [vmem:[#allocation3 + $0x2c] sm:$0xf] %vm2779_vm6, %v2706_v29  ;;  %5383 = vmatmul.mubr.msk.bf16.gmra.mxu0 %vm4389_vm2, %v5447_v44  ;;  %v3037_v7 = vpop.permute.xlu0 %3036  ;;  %v2988_v29 = vsel %vm6010_vm14, %v5112_v37, %v2987_v13  ;;  %v2991_v44 = vsel %vm6010_vm14, %v2989_v39, %v2990_v40  ;;  %v3663_v13 = vrot.slane %v3662_v6, 4  ;;  %v3937_v40 = vld [vmem:[#allocation2 + $0x9c] sm:$0xe]  ;;  %v2614_v6 = vrot.slane %v2612_v43, 4 }
 0x1f5   : > { %4150 = vrot.lane.b32.xlu1 %v4069_v26, %s5480_s10  ;;  %3125 = vst.msk [vmem:[#allocation3 + $0x20] sm:$0xf] %vm3116_vm8, %v3037_v7  ;;  %v2981_v26 = vsel %vm6010_vm14, %v5111_v17, %v2980_v11  ;;  %v3643_v7 = vrot.slane %v3641_v18, 5  ;;  %v3938_v17 = vld [vmem:[#allocation2 + $0xa0] sm:$0xf]  ;;  %v5128_v1 = vrot.slane %v3937_v40, 9 }
 0x1f6   : > { %2162 = vrot.lane.b32.xlu0 %v2078_v16, %s5475_s14  ;;  %v3637_v16 = vrot.slane %v3635_v38, 5  ;;  %v4079_v36 = vrot.slane %v3938_v17, 5  ;;  %v3668_v37 = vsel %vm5590_vm9, %v3663_v13, %v3667_v60  ;;  %v2287_v18 = vld [vmem:[#allocation2 + $0x9c] sm:$0xf]  ;;  %v2084_v13 = vld [vmem:[#allocation2 + $0xa8] sm:$0xf] }
 0x1f7   : > { %v3039_v55 = vpop.permute.xlu1 %3038  ;;  %v2591_v46 = vshll.u32 %v2287_v18, 16 }
 0x1f8   : > { %3126 = vst.msk [vmem:[#allocation3 + $0x24] sm:$0xf] %vm3116_vm8, %v3039_v55  ;;  %v3041_v27 = vpop.permute.xlu0 %3040  ;;  %v3170_v55 = vld [vmem:[#allocation2 + $0x90] sm:$0xf]  ;;  %v4080_v53 = vsel %vm6010_vm14, %v5128_v1, %v4079_v36 }
 0x1f9   : > { %2164 = vrot.lane.b32.xlu1 %v2079_v50, %s5475_s14  ;;  %3127 = vst.msk [vmem:[#allocation3 + $0x28] sm:$0xf] %vm3116_vm8, %v3041_v27  ;;  %v3647_v50 = vrot.slane %v3645_v22, 4 }
 0x1fa   : > { %2166 = vrot.lane.b32.xlu0 %v2080_v57, %s5475_s14  ;;  %v3638_v57 = vor.u32 %v3637_v16, %v3634_v45  ;;  %v2588_v16 = vshrl.u32 %v2287_v18, 16 }
 0x1fb   : > { %v3043_v3 = vpop.permute.xlu1 %3042 }
 0x1fc   : > { %3128 = vst.msk [vmem:[#allocation3 + $0x2c] sm:$0xf] %vm3116_vm8, %v3043_v3  ;;  %v3231_v24 = vpop.permute.xlu0 %3230 }
 0x1fd   : > { %2168 = vrot.lane.b32.xlu1 %v2081_v21, %s5475_s14  ;;  %3319 = vst.msk [vmem:[#allocation3 + $0x20] sm:$0xf] %vm3310_vm12, %v3231_v24  ;;  %v3648_v21 = vor.u32 %v3647_v50, %v3643_v7 }
 0x1fe   : > { %2723 = vrot.lane.b32.xlu0 %v2552_v5, %s5476_s15  ;;  %v3639_v5 = vrot.slane %v3638_v57, 4  ;;  %v2593_v57 = vrot.slane %v2591_v46, 5 }
 0x1ff   : > { %v3233_v12 = vpop.permute.xlu1 %3232  ;;  %v3649_v0 = vrot.slane %v3648_v21, 4 }
 0x200   : > { %3320 = vst.msk [vmem:[#allocation3 + $0x24] sm:$0xf] %vm3310_vm12, %v3233_v12  ;;  %v3235_v30 = vpop.permute.xlu0 %3234  ;;  %v3935_v12 = vld [vmem:[#allocation2 + $0x94] sm:$0xf]  ;;  %v3644_v25 = vsel %vm5590_vm9, %v3639_v5, %v3643_v7 }
 0x201   : > { %2725 = vrot.lane.b32.xlu1 %v2562_v8, %s5476_s15  ;;  %3321 = vst.msk [vmem:[#allocation3 + $0x28] sm:$0xf] %vm3310_vm12, %v3235_v30  ;;  %v3173_v8 = vld [vmem:[#allocation2 + $0xa0] sm:$0xf]  ;;  %v3654_v15 = vsel %vm5590_vm9, %v3649_v0, %v3653_v28  ;;  %v3673_v30 = vrot.slane %v3672_v9, 4  ;;  %v4072_v32 = vrot.slane %v3935_v12, 5 }
 0x202   : > { %2727 = vrot.lane.b32.xlu0 %v2576_v20, %s5476_s15  ;;  %v3677_v20 = vrot.slane %v3675_v14, 5  ;;  %v2617_v14 = vrot.slane %v2615_v58, 5 }
 0x203   : > { %v3237_v35 = vpop.permute.xlu1 %3236 }
 0x204   : > { %3322 = vst.msk [vmem:[#allocation3 + $0x2c] sm:$0xf] %vm3310_vm12, %v3237_v35  ;;  %v3792_v62 = vpop.permute.xlu0 %3791  ;;  %v3936_v35 = vld [vmem:[#allocation2 + $0x98] sm:$0x1]  ;;  %v3678_v38 = vsel %vm5590_vm9, %v3673_v30, %v3677_v20  ;;  %v2618_v17 = vor.u32 %v2617_v14, %v2614_v6 }
 0x205   : > { %2729 = vrot.lane.b32.xlu1 %v2586_v31, %s5476_s15  ;;  %3880 = vst.msk [vmem:[#allocation3 + $0x20] sm:$0xf] %vm3871_vm13, %v3792_v62  ;;  %v3934_v31 = vld [vmem:[#allocation2 + $0x90] sm:$0xe]  ;;  %v4074_v62 = vrot.slane %v4072_v32, 4 }
 0x206   : > { %3060 = vrot.lane.b32.xlu0 %v2981_v26, %s5477_s16  ;;  %v5127_v39 = vrot.slane %v3934_v31, 9  ;;  %v3939_v26 = vld [vmem:[#allocation2 + $0xa4] sm:$0x1] }
 0x207   : > { %v3794_v2 = vpop.permute.xlu1 %3793 }
 0x208   : > { %3881 = vst.msk [vmem:[#allocation3 + $0x24] sm:$0xf] %vm3871_vm13, %v3794_v2  ;;  %v3796_v49 = vpop.permute.xlu0 %3795  ;;  %v2288_v2 = vld [vmem:[#allocation2 + $0xa0] sm:$0xf]  ;;  %v4073_v45 = vsel %vm6010_vm14, %v5127_v39, %v4072_v32  ;;  %v2852_v39 = vld [vmem:[#allocation2 + $0xac] sm:$0xf] }
 0x209   : > { %3062 = vrot.lane.b32.xlu1 %v2984_v63, %s5477_s16  ;;  %3882 = vst.msk [vmem:[#allocation3 + $0x28] sm:$0xf] %vm3871_vm13, %v3796_v49  ;;  %v4075_v63 = vrot.slane %v3936_v35, 5  ;;  %v2597_v7 = vshll.u32 %v2288_v2, 16  ;;  %v2601_v50 = vshrl.u32 %v2288_v2, 16 }
 0x20a   : > { %3064 = vrot.lane.b32.xlu0 %v2988_v29, %s5477_s16  ;;  %v4081_v29 = vrot.slane %v4079_v36, 4  ;;  %v2849_v35 = vld [vmem:[#allocation2 + $0xa0] sm:$0xf] }
 0x20b   : > { %v3798_v19 = vpop.permute.xlu1 %3797  ;;  %v4076_v49 = vsel %vm6010_vm14, %v4074_v62, %v4075_v63  ;;  %v2599_v21 = vrot.slane %v2597_v7, 5  ;;  %v2603_v54 = vrot.slane %v2601_v50, 4  ;;  %v2848_v62 = vld [vmem:[#allocation2 + $0x9c] sm:$0xe]  ;;  %v2994_v63 = vrot.slane %v2849_v35, 5 }
 0x20c   : > { %3883 = vst.msk [vmem:[#allocation3 + $0x2c] sm:$0xf] %vm3871_vm13, %v3798_v19  ;;  %v4129_v27 = vpop.permute.xlu0 %4128  ;;  %v2291_v19 = vld [vmem:[#allocation2 + $0xac] sm:$0xf]  ;;  %v5113_v1 = vrot.slane %v2848_v62, 9 }
 0x20d   : > { %3066 = vrot.lane.b32.xlu1 %v2991_v44, %s5477_s16  ;;  %4217 = vst.msk [vmem:[#allocation3 + $0x20] sm:$0xf] %vm4208_vm15, %v4129_v27  ;;  %v4082_v44 = vrot.slane %v3939_v26, 5  ;;  %v2621_v60 = vshll.u32 %v2291_v19, 16  ;;  %v2625_v61 = vshrl.u32 %v2291_v19, 16  ;;  %v2604_v0 = vor.u32 %v2603_v54, %v2599_v21 }
 0x20e   : > { %3254 = vrot.lane.b32.xlu0 %v3170_v55, %s5478_s25  ;;  %v2996_v46 = vrot.slane %v2994_v63, 4  ;;  %v3380_v50 = vld [vmem:[#allocation2 + $0xac] sm:$0xf]  ;;  %v3384_v35 = vld [vmem:[#allocation2 + $0xbc] sm:$0x1] }
 0x20f   : > { %v4131_v3 = vpop.permute.xlu1 %4130  ;;  %v4083_v55 = vsel %vm6010_vm14, %v4081_v29, %v4082_v44  ;;  %v2623_v9 = vrot.slane %v2621_v60, 5  ;;  %v2605_v30 = vrot.slane %v2604_v0, 4  ;;  %v2851_v29 = vld [vmem:[#allocation2 + $0xa8] sm:$0xe]  ;;  %v2853_v44 = vld [vmem:[#allocation2 + $0xb0] sm:$0x1] }
 0x210   : > { %4218 = vst.msk [vmem:[#allocation3 + $0x24] sm:$0xf] %vm4208_vm15, %v4131_v3  ;;  %v4133_v24 = vpop.permute.xlu0 %4132  ;;  %v2289_v3 = vld [vmem:[#allocation2 + $0xa4] sm:$0x1]  ;;  %v5114_v51 = vrot.slane %v2851_v29, 9  ;;  %v3004_v19 = vrot.slane %v2853_v44, 5 }
 0x211   : > { %3256 = vrot.lane.b32.xlu1 %v3171_v56, %s5478_s25  ;;  %4219 = vst.msk [vmem:[#allocation3 + $0x28] sm:$0xf] %vm4208_vm15, %v4133_v24  ;;  %v2590_v56 = vrot.slane %v2588_v16, 4  ;;  %v2607_v28 = vshll.u32 %v2289_v3, 16  ;;  %v3689_v58 = vshll.u32 %v3380_v50, 16 }
 0x212   : > { %3258 = vrot.lane.b32.xlu0 %v3172_v4, %s5478_s25  ;;  %v2082_v4 = vld [vmem:[#allocation2 + $0x9c] sm:$0xf]  ;;  %v3383_v60 = vld [vmem:[#allocation2 + $0xb8] sm:$0xf] }
 0x213   : > { %v4135_v11 = vpop.permute.xlu1 %4134  ;;  %v2594_v5 = vor.u32 %v2593_v57, %v2590_v56  ;;  %v2609_v31 = vrot.slane %v2607_v28, 5  ;;  %v3713_v0 = vshll.u32 %v3383_v60, 16  ;;  %v3717_v28 = vshrl.u32 %v3383_v60, 16  ;;  %v3944_v29 = vld [vmem:[#allocation2 + $0xb8] sm:$0xf] }
 0x214   : > { %4220 = vst.msk [vmem:[#allocation3 + $0x2c] sm:$0xf] %vm4208_vm15, %v4135_v11  ;;  %v2708_v23 = vpop.permute.xlu0 %2707  ;;  %v2627_v11 = vrot.slane %v2625_v61, 4 }
 0x215   : > { %3260 = vrot.lane.b32.xlu1 %v3173_v8, %s5478_s25  ;;  %2792 = vst.msk [vmem:[#allocation3 + $0x30] sm:$0xf] %vm2779_vm6, %v2708_v23  ;;  %v2083_v8 = vld [vmem:[#allocation2 + $0xa0] sm:$0xf]  ;;  %v2595_v20 = vrot.slane %v2594_v5, 4  ;;  %v2610_v26 = vsel %vm5590_vm9, %v2605_v30, %v2609_v31  ;;  %v3715_v31 = vrot.slane %v3713_v0, 5 }
 0x216   : > { %3815 = vrot.lane.b32.xlu0 %v3644_v25, %s5479_s7  ;;  %v2292_v25 = vld [vmem:[#allocation2 + $0xb0] sm:$0x1]  ;;  %v2628_v32 = vor.u32 %v2627_v11, %v2623_v9  ;;  %v2296_v0 = vld [vmem:[#allocation2 + $0xc0] sm:$0xf] }
 0x217   : > { %v2710_v33 = vpop.permute.xlu1 %2709  ;;  %v5448_v34 = vld [vmem:[#allocation3 + $0x20] sm:$0xff]   ;;  %v2600_v36 = vsel %vm5590_vm9, %v2595_v20, %v2599_v21  ;;  %v3382_v21 = vld [vmem:[#allocation2 + $0xb4] sm:$0xf]  ;;  %v3381_v11 = vld [vmem:[#allocation2 + $0xb0] sm:$0x1] }
 0x218   : > { %2793 = vst.msk [vmem:[#allocation3 + $0x34] sm:$0xf] %vm2779_vm6, %v2710_v33  ;;  %5386 = vmatprep.mubr.msk.bf16.mxu0 %vm4389_vm2, %v5448_v34  ;;  %v2712_v41 = vpop.permute.xlu0 %2711  ;;  %v2631_v33 = vshll.u32 %v2292_v25, 16  ;;  %v3704_v5 = vshrl.u32 %v3382_v21, 16  ;;  %v3707_v6 = vshll.u32 %v3382_v21, 16  ;;  %v3699_v30 = vshll.u32 %v3381_v11, 16 }
 0x219   : > { %3817 = vrot.lane.b32.xlu1 %v3654_v15, %s5479_s7  ;;  %2794 = vst.msk [vmem:[#allocation3 + $0x38] sm:$0xf] %vm2779_vm6, %v2712_v41  ;;  %v2085_v15 = vld [vmem:[#allocation2 + $0xac] sm:$0xf]  ;;  %v2629_v41 = vrot.slane %v2628_v32, 4  ;;  %v3719_v32 = vrot.slane %v3717_v28, 4 }
 0x21a   : > { %3819 = vrot.lane.b32.xlu0 %v3668_v37, %s5479_s7  ;;  %v2619_v37 = vrot.slane %v2618_v17, 4  ;;  %v3175_v25 = vld [vmem:[#allocation2 + $0xac] sm:$0xf]  ;;  %v3706_v20 = vrot.slane %v3704_v5, 4  ;;  %v3709_v17 = vrot.slane %v3707_v6, 5 }
 0x21b   : > { %v2714_v22 = vpop.permute.xlu1 %2713  ;;  %v5449_v42 = vld [vmem:[#allocation3 + $0x28] sm:$0xff]   ;;  %v3720_v62 = vor.u32 %v3719_v32, %v3715_v31 }
 0x21c   : > { %2795 = vst.msk [vmem:[#allocation3 + $0x3c] sm:$0xf] %vm2779_vm6, %v2714_v22  ;;  %5387 = vmatmul.mubr.msk.bf16.gmra.mxu0 %vm4389_vm2, %v5449_v42  ;;  %v3045_v48 = vpop.permute.xlu0 %3044  ;;  %v2850_v22 = vld [vmem:[#allocation2 + $0xa4] sm:$0x1]  ;;  %v3001_v42 = vrot.slane %v2852_v39, 5  ;;  %v2624_v2 = vsel %vm5590_vm9, %v2619_v37, %v2623_v9 }
 0x21d   : > { %3821 = vrot.lane.b32.xlu1 %v3678_v38, %s5479_s7  ;;  %3129 = vst.msk [vmem:[#allocation3 + $0x30] sm:$0xf] %vm3116_vm8, %v3045_v48  ;;  %v2633_v38 = vrot.slane %v2631_v33, 5  ;;  %v2997_v48 = vrot.slane %v2850_v22, 5  ;;  %v3177_v37 = vld [vmem:[#allocation2 + $0xb8] sm:$0xf] }
 0x21e   : > { %4152 = vrot.lane.b32.xlu0 %v4073_v45, %s5480_s10  ;;  %v3002_v61 = vsel %vm6010_vm14, %v5114_v51, %v3001_v42  ;;  %v4093_v51 = vrot.slane %v3944_v29, 5 }
 0x21f   : > { %v3047_v52 = vpop.permute.xlu1 %3046  ;;  %v2634_v16 = vsel %vm5590_vm9, %v2629_v41, %v2633_v38  ;;  %v2998_v43 = vsel %vm6010_vm14, %v2996_v46, %v2997_v48  ;;  %v3701_v38 = vrot.slane %v3699_v30, 5  ;;  %v3940_v48 = vld [vmem:[#allocation2 + $0xa8] sm:$0xe] }
 0x220   : > { %3130 = vst.msk [vmem:[#allocation3 + $0x34] sm:$0xf] %vm3116_vm8, %v3047_v52  ;;  %v3049_v27 = vpop.permute.xlu0 %3048  ;;  %v3003_v52 = vrot.slane %v3001_v42, 4  ;;  %v3941_v42 = vld [vmem:[#allocation2 + $0xac] sm:$0xf] }
 0x221   : > { %4154 = vrot.lane.b32.xlu1 %v4076_v49, %s5480_s10  ;;  %3131 = vst.msk [vmem:[#allocation3 + $0x38] sm:$0xf] %vm3116_vm8, %v3049_v27  ;;  %v3379_v49 = vld [vmem:[#allocation2 + $0xa8] sm:$0xf]  ;;  %v3693_v27 = vshrl.u32 %v3380_v50, 16 }
 0x222   : > { %4156 = vrot.lane.b32.xlu0 %v4080_v53, %s5480_s10  ;;  %v2995_v53 = vsel %vm6010_vm14, %v5113_v1, %v2994_v63  ;;  %v3683_v56 = vshll.u32 %v3379_v49, 16  ;;  %v3723_v63 = vshll.u32 %v3384_v35, 16  ;;  %v3942_v50 = vld [vmem:[#allocation2 + $0xb0] sm:$0x1]  ;;  %v2086_v35 = vld [vmem:[#allocation2 + $0xb4] sm:$0xf] }
 0x223   : > { %v3051_v10 = vpop.permute.xlu1 %3050 }
 0x224   : > { %3132 = vst.msk [vmem:[#allocation3 + $0x3c] sm:$0xf] %vm3116_vm8, %v3051_v10  ;;  %v3239_v24 = vpop.permute.xlu0 %3238  ;;  %v3005_v10 = vsel %vm6010_vm14, %v3003_v52, %v3004_v19  ;;  %v3725_v46 = vrot.slane %v3723_v63, 5  ;;  %v5129_v19 = vrot.slane %v3940_v48, 9 }
 0x225   : > { %4158 = vrot.lane.b32.xlu1 %v4083_v55, %s5480_s10  ;;  %3323 = vst.msk [vmem:[#allocation3 + $0x30] sm:$0xf] %vm3310_vm12, %v3239_v24  ;;  %v3680_v55 = vshrl.u32 %v3379_v49, 16  ;;  %v3691_v24 = vrot.slane %v3689_v58, 5  ;;  %v4086_v49 = vrot.slane %v3941_v42, 5  ;;  %v4089_v58 = vrot.slane %v3942_v50, 5 }
 0x226   : > { %2170 = vrot.lane.b32.xlu0 %v2082_v4, %s5475_s14  ;;  %v3685_v4 = vrot.slane %v3683_v56, 5  ;;  %v2088_v42 = vld [vmem:[#allocation2 + $0xc0] sm:$0xf] }
 0x227   : > { %v3241_v12 = vpop.permute.xlu1 %3240  ;;  %v3682_v3 = vrot.slane %v3680_v55, 4  ;;  %v3945_v55 = vld [vmem:[#allocation2 + $0xbc] sm:$0x1] }
 0x228   : > { %3324 = vst.msk [vmem:[#allocation3 + $0x34] sm:$0xf] %vm3310_vm12, %v3241_v12  ;;  %v3243_v23 = vpop.permute.xlu0 %3242  ;;  %v3174_v12 = vld [vmem:[#allocation2 + $0xa8] sm:$0xf] }
 0x229   : > { %2172 = vrot.lane.b32.xlu1 %v2083_v8, %s5475_s14  ;;  %3325 = vst.msk [vmem:[#allocation3 + $0x38] sm:$0xf] %vm3310_vm12, %v3243_v23  ;;  %v3695_v8 = vrot.slane %v3693_v27, 4  ;;  %v2293_v27 = vld [vmem:[#allocation2 + $0xb4] sm:$0xf] }
 0x22a   : > { %2174 = vrot.lane.b32.xlu0 %v2084_v13, %s5475_s14  ;;  %v3686_v13 = vor.u32 %v3685_v4, %v3682_v3  ;;  %v4087_v3 = vsel %vm6010_vm14, %v5129_v19, %v4086_v49  ;;  %v2636_v4 = vshrl.u32 %v2293_v27, 16  ;;  %v2639_v5 = vshll.u32 %v2293_v27, 16  ;;  %v2856_v27 = vld [vmem:[#allocation2 + $0xbc] sm:$0x1] }
 0x22b   : > { %v3245_v34 = vpop.permute.xlu1 %3244 }
 0x22c   : > { %3326 = vst.msk [vmem:[#allocation3 + $0x3c] sm:$0xf] %vm3310_vm12, %v3245_v34  ;;  %v3800_v40 = vpop.permute.xlu0 %3799  ;;  %v3687_v39 = vrot.slane %v3686_v13, 4  ;;  %v2641_v13 = vrot.slane %v2639_v5, 5 }
 0x22d   : > { %2176 = vrot.lane.b32.xlu1 %v2085_v15, %s5475_s14  ;;  %3884 = vst.msk [vmem:[#allocation3 + $0x30] sm:$0xf] %vm3871_vm13, %v3800_v40  ;;  %v3696_v15 = vor.u32 %v3695_v8, %v3691_v24  ;;  %v3710_v40 = vor.u32 %v3709_v17, %v3706_v20  ;;  %v2660_v20 = vshrl.u32 %v2296_v0, 16  ;;  %v2663_v17 = vshll.u32 %v2296_v0, 16 }
 0x22e   : > { %2731 = vrot.lane.b32.xlu0 %v2600_v36, %s5476_s15  ;;  %v3176_v36 = vld [vmem:[#allocation2 + $0xb4] sm:$0xf] }
 0x22f   : > { %v3802_v18 = vpop.permute.xlu1 %3801  ;;  %v3697_v41 = vrot.slane %v3696_v15, 4  ;;  %v3711_v1 = vrot.slane %v3710_v40, 4 }
 0x230   : > { %3885 = vst.msk [vmem:[#allocation3 + $0x34] sm:$0xf] %vm3871_vm13, %v3802_v18  ;;  %v3804_v45 = vpop.permute.xlu0 %3803 }
 0x231   : > { %2733 = vrot.lane.b32.xlu1 %v2610_v26, %s5476_s15  ;;  %3886 = vst.msk [vmem:[#allocation3 + $0x38] sm:$0xf] %vm3871_vm13, %v3804_v45  ;;  %v3702_v45 = vsel %vm5590_vm9, %v3697_v41, %v3701_v38  ;;  %v3716_v52 = vsel %vm5590_vm9, %v3711_v1, %v3715_v31 }
 0x232   : > { %2735 = vrot.lane.b32.xlu0 %v2624_v2, %s5476_s15  ;;  %v3692_v2 = vsel %vm5590_vm9, %v3687_v39, %v3691_v24  ;;  %v2665_v39 = vrot.slane %v2663_v17, 5 }
 0x233   : > { %v3806_v7 = vpop.permute.xlu1 %3805 }
 0x234   : > { %3887 = vst.msk [vmem:[#allocation3 + $0x3c] sm:$0xf] %vm3871_vm13, %v3806_v7  ;;  %v4137_v57 = vpop.permute.xlu0 %4136 }
 0x235   : > { %2737 = vrot.lane.b32.xlu1 %v2634_v16, %s5476_s15  ;;  %4221 = vst.msk [vmem:[#allocation3 + $0x30] sm:$0xf] %vm4208_vm15, %v4137_v57  ;;  %v3721_v16 = vrot.slane %v3720_v62, 4 }
 0x236   : > { %3068 = vrot.lane.b32.xlu0 %v2995_v53, %s5477_s16  ;;  %v3943_v53 = vld [vmem:[#allocation2 + $0xb4] sm:$0xe] }
 0x237   : > { %v4139_v54 = vpop.permute.xlu1 %4138  ;;  %v3726_v57 = vsel %vm5590_vm9, %v3721_v16, %v3725_v46  ;;  %v5130_v60 = vrot.slane %v3943_v53, 9 }
 0x238   : > { %4222 = vst.msk [vmem:[#allocation3 + $0x34] sm:$0xf] %vm4208_vm15, %v4139_v54  ;;  %v4141_v14 = vpop.permute.xlu0 %4140  ;;  %v2294_v54 = vld [vmem:[#allocation2 + $0xb8] sm:$0xf] }
 0x239   : > { %3070 = vrot.lane.b32.xlu1 %v2998_v43, %s5477_s16  ;;  %4223 = vst.msk [vmem:[#allocation3 + $0x38] sm:$0xf] %vm4208_vm15, %v4141_v14  ;;  %v4088_v43 = vrot.slane %v4086_v49, 4  ;;  %v2645_v24 = vshll.u32 %v2294_v54, 16  ;;  %v2649_v8 = vshrl.u32 %v2294_v54, 16  ;;  %v4094_v11 = vsel %vm6010_vm14, %v5130_v60, %v4093_v51 }
 0x23a   : > { %3072 = vrot.lane.b32.xlu0 %v3002_v61, %s5477_s16  ;;  %v4095_v61 = vrot.slane %v4093_v51, 4 }
 0x23b   : > { %v4143_v9 = vpop.permute.xlu1 %4142  ;;  %v4090_v14 = vsel %vm6010_vm14, %v4088_v43, %v4089_v58  ;;  %v2647_v15 = vrot.slane %v2645_v24, 5  ;;  %v2651_v30 = vrot.slane %v2649_v8, 4  ;;  %v3386_v8 = vld [vmem:[#allocation2 + $0xc4] sm:$0xf] }
 0x23c   : > { %4224 = vst.msk [vmem:[#allocation3 + $0x3c] sm:$0xf] %vm4208_vm15, %v4143_v9  ;;  %v2159_v23 = vpop.permute.xlu0 %2158  ;;  %v2297_v9 = vld [vmem:[#allocation2 + $0xc4] sm:$0xf]  ;;  %v3737_v17 = vshll.u32 %v3386_v8, 16 }
 0x23d   : > { %3074 = vrot.lane.b32.xlu1 %v3005_v10, %s5477_s16  ;;  %2237 = vst.msk [vmem:[#allocation3 + $0x48] sm:$0xf] %vm2218_vm4, %v2159_v23  ;;  %v4096_v10 = vrot.slane %v3945_v55, 5  ;;  %v2669_v31 = vshll.u32 %v2297_v9, 16  ;;  %v2673_v32 = vshrl.u32 %v2297_v9, 16  ;;  %v2652_v41 = vor.u32 %v2651_v30, %v2647_v15 }
 0x23e   : > { %3262 = vrot.lane.b32.xlu0 %v3174_v12, %s5478_s25 }
 0x23f   : > { %v2161_v33 = vpop.permute.xlu1 %2160  ;;  %v5450_v34 = vld [vmem:[#allocation3 + $0x30] sm:$0xff]   ;;  %v4097_v12 = vsel %vm6010_vm14, %v4095_v61, %v4096_v10  ;;  %v2671_v62 = vrot.slane %v2669_v31, 5  ;;  %v2675_v63 = vrot.slane %v2673_v32, 4  ;;  %v2857_v61 = vld [vmem:[#allocation2 + $0xc0] sm:$0xe] }
 0x240   : > { %2238 = vst.msk [vmem:[#allocation3 + $0x4c] sm:$0xf] %vm2218_vm4, %v2161_v33  ;;  %5390 = vmatprep.mubr.msk.bf16.mxu0 %vm4389_vm2, %v5450_v34  ;;  %v2716_v26 = vpop.permute.xlu0 %2715  ;;  %v2295_v34 = vld [vmem:[#allocation2 + $0xbc] sm:$0x1]  ;;  %v2859_v10 = vld [vmem:[#allocation2 + $0xc8] sm:$0x1] }
 0x241   : > { %3264 = vrot.lane.b32.xlu1 %v3175_v25, %s5478_s25  ;;  %2796 = vst.msk [vmem:[#allocation3 + $0x40] sm:$0xf] %vm2779_vm6, %v2716_v26  ;;  %v2638_v25 = vrot.slane %v2636_v4, 4  ;;  %v2087_v26 = vld [vmem:[#allocation2 + $0xb8] sm:$0xf]  ;;  %v2655_v38 = vshll.u32 %v2295_v34, 16  ;;  %v2676_v46 = vor.u32 %v2675_v63, %v2671_v62 }
 0x242   : > { %3266 = vrot.lane.b32.xlu0 %v3176_v36, %s5478_s25  ;;  %v5116_v0 = vrot.slane %v2857_v61, 9  ;;  %v3018_v9 = vrot.slane %v2859_v10, 5  ;;  %v3389_v31 = vld [vmem:[#allocation2 + $0xd0] sm:$0xf] }
 0x243   : > { %v2718_v18 = vpop.permute.xlu1 %2717  ;;  %v5451_v22 = vld [vmem:[#allocation3 + $0x38] sm:$0xff]   ;;  %v2642_v36 = vor.u32 %v2641_v13, %v2638_v25  ;;  %v2657_v16 = vrot.slane %v2655_v38, 5  ;;  %v2677_v55 = vrot.slane %v2676_v46, 4  ;;  %v3765_v38 = vshrl.u32 %v3389_v31, 16 }
 0x244   : > { %2797 = vst.msk [vmem:[#allocation3 + $0x44] sm:$0xf] %vm2779_vm6, %v2718_v18  ;;  %5391 = vmatmul.mubr.msk.bf16.gmra.mxu0 %vm4389_vm2, %v5451_v22  ;;  %v2720_v44 = vpop.permute.xlu0 %2719  ;;  %v2298_v22 = vld [vmem:[#allocation2 + $0xc8] sm:$0x1] }
 0x245   : > { %3268 = vrot.lane.b32.xlu1 %v3177_v37, %s5478_s25  ;;  %2798 = vst.msk [vmem:[#allocation3 + $0x48] sm:$0xf] %vm2779_vm6, %v2720_v44  ;;  %v2662_v37 = vrot.slane %v2660_v20, 4  ;;  %v2089_v44 = vld [vmem:[#allocation2 + $0xc4] sm:$0xf]  ;;  %v2679_v48 = vshll.u32 %v2298_v22, 16 }
 0x246   : > { %3823 = vrot.lane.b32.xlu0 %v3692_v2, %s5479_s7  ;;  %v2643_v2 = vrot.slane %v2642_v36, 4  ;;  %v3178_v22 = vld [vmem:[#allocation2 + $0xc0] sm:$0xf] }
 0x247   : > { %v2722_v7 = vpop.permute.xlu1 %2721  ;;  %v2666_v1 = vor.u32 %v2665_v39, %v2662_v37 }
 0x248   : > { %2799 = vst.msk [vmem:[#allocation3 + $0x4c] sm:$0xf] %vm2779_vm6, %v2722_v7  ;;  %v3053_v56 = vpop.permute.xlu0 %3052  ;;  %v2855_v7 = vld [vmem:[#allocation2 + $0xb8] sm:$0xf]  ;;  %v2648_v50 = vsel %vm5590_vm9, %v2643_v2, %v2647_v15  ;;  %v3388_v15 = vld [vmem:[#allocation2 + $0xcc] sm:$0xf] }
 0x249   : > { %3825 = vrot.lane.b32.xlu1 %v3702_v45, %s5479_s7  ;;  %3133 = vst.msk [vmem:[#allocation3 + $0x40] sm:$0xf] %vm3116_vm8, %v3053_v56  ;;  %v2653_v45 = vrot.slane %v2652_v41, 4  ;;  %v2667_v51 = vrot.slane %v2666_v1, 4  ;;  %v2681_v56 = vrot.slane %v2679_v48, 5  ;;  %v3008_v43 = vrot.slane %v2855_v7, 5 }
 0x24a   : > { %3827 = vrot.lane.b32.xlu0 %v3716_v52, %s5479_s7  ;;  %v2858_v52 = vld [vmem:[#allocation2 + $0xc4] sm:$0xf]  ;;  %v3752_v36 = vshrl.u32 %v3388_v15, 16  ;;  %v3755_v37 = vshll.u32 %v3388_v15, 16  ;;  %v3761_v41 = vshll.u32 %v3389_v31, 16  ;;  %v3767_v48 = vrot.slane %v3765_v38, 4 }
 0x24b   : > { %v3055_v21 = vpop.permute.xlu1 %3054  ;;  %v2658_v53 = vsel %vm5590_vm9, %v2653_v45, %v2657_v16  ;;  %v2672_v54 = vsel %vm5590_vm9, %v2667_v51, %v2671_v62  ;;  %v2682_v4 = vsel %vm5590_vm9, %v2677_v55, %v2681_v56  ;;  %v3010_v5 = vrot.slane %v3008_v43, 4  ;;  %v3180_v51 = vld [vmem:[#allocation2 + $0xcc] sm:$0xf]  ;;  %v3181_v55 = vld [vmem:[#allocation2 + $0xd0] sm:$0xf] }
 0x24c   : > { %3134 = vst.msk [vmem:[#allocation3 + $0x44] sm:$0xf] %vm3116_vm8, %v3055_v21  ;;  %v3057_v6 = vpop.permute.xlu0 %3056  ;;  %v3015_v21 = vrot.slane %v2858_v52, 5  ;;  %v3754_v1 = vrot.slane %v3752_v36, 4  ;;  %v3763_v46 = vrot.slane %v3761_v41, 5 }
 0x24d   : > { %3829 = vrot.lane.b32.xlu1 %v3726_v57, %s5479_s7  ;;  %3135 = vst.msk [vmem:[#allocation3 + $0x48] sm:$0xf] %vm3116_vm8, %v3057_v6  ;;  %v2854_v57 = vld [vmem:[#allocation2 + $0xb4] sm:$0xe]  ;;  %v3011_v6 = vrot.slane %v2856_v27, 5 }
 0x24e   : > { %4160 = vrot.lane.b32.xlu0 %v4087_v3, %s5480_s10  ;;  %v5115_v60 = vrot.slane %v2854_v57, 9  ;;  %v3016_v32 = vsel %vm6010_vm14, %v5116_v0, %v3015_v21 }
 0x24f   : > { %v3059_v28 = vpop.permute.xlu1 %3058  ;;  %v3012_v20 = vsel %vm6010_vm14, %v3010_v5, %v3011_v6  ;;  %v3946_v5 = vld [vmem:[#allocation2 + $0xc0] sm:$0xe] }
 0x250   : > { %3136 = vst.msk [vmem:[#allocation3 + $0x4c] sm:$0xf] %vm3116_vm8, %v3059_v28  ;;  %v3247_v23 = vpop.permute.xlu0 %3246  ;;  %v3017_v28 = vrot.slane %v3015_v21, 4  ;;  %v3947_v21 = vld [vmem:[#allocation2 + $0xc4] sm:$0xf] }
 0x251   : > { %4162 = vrot.lane.b32.xlu1 %v4090_v14, %s5480_s10  ;;  %3327 = vst.msk [vmem:[#allocation3 + $0x40] sm:$0xf] %vm3310_vm12, %v3247_v23  ;;  %v3385_v14 = vld [vmem:[#allocation2 + $0xc0] sm:$0xf]  ;;  %v3741_v23 = vshrl.u32 %v3386_v8, 16  ;;  %v4100_v6 = vrot.slane %v3947_v21, 5 }
 0x252   : > { %4164 = vrot.lane.b32.xlu0 %v4094_v11, %s5480_s10  ;;  %v3009_v11 = vsel %vm6010_vm14, %v5115_v60, %v3008_v43  ;;  %v3731_v25 = vshll.u32 %v3385_v14, 16  ;;  %v3768_v43 = vor.u32 %v3767_v48, %v3763_v46  ;;  %v3950_v8 = vld [vmem:[#allocation2 + $0xd0] sm:$0xf] }
 0x253   : > { %v3249_v33 = vpop.permute.xlu1 %3248 }
 0x254   : > { %3328 = vst.msk [vmem:[#allocation3 + $0x44] sm:$0xf] %vm3310_vm12, %v3249_v33  ;;  %v3251_v40 = vpop.permute.xlu0 %3250  ;;  %v3019_v33 = vsel %vm6010_vm14, %v3017_v28, %v3018_v9  ;;  %v5131_v28 = vrot.slane %v3946_v5, 9 }
 0x255   : > { %4166 = vrot.lane.b32.xlu1 %v4097_v12, %s5480_s10  ;;  %3329 = vst.msk [vmem:[#allocation3 + $0x48] sm:$0xf] %vm3310_vm12, %v3251_v40  ;;  %v3728_v12 = vshrl.u32 %v3385_v14, 16  ;;  %v3739_v40 = vrot.slane %v3737_v17, 5 }
 0x256   : > { %2178 = vrot.lane.b32.xlu0 %v2086_v35, %s5475_s14  ;;  %v3733_v35 = vrot.slane %v3731_v25, 5  ;;  %v4101_v15 = vsel %vm6010_vm14, %v5131_v28, %v4100_v6 }
 0x257   : > { %v3253_v18 = vpop.permute.xlu1 %3252  ;;  %v3730_v34 = vrot.slane %v3728_v12, 4  ;;  %v4102_v12 = vrot.slane %v4100_v6, 4 }
 0x258   : > { %3330 = vst.msk [vmem:[#allocation3 + $0x4c] sm:$0xf] %vm3310_vm12, %v3253_v18  ;;  %v3808_v29 = vpop.permute.xlu0 %3807  ;;  %v3387_v18 = vld [vmem:[#allocation2 + $0xc8] sm:$0x1] }
 0x259   : > { %2180 = vrot.lane.b32.xlu1 %v2087_v26, %s5475_s14  ;;  %3888 = vst.msk [vmem:[#allocation3 + $0x40] sm:$0xf] %vm3871_vm13, %v3808_v29  ;;  %v3743_v26 = vrot.slane %v3741_v23, 4  ;;  %v3734_v2 = vor.u32 %v3733_v35, %v3730_v34  ;;  %v3757_v29 = vrot.slane %v3755_v37, 5  ;;  %v3747_v16 = vshll.u32 %v3387_v18, 16 }
 0x25a   : > { %2182 = vrot.lane.b32.xlu0 %v2088_v42, %s5475_s14  ;;  %v3179_v42 = vld [vmem:[#allocation2 + $0xc4] sm:$0xf]  ;;  %v3951_v23 = vld [vmem:[#allocation2 + $0xd4] sm:$0x1] }
 0x25b   : > { %v3810_v49 = vpop.permute.xlu1 %3809  ;;  %v3744_v45 = vor.u32 %v3743_v26, %v3739_v40  ;;  %v3735_v52 = vrot.slane %v3734_v2, 4  ;;  %v3749_v57 = vrot.slane %v3747_v16, 5 }
 0x25c   : > { %3889 = vst.msk [vmem:[#allocation3 + $0x44] sm:$0xf] %vm3871_vm13, %v3810_v49  ;;  %v3812_v19 = vpop.permute.xlu0 %3811 }
 0x25d   : > { %2184 = vrot.lane.b32.xlu1 %v2089_v44, %s5475_s14  ;;  %3890 = vst.msk [vmem:[#allocation3 + $0x48] sm:$0xf] %vm3871_vm13, %v3812_v19  ;;  %v3758_v19 = vor.u32 %v3757_v29, %v3754_v1  ;;  %v3745_v56 = vrot.slane %v3744_v45, 4 }
 0x25e   : > { %2739 = vrot.lane.b32.xlu0 %v2648_v50, %s5476_s15  ;;  %v3390_v50 = vld [vmem:[#allocation2 + $0xd4] sm:$0x1] }
 0x25f   : > { %v3814_v58 = vpop.permute.xlu1 %3813  ;;  %v3759_v60 = vrot.slane %v3758_v19, 4  ;;  %v3750_v10 = vsel %vm5590_vm9, %v3745_v56, %v3749_v57 }
 0x260   : > { %3891 = vst.msk [vmem:[#allocation3 + $0x4c] sm:$0xf] %vm3871_vm13, %v3814_v58  ;;  %v4145_v3 = vpop.permute.xlu0 %4144  ;;  %v3771_v58 = vshll.u32 %v3390_v50, 16 }
 0x261   : > { %2741 = vrot.lane.b32.xlu1 %v2658_v53, %s5476_s15  ;;  %4225 = vst.msk [vmem:[#allocation3 + $0x40] sm:$0xf] %vm4208_vm15, %v4145_v3  ;;  %v3769_v3 = vrot.slane %v3768_v43, 4  ;;  %v3764_v0 = vsel %vm5590_vm9, %v3759_v60, %v3763_v46 }
 0x262   : > { %2743 = vrot.lane.b32.xlu0 %v2672_v54, %s5476_s15  ;;  %v3740_v54 = vsel %vm5590_vm9, %v3735_v52, %v3739_v40 }
 0x263   : > { %v4147_v24 = vpop.permute.xlu1 %4146 }
 0x264   : > { %4226 = vst.msk [vmem:[#allocation3 + $0x44] sm:$0xf] %vm4208_vm15, %v4147_v24  ;;  %v4149_v13 = vpop.permute.xlu0 %4148  ;;  %v3948_v24 = vld [vmem:[#allocation2 + $0xc8] sm:$0x1] }
 0x265   : > { %2745 = vrot.lane.b32.xlu1 %v2682_v4, %s5476_s15  ;;  %4227 = vst.msk [vmem:[#allocation3 + $0x48] sm:$0xf] %vm4208_vm15, %v4149_v13  ;;  %v3773_v4 = vrot.slane %v3771_v58, 5  ;;  %v4103_v25 = vrot.slane %v3948_v24, 5  ;;  %v3949_v13 = vld [vmem:[#allocation2 + $0xcc] sm:$0xe] }
 0x266   : > { %3076 = vrot.lane.b32.xlu0 %v3009_v11, %s5477_s16 }
 0x267   : > { %v4151_v30 = vpop.permute.xlu1 %4150  ;;  %v3774_v11 = vsel %vm5590_vm9, %v3769_v3, %v3773_v4  ;;  %v4104_v31 = vsel %vm6010_vm14, %v4102_v12, %v4103_v25 }
 0x268   : > { %4228 = vst.msk [vmem:[#allocation3 + $0x4c] sm:$0xf] %vm4208_vm15, %v4151_v30  ;;  %v2163_v39 = vpop.permute.xlu0 %2162  ;;  %v5132_v30 = vrot.slane %v3949_v13, 9 }
 0x269   : > { %3078 = vrot.lane.b32.xlu1 %v3012_v20, %s5477_s16  ;;  %2239 = vst.msk [vmem:[#allocation3 + $0x50] sm:$0xf] %vm2218_vm4, %v2163_v39  ;;  %v4107_v20 = vrot.slane %v3950_v8, 5 }
 0x26a   : > { %3080 = vrot.lane.b32.xlu0 %v3016_v32, %s5477_s16 }
 0x26b   : > { %v2165_v62 = vpop.permute.xlu1 %2164  ;;  %v5452_v63 = vld [vmem:[#allocation3 + $0x40] sm:$0xff]   ;;  %v4109_v32 = vrot.slane %v4107_v20, 4  ;;  %v4108_v35 = vsel %vm6010_vm14, %v5132_v30, %v4107_v20 }
 0x26c   : > { %2240 = vst.msk [vmem:[#allocation3 + $0x54] sm:$0xf] %vm2218_vm4, %v2165_v62  ;;  %5394 = vmatprep.mubr.msk.bf16.mxu1 %vm4389_vm2, %v5452_v63  ;;  %v2167_v44 = vpop.permute.xlu0 %2166 }
 0x26d   : > { %3082 = vrot.lane.b32.xlu1 %v3019_v33, %s5477_s16  ;;  %2241 = vst.msk [vmem:[#allocation3 + $0x58] sm:$0xf] %vm2218_vm4, %v2167_v44  ;;  %v4110_v33 = vrot.slane %v3951_v23, 5  ;;  %s6859_s16 = scalar_lea.vmem %s7066_s4, %s5048_s24 }
 0x26e   : > { %3270 = vrot.lane.b32.xlu0 %v3178_v22, %s5478_s25 }
 0x26f   : > { %v2169_v49 = vpop.permute.xlu1 %2168  ;;  %v5453_v7 = vld [vmem:[#allocation3 + $0x48] sm:$0xff]   ;;  %v4111_v37 = vsel %vm6010_vm14, %v4109_v32, %v4110_v33 }
 0x270   : > { %2242 = vst.msk [vmem:[#allocation3 + $0x5c] sm:$0xf] %vm2218_vm4, %v2169_v49  ;;  %5395 = vmatmul.mubr.msk.bf16.vlgmr.msra.gmra.mxu1 %vm4389_vm2, %v5453_v7  ;;  %v2724_v53 = vpop.permute.xlu0 %2723 }
 0x271   : > { %3272 = vrot.lane.b32.xlu1 %v3179_v42, %s5478_s25  ;;  %2800 = vst.msk [vmem:[#allocation3 + $0x50] sm:$0xf] %vm2779_vm6, %v2724_v53 }
 0x272   : > { %3274 = vrot.lane.b32.xlu0 %v3180_v51, %s5478_s25 }
 0x273   : > { %v2726_v27 = vpop.permute.xlu1 %2725 }
 0x274   : > { %2801 = vst.msk [vmem:[#allocation3 + $0x54] sm:$0xf] %vm2779_vm6, %v2726_v27  ;;  %v2728_v61 = vpop.permute.xlu0 %2727 }
 0x275   : > { %3276 = vrot.lane.b32.xlu1 %v3181_v55, %s5478_s25  ;;  %2802 = vst.msk [vmem:[#allocation3 + $0x58] sm:$0xf] %vm2779_vm6, %v2728_v61 }
 0x276   : > { %3831 = vrot.lane.b32.xlu0 %v3740_v54, %s5479_s7 }
 0x277   : > { %v2730_v14 = vpop.permute.xlu1 %2729 }
 0x278   : > { %2803 = vst.msk [vmem:[#allocation3 + $0x5c] sm:$0xf] %vm2779_vm6, %v2730_v14  ;;  %v3061_v9 = vpop.permute.xlu0 %3060 }
 0x279   : > { %3833 = vrot.lane.b32.xlu1 %v3750_v10, %s5479_s7  ;;  %3137 = vst.msk [vmem:[#allocation3 + $0x50] sm:$0xf] %vm3116_vm8, %v3061_v9 }
 0x27a   : > { %3835 = vrot.lane.b32.xlu0 %v3764_v0, %s5479_s7 }
 0x27b   : > { %v3063_v17 = vpop.permute.xlu1 %3062 }
 0x27c   : > { %3138 = vst.msk [vmem:[#allocation3 + $0x54] sm:$0xf] %vm3116_vm8, %v3063_v17  ;;  %v3065_v47 = vpop.permute.xlu0 %3064 }
 0x27d   : > { %3837 = vrot.lane.b32.xlu1 %v3774_v11, %s5479_s7  ;;  %3139 = vst.msk [vmem:[#allocation3 + $0x58] sm:$0xf] %vm3116_vm8, %v3065_v47 }
 0x27e   : > { %4168 = vrot.lane.b32.xlu0 %v4101_v15, %s5480_s10 }
 0x27f   : > { %v3067_v34 = vpop.permute.xlu1 %3066 }
 0x280   : > { %3140 = vst.msk [vmem:[#allocation3 + $0x5c] sm:$0xf] %vm3116_vm8, %v3067_v34  ;;  %v3255_v36 = vpop.permute.xlu0 %3254 }
 0x281   : > { %4170 = vrot.lane.b32.xlu1 %v4104_v31, %s5480_s10  ;;  %3331 = vst.msk [vmem:[#allocation3 + $0x50] sm:$0xf] %vm3310_vm12, %v3255_v36 }
 0x282   : > { %4172 = vrot.lane.b32.xlu0 %v4108_v35, %s5480_s10 }
 0x283   : > { %v3257_v39 = vpop.permute.xlu1 %3256 }
 0x284   : > { %3332 = vst.msk [vmem:[#allocation3 + $0x54] sm:$0xf] %vm3310_vm12, %v3257_v39  ;;  %v3259_v40 = vpop.permute.xlu0 %3258 }
 0x285   : > { %4174 = vrot.lane.b32.xlu1 %v4111_v37, %s5480_s10  ;;  %3333 = vst.msk [vmem:[#allocation3 + $0x58] sm:$0xf] %vm3310_vm12, %v3259_v40 }
 0x287   : > { %v3261_v26 = vpop.permute.xlu1 %3260 }
 0x288   : > { %3334 = vst.msk [vmem:[#allocation3 + $0x5c] sm:$0xf] %vm3310_vm12, %v3261_v26  ;;  %v3816_v41 = vpop.permute.xlu0 %3815 }
 0x289   : > { %3892 = vst.msk [vmem:[#allocation3 + $0x50] sm:$0xf] %vm3871_vm13, %v3816_v41 }
 0x28b   : > { %v3818_v59 = vpop.permute.xlu1 %3817 }
 0x28c   : > { %3893 = vst.msk [vmem:[#allocation3 + $0x54] sm:$0xf] %vm3871_vm13, %v3818_v59  ;;  %v5380_v38 = vpop.f32.mrf.mxu0  ;;  %v3820_v63 = vpop.permute.xlu0 %3819 }
 0x28d   : > { %v5238_v62 = vpack.c.bf16 %v5380_v38, %v5380_v38  ;;  %3894 = vst.msk [vmem:[#allocation3 + $0x58] sm:$0xf] %vm3871_vm13, %v3820_v63  ;;  %v4676_v45 = vmul.f32 %v5380_v38, %v5380_v38  ;;  %v4607_v52 = vsel %vm4603_vm5, %v5380_v38, 0.0 }
 0x28e   : > { %v4476_v22 = vpop.f32.mrf.mxu0 }
 0x28f   : > { %v3822_v18 = vpop.permute.xlu1 %3821  ;;  %4906 = vst.msk [vmem:[%s6859_s16 + $0x8] sm:$0xf] %vm447_vm0, %v5238_v62  ;;  %v5236_v42 = vpack.c.bf16 %v4476_v22, %v4476_v22  ;;  %v4674_v1 = vmul.f32 %v4476_v22, %v4476_v22  ;;  %v4604_v48 = vsel %vm4603_vm5, %v4476_v22, 0.0  ;;  %v4709_v27 = vsel %vm4603_vm5, %v4676_v45, 0.0 }
 0x290   : > { %3895 = vst.msk [vmem:[#allocation3 + $0x5c] sm:$0xf] %vm3871_vm13, %v3822_v18  ;;  %v5381_v2 = vpop.f32.mrf.mxu0  ;;  %v4153_v44 = vpop.permute.xlu0 %4152 }
 0x291   : > { %4904 = vst.msk [vmem:[%s6859_s16] sm:$0xf] %vm447_vm0, %v5236_v42  ;;  %v5239_v29 = vpack.c.bf16 %v5381_v2, %v5381_v2  ;;  %v4706_v19 = vsel %vm4603_vm5, %v4674_v1, 0.0  ;;  %v4677_v53 = vmul.f32 %v5381_v2, %v5381_v2  ;;  %v4609_v21 = vsel %vm4603_vm5, %v5381_v2, 0.0 }
 0x292   : > { %4229 = vst.msk [vmem:[#allocation3 + $0x50] sm:$0xf] %vm4208_vm15, %v4153_v44  ;;  %v4479_v46 = vpop.f32.mrf.mxu0 }
 0x293   : > { %v4155_v16 = vpop.permute.xlu1 %4154  ;;  %4907 = vst.msk [vmem:[%s6859_s16 + $0xc] sm:$0xf] %vm447_vm0, %v5239_v29  ;;  %v4605_v49 = vsel %vm4603_vm5, %v4479_v46, 0.0  ;;  %v4675_v7 = vmul.f32 %v4479_v46, %v4479_v46  ;;  %v5237_v50 = vpack.c.bf16 %v4479_v46, %v4479_v46  ;;  %v4711_v61 = vsel %vm4603_vm5, %v4677_v53, 0.0 }
 0x294   : > { %4230 = vst.msk [vmem:[#allocation3 + $0x54] sm:$0xf] %vm4208_vm15, %v4155_v16  ;;  %v4606_v51 = vadd.f32 %v4605_v49, %v4604_v48  ;;  %v4157_v56 = vpop.permute.xlu0 %4156 }
 0x295   : > { %v4707_v55 = vsel %vm4603_vm5, %v4675_v7, 0.0  ;;  %4905 = vst.msk [vmem:[%s6859_s16 + $0x4] sm:$0xf] %vm447_vm0, %v5237_v50 }
 0x296   : > { %v4608_v57 = vadd.f32 %v4607_v52, %v4606_v51  ;;  %v4708_v43 = vadd.f32 %v4707_v55, %v4706_v19  ;;  %4231 = vst.msk [vmem:[#allocation3 + $0x58] sm:$0xf] %vm4208_vm15, %v4157_v56 }
 0x297   : > { %v4159_v58 = vpop.permute.xlu1 %4158 }
 0x298   : > { %4232 = vst.msk [vmem:[#allocation3 + $0x5c] sm:$0xf] %vm4208_vm15, %v4159_v58  ;;  %v4710_v54 = vadd.f32 %v4709_v27, %v4708_v43  ;;  %v4610_v60 = vadd.f32 %v4609_v21, %v4608_v57  ;;  %v2171_v10 = vpop.permute.xlu0 %2170 }
 0x299   : > { %2243 = vst.msk [vmem:[#allocation3 + $0x60] sm:$0xf] %vm2218_vm4, %v2171_v10 }
 0x29a   : > { %v4712_v5 = vadd.f32 %v4711_v61, %v4710_v54 }
 0x29b   : > { %v2173_v3 = vpop.permute.xlu1 %2172  ;;  %v5454_v4 = vld [vmem:[#allocation3 + $0x50] sm:$0xff]  }
 0x29c   : > { %2244 = vst.msk [vmem:[#allocation3 + $0x64] sm:$0xf] %vm2218_vm4, %v2173_v3  ;;  %5398 = vmatprep.mubr.msk.bf16.mxu1 %vm4389_vm2, %v5454_v4  ;;  %v2175_v6 = vpop.permute.xlu0 %2174 }
 0x29d   : > { %2245 = vst.msk [vmem:[#allocation3 + $0x68] sm:$0xf] %vm2218_vm4, %v2175_v6 }
 0x29f   : > { %v2177_v14 = vpop.permute.xlu1 %2176  ;;  %v5455_v24 = vld [vmem:[#allocation3 + $0x58] sm:$0xff]  }
 0x2a0   : > { %2246 = vst.msk [vmem:[#allocation3 + $0x6c] sm:$0xf] %vm2218_vm4, %v2177_v14  ;;  %5399 = vmatmul.mubr.msk.bf16.gmra.mxu1 %vm4389_vm2, %v5455_v24  ;;  %v2732_v8 = vpop.permute.xlu0 %2731 }
 0x2a1   : > { %2804 = vst.msk [vmem:[#allocation3 + $0x60] sm:$0xf] %vm2779_vm6, %v2732_v8 }
 0x2a3   : > { %v2734_v0 = vpop.permute.xlu1 %2733 }
 0x2a4   : > { %2805 = vst.msk [vmem:[#allocation3 + $0x64] sm:$0xf] %vm2779_vm6, %v2734_v0  ;;  %v2736_v28 = vpop.permute.xlu0 %2735 }
 0x2a5   : > { %2806 = vst.msk [vmem:[#allocation3 + $0x68] sm:$0xf] %vm2779_vm6, %v2736_v28 }
 0x2a7   : > { %v2738_v9 = vpop.permute.xlu1 %2737 }
 0x2a8   : > { %2807 = vst.msk [vmem:[#allocation3 + $0x6c] sm:$0xf] %vm2779_vm6, %v2738_v9  ;;  %v3069_v11 = vpop.permute.xlu0 %3068 }
 0x2a9   : > { %3141 = vst.msk [vmem:[#allocation3 + $0x60] sm:$0xf] %vm3116_vm8, %v3069_v11 }
 0x2ab   : > { %v3071_v12 = vpop.permute.xlu1 %3070 }
 0x2ac   : > { %3142 = vst.msk [vmem:[#allocation3 + $0x64] sm:$0xf] %vm3116_vm8, %v3071_v12  ;;  %v3073_v25 = vpop.permute.xlu0 %3072 }
 0x2ad   : > { %3143 = vst.msk [vmem:[#allocation3 + $0x68] sm:$0xf] %vm3116_vm8, %v3073_v25 }
 0x2af   : > { %v3075_v13 = vpop.permute.xlu1 %3074 }
 0x2b0   : > { %3144 = vst.msk [vmem:[#allocation3 + $0x6c] sm:$0xf] %vm3116_vm8, %v3075_v13  ;;  %v3263_v20 = vpop.permute.xlu0 %3262 }
 0x2b1   : > { %3335 = vst.msk [vmem:[#allocation3 + $0x60] sm:$0xf] %vm3310_vm12, %v3263_v20 }
 0x2b3   : > { %v3265_v17 = vpop.permute.xlu1 %3264 }
 0x2b4   : > { %3336 = vst.msk [vmem:[#allocation3 + $0x64] sm:$0xf] %vm3310_vm12, %v3265_v17  ;;  %v5384_v23 = vpop.f32.mrf.mxu0  ;;  %v3267_v30 = vpop.permute.xlu0 %3266 }
 0x2b5   : > { %v5242_v15 = vpack.c.bf16 %v5384_v23, %v5384_v23  ;;  %3337 = vst.msk [vmem:[#allocation3 + $0x68] sm:$0xf] %vm3310_vm12, %v3267_v30  ;;  %v4680_v38 = vmul.f32 %v5384_v23, %v5384_v23  ;;  %v4615_v42 = vsel %vm4603_vm5, %v5384_v23, 0.0 }
 0x2b6   : > { %v4492_v31 = vpop.f32.mrf.mxu0 }
 0x2b7   : > { %v3269_v47 = vpop.permute.xlu1 %3268  ;;  %4910 = vst.msk [vmem:[%s6859_s16 + $0x18] sm:$0xf] %vm447_vm0, %v5242_v15  ;;  %v4611_v32 = vsel %vm4603_vm5, %v4492_v31, 0.0  ;;  %v4678_v33 = vmul.f32 %v4492_v31, %v4492_v31  ;;  %v5240_v34 = vpack.c.bf16 %v4492_v31, %v4492_v31  ;;  %v4717_v46 = vsel %vm4603_vm5, %v4680_v38, 0.0 }
 0x2b8   : > { %3338 = vst.msk [vmem:[#allocation3 + $0x6c] sm:$0xf] %vm3310_vm12, %v3269_v47  ;;  %v4612_v35 = vadd.f32 %v4611_v32, %v4610_v60  ;;  %v5385_v36 = vpop.f32.mrf.mxu0  ;;  %v3824_v40 = vpop.permute.xlu0 %3823 }
 0x2b9   : > { %v4713_v37 = vsel %vm4603_vm5, %v4678_v33, 0.0  ;;  %4908 = vst.msk [vmem:[%s6859_s16 + $0x10] sm:$0xf] %vm447_vm0, %v5240_v34  ;;  %v5243_v39 = vpack.c.bf16 %v5385_v36, %v5385_v36  ;;  %v4681_v2 = vmul.f32 %v5385_v36, %v5385_v36  ;;  %v4617_v48 = vsel %vm4603_vm5, %v5385_v36, 0.0 }
 0x2ba   : > { %v4714_v26 = vadd.f32 %v4713_v37, %v4712_v5  ;;  %3896 = vst.msk [vmem:[#allocation3 + $0x60] sm:$0xf] %vm3871_vm13, %v3824_v40  ;;  %v4495_v59 = vpop.f32.mrf.mxu0 }
 0x2bb   : > { %v3826_v41 = vpop.permute.xlu1 %3825  ;;  %4911 = vst.msk [vmem:[%s6859_s16 + $0x1c] sm:$0xf] %vm447_vm0, %v5243_v39  ;;  %v4613_v62 = vsel %vm4603_vm5, %v4495_v59, 0.0  ;;  %v4679_v63 = vmul.f32 %v4495_v59, %v4495_v59  ;;  %v5241_v18 = vpack.c.bf16 %v4495_v59, %v4495_v59  ;;  %v4719_v50 = vsel %vm4603_vm5, %v4681_v2, 0.0 }
 0x2bc   : > { %3897 = vst.msk [vmem:[#allocation3 + $0x64] sm:$0xf] %vm3871_vm13, %v3826_v41  ;;  %v4614_v22 = vadd.f32 %v4613_v62, %v4612_v35  ;;  %v3828_v29 = vpop.permute.xlu0 %3827 }
 0x2bd   : > { %v4715_v1 = vsel %vm4603_vm5, %v4679_v63, 0.0  ;;  %4909 = vst.msk [vmem:[%s6859_s16 + $0x14] sm:$0xf] %vm447_vm0, %v5241_v18 }
 0x2be   : > { %v4616_v44 = vadd.f32 %v4615_v42, %v4614_v22  ;;  %v4716_v45 = vadd.f32 %v4715_v1, %v4714_v26  ;;  %3898 = vst.msk [vmem:[#allocation3 + $0x68] sm:$0xf] %vm3871_vm13, %v3828_v29 }
 0x2bf   : > { %v3830_v16 = vpop.permute.xlu1 %3829 }
 0x2c0   : > { %3899 = vst.msk [vmem:[#allocation3 + $0x6c] sm:$0xf] %vm3871_vm13, %v3830_v16  ;;  %v4718_v49 = vadd.f32 %v4717_v46, %v4716_v45  ;;  %v4618_v7 = vadd.f32 %v4617_v48, %v4616_v44  ;;  %v4161_v51 = vpop.permute.xlu0 %4160 }
 0x2c1   : > { %4233 = vst.msk [vmem:[#allocation3 + $0x60] sm:$0xf] %vm4208_vm15, %v4161_v51 }
 0x2c2   : > { %v4720_v19 = vadd.f32 %v4719_v50, %v4718_v49 }
 0x2c3   : > { %v4163_v52 = vpop.permute.xlu1 %4162 }
 0x2c4   : > { %4234 = vst.msk [vmem:[#allocation3 + $0x64] sm:$0xf] %vm4208_vm15, %v4163_v52  ;;  %v4165_v53 = vpop.permute.xlu0 %4164 }
 0x2c5   : > { %4235 = vst.msk [vmem:[#allocation3 + $0x68] sm:$0xf] %vm4208_vm15, %v4165_v53 }
 0x2c7   : > { %v4167_v55 = vpop.permute.xlu1 %4166 }
 0x2c8   : > { %4236 = vst.msk [vmem:[#allocation3 + $0x6c] sm:$0xf] %vm4208_vm15, %v4167_v55  ;;  %v2179_v56 = vpop.permute.xlu0 %2178 }
 0x2c9   : > { %2247 = vst.msk [vmem:[#allocation3 + $0x70] sm:$0xf] %vm2218_vm4, %v2179_v56 }
 0x2cb   : > { %v2181_v57 = vpop.permute.xlu1 %2180  ;;  %v5456_v43 = vld [vmem:[#allocation3 + $0x60] sm:$0xff]  }
 0x2cc   : > { %2248 = vst.msk [vmem:[#allocation3 + $0x74] sm:$0xf] %vm2218_vm4, %v2181_v57  ;;  %5402 = vmatprep.mubr.msk.bf16.mxu1 %vm4389_vm2, %v5456_v43  ;;  %v2183_v58 = vpop.permute.xlu0 %2182 }
 0x2cd   : > { %2249 = vst.msk [vmem:[#allocation3 + $0x78] sm:$0xf] %vm2218_vm4, %v2183_v58 }
 0x2cf   : > { %v2185_v27 = vpop.permute.xlu1 %2184  ;;  %v5457_v21 = vld [vmem:[#allocation3 + $0x68] sm:$0xff]  }
 0x2d0   : > { %2250 = vst.msk [vmem:[#allocation3 + $0x7c] sm:$0xf] %vm2218_vm4, %v2185_v27  ;;  %5403 = vmatmul.mubr.msk.bf16.gmra.mxu1 %vm4389_vm2, %v5457_v21  ;;  %v2740_v54 = vpop.permute.xlu0 %2739 }
 0x2d1   : > { %2808 = vst.msk [vmem:[#allocation3 + $0x70] sm:$0xf] %vm2779_vm6, %v2740_v54 }
 0x2d3   : > { %v2742_v60 = vpop.permute.xlu1 %2741 }
 0x2d4   : > { %2809 = vst.msk [vmem:[#allocation3 + $0x74] sm:$0xf] %vm2779_vm6, %v2742_v60  ;;  %v2744_v61 = vpop.permute.xlu0 %2743 }
 0x2d5   : > { %2810 = vst.msk [vmem:[#allocation3 + $0x78] sm:$0xf] %vm2779_vm6, %v2744_v61 }
 0x2d7   : > { %v2746_v10 = vpop.permute.xlu1 %2745 }
 0x2d8   : > { %2811 = vst.msk [vmem:[#allocation3 + $0x7c] sm:$0xf] %vm2779_vm6, %v2746_v10  ;;  %v3077_v3 = vpop.permute.xlu0 %3076 }
 0x2d9   : > { %3145 = vst.msk [vmem:[#allocation3 + $0x70] sm:$0xf] %vm3116_vm8, %v3077_v3 }
 0x2db   : > { %v3079_v4 = vpop.permute.xlu1 %3078 }
 0x2dc   : > { %3146 = vst.msk [vmem:[#allocation3 + $0x74] sm:$0xf] %vm3116_vm8, %v3079_v4  ;;  %v5388_v5 = vpop.f32.mrf.mxu0  ;;  %v3081_v14 = vpop.permute.xlu0 %3080 }
 0x2dd   : > { %v5246_v6 = vpack.c.bf16 %v5388_v5, %v5388_v5  ;;  %3147 = vst.msk [vmem:[#allocation3 + $0x78] sm:$0xf] %vm3116_vm8, %v3081_v14  ;;  %v4684_v30 = vmul.f32 %v5388_v5, %v5388_v5  ;;  %v4623_v34 = vsel %vm4603_vm5, %v5388_v5, 0.0 }
 0x2de   : > { %v4508_v8 = vpop.f32.mrf.mxu0 }
 0x2df   : > { %v3083_v24 = vpop.permute.xlu1 %3082  ;;  %4914 = vst.msk [vmem:[%s6859_s16 + $0x28] sm:$0xf] %vm447_vm0, %v5246_v6  ;;  %v4619_v0 = vsel %vm4603_vm5, %v4508_v8, 0.0  ;;  %v4682_v28 = vmul.f32 %v4508_v8, %v4508_v8  ;;  %v5244_v9 = vpack.c.bf16 %v4508_v8, %v4508_v8  ;;  %v4725_v41 = vsel %vm4603_vm5, %v4684_v30, 0.0 }
 0x2e0   : > { %3148 = vst.msk [vmem:[#allocation3 + $0x7c] sm:$0xf] %vm3116_vm8, %v3083_v24  ;;  %v4620_v11 = vadd.f32 %v4619_v0, %v4618_v7  ;;  %v5389_v12 = vpop.f32.mrf.mxu0  ;;  %v3271_v20 = vpop.permute.xlu0 %3270 }
 0x2e1   : > { %v4721_v25 = vsel %vm4603_vm5, %v4682_v28, 0.0  ;;  %4912 = vst.msk [vmem:[%s6859_s16 + $0x20] sm:$0xf] %vm447_vm0, %v5244_v9  ;;  %v5247_v13 = vpack.c.bf16 %v5389_v12, %v5389_v12  ;;  %v4685_v35 = vmul.f32 %v5389_v12, %v5389_v12  ;;  %v4625_v59 = vsel %vm4603_vm5, %v5389_v12, 0.0 }
 0x2e2   : > { %v4722_v17 = vadd.f32 %v4721_v25, %v4720_v19  ;;  %3339 = vst.msk [vmem:[#allocation3 + $0x70] sm:$0xf] %vm3310_vm12, %v3271_v20  ;;  %v4511_v15 = vpop.f32.mrf.mxu0 }
 0x2e3   : > { %v3273_v23 = vpop.permute.xlu1 %3272  ;;  %4915 = vst.msk [vmem:[%s6859_s16 + $0x2c] sm:$0xf] %vm447_vm0, %v5247_v13  ;;  %v4621_v47 = vsel %vm4603_vm5, %v4511_v15, 0.0  ;;  %v4683_v31 = vmul.f32 %v4511_v15, %v4511_v15  ;;  %v5245_v32 = vpack.c.bf16 %v4511_v15, %v4511_v15  ;;  %v4727_v63 = vsel %vm4603_vm5, %v4685_v35, 0.0 }
 0x2e4   : > { %3340 = vst.msk [vmem:[#allocation3 + $0x74] sm:$0xf] %vm3310_vm12, %v3273_v23  ;;  %v4622_v33 = vadd.f32 %v4621_v47, %v4620_v11  ;;  %v3275_v37 = vpop.permute.xlu0 %3274 }
 0x2e5   : > { %v4723_v36 = vsel %vm4603_vm5, %v4683_v31, 0.0  ;;  %4913 = vst.msk [vmem:[%s6859_s16 + $0x24] sm:$0xf] %vm447_vm0, %v5245_v32 }
 0x2e6   : > { %v4624_v39 = vadd.f32 %v4623_v34, %v4622_v33  ;;  %v4724_v40 = vadd.f32 %v4723_v36, %v4722_v17  ;;  %3341 = vst.msk [vmem:[#allocation3 + $0x78] sm:$0xf] %vm3310_vm12, %v3275_v37 }
 0x2e7   : > { %v3277_v26 = vpop.permute.xlu1 %3276 }
 0x2e8   : > { %3342 = vst.msk [vmem:[#allocation3 + $0x7c] sm:$0xf] %vm3310_vm12, %v3277_v26  ;;  %v4726_v38 = vadd.f32 %v4725_v41, %v4724_v40  ;;  %v4626_v62 = vadd.f32 %v4625_v59, %v4624_v39  ;;  %v3832_v18 = vpop.permute.xlu0 %3831 }
 0x2e9   : > { %3900 = vst.msk [vmem:[#allocation3 + $0x70] sm:$0xf] %vm3871_vm13, %v3832_v18 }
 0x2ea   : > { %v4728_v42 = vadd.f32 %v4727_v63, %v4726_v38 }
 0x2eb   : > { %v3834_v22 = vpop.permute.xlu1 %3833 }
 0x2ec   : > { %3901 = vst.msk [vmem:[#allocation3 + $0x74] sm:$0xf] %vm3871_vm13, %v3834_v22  ;;  %v3836_v2 = vpop.permute.xlu0 %3835 }
 0x2ed   : > { %3902 = vst.msk [vmem:[#allocation3 + $0x78] sm:$0xf] %vm3871_vm13, %v3836_v2 }
 0x2ef   : > { %v3838_v1 = vpop.permute.xlu1 %3837 }
 0x2f0   : > { %3903 = vst.msk [vmem:[#allocation3 + $0x7c] sm:$0xf] %vm3871_vm13, %v3838_v1  ;;  %v4169_v29 = vpop.permute.xlu0 %4168 }
 0x2f1   : > { %4237 = vst.msk [vmem:[#allocation3 + $0x70] sm:$0xf] %vm4208_vm15, %v4169_v29 }
 0x2f3   : > { %v4171_v44 = vpop.permute.xlu1 %4170 }
 0x2f4   : > { %4238 = vst.msk [vmem:[#allocation3 + $0x74] sm:$0xf] %vm4208_vm15, %v4171_v44  ;;  %v4173_v45 = vpop.permute.xlu0 %4172 }
 0x2f5   : > { %4239 = vst.msk [vmem:[#allocation3 + $0x78] sm:$0xf] %vm4208_vm15, %v4173_v45 }
 0x2f7   : > { %v4175_v16 = vpop.permute.xlu1 %4174 }
 0x2f8   : > { %4240 = vst.msk [vmem:[#allocation3 + $0x7c] sm:$0xf] %vm4208_vm15, %v4175_v16 }
 0x2fb   : > { %v5458_v46 = vld [vmem:[#allocation3 + $0x70] sm:$0xff]  }
 0x2fc   : > { %5406 = vmatprep.mubr.msk.bf16.mxu1 %vm4389_vm2, %v5458_v46 }
 0x2ff   : > { %v5459_v48 = vld [vmem:[#allocation3 + $0x78] sm:$0xff]  }
 0x300   : > { %5407 = vmatmul.mubr.msk.bf16.gmra.mxu1 %vm4389_vm2, %v5459_v48 }
 0x304   : > { %v5392_v49 = vpop.f32.mrf.mxu0 }
 0x305   : > { %v5250_v7 = vpack.c.bf16 %v5392_v49, %v5392_v49  ;;  %v4688_v27 = vmul.f32 %v5392_v49, %v5392_v49  ;;  %v4631_v10 = vsel %vm4603_vm5, %v5392_v49, 0.0 }
 0x306   : > { %v4524_v50 = vpop.f32.mrf.mxu0 }
 0x307   : > { %4918 = vst.msk [vmem:[%s6859_s16 + $0x38] sm:$0xf] %vm447_vm0, %v5250_v7  ;;  %v4627_v51 = vsel %vm4603_vm5, %v4524_v50, 0.0  ;;  %v4686_v52 = vmul.f32 %v4524_v50, %v4524_v50  ;;  %v5248_v19 = vpack.c.bf16 %v4524_v50, %v4524_v50  ;;  %v4733_v14 = vsel %vm4603_vm5, %v4688_v27, 0.0 }
 0x308   : > { %v4628_v53 = vadd.f32 %v4627_v51, %v4626_v62  ;;  %v5393_v55 = vpop.f32.mrf.mxu0 }
 0x309   : > { %v4729_v56 = vsel %vm4603_vm5, %v4686_v52, 0.0  ;;  %4916 = vst.msk [vmem:[%s6859_s16 + $0x30] sm:$0xf] %vm447_vm0, %v5248_v19  ;;  %v5251_v57 = vpack.c.bf16 %v5393_v55, %v5393_v55  ;;  %v4689_v3 = vmul.f32 %v5393_v55, %v5393_v55  ;;  %v4633_v24 = vsel %vm4603_vm5, %v5393_v55, 0.0 }
 0x30a   : > { %v4730_v43 = vadd.f32 %v4729_v56, %v4728_v42  ;;  %v4527_v58 = vpop.f32.mrf.mxu0 }
 0x30b   : > { %4919 = vst.msk [vmem:[%s6859_s16 + $0x3c] sm:$0xf] %vm447_vm0, %v5251_v57  ;;  %v4629_v21 = vsel %vm4603_vm5, %v4527_v58, 0.0  ;;  %v4687_v54 = vmul.f32 %v4527_v58, %v4527_v58  ;;  %v5249_v60 = vpack.c.bf16 %v4527_v58, %v4527_v58  ;;  %v4735_v28 = vsel %vm4603_vm5, %v4689_v3, 0.0 }
 0x30c   : > { %v4630_v61 = vadd.f32 %v4629_v21, %v4628_v53 }
 0x30d   : > { %v4731_v4 = vsel %vm4603_vm5, %v4687_v54, 0.0  ;;  %4917 = vst.msk [vmem:[%s6859_s16 + $0x34] sm:$0xf] %vm447_vm0, %v5249_v60 }
 0x30e   : > { %v4632_v5 = vadd.f32 %v4631_v10, %v4630_v61  ;;  %v4732_v6 = vadd.f32 %v4731_v4, %v4730_v43 }
 0x310   : > { %v4734_v8 = vadd.f32 %v4733_v14, %v4732_v6  ;;  %v4634_v0 = vadd.f32 %v4633_v24, %v4632_v5 }
 0x312   : > { %v4736_v9 = vadd.f32 %v4735_v28, %v4734_v8 }
 0x330   : > { %v5396_v11 = vpop.f32.mrf.mxu1 }
 0x331   : > { %v5254_v12 = vpack.c.bf16 %v5396_v11, %v5396_v11  ;;  %v4692_v33 = vmul.f32 %v5396_v11, %v5396_v11  ;;  %v4639_v39 = vsel %vm4603_vm5, %v5396_v11, 0.0 }
 0x332   : > { %v4540_v25 = vpop.f32.mrf.mxu1 }
 0x333   : > { %4922 = vst.msk [vmem:[%s6859_s16 + $0x48] sm:$0xf] %vm447_vm0, %v5254_v12  ;;  %v4635_v13 = vsel %vm4603_vm5, %v4540_v25, 0.0  ;;  %v4690_v20 = vmul.f32 %v4540_v25, %v4540_v25  ;;  %v5252_v17 = vpack.c.bf16 %v4540_v25, %v4540_v25  ;;  %v4741_v38 = vsel %vm4603_vm5, %v4692_v33, 0.0 }
 0x334   : > { %v4636_v23 = vadd.f32 %v4635_v13, %v4634_v0  ;;  %v5397_v15 = vpop.f32.mrf.mxu1 }
 0x335   : > { %v4737_v30 = vsel %vm4603_vm5, %v4690_v20, 0.0  ;;  %4920 = vst.msk [vmem:[%s6859_s16 + $0x40] sm:$0xf] %vm447_vm0, %v5252_v17  ;;  %v5255_v47 = vpack.c.bf16 %v5397_v15, %v5397_v15  ;;  %v4693_v40 = vmul.f32 %v5397_v15, %v5397_v15  ;;  %v4641_v62 = vsel %vm4603_vm5, %v5397_v15, 0.0 }
 0x336   : > { %v4738_v31 = vadd.f32 %v4737_v30, %v4736_v9  ;;  %v4543_v32 = vpop.f32.mrf.mxu1 }
 0x337   : > { %4923 = vst.msk [vmem:[%s6859_s16 + $0x4c] sm:$0xf] %vm447_vm0, %v5255_v47  ;;  %v4637_v34 = vsel %vm4603_vm5, %v4543_v32, 0.0  ;;  %v4691_v35 = vmul.f32 %v4543_v32, %v4543_v32  ;;  %v5253_v36 = vpack.c.bf16 %v4543_v32, %v4543_v32  ;;  %v4743_v22 = vsel %vm4603_vm5, %v4693_v40, 0.0 }
 0x338   : > { %v4638_v37 = vadd.f32 %v4637_v34, %v4636_v23 }
 0x339   : > { %v4739_v26 = vsel %vm4603_vm5, %v4691_v35, 0.0  ;;  %4921 = vst.msk [vmem:[%s6859_s16 + $0x44] sm:$0xf] %vm447_vm0, %v5253_v36 }
 0x33a   : > { %v4640_v41 = vadd.f32 %v4639_v39, %v4638_v37  ;;  %v4740_v59 = vadd.f32 %v4739_v26, %v4738_v31 }
 0x33c   : > { %v4742_v63 = vadd.f32 %v4741_v38, %v4740_v59  ;;  %v4642_v18 = vadd.f32 %v4641_v62, %v4640_v41 }
 0x33e   : > { %v4744_v42 = vadd.f32 %v4743_v22, %v4742_v63 }
 0x360   : > { %v5400_v2 = vpop.f32.mrf.mxu1 }
 0x361   : > { %v5258_v1 = vpack.c.bf16 %v5400_v2, %v5400_v2  ;;  %v4696_v52 = vmul.f32 %v5400_v2, %v5400_v2  ;;  %v4647_v57 = vsel %vm4603_vm5, %v5400_v2, 0.0 }
 0x362   : > { %v4556_v29 = vpop.f32.mrf.mxu1 }
 0x363   : > { %4926 = vst.msk [vmem:[%s6859_s16 + $0x58] sm:$0xf] %vm447_vm0, %v5258_v1  ;;  %v4643_v44 = vsel %vm4603_vm5, %v4556_v29, 0.0  ;;  %v4694_v45 = vmul.f32 %v4556_v29, %v4556_v29  ;;  %v5256_v16 = vpack.c.bf16 %v4556_v29, %v4556_v29  ;;  %v4749_v54 = vsel %vm4603_vm5, %v4696_v52, 0.0 }
 0x364   : > { %v4644_v46 = vadd.f32 %v4643_v44, %v4642_v18  ;;  %v5401_v48 = vpop.f32.mrf.mxu1 }
 0x365   : > { %v4745_v49 = vsel %vm4603_vm5, %v4694_v45, 0.0  ;;  %4924 = vst.msk [vmem:[%s6859_s16 + $0x50] sm:$0xf] %vm447_vm0, %v5256_v16  ;;  %v5259_v7 = vpack.c.bf16 %v5401_v48, %v5401_v48  ;;  %v4697_v43 = vmul.f32 %v5401_v48, %v5401_v48  ;;  %v4649_v60 = vsel %vm4603_vm5, %v5401_v48, 0.0 }
 0x366   : > { %v4746_v50 = vadd.f32 %v4745_v49, %v4744_v42  ;;  %v4559_v51 = vpop.f32.mrf.mxu1 }
 0x367   : > { %4927 = vst.msk [vmem:[%s6859_s16 + $0x5c] sm:$0xf] %vm447_vm0, %v5259_v7  ;;  %v4645_v19 = vsel %vm4603_vm5, %v4559_v51, 0.0  ;;  %v4695_v53 = vmul.f32 %v4559_v51, %v4559_v51  ;;  %v5257_v55 = vpack.c.bf16 %v4559_v51, %v4559_v51  ;;  %v4751_v3 = vsel %vm4603_vm5, %v4697_v43, 0.0 }
 0x368   : > { %v4646_v56 = vadd.f32 %v4645_v19, %v4644_v46 }
 0x369   : > { %v4747_v58 = vsel %vm4603_vm5, %v4695_v53, 0.0  ;;  %4925 = vst.msk [vmem:[%s6859_s16 + $0x54] sm:$0xf] %vm447_vm0, %v5257_v55 }
 0x36a   : > { %v4648_v27 = vadd.f32 %v4647_v57, %v4646_v56  ;;  %v4748_v21 = vadd.f32 %v4747_v58, %v4746_v50 }
 0x36c   : > { %v4750_v61 = vadd.f32 %v4749_v54, %v4748_v21  ;;  %v4650_v10 = vadd.f32 %v4649_v60, %v4648_v27 }
 0x36e   : > { %v4752_v4 = vadd.f32 %v4751_v3, %v4750_v61 }
 0x390   : > { %v5404_v5 = vpop.f32.mrf.mxu1 }
 0x391   : > { %v5262_v6 = vpack.c.bf16 %v5404_v5, %v5404_v5  ;;  %v4700_v47 = vmul.f32 %v5404_v5, %v5404_v5  ;;  %v4655_v32 = vsel %vm4603_vm5, %v5404_v5, 0.0 }
 0x392   : > { %v4572_v14 = vpop.f32.mrf.mxu1 }
 0x393   : > { %4930 = vst.msk [vmem:[%s6859_s16 + $0x68] sm:$0xf] %vm447_vm0, %v5262_v6  ;;  %v5260_v24 = vpack.c.bf16 %v4572_v14, %v4572_v14  ;;  %v4698_v11 = vmul.f32 %v4572_v14, %v4572_v14  ;;  %v4651_v12 = vsel %vm4603_vm5, %v4572_v14, 0.0  ;;  %v4757_v35 = vsel %vm4603_vm5, %v4700_v47, 0.0 }
 0x394   : > { %v5405_v8 = vpop.f32.mrf.mxu1  ;;  %v4652_v17 = vadd.f32 %v4651_v12, %v4650_v10 }
 0x395   : > { %4928 = vst.msk [vmem:[%s6859_s16 + $0x60] sm:$0xf] %vm447_vm0, %v5260_v24  ;;  %v5263_v0 = vpack.c.bf16 %v5405_v8, %v5405_v8  ;;  %v4753_v13 = vsel %vm4603_vm5, %v4698_v11, 0.0  ;;  %v4701_v36 = vmul.f32 %v5405_v8, %v5405_v8  ;;  %v4657_v26 = vsel %vm4603_vm5, %v5405_v8, 0.0 }
 0x396   : > { %v4575_v28 = vpop.f32.mrf.mxu1  ;;  %v4754_v15 = vadd.f32 %v4753_v13, %v4752_v4 }
 0x397   : > { %4931 = vst.msk [vmem:[%s6859_s16 + $0x6c] sm:$0xf] %vm447_vm0, %v5263_v0  ;;  %v5261_v9 = vpack.c.bf16 %v4575_v28, %v4575_v28  ;;  %v4699_v25 = vmul.f32 %v4575_v28, %v4575_v28  ;;  %v4653_v20 = vsel %vm4603_vm5, %v4575_v28, 0.0  ;;  %v4759_v18 = vsel %vm4603_vm5, %v4701_v36, 0.0 }
 0x398   : > { %v4654_v30 = vadd.f32 %v4653_v20, %v4652_v17 }
 0x399   : > { %4929 = vst.msk [vmem:[%s6859_s16 + $0x64] sm:$0xf] %vm447_vm0, %v5261_v9  ;;  %v4755_v23 = vsel %vm4603_vm5, %v4699_v25, 0.0 }
 0x39a   : > { %v4756_v31 = vadd.f32 %v4755_v23, %v4754_v15  ;;  %v4656_v33 = vadd.f32 %v4655_v32, %v4654_v30 }
 0x39c   : > { %v4758_v39 = vadd.f32 %v4757_v35, %v4756_v31  ;;  %v4658_v62 = vadd.f32 %v4657_v26, %v4656_v33 }
 0x39e   : > { %v4760_v1 = vadd.f32 %v4759_v18, %v4758_v39 }
 0x3c0   : > { %v5408_v34 = vpop.f32.mrf.mxu1 }
 0x3c1   : > { %v5266_v37 = vpack.c.bf16 %v5408_v34, %v5408_v34  ;;  %v4704_v44 = vmul.f32 %v5408_v34, %v5408_v34  ;;  %v4663_v7 = vsel %vm4603_vm5, %v5408_v34, 0.0 }
 0x3c2   : > { %v4588_v40 = vpop.f32.mrf.mxu1 }
 0x3c3   : > { %4934 = vst.msk [vmem:[%s6859_s16 + $0x78] sm:$0xf] %vm447_vm0, %v5266_v37  ;;  %v4659_v41 = vsel %vm4603_vm5, %v4588_v40, 0.0  ;;  %v4702_v59 = vmul.f32 %v4588_v40, %v4588_v40  ;;  %v5264_v38 = vpack.c.bf16 %v4588_v40, %v4588_v40  ;;  %v4765_v53 = vsel %vm4603_vm5, %v4704_v44, 0.0 }
 0x3c4   : > { %v5409_v63 = vpop.f32.mrf.mxu1  ;;  %v4660_v2 = vadd.f32 %v4659_v41, %v4658_v62 }
 0x3c5   : > { %v4761_v22 = vsel %vm4603_vm5, %v4702_v59, 0.0  ;;  %4932 = vst.msk [vmem:[%s6859_s16 + $0x70] sm:$0xf] %vm447_vm0, %v5264_v38  ;;  %v5267_v42 = vpack.c.bf16 %v5409_v63, %v5409_v63  ;;  %v4705_v50 = vmul.f32 %v5409_v63, %v5409_v63  ;;  %v4665_v55 = vsel %vm4603_vm5, %v5409_v63, 0.0 }
 0x3c6   : > { %v4591_v29 = vpop.f32.mrf.mxu1  ;;  %v4762_v48 = vadd.f32 %v4761_v22, %v4760_v1 }
 0x3c7   : > { %4935 = vst.msk [vmem:[%s6859_s16 + $0x7c] sm:$0xf] %vm447_vm0, %v5267_v42  ;;  %v4661_v45 = vsel %vm4603_vm5, %v4591_v29, 0.0  ;;  %v4703_v16 = vmul.f32 %v4591_v29, %v4591_v29  ;;  %v5265_v46 = vpack.c.bf16 %v4591_v29, %v4591_v29  ;;  %v4767_v43 = vsel %vm4603_vm5, %v4705_v50, 0.0 }
 0x3c8   : > { %v4662_v49 = vadd.f32 %v4661_v45, %v4660_v2 }
 0x3c9   : > { %v4763_v51 = vsel %vm4603_vm5, %v4703_v16, 0.0  ;;  %4933 = vst.msk [vmem:[%s6859_s16 + $0x74] sm:$0xf] %vm447_vm0, %v5265_v46 }
 0x3ca   : > { %v4664_v52 = vadd.f32 %v4663_v7, %v4662_v49  ;;  %v4764_v19 = vadd.f32 %v4763_v51, %v4762_v48 }
 0x3cc   : > { %v4666_v56 = vadd.f32 %v4665_v55, %v4664_v52  ;;  %v4766_v57 = vadd.f32 %v4765_v53, %v4764_v19 }
 0x3ce   : > { %v4667_v58 = vrot.slane %v4666_v56, 4  ;;  %v4768_v27 = vadd.f32 %v4767_v43, %v4766_v57 }
 0x3d0   : > { %v4668_v21 = vadd.f32 %v4667_v58, %v4666_v56  ;;  %v4769_v54 = vrot.slane %v4768_v27, 4 }
 0x3d2   : > { %v4669_v60 = vrot.slane %v4668_v21, 2  ;;  %v4770_v61 = vadd.f32 %v4769_v54, %v4768_v27 }
 0x3d4   : > { %v4670_v10 = vadd.f32 %v4669_v60, %v4668_v21  ;;  %v4771_v3 = vrot.slane %v4770_v61, 2 }
 0x3d6   : > { %v4671_v4 = vrot.slane %v4670_v10, 1  ;;  %v4772_v5 = vadd.f32 %v4771_v3, %v4770_v61 }
 0x3d8   : > { %v4672_v6 = vadd.f32 %v4671_v4, %v4670_v10  ;;  %v4773_v14 = vrot.slane %v4772_v5, 1 }
 0x3da   : > { %4673 = vst.msk [vmem:[%s268_s17] sm:$0x1] %vm450_vm1, %v4672_v6  ;;  %v4774_v24 = vadd.f32 %v4773_v14, %v4772_v5 }
 0x3dc   : > { %4775 = vst.msk [vmem:[%s271_s20] sm:$0x1] %vm450_vm1, %v4774_v24 }
 0x3dd PF: > { %s17_s21 = sadd.s32 1, %s5470_s21  }
 0x3de   : > { %p14_p5 = scmp.ge.s32.totalorder %s17_s21, 4  }
 0x3e0   :  { %16 = sbr.rel (!%p14_p5) target bundleno = 1 (0x1), region = 93 }

</bundles_post_ra>
